<compile_context>
chip_gen: v5e
topology: v5e:2x2
jax: 0.10.0
libtpu: 0.0.40
codegen_flags: <defaults>
</compile_context>

<pallas_src>
import functools

import jax
import jax.numpy as jnp
from jax.experimental import pallas as pl
from jax.experimental.pallas import tpu as pltpu

# Production sizes in the PyTorch module; the self-test uses scaled-down
# stand-ins with the same structure.
MODEL_DIM = 4096
FEED_FORWARD_DIMENSION = 14336

_TM_TARGET = {"v5e": 256, "v6e": 1024, "v7x": 512}
_TF_TARGET = {"v5e": 512, "v6e": 512, "v7x": 256}


# ----------------------------------------------------------------------------
# Kernel
# ----------------------------------------------------------------------------
def _ffn_kernel(x_ref, w_gu_ref, w_down_ref, o_ref, *maybe_acc, n_chunks):
    # grid axis 0: M tiles ("parallel"); grid axis 1: FF tiles (reduction,
    # "arbitrary", last in grid order). Output block is resident across axis 1.
    acc_ref = maybe_acc[0] if maybe_acc else o_ref  # accumulate in place for f32 out
    j = pl.program_id(1)
    tf = w_down_ref.shape[0]

    @pl.when(j == 0)
    def _():
        acc_ref[...] = jnp.zeros_like(acc_ref)

    x = x_ref[...]                                           # (tm, D) bf16
    # One wide up-projection: [gate_j | up_j] tiles interleaved in the fused slab.
    gu = jnp.dot(x, w_gu_ref[...],
                 preferred_element_type=jnp.float32)         # (tm, 2*tf) f32

    cs = tf // n_chunks
    for c in range(n_chunks):                                # static unroll
        gate = gu[:, c * cs:(c + 1) * cs]                    # W(x) chunk
        up = gu[:, tf + c * cs: tf + (c + 1) * cs]           # V(x) chunk
        h = (gate * jax.nn.sigmoid(gate)) * up               # silu(Wx) * Vx, f32
        acc_ref[...] += jnp.dot(h.astype(w_down_ref.dtype),
                                w_down_ref[c * cs:(c + 1) * cs, :],
                                preferred_element_type=jnp.float32)

    if maybe_acc:  # static: only when output dtype != f32
        @pl.when(j == pl.num_programs(1) - 1)
        def _():
            o_ref[...] = acc_ref[...].astype(o_ref.dtype)


# ----------------------------------------------------------------------------
# Helpers
# ----------------------------------------------------------------------------
def _round_up(x, m):
    return (x + m - 1) // m * m


def _chip_kind():
    try:
        kind = jax.devices()[0].device_kind.lower()
    except Exception:
        return "unknown"
    if "v5 lite" in kind or "v5e" in kind:
        return "v5e"
    if "v6" in kind:
        return "v6e"
    if "v7" in kind:
        return "v7x"
    return "unknown"


def _vmem_capacity(chip):
    try:
        return int(pltpu.get_tpu_info().vmem_capacity_bytes)
    except Exception:
        return {"v7x": 64, "v6e": 128, "v5e": 128}.get(chip, 64) * 1024 * 1024


def _pick_tf(ff, tf_req):
    """Largest multiple of 128 that divides FF and is <= requested tf."""
    tf_req = min(tf_req, ff)
    best = None
    t = 128
    while t <= tf_req:
        if ff % t == 0:
            best = t
        t += 128
    return best if best is not None else ff  # fall back to one FF tile


def _choose_tm(M, tm_target, align=16):
    """Pick a bf16-legal M tile near the target that minimizes padding waste."""
    tm_target = max(align, _round_up(tm_target, align))
    if M <= tm_target:
        return _round_up(M, align)
    cands = {tm_target,
             max(align, _round_up((tm_target * 3) // 4, align)),
             max(align, _round_up(tm_target // 2, align)),
             max(align, _round_up(tm_target // 4, align))}
    best_key, best_tm = None, tm_target
    for c in sorted(cands, reverse=True):
        waste = _round_up(M, c) - M
        key = (waste, -c)   # minimize padding, tie-break: bigger tile
        if best_key is None or key < best_key:
            best_key, best_tm = key, c
    return best_tm


def _footprint_bytes(tm, tf, D, cdt_size, out_size, use_scratch):
    """Explicit VMEM budget for one grid step (double-buffered blocks)."""
    fp = 2 * tm * D * cdt_size           # x tile
    fp += 2 * D * (2 * tf) * cdt_size    # fused [W|V] slab
    fp += 2 * tf * D * cdt_size          # DIM_REDUCER slab
    fp += 2 * tm * D * out_size          # output block
    if use_scratch:
        fp += tm * D * 4                 # f32 accumulator scratch
    fp += tm * (2 * tf) * 4              # f32 gu intermediate (approx)
    return fp


def _fuse_gate_up(w_gate, w_up, tf):
    """Tile-interleave W and V columns so FF-tile j of the slab is [gate_j | up_j]."""
    d, ff = w_gate.shape
    n = ff // tf
    wg = w_gate.reshape(d, n, tf)
    wu = w_up.reshape(d, n, tf)
    return jnp.stack([wg, wu], axis=2).reshape(d, 2 * ff)


# ----------------------------------------------------------------------------
# Public API
# ----------------------------------------------------------------------------
def prepare_ffn_weights(w_gate, w_up, w_down, *, tf=None,
                        compute_dtype=jnp.bfloat16):
    """One-time weight preparation. Call at weight-load time, NOT per forward.

    w_gate / w_up: (D, FF), w_down: (FF, D) -- the transposes of the PyTorch
    nn.Linear weights, so every kernel matmul contracts on the LHS's last axis.
    """
    D, FF = w_gate.shape
    assert w_up.shape == (D, FF) and w_down.shape == (FF, D)
    if tf is None:
        tf = _TF_TARGET.get(_chip_kind(), 512)
    tf = _pick_tf(FF, tf)
    w_gu = _fuse_gate_up(w_gate.astype(compute_dtype),
                         w_up.astype(compute_dtype), tf)
    return dict(w_gu=w_gu, w_down=w_down.astype(compute_dtype), tf=tf)


def feed_forward(x, prepared, *, tm=None):
    """SwiGLU FFN forward. x: (..., D); `prepared` from prepare_ffn_weights()."""
    w_gu = prepared["w_gu"]
    wd = prepared["w_down"]
    tf = prepared["tf"]
    compute_dtype = w_gu.dtype
    cdt_size = jnp.dtype(compute_dtype).itemsize

    orig_shape = x.shape
    D = orig_shape[-1]
    FF = wd.shape[0]
    assert w_gu.shape == (D, 2 * FF) and wd.shape == (FF, D)
    out_dtype = x.dtype
    out_size = jnp.dtype(out_dtype).itemsize

    x2d = x.reshape(-1, D).astype(compute_dtype)
    M = x2d.shape[0]

    chip = _chip_kind()
    if tm is None:
        tm = _TM_TARGET.get(chip, 512)
    tm = _choose_tm(M, tm)

    # v7x has 2 TensorCores and M is the only "parallel" axis: make sure there
    # are at least two M tiles whenever M allows it.
    if chip == "v7x" and _round_up(M, tm) // tm < 2 and _round_up(M, 16) >= 32:
        tm = max(16, _round_up(_round_up(M, 16) // 2, 16))

    use_scratch = jnp.dtype(out_dtype) != jnp.dtype(jnp.float32)

    # Shrink the M tile until the double-buffered footprint fits VMEM.
    budget = _vmem_capacity(chip) - 8 * 1024 * 1024
    while (_footprint_bytes(tm, tf, D, cdt_size, out_size, use_scratch) > budget
           and tm > 16):
        tm = max(16, _round_up(tm // 2, 16))
    # TODO(synk): for exotic D/FF where even tm=16 overflows VMEM, re-prepare
    # the fused weights with a smaller tf instead of only shrinking tm.

    M_pad = _round_up(M, tm)
    if M_pad != M:
        x2d = jnp.pad(x2d, ((0, M_pad - M), (0, 0)))

    n_m = M_pad // tm
    n_f = FF // tf

    # Chunked gating only pays on v5e (shorter live f32 range, fewer spills).
    n_chunks = 2 if (chip == "v5e" and tf % 256 == 0) else 1

    scratch = [pltpu.VMEM((tm, D), jnp.float32)] if use_scratch else []

    footprint = _footprint_bytes(tm, tf, D, cdt_size, out_size, use_scratch)
    vmem_limit = int(min(_vmem_capacity(chip), footprint + 16 * 1024 * 1024))

    cost = pl.CostEstimate(
        flops=6 * M_pad * D * FF,
        transcendentals=M_pad * FF,
        bytes_accessed=(M_pad * D * cdt_size                 # x
                        + n_m * 3 * D * FF * cdt_size        # weights per M tile
                        + M_pad * D * out_size),             # output
    )

    kernel = functools.partial(_ffn_kernel, n_chunks=n_chunks)
    out = pl.pallas_call(
        kernel,
        out_shape=jax.ShapeDtypeStruct((M_pad, D), out_dtype),
        grid_spec=pltpu.PrefetchScalarGridSpec(
            num_scalar_prefetch=0,
            grid=(n_m, n_f),
            in_specs=[
                pl.BlockSpec((tm, D), lambda i, j: (i, 0)),        # x tile
                pl.BlockSpec((D, 2 * tf), lambda i, j: (0, j)),    # fused [W|V] slab
                pl.BlockSpec((tf, D), lambda i, j: (j, 0)),        # DIM_REDUCER slab
            ],
            out_specs=pl.BlockSpec((tm, D), lambda i, j: (i, 0)),
            scratch_shapes=scratch,
        ),
        compiler_params=pltpu.CompilerParams(
            dimension_semantics=("parallel", "arbitrary"),
            vmem_limit_bytes=vmem_limit,
        ),
        cost_estimate=cost,
    )(x2d, w_gu, wd)

    if M_pad != M:
        out = out[:M]
    return out.reshape(orig_shape[:-1] + (D,))


# ----------------------------------------------------------------------------
# Reference + self-test
# ----------------------------------------------------------------------------
def _reference(x, w_gate, w_up, w_down, compute_dtype=jnp.float32):
    xc = x.astype(compute_dtype)
    gate = jnp.dot(xc, w_gate.astype(compute_dtype),
                   preferred_element_type=jnp.float32)
    up = jnp.dot(xc, w_up.astype(compute_dtype),
                 preferred_element_type=jnp.float32)
    h = gate * jax.nn.sigmoid(gate) * up
    return jnp.dot(h.astype(compute_dtype), w_down.astype(compute_dtype),
                   preferred_element_type=jnp.float32).astype(x.dtype)


if __name__ == "__main__":
    key = jax.random.PRNGKey(0)
    k_x, k_w, k_v, k_d = jax.random.split(key, 4)

    # Small stand-ins for MODEL_DIM=4096 / FEED_FORWARD_DIMENSION=14336
    # (same structure).
    D, FF = 256, 1024
    batch, seq = 2, 128

    x = jax.random.normal(k_x, (batch, seq, D), dtype=jnp.float32)
    # nn.Linear weights are (out, in); the kernel takes the (in, out) transposes.
    w_gate = jax.random.normal(k_w, (D, FF), dtype=jnp.float32) / (D ** 0.5)   # W.T
    w_up = jax.random.normal(k_v, (D, FF), dtype=jnp.float32) / (D ** 0.5)     # V.T
    w_down = jax.random.normal(k_d, (FF, D), dtype=jnp.float32) / (FF ** 0.5)  # DIM_REDUCER.T

    # One-time weight prep (hoisted out of the forward pass).
    prepared = prepare_ffn_weights(w_gate, w_up, w_down)

    out = jax.block_until_ready(feed_forward(x, prepared))

    # Reference with the same bf16-in / f32-accumulate mixed precision,
    # plus a loose check against the pure-f32 forward of the original module.
    ref_mixed = jax.block_until_ready(
        _reference(x, w_gate, w_up, w_down, compute_dtype=jnp.bfloat16))
    ref_f32 = jax.block_until_ready(
        _reference(x, w_gate, w_up, w_down, compute_dtype=jnp.float32))

    assert out.shape == x.shape and out.dtype == x.dtype
    assert jnp.allclose(out, ref_mixed, atol=1e-2, rtol=1e-2), float(
        jnp.max(jnp.abs(out - ref_mixed)))
    assert jnp.allclose(out, ref_f32, atol=1e-1, rtol=1e-1), float(
        jnp.max(jnp.abs(out - ref_f32)))
    print("KERNEL_OK")
</pallas_src>

<mosaic_0001>
module attributes {stable_mosaic.version = 11 : i64} {
  func.func @_ffn_kernel(%arg0: i32, %arg1: i32, %arg2: memref<256x256xbf16, #tpu.memory_space<vmem>>, %arg3: memref<256x1024xbf16, #tpu.memory_space<vmem>>, %arg4: memref<512x256xbf16, #tpu.memory_space<vmem>>, %arg5: memref<256x256xf32, #tpu.memory_space<vmem>>) attributes {dimension_semantics = [#tpu.dimension_semantics<parallel>, #tpu.dimension_semantics<arbitrary>], iteration_bounds = array<i64: 1, 2>, scalar_prefetch = 0 : i64, scratch_operands = 0 : i64, tpu.core_type = #tpu.core_type<tc>, window_params = [{transform_indices = @transform_0, window_bounds = array<i64: 256, 256>}, {transform_indices = @transform_1, window_bounds = array<i64: 256, 1024>}, {transform_indices = @transform_2, window_bounds = array<i64: 512, 256>}, {transform_indices = @transform_3, window_bounds = array<i64: 256, 256>}]} {
    %c0_i32 = arith.constant 0 : i32
    %0 = arith.cmpi eq, %arg1, %c0_i32 : i32
    %1 = arith.extui %0 : i1 to i32
    %c0_i32_0 = arith.constant 0 : i32
    %2 = arith.cmpi ne, %1, %c0_i32_0 : i32
    scf.if %2 {
      %cst_12 = arith.constant 0.000000e+00 : f32
      %21 = vector.broadcast %cst_12 : f32 to vector<256x256xf32>
      %c0_13 = arith.constant 0 : index
      %c0_14 = arith.constant 0 : index
      %22 = vector.load %arg5[%c0_13, %c0_14] : memref<256x256xf32, #tpu.memory_space<vmem>>, vector<256x256xf32>
      tpu.vector_store %arg5[%c0_13, %c0_14], %21 {strides = array<i32>} : memref<256x256xf32, #tpu.memory_space<vmem>>, vector<256x256xf32>,
    } else {
    }
    %c0 = arith.constant 0 : index
    %c0_1 = arith.constant 0 : index
    %3 = vector.load %arg2[%c0, %c0_1] : memref<256x256xbf16, #tpu.memory_space<vmem>>, vector<256x256xbf16>
    %c0_2 = arith.constant 0 : index
    %c0_3 = arith.constant 0 : index
    %4 = vector.load %arg3[%c0_2, %c0_3] : memref<256x1024xbf16, #tpu.memory_space<vmem>>, vector<256x1024xbf16>
    %cst = arith.constant dense<0.000000e+00> : vector<256x1024xf32>
    %5 = tpu.matmul %3, %4, %cst {dimension_numbers = #tpu.dot_dimension_numbers<[1], [0], [0], [1], [0, 0, 1, 1], [], []>} : vector<256x256xbf16>, vector<256x1024xbf16>, vector<256x1024xf32> -> vector<256x1024xf32>
    %6 = vector.extract_strided_slice %5 {offsets = [0, 0], sizes = [256, 512], strides = [1, 1]} : vector<256x1024xf32> to vector<256x512xf32>
    %7 = vector.extract_strided_slice %5 {offsets = [0, 512], sizes = [256, 512], strides = [1, 1]} : vector<256x1024xf32> to vector<256x512xf32>
    %8 = arith.negf %6 : vector<256x512xf32>
    %9 = math.exp %8 : vector<256x512xf32>
    %cst_4 = arith.constant 1.000000e+00 : f32
    %10 = vector.broadcast %cst_4 : f32 to vector<256x512xf32>
    %11 = arith.addf %10, %9 : vector<256x512xf32>
    %12 = arith.divf %10, %11 : vector<256x512xf32>
    %13 = arith.mulf %6, %12 : vector<256x512xf32>
    %14 = arith.mulf %13, %7 : vector<256x512xf32>
    %c0_5 = arith.constant 0 : index
    %c0_6 = arith.constant 0 : index
    %15 = vector.load %arg5[%c0_5, %c0_6] : memref<256x256xf32, #tpu.memory_space<vmem>>, vector<256x256xf32>
    %16 = arith.truncf %14 : vector<256x512xf32> to vector<256x512xbf16>
    %c0_7 = arith.constant 0 : index
    %c0_8 = arith.constant 0 : index
    %17 = vector.load %arg4[%c0_7, %c0_8] : memref<512x256xbf16, #tpu.memory_space<vmem>>, vector<512x256xbf16>
    %cst_9 = arith.constant dense<0.000000e+00> : vector<256x256xf32>
    %18 = tpu.matmul %16, %17, %cst_9 {dimension_numbers = #tpu.dot_dimension_numbers<[1], [0], [0], [1], [0, 0, 1, 1], [], []>} : vector<256x512xbf16>, vector<512x256xbf16>, vector<256x256xf32> -> vector<256x256xf32>
    %19 = arith.addf %15, %18 : vector<256x256xf32>
    %c0_10 = arith.constant 0 : index
    %c0_11 = arith.constant 0 : index
    %20 = vector.load %arg5[%c0_10, %c0_11] : memref<256x256xf32, #tpu.memory_space<vmem>>, vector<256x256xf32>
    tpu.vector_store %arg5[%c0_10, %c0_11], %19 {strides = array<i32>} : memref<256x256xf32, #tpu.memory_space<vmem>>, vector<256x256xf32>,
    return
  }
  func.func @transform_0(%arg0: i32, %arg1: i32) -> (i32, i32) {
    %c0_i32 = arith.constant 0 : i32
    %c0_i32_0 = arith.constant 0 : i32
    return %arg0, %c0_i32 : i32, i32
  }
  func.func @transform_1(%arg0: i32, %arg1: i32) -> (i32, i32) {
    %c0_i32 = arith.constant 0 : i32
    %c0_i32_0 = arith.constant 0 : i32
    return %c0_i32, %arg1 : i32, i32
  }
  func.func @transform_2(%arg0: i32, %arg1: i32) -> (i32, i32) {
    %c0_i32 = arith.constant 0 : i32
    %c0_i32_0 = arith.constant 0 : i32
    return %arg1, %c0_i32 : i32, i32
  }
  func.func @transform_3(%arg0: i32, %arg1: i32) -> (i32, i32) {
    %c0_i32 = arith.constant 0 : i32
    %c0_i32_0 = arith.constant 0 : i32
    return %arg0, %c0_i32 : i32, i32
  }
}

</mosaic_0001>

<bundles_post_ra>
// kernel: tpu_custom_call.1
= control target key start
LH: loop header
LB: loop body
LE: loop exit
PB: predicated region body
PF: predicated region fallthrough
CT: control target
= control target key end

     0   :  { %8 = vsyncpa [#allocation3], 0  ;;  %s15330_s0 = inlined_call_operand.hbm [shape: bf16[256,256], index: 0, kind: input, shape index: {}]   ;;  %s15331_s1 = inlined_call_operand.hbm [shape: bf16[256,2048], index: 1, kind: input, shape index: {}]   ;;  %s15332_s2 = inlined_call_operand.hbm [shape: bf16[1024,256], index: 2, kind: input, shape index: {}]   ;;  %s15333_s3 = inlined_call_operand.hbm [shape: f32[256,256], index: 3, kind: output, shape index: {}]  }
   0x1   :  { %9 = vsyncpa [#allocation6], 0 }
   0x2   :  { %11 = vsyncpa [#allocation6 + $0x1], 0 }
   0x3   :  { %12 = vsyncpa [#allocation4], 0  ;;  %s8945_s12 = smov 0   ;;  %s8947_s13 = smov 0  }
   0x4   :  { %s8949_s14 = smov 0   ;;  %s8951_s15 = smov 0  }
   0x5   :  { %s8953_s16 = smov 0   ;;  %s8955_s17 = smov 0  }
   0x6 LB: > { %s27_s18 = sadd.s32 1, %s8909_s16  ;;  %s63_s19 = sadd.s32 1, %s8901_s14  ;;  %s8913_s17 = sphi %s8955_s17, %s18_s17   ;;  %s8909_s16 = sphi %s8953_s16, %s16633_s16   ;;  %s8905_s15 = sphi %s8951_s15, %s16632_s15   ;;  %s8901_s14 = sphi %s8949_s14, %s16631_s14   ;;  %s8897_s13 = sphi %s8947_s13, %s16630_s13   ;;  %s8893_s12 = sphi %s8945_s12, %s16629_s12  }
   0x7   : > { %p28_p0 = scmp.ge.s32.totalorder %s27_s18, 2  ;;  %p70_p1 = scmp.ne.s32.totalorder %s8901_s14, %s8897_s13 }
   0x8   : > { %p71_p2 = scmp.eq.s32.totalorder %s8913_s17, 0  ;;  %p8163_p4 = scmp.lt.s32.totalorder %s8913_s17, 2 }
   0x9   : > { %s16635_s18 = smov (%p28_p0, %s27_s18), 0  ;;  %s170_s22 = sand.u32 1, %s8913_s17  }
   0xa   : > { %p8982_p3 = por %p71_p2, %p70_p1  ;;  %s60_s21 = ssub.s32 %s8909_s16, %s16635_s18 }
   0xb   : > { %p61_p5 = scmp.eq.s32.totalorder %s60_s21, 0  ;;  %s172_s23 = sand.u32 1, %s8901_s14  }
   0xc   : > { %s7912_s24 = sshll.u32 %s8909_s16, 5  ;;  %s6872_s26 = sshll.u32 %s172_s23, 10 }
   0xd   : > { %s8993_s25 = scalar_select %p61_p5, %s8901_s14, %s63_s19  }
   0xe   : > { %s179_s29 = scalar_lea.hbm %s15331_s1, %s7912_s24  ;;  %s174_s4 = scalar_lea.vmem [#allocation5], %s6872_s26 }
   0xf   : > { %s180_s30 = sshll.u32 %s179_s29, 4  ;;  %s182_s5 = sshll.u32 %s174_s4, 4  ;;  %s181_s30 = int_to_ptr.hbm [resolvable:$true] %s180_s30  ;;  %s183_s5 = int_to_ptr.vmem [resolvable:$true] %s182_s5 }
  0x10   : > { %p9002_p6 = pnand %p8163_p4, %p8982_p3  ;;  %s9006_s7 = scalar_lea.sflag [#allocation6], %s170_s22 }
  0x11   : > { %s8915_s8 = smov 1024   ;;  %s8916_s9 = smov 512  }
  0x12   : > { %s8917_s10 = smov 32   ;;  %s9012_s11 = sadd.s32 4294967295, %s8913_s17  }
  0x13   : > { %8158 = dma.hbm_to_vmem [thread:$0]  (!%p9002_p6), %s181_s30, 16384, %s183_s5, %s9006_s7, %s8915_s8, %s8916_s9, %s8917_s10  }
  0x14   : > { %p76_p7 = scmp.ne.s32.totalorder %s8897_s13, %s8893_s12  ;;  %p77_p8 = scmp.eq.s32.totalorder %s9012_s11, 0 }
  0x15   : > { %p6869_p9 = scmp.ge.s32.totalorder %s8913_s17, 1  ;;  %p139_p10 = scmp.lt.s32.totalorder %s8913_s17, 3 }
  0x16   : > { %p9021_p11 = por %p77_p8, %p76_p7  ;;  %s154_s22 = sshll.u32 %s15330_s0, 4  ;;  %s155_s22 = int_to_ptr.hbm [resolvable:$true] %s154_s22 }
  0x17   : > { %p9028_p12 = pnand %p6869_p9, %p139_p10  ;;  %s8918_s12 = smov [#allocation2]  }
  0x18   : > { %s156_s26 = sshll.u32 %s8918_s12, 4  ;;  %s6875_s27 = sshll.u32 %s172_s23, 9  ;;  %s157_s26 = int_to_ptr.vmem [resolvable:$true] %s156_s26 }
  0x19   : > { %p8151_p13 = pneg %p9028_p12  ;;  %s7914_s28 = sshll.u32 %s8909_s16, 9 }
  0x1a   : > { %s202_s4 = scalar_lea.hbm %s15332_s2, %s7914_s28  ;;  %s8919_s5 = smov 128  }
  0x1b   : > { %p8152_p0 = pnand %p8151_p13, %p77_p8  ;;  %s8920_s8 = smov 8  }
  0x1c   : > { %s203_s9 = sshll.u32 %s202_s4, 4  ;;  %s196_s10 = scalar_lea.vmem [#allocation7], %s6875_s27  ;;  %s204_s9 = int_to_ptr.hbm [resolvable:$true] %s203_s9 }
  0x1d   : > { %8154 = dma.hbm_to_vmem [thread:$0]  (!%p8152_p0), %s155_s22, 4096, %s157_s26, [#allocation3], %s8919_s5, %s8919_s5, %s8920_s8  }
  0x1e   : > { %s205_s20 = sshll.u32 %s196_s10, 4  ;;  %217 = sbr.rel (%p9028_p12) target bundleno = 1858 (0x742), region = 32  ;;  %s206_s20 = int_to_ptr.vmem [resolvable:$true] %s205_s20 }
  0x1f   : > { %8161 = dma.hbm_to_vmem [thread:$0]  (!%p9002_p6), %s204_s9, 8192, %s206_s20, %s9006_s7, %s8919_s5, %s8919_s5, %s8920_s8  }
  0x23   : > { %8880 = dma.done.wait (%p77_p8), [#allocation3], 4096  }
  0x24   : > { %8882 = vsyncadd (%p77_p8), [#allocation3], 4294963200  ;;  %s224_s23 = sand.u32 1, %s9012_s11   ;;  %s226_s21 = sand.u32 1, %s8897_s13  }
  0x25   : > { %s6881_s22 = sshll.u32 %s226_s21, 10  ;;  %s225_s12 = scalar_lea.sflag [#allocation6], %s224_s23 }
  0x26   : > { %s9051_s26 = scalar_lea.vmem [#allocation5], %s6881_s22 }
  0x27   : > { %8884 = dma.done.wait (%p9021_p11), %s225_s12, 24576  }
  0x28   : > { %8886 = vsyncadd (%p9021_p11), %s225_s12, 4294942720  ;;  %s6882_s6 = sshll.u32 %s226_s21, 9  ;;  %p6883_p1 = scmp.ne.s32.totalorder %s8905_s15, 0 }
  0x29   : > { %s9057_s7 = scalar_lea.vmem [#allocation7], %s6882_s6 }
  0x2a   : > { %269 = sbr.rel (%p6883_p1) target bundleno = 112 (0x70), region = 48 }
  0x2f   : > { %v8921_v0 = vmov 0.0  }
  0x30   : > { %270 = vst [vmem:[#allocation8] sm:$0xff] %v8921_v0 }
  0x31   : > { %271 = vst [vmem:[#allocation8 + $0x8] sm:$0xff] %v8921_v0 }
  0x32   : > { %272 = vst [vmem:[#allocation8 + $0x10] sm:$0xff] %v8921_v0 }
  0x33   : > { %273 = vst [vmem:[#allocation8 + $0x18] sm:$0xff] %v8921_v0 }
  0x34   : > { %274 = vst [vmem:[#allocation8 + $0x20] sm:$0xff] %v8921_v0 }
  0x35   : > { %275 = vst [vmem:[#allocation8 + $0x28] sm:$0xff] %v8921_v0 }
  0x36   : > { %276 = vst [vmem:[#allocation8 + $0x30] sm:$0xff] %v8921_v0 }
  0x37   : > { %277 = vst [vmem:[#allocation8 + $0x38] sm:$0xff] %v8921_v0 }
  0x38   : > { %278 = vst [vmem:[#allocation8 + $0x40] sm:$0xff] %v8921_v0 }
  0x39   : > { %279 = vst [vmem:[#allocation8 + $0x48] sm:$0xff] %v8921_v0 }
  0x3a   : > { %280 = vst [vmem:[#allocation8 + $0x50] sm:$0xff] %v8921_v0 }
  0x3b   : > { %281 = vst [vmem:[#allocation8 + $0x58] sm:$0xff] %v8921_v0 }
  0x3c   : > { %282 = vst [vmem:[#allocation8 + $0x60] sm:$0xff] %v8921_v0 }
  0x3d   : > { %283 = vst [vmem:[#allocation8 + $0x68] sm:$0xff] %v8921_v0 }
  0x3e   : > { %284 = vst [vmem:[#allocation8 + $0x70] sm:$0xff] %v8921_v0 }
  0x3f   : > { %285 = vst [vmem:[#allocation8 + $0x78] sm:$0xff] %v8921_v0 }
  0x40   : > { %286 = vst [vmem:[#allocation8 + $0x80] sm:$0xff] %v8921_v0 }
  0x41   : > { %287 = vst [vmem:[#allocation8 + $0x88] sm:$0xff] %v8921_v0 }
  0x42   : > { %288 = vst [vmem:[#allocation8 + $0x90] sm:$0xff] %v8921_v0 }
  0x43   : > { %289 = vst [vmem:[#allocation8 + $0x98] sm:$0xff] %v8921_v0 }
  0x44   : > { %290 = vst [vmem:[#allocation8 + $0xa0] sm:$0xff] %v8921_v0 }
  0x45   : > { %291 = vst [vmem:[#allocation8 + $0xa8] sm:$0xff] %v8921_v0 }
  0x46   : > { %292 = vst [vmem:[#allocation8 + $0xb0] sm:$0xff] %v8921_v0 }
  0x47   : > { %293 = vst [vmem:[#allocation8 + $0xb8] sm:$0xff] %v8921_v0 }
  0x48   : > { %294 = vst [vmem:[#allocation8 + $0xc0] sm:$0xff] %v8921_v0 }
  0x49   : > { %295 = vst [vmem:[#allocation8 + $0xc8] sm:$0xff] %v8921_v0 }
  0x4a   : > { %296 = vst [vmem:[#allocation8 + $0xd0] sm:$0xff] %v8921_v0 }
  0x4b   : > { %297 = vst [vmem:[#allocation8 + $0xd8] sm:$0xff] %v8921_v0 }
  0x4c   : > { %298 = vst [vmem:[#allocation8 + $0xe0] sm:$0xff] %v8921_v0 }
  0x4d   : > { %299 = vst [vmem:[#allocation8 + $0xe8] sm:$0xff] %v8921_v0 }
  0x4e   : > { %300 = vst [vmem:[#allocation8 + $0xf0] sm:$0xff] %v8921_v0 }
  0x4f   : > { %301 = vst [vmem:[#allocation8 + $0xf8] sm:$0xff] %v8921_v0 }
  0x50   : > { %302 = vst [vmem:[#allocation8 + $0x100] sm:$0xff] %v8921_v0 }
  0x51   : > { %303 = vst [vmem:[#allocation8 + $0x108] sm:$0xff] %v8921_v0 }
  0x52   : > { %304 = vst [vmem:[#allocation8 + $0x110] sm:$0xff] %v8921_v0 }
  0x53   : > { %305 = vst [vmem:[#allocation8 + $0x118] sm:$0xff] %v8921_v0 }
  0x54   : > { %306 = vst [vmem:[#allocation8 + $0x120] sm:$0xff] %v8921_v0 }
  0x55   : > { %307 = vst [vmem:[#allocation8 + $0x128] sm:$0xff] %v8921_v0 }
  0x56   : > { %308 = vst [vmem:[#allocation8 + $0x130] sm:$0xff] %v8921_v0 }
  0x57   : > { %309 = vst [vmem:[#allocation8 + $0x138] sm:$0xff] %v8921_v0 }
  0x58   : > { %310 = vst [vmem:[#allocation8 + $0x140] sm:$0xff] %v8921_v0 }
  0x59   : > { %311 = vst [vmem:[#allocation8 + $0x148] sm:$0xff] %v8921_v0 }
  0x5a   : > { %312 = vst [vmem:[#allocation8 + $0x150] sm:$0xff] %v8921_v0 }
  0x5b   : > { %313 = vst [vmem:[#allocation8 + $0x158] sm:$0xff] %v8921_v0 }
  0x5c   : > { %314 = vst [vmem:[#allocation8 + $0x160] sm:$0xff] %v8921_v0 }
  0x5d   : > { %315 = vst [vmem:[#allocation8 + $0x168] sm:$0xff] %v8921_v0 }
  0x5e   : > { %316 = vst [vmem:[#allocation8 + $0x170] sm:$0xff] %v8921_v0 }
  0x5f   : > { %317 = vst [vmem:[#allocation8 + $0x178] sm:$0xff] %v8921_v0 }
  0x60   : > { %318 = vst [vmem:[#allocation8 + $0x180] sm:$0xff] %v8921_v0 }
  0x61   : > { %319 = vst [vmem:[#allocation8 + $0x188] sm:$0xff] %v8921_v0 }
  0x62   : > { %320 = vst [vmem:[#allocation8 + $0x190] sm:$0xff] %v8921_v0 }
  0x63   : > { %321 = vst [vmem:[#allocation8 + $0x198] sm:$0xff] %v8921_v0 }
  0x64   : > { %322 = vst [vmem:[#allocation8 + $0x1a0] sm:$0xff] %v8921_v0 }
  0x65   : > { %323 = vst [vmem:[#allocation8 + $0x1a8] sm:$0xff] %v8921_v0 }
  0x66   : > { %324 = vst [vmem:[#allocation8 + $0x1b0] sm:$0xff] %v8921_v0 }
  0x67   : > { %325 = vst [vmem:[#allocation8 + $0x1b8] sm:$0xff] %v8921_v0 }
  0x68   : > { %326 = vst [vmem:[#allocation8 + $0x1c0] sm:$0xff] %v8921_v0 }
  0x69   : > { %327 = vst [vmem:[#allocation8 + $0x1c8] sm:$0xff] %v8921_v0 }
  0x6a   : > { %328 = vst [vmem:[#allocation8 + $0x1d0] sm:$0xff] %v8921_v0 }
  0x6b   : > { %329 = vst [vmem:[#allocation8 + $0x1d8] sm:$0xff] %v8921_v0 }
  0x6c   : > { %330 = vst [vmem:[#allocation8 + $0x1e0] sm:$0xff] %v8921_v0 }
  0x6d   : > { %331 = vst [vmem:[#allocation8 + $0x1e8] sm:$0xff] %v8921_v0 }
  0x6e   : > { %332 = vst [vmem:[#allocation8 + $0x1f0] sm:$0xff] %v8921_v0 }
  0x6f   : > { %333 = vst [vmem:[#allocation8 + $0x1f8] sm:$0xff] %v8921_v0 }
  0x70 PF: > { %v7238_v1 = vld [vmem:[%s9051_s26 + $0x1c0] sm:$0xf]  ;;  %v8003_v6 = vld [vmem:[%s9051_s26 + $0x1c4] sm:$0xf]  ;;  %s8922_s15 = smov [#allocation8]   ;;  %s6769_s28 = sshll.u32 %s15333_s3, 4  ;;  %s6770_s28 = int_to_ptr.hbm [resolvable:$true] %s6769_s28 }
  0x71   : > { %v8007_v2 = vld [vmem:[%s9051_s26 + $0x1dc] sm:$0xf0]  ;;  %v7240_v7 = vld [vmem:[%s9051_s26 + $0x1e0] sm:$0xf0]  ;;  %s6767_s19 = sshll.u32 %s8922_s15, 4  ;;  %p8165_p2 = scmp.eq.s32.totalorder %s9012_s11, 1  ;;  %s6768_s19 = int_to_ptr.vmem [resolvable:$true] %s6767_s19 }
  0x72   : > { %v7494_v3 = vld [vmem:[%s9051_s26 + $0x3c0] sm:$0xf]  ;;  %v7239_v4 = vor.u32 %v8007_v2, %v7238_v1  ;;  %v7243_v9 = vor.u32 %v8003_v6, %v7240_v7  ;;  %v8067_v10 = vld [vmem:[%s9051_s26 + $0x3c4] sm:$0xf]  ;;  %s8923_s29 = smov 256   ;;  %s8924_s30 = smov 16  }
  0x73   : > { %v8071_v5 = vld [vmem:[%s9051_s26 + $0x3dc] sm:$0xf0]  ;;  %v7496_v11 = vld [vmem:[%s9051_s26 + $0x3e0] sm:$0xf0] }
  0x74   : > { %v7495_v8 = vor.u32 %v8071_v5, %v7494_v3  ;;  %v7206_v12 = vld [vmem:[%s9051_s26 + $0x180] sm:$0xf]  ;;  %1294 = vmatpush.bf16.msra.mxu0 %v7239_v4  ;;  %v7499_v13 = vor.u32 %v8067_v10, %v7496_v11  ;;  %1472 = vmatpush.bf16.msra.mxu2 %v7243_v9  ;;  %v7995_v19 = vld [vmem:[%s9051_s26 + $0x184] sm:$0xf] }
  0x75   : > { %v7999_v14 = vld [vmem:[%s9051_s26 + $0x19c] sm:$0xf0]  ;;  %v7208_v20 = vld [vmem:[%s9051_s26 + $0x1a0] sm:$0xf0] }
  0x76   : > { %v7462_v15 = vld [vmem:[%s9051_s26 + $0x380] sm:$0xf]  ;;  %1383 = vmatpush.bf16.msra.mxu1 %v7495_v8  ;;  %v7207_v17 = vor.u32 %v7999_v14, %v7206_v12  ;;  %v8059_v21 = vld [vmem:[%s9051_s26 + $0x384] sm:$0xf]  ;;  %1561 = vmatpush.bf16.msra.mxu3 %v7499_v13  ;;  %v7211_v22 = vor.u32 %v7995_v19, %v7208_v20 }
  0x77   : > { %v8063_v16 = vld [vmem:[%s9051_s26 + $0x39c] sm:$0xf0]  ;;  %v7464_v23 = vld [vmem:[%s9051_s26 + $0x3a0] sm:$0xf0] }
  0x78   : > { %v7463_v18 = vor.u32 %v8063_v16, %v7462_v15  ;;  %v7174_v24 = vld [vmem:[%s9051_s26 + $0x140] sm:$0xf]  ;;  %v7467_v26 = vor.u32 %v8059_v21, %v7464_v23  ;;  %v7987_v29 = vld [vmem:[%s9051_s26 + $0x144] sm:$0xf]  ;;  %1295 = vmatpush.bf16.msra.mxu0 %v7207_v17  ;;  %1473 = vmatpush.bf16.msra.mxu2 %v7211_v22 }
  0x79   : > { %v7991_v25 = vld [vmem:[%s9051_s26 + $0x15c] sm:$0xf0]  ;;  %v7176_v31 = vld [vmem:[%s9051_s26 + $0x160] sm:$0xf0] }
  0x7a   : > { %v7430_v27 = vld [vmem:[%s9051_s26 + $0x340] sm:$0xf]  ;;  %v7175_v30 = vor.u32 %v7991_v25, %v7174_v24  ;;  %v8051_v32 = vld [vmem:[%s9051_s26 + $0x344] sm:$0xf]  ;;  %1384 = vmatpush.bf16.msra.mxu1 %v7463_v18  ;;  %v7179_v35 = vor.u32 %v7987_v29, %v7176_v31  ;;  %1562 = vmatpush.bf16.msra.mxu3 %v7467_v26  ;;  %v8004_v31 = vld [vmem:[%s9051_s26 + $0x1cc] sm:$0xf] }
  0x7b   : > { %v8055_v28 = vld [vmem:[%s9051_s26 + $0x35c] sm:$0xf0]  ;;  %v7432_v33 = vld [vmem:[%s9051_s26 + $0x360] sm:$0xf0] }
  0x7c   : > { %v7431_v34 = vor.u32 %v8055_v28, %v7430_v27  ;;  %v7142_v36 = vld [vmem:[%s9051_s26 + $0x100] sm:$0xf]  ;;  %v7435_v39 = vor.u32 %v8051_v32, %v7432_v33  ;;  %v7979_v41 = vld [vmem:[%s9051_s26 + $0x104] sm:$0xf]  ;;  %1296 = vmatpush.bf16.msra.mxu0 %v7175_v30  ;;  %1474 = vmatpush.bf16.msra.mxu2 %v7179_v35  ;;  %v7916_v30 = vld [vmem:[#allocation2 + $0x4] sm:$0xf0] }
  0x7d   : > { %v7983_v37 = vld [vmem:[%s9051_s26 + $0x11c] sm:$0xf0]  ;;  %v7144_v42 = vld [vmem:[%s9051_s26 + $0x120] sm:$0xf0]  ;;  %v7248_v32 = vld [vmem:[%s9051_s26 + $0x1e8] sm:$0xf0] }
  0x7e   : > { %v7398_v38 = vld [vmem:[%s9051_s26 + $0x300] sm:$0xf]  ;;  %v8043_v43 = vld [vmem:[%s9051_s26 + $0x304] sm:$0xf]  ;;  %v7143_v45 = vor.u32 %v7983_v37, %v7142_v36  ;;  %1385 = vmatpush.bf16.msra.mxu1 %v7431_v34  ;;  %v7147_v47 = vor.u32 %v7979_v41, %v7144_v42  ;;  %1563 = vmatpush.bf16.msra.mxu3 %v7435_v39  ;;  %v8068_v34 = vld [vmem:[%s9051_s26 + $0x3cc] sm:$0xf]  ;;  %v7251_v41 = vor.u32 %v8004_v31, %v7248_v32 }
  0x7f   : > { %v8047_v40 = vld [vmem:[%s9051_s26 + $0x31c] sm:$0xf0]  ;;  %v7400_v44 = vld [vmem:[%s9051_s26 + $0x320] sm:$0xf0]  ;;  %v7504_v35 = vld [vmem:[%s9051_s26 + $0x3e8] sm:$0xf0] }
  0x80   : > { %v7399_v46 = vor.u32 %v8047_v40, %v7398_v38  ;;  %v7110_v48 = vld [vmem:[%s9051_s26 + $0xc0] sm:$0xf]  ;;  %v7403_v51 = vor.u32 %v8043_v43, %v7400_v44  ;;  %v7971_v53 = vld [vmem:[%s9051_s26 + $0xc4] sm:$0xf]  ;;  %1297 = vmatpush.bf16.msra.mxu0 %v7143_v45  ;;  %1475 = vmatpush.bf16.msra.mxu2 %v7147_v47  ;;  %v6888_v39 = vld [vmem:[#allocation2 + $0x8] sm:$0xf0]  ;;  %v7507_v45 = vor.u32 %v8068_v34, %v7504_v35 }
  0x81   : > { %v7975_v49 = vld [vmem:[%s9051_s26 + $0xdc] sm:$0xf0]  ;;  %v7112_v54 = vld [vmem:[%s9051_s26 + $0xe0] sm:$0xf0]  ;;  %v7246_v42 = vld [vmem:[%s9051_s26 + $0x1c8] sm:$0xf] }
  0x82   : > { %v7366_v50 = vld [vmem:[%s9051_s26 + $0x2c0] sm:$0xf]  ;;  %v8035_v55 = vld [vmem:[%s9051_s26 + $0x2c4] sm:$0xf]  ;;  %v7111_v57 = vor.u32 %v7975_v49, %v7110_v48  ;;  %1386 = vmatpush.bf16.msra.mxu1 %v7399_v46  ;;  %v7115_v59 = vor.u32 %v7971_v53, %v7112_v54  ;;  %1564 = vmatpush.bf16.msra.mxu3 %v7403_v51  ;;  %v8008_v43 = vld [vmem:[%s9051_s26 + $0x1e4] sm:$0xf0] }
  0x83   : > { %v8039_v52 = vld [vmem:[%s9051_s26 + $0x2dc] sm:$0xf0]  ;;  %v7368_v56 = vld [vmem:[%s9051_s26 + $0x2e0] sm:$0xf0]  ;;  %v7502_v46 = vld [vmem:[%s9051_s26 + $0x3c8] sm:$0xf]  ;;  %v7247_v49 = vor.u32 %v8008_v43, %v7246_v42 }
  0x84   : > { %v7367_v58 = vor.u32 %v8039_v52, %v7366_v50  ;;  %v7078_v60 = vld [vmem:[%s9051_s26 + $0x80] sm:$0xf]  ;;  %v7371_v63 = vor.u32 %v8035_v55, %v7368_v56  ;;  %v7963_v1 = vld [vmem:[%s9051_s26 + $0x84] sm:$0xf]  ;;  %1298 = vmatpush.bf16.msra.mxu0 %v7111_v57  ;;  %1476 = vmatpush.bf16.msra.mxu2 %v7115_v59  ;;  %v8072_v47 = vld [vmem:[%s9051_s26 + $0x3e4] sm:$0xf0] }
  0x85   : > { %v7967_v61 = vld [vmem:[%s9051_s26 + $0x9c] sm:$0xf0]  ;;  %v7080_v2 = vld [vmem:[%s9051_s26 + $0xa0] sm:$0xf0]  ;;  %v7503_v50 = vor.u32 %v8072_v47, %v7502_v46  ;;  %v7996_v51 = vld [vmem:[%s9051_s26 + $0x18c] sm:$0xf] }
  0x86   : > { %v7334_v62 = vld [vmem:[%s9051_s26 + $0x280] sm:$0xf]  ;;  %v8027_v3 = vld [vmem:[%s9051_s26 + $0x284] sm:$0xf]  ;;  %v7079_v5 = vor.u32 %v7967_v61, %v7078_v60  ;;  %1387 = vmatpush.bf16.msra.mxu1 %v7367_v58  ;;  %v7083_v7 = vor.u32 %v7963_v1, %v7080_v2  ;;  %1565 = vmatpush.bf16.msra.mxu3 %v7371_v63  ;;  %v7216_v52 = vld [vmem:[%s9051_s26 + $0x1a8] sm:$0xf0] }
  0x87   : > { %v8031_v0 = vld [vmem:[%s9051_s26 + $0x29c] sm:$0xf0]  ;;  %v7336_v4 = vld [vmem:[%s9051_s26 + $0x2a0] sm:$0xf0]  ;;  %v8060_v53 = vld [vmem:[%s9051_s26 + $0x38c] sm:$0xf]  ;;  %v7219_v54 = vor.u32 %v7996_v51, %v7216_v52 }
  0x88   : > { %v7335_v6 = vor.u32 %v8031_v0, %v7334_v62  ;;  %v7046_v8 = vld [vmem:[%s9051_s26 + $0x40] sm:$0xf]  ;;  %v7339_v11 = vor.u32 %v8027_v3, %v7336_v4  ;;  %v7955_v13 = vld [vmem:[%s9051_s26 + $0x44] sm:$0xf]  ;;  %1299 = vmatpush.bf16.msra.mxu0 %v7079_v5  ;;  %1477 = vmatpush.bf16.msra.mxu2 %v7083_v7  ;;  %v7472_v55 = vld [vmem:[%s9051_s26 + $0x3a8] sm:$0xf0] }
  0x89   : > { %v7959_v9 = vld [vmem:[%s9051_s26 + $0x5c] sm:$0xf0]  ;;  %v7048_v14 = vld [vmem:[%s9051_s26 + $0x60] sm:$0xf0]  ;;  %v7214_v56 = vld [vmem:[%s9051_s26 + $0x188] sm:$0xf]  ;;  %v7475_v58 = vor.u32 %v8060_v53, %v7472_v55 }
  0x8a   : > { %v7302_v10 = vld [vmem:[%s9051_s26 + $0x240] sm:$0xf]  ;;  %v8019_v15 = vld [vmem:[%s9051_s26 + $0x244] sm:$0xf]  ;;  %v7047_v17 = vor.u32 %v7959_v9, %v7046_v8  ;;  %1388 = vmatpush.bf16.msra.mxu1 %v7335_v6  ;;  %v7051_v22 = vor.u32 %v7955_v13, %v7048_v14  ;;  %1566 = vmatpush.bf16.msra.mxu3 %v7339_v11  ;;  %v8000_v57 = vld [vmem:[%s9051_s26 + $0x1a4] sm:$0xf0] }
  0x8b   : > { %v8023_v12 = vld [vmem:[%s9051_s26 + $0x25c] sm:$0xf0]  ;;  %v7304_v16 = vld [vmem:[%s9051_s26 + $0x260] sm:$0xf0]  ;;  %v7215_v59 = vor.u32 %v8000_v57, %v7214_v56  ;;  %v7470_v60 = vld [vmem:[%s9051_s26 + $0x388] sm:$0xf] }
  0x8c   : > { %v7014_v18 = vld [vmem:[%s9051_s26] sm:$0xf]  ;;  %v7303_v21 = vor.u32 %v8023_v12, %v7302_v10  ;;  %v7947_v24 = vld [vmem:[%s9051_s26 + $0x4] sm:$0xf]  ;;  %v7307_v26 = vor.u32 %v8019_v15, %v7304_v16  ;;  %1300 = vmatpush.bf16.msra.mxu0 %v7047_v17  ;;  %1478 = vmatpush.bf16.msra.mxu2 %v7051_v22  ;;  %v8064_v61 = vld [vmem:[%s9051_s26 + $0x3a4] sm:$0xf0] }
  0x8d   : > { %v7951_v19 = vld [vmem:[%s9051_s26 + $0x1c] sm:$0xf0]  ;;  %v7016_v25 = vld [vmem:[%s9051_s26 + $0x20] sm:$0xf0]  ;;  %v7471_v62 = vor.u32 %v8064_v61, %v7470_v60  ;;  %v6894_v63 = vld [vmem:[#allocation2 + $0x10] sm:$0xf] }
  0x8e   : > { %v7270_v20 = vld [vmem:[%s9051_s26 + $0x200] sm:$0xf]  ;;  %v8011_v27 = vld [vmem:[%s9051_s26 + $0x204] sm:$0xf]  ;;  %v7015_v33 = vor.u32 %v7951_v19, %v7014_v18  ;;  %1389 = vmatpush.bf16.msra.mxu1 %v7303_v21  ;;  %v7019_v37 = vor.u32 %v7947_v24, %v7016_v25  ;;  %1567 = vmatpush.bf16.msra.mxu3 %v7307_v26  ;;  %v7918_v0 = vld [vmem:[#allocation2 + $0x14] sm:$0xf0] }
  0x8f   : > { %v8015_v23 = vld [vmem:[%s9051_s26 + $0x21c] sm:$0xf0]  ;;  %v7272_v28 = vld [vmem:[%s9051_s26 + $0x220] sm:$0xf0]  ;;  %v7917_v1 = vld [vmem:[#allocation2 + $0x14] sm:$0xf]  ;;  %v9212_v3 = vor.u32 %v7918_v0, %v6894_v63 }
  0x90   : > { %v6886_v29 = vld [vmem:[#allocation2] sm:$0xf]  ;;  %v7271_v36 = vor.u32 %v8015_v23, %v7270_v20  ;;  %v7915_v38 = vld [vmem:[#allocation2 + $0x4] sm:$0xf]  ;;  %v7275_v40 = vor.u32 %v8011_v27, %v7272_v28  ;;  %1301 = vmatpush.bf16.msra.mxu0 %v7015_v33  ;;  %1479 = vmatpush.bf16.msra.mxu2 %v7019_v37  ;;  %v6896_v2 = vld [vmem:[#allocation2 + $0x18] sm:$0xf0] }
  0x91   : > { %v9194_v44 = vor.u32 %v7916_v30, %v6886_v29  ;;  %v9198_v48 = vor.u32 %v7915_v38, %v6888_v39  ;;  %15570 = vst [vmem:[#allocation14_spill] sm:$0xff] %v9212_v3  ;;  %v9214_v4 = vor.u32 %v7917_v1, %v6896_v2  ;;  %v6902_v5 = vld [vmem:[#allocation2 + $0x20] sm:$0xf]  ;;  %v7920_v6 = vld [vmem:[#allocation2 + $0x24] sm:$0xf0] }
  0x92   : > { %1390 = vmatpush.bf16.msra.mxu1 %v7271_v36  ;;  %1568 = vmatpush.bf16.msra.mxu3 %v7275_v40  ;;  %v7919_v7 = vld [vmem:[#allocation2 + $0x24] sm:$0xf]  ;;  %v6904_v8 = vld [vmem:[#allocation2 + $0x28] sm:$0xf0]  ;;  %v9220_v9 = vor.u32 %v7920_v6, %v6902_v5  ;;  %v7182_v16 = vld [vmem:[%s9051_s26 + $0x148] sm:$0xf] }
  0x93   : > { %15568 = vst [vmem:[#allocation12_spill] sm:$0xff] %v9194_v44  ;;  %1302 = vmatmul.bf16.vlgmr.msra.gmra.mxu0 %v9194_v44  ;;  %1480 = vmatmul.bf16.vlgmr.msra.gmra.mxu2 %v9194_v44  ;;  %v9222_v10 = vor.u32 %v7919_v7, %v6904_v8  ;;  %v7988_v11 = vld [vmem:[%s9051_s26 + $0x14c] sm:$0xf]  ;;  %v7992_v17 = vld [vmem:[%s9051_s26 + $0x164] sm:$0xf0] }
  0x94   : > { %15569 = vst [vmem:[#allocation13_spill] sm:$0xff] %v9198_v48  ;;  %1828 = vmatpush.bf16.msrb.mxu2 %v7251_v41  ;;  %1650 = vmatpush.bf16.msrb.mxu0 %v7247_v49  ;;  %v7184_v12 = vld [vmem:[%s9051_s26 + $0x168] sm:$0xf0]  ;;  %v7183_v19 = vor.u32 %v7992_v17, %v7182_v16  ;;  %v7438_v20 = vld [vmem:[%s9051_s26 + $0x348] sm:$0xf] }
  0x95   : > { %1391 = vmatmul.bf16.vlgmr.msra.gmra.mxu1 %v9198_v48  ;;  %1569 = vmatmul.bf16.vlgmr.msra.gmra.mxu3 %v9198_v48  ;;  %15571 = vst [vmem:[#allocation15_spill] sm:$0xff] %v9214_v4  ;;  %v8052_v13 = vld [vmem:[%s9051_s26 + $0x34c] sm:$0xf]  ;;  %v7187_v14 = vor.u32 %v7988_v11, %v7184_v12  ;;  %v8056_v21 = vld [vmem:[%s9051_s26 + $0x364] sm:$0xf0] }
  0x96   : > { %1917 = vmatpush.bf16.msrb.mxu3 %v7507_v45  ;;  %1739 = vmatpush.bf16.msrb.mxu1 %v7503_v50  ;;  %15572 = vst [vmem:[#allocation16_spill] sm:$0xff] %v9220_v9  ;;  %v7440_v15 = vld [vmem:[%s9051_s26 + $0x368] sm:$0xf0]  ;;  %v7439_v22 = vor.u32 %v8056_v21, %v7438_v20  ;;  %v6910_v23 = vld [vmem:[#allocation2 + $0x30] sm:$0xf] }
  0x97   : > { %15573 = vst [vmem:[#allocation17_spill] sm:$0xff] %v9222_v10  ;;  %v7443_v18 = vor.u32 %v8052_v13, %v7440_v15  ;;  %v7922_v24 = vld [vmem:[#allocation2 + $0x34] sm:$0xf0]  ;;  %v7921_v25 = vld [vmem:[#allocation2 + $0x34] sm:$0xf] }
  0x98   : > { %1829 = vmatpush.bf16.msrb.mxu2 %v7219_v54  ;;  %1651 = vmatpush.bf16.msrb.mxu0 %v7215_v59  ;;  %v6912_v26 = vld [vmem:[#allocation2 + $0x38] sm:$0xf0]  ;;  %v9236_v27 = vor.u32 %v7922_v24, %v6910_v23  ;;  %v6918_v29 = vld [vmem:[#allocation2 + $0x40] sm:$0xf]  ;;  %v7924_v30 = vld [vmem:[#allocation2 + $0x44] sm:$0xf0] }
  0x99   : > { %v9238_v28 = vor.u32 %v7921_v25, %v6912_v26  ;;  %v7923_v31 = vld [vmem:[#allocation2 + $0x44] sm:$0xf]  ;;  %v6920_v32 = vld [vmem:[#allocation2 + $0x48] sm:$0xf0]  ;;  %v9244_v33 = vor.u32 %v7924_v30, %v6918_v29  ;;  %v7150_v40 = vld [vmem:[%s9051_s26 + $0x108] sm:$0xf] }
  0x9a   : > { %1918 = vmatpush.bf16.msrb.mxu3 %v7475_v58  ;;  %1740 = vmatpush.bf16.msrb.mxu1 %v7471_v62  ;;  %15574 = vst [vmem:[#allocation18_spill] sm:$0xff] %v9236_v27  ;;  %v9246_v34 = vor.u32 %v7923_v31, %v6920_v32  ;;  %v7980_v35 = vld [vmem:[%s9051_s26 + $0x10c] sm:$0xf]  ;;  %v7984_v41 = vld [vmem:[%s9051_s26 + $0x124] sm:$0xf0] }
  0x9b   : > { %15575 = vst [vmem:[#allocation19_spill] sm:$0xff] %v9238_v28  ;;  %v7152_v36 = vld [vmem:[%s9051_s26 + $0x128] sm:$0xf0]  ;;  %v7151_v43 = vor.u32 %v7984_v41, %v7150_v40  ;;  %v7406_v45 = vld [vmem:[%s9051_s26 + $0x308] sm:$0xf] }
  0x9c   : > { %1830 = vmatpush.bf16.msrb.mxu2 %v7187_v14  ;;  %1652 = vmatpush.bf16.msrb.mxu0 %v7183_v19  ;;  %15576 = vst [vmem:[#allocation20_spill] sm:$0xff] %v9244_v33  ;;  %v8044_v37 = vld [vmem:[%s9051_s26 + $0x30c] sm:$0xf]  ;;  %v7155_v38 = vor.u32 %v7980_v35, %v7152_v36  ;;  %v8048_v46 = vld [vmem:[%s9051_s26 + $0x324] sm:$0xf0] }
  0x9d   : > { %15577 = vst [vmem:[#allocation21_spill] sm:$0xff] %v9246_v34  ;;  %v7408_v39 = vld [vmem:[%s9051_s26 + $0x328] sm:$0xf0]  ;;  %v7407_v47 = vor.u32 %v8048_v46, %v7406_v45  ;;  %v6926_v49 = vld [vmem:[#allocation2 + $0x50] sm:$0xf] }
  0x9e   : > { %1919 = vmatpush.bf16.msrb.mxu3 %v7443_v18  ;;  %1741 = vmatpush.bf16.msrb.mxu1 %v7439_v22  ;;  %v7411_v42 = vor.u32 %v8044_v37, %v7408_v39  ;;  %v7926_v50 = vld [vmem:[#allocation2 + $0x54] sm:$0xf0]  ;;  %v7925_v51 = vld [vmem:[#allocation2 + $0x54] sm:$0xf]  ;;  %v6928_v52 = vld [vmem:[#allocation2 + $0x58] sm:$0xf0] }
  0x9f   : > { %v9260_v53 = vor.u32 %v7926_v50, %v6926_v49  ;;  %v9262_v54 = vor.u32 %v7925_v51, %v6928_v52  ;;  %v6934_v55 = vld [vmem:[#allocation2 + $0x60] sm:$0xf]  ;;  %v7928_v56 = vld [vmem:[#allocation2 + $0x64] sm:$0xf0]  ;;  %v7927_v57 = vld [vmem:[#allocation2 + $0x64] sm:$0xf] }
  0xa0   : > { %1831 = vmatpush.bf16.msrb.mxu2 %v7155_v38  ;;  %1653 = vmatpush.bf16.msrb.mxu0 %v7151_v43  ;;  %v6936_v58 = vld [vmem:[#allocation2 + $0x68] sm:$0xf0]  ;;  %v9268_v59 = vor.u32 %v7928_v56, %v6934_v55  ;;  %v6942_v61 = vld [vmem:[#allocation2 + $0x70] sm:$0xf]  ;;  %v7930_v62 = vld [vmem:[#allocation2 + $0x74] sm:$0xf0] }
  0xa1   : > { %15578 = vst [vmem:[#allocation22_spill] sm:$0xff] %v9260_v53  ;;  %v9270_v60 = vor.u32 %v7927_v57, %v6936_v58  ;;  %v7929_v63 = vld [vmem:[#allocation2 + $0x74] sm:$0xf]  ;;  %v6944_v0 = vld [vmem:[#allocation2 + $0x78] sm:$0xf0]  ;;  %v9276_v1 = vor.u32 %v7930_v62, %v6942_v61 }
  0xa2   : > { %1920 = vmatpush.bf16.msrb.mxu3 %v7411_v42  ;;  %1742 = vmatpush.bf16.msrb.mxu1 %v7407_v47  ;;  %15579 = vst [vmem:[#allocation23_spill] sm:$0xff] %v9262_v54  ;;  %v9278_v2 = vor.u32 %v7929_v63, %v6944_v0  ;;  %v6950_v5 = vld [vmem:[#allocation2 + $0x80] sm:$0xf]  ;;  %v7932_v6 = vld [vmem:[#allocation2 + $0x84] sm:$0xf0] }
  0xa3   : > { %1307 = vmatmul.bf16.gmra.mxu0 %v9212_v3  ;;  %1485 = vmatmul.bf16.gmra.mxu2 %v9212_v3  ;;  %15580 = vst [vmem:[#allocation24_spill] sm:$0xff] %v9268_v59  ;;  %v7931_v7 = vld [vmem:[#allocation2 + $0x84] sm:$0xf]  ;;  %v6952_v8 = vld [vmem:[#allocation2 + $0x88] sm:$0xf0]  ;;  %v9284_v11 = vor.u32 %v7932_v6, %v6950_v5 }
  0xa4   : > { %15581 = vst [vmem:[#allocation25_spill] sm:$0xff] %v9270_v60  ;;  %v9286_v13 = vor.u32 %v7931_v7, %v6952_v8  ;;  %v7972_v14 = vld [vmem:[%s9051_s26 + $0xcc] sm:$0xf]  ;;  %v7118_v23 = vld [vmem:[%s9051_s26 + $0xc8] sm:$0xf] }
  0xa5   : > { %1396 = vmatmul.bf16.gmra.mxu1 %v9214_v4  ;;  %1574 = vmatmul.bf16.gmra.mxu3 %v9214_v4  ;;  %15582 = vst [vmem:[#allocation26_spill] sm:$0xff] %v9276_v1  ;;  %v7120_v15 = vld [vmem:[%s9051_s26 + $0xe8] sm:$0xf0]  ;;  %v7976_v24 = vld [vmem:[%s9051_s26 + $0xe4] sm:$0xf0] }
  0xa6   : > { %15583 = vst [vmem:[#allocation27_spill] sm:$0xff] %v9278_v2  ;;  %v8036_v16 = vld [vmem:[%s9051_s26 + $0x2cc] sm:$0xf]  ;;  %v7123_v18 = vor.u32 %v7972_v14, %v7120_v15  ;;  %v7374_v25 = vld [vmem:[%s9051_s26 + $0x2c8] sm:$0xf]  ;;  %v7119_v29 = vor.u32 %v7976_v24, %v7118_v23 }
  0xa7   : > { %15584 = vst [vmem:[#allocation28_spill] sm:$0xff] %v9284_v11  ;;  %v7376_v19 = vld [vmem:[%s9051_s26 + $0x2e8] sm:$0xf0]  ;;  %v8040_v30 = vld [vmem:[%s9051_s26 + $0x2e4] sm:$0xf0] }
  0xa8   : > { %15585 = vst [vmem:[#allocation29_spill] sm:$0xff] %v9286_v13  ;;  %v7379_v21 = vor.u32 %v8036_v16, %v7376_v19  ;;  %1832 = vmatpush.bf16.msrb.mxu2 %v7123_v18  ;;  %v7375_v35 = vor.u32 %v8040_v30, %v7374_v25  ;;  %1654 = vmatpush.bf16.msrb.mxu0 %v7119_v29  ;;  %v6958_v38 = vld [vmem:[#allocation2 + $0x90] sm:$0xf]  ;;  %v7934_v39 = vld [vmem:[#allocation2 + $0x94] sm:$0xf0] }
  0xa9   : > { %v7933_v40 = vld [vmem:[#allocation2 + $0x94] sm:$0xf]  ;;  %v6960_v41 = vld [vmem:[#allocation2 + $0x98] sm:$0xf0]  ;;  %v9306_v43 = vor.u32 %v7934_v39, %v6958_v38  ;;  %v6966_v61 = vld [vmem:[#allocation2 + $0xa0] sm:$0xf] }
  0xaa   : > { %1921 = vmatpush.bf16.msrb.mxu3 %v7379_v21  ;;  %1743 = vmatpush.bf16.msrb.mxu1 %v7375_v35  ;;  %v9308_v47 = vor.u32 %v7933_v40, %v6960_v41  ;;  %v7936_v62 = vld [vmem:[#allocation2 + $0xa4] sm:$0xf0]  ;;  %v7935_v63 = vld [vmem:[#allocation2 + $0xa4] sm:$0xf]  ;;  %v6968_v0 = vld [vmem:[#allocation2 + $0xa8] sm:$0xf0] }
  0xab   : > { %15586 = vst [vmem:[#allocation30_spill] sm:$0xff] %v9306_v43  ;;  %v9324_v6 = vor.u32 %v7936_v62, %v6966_v61  ;;  %v7964_v18 = vld [vmem:[%s9051_s26 + $0x8c] sm:$0xf]  ;;  %v7938_v35 = vld [vmem:[#allocation2 + $0xb4] sm:$0xf0] }
  0xac   : > { %15587 = vst [vmem:[#allocation31_spill] sm:$0xff] %v9308_v47  ;;  %v8028_v23 = vld [vmem:[%s9051_s26 + $0x28c] sm:$0xf]  ;;  %v6976_v38 = vld [vmem:[#allocation2 + $0xb8] sm:$0xf0] }
  0xad   : > { %15588 = vst [vmem:[#allocation32_spill] sm:$0xff] %v9324_v6  ;;  %v7344_v24 = vld [vmem:[%s9051_s26 + $0x2a8] sm:$0xf0]  ;;  %v7086_v39 = vld [vmem:[%s9051_s26 + $0x88] sm:$0xf] }
  0xae   : > { %v7347_v29 = vor.u32 %v8028_v23, %v7344_v24  ;;  %v7968_v40 = vld [vmem:[%s9051_s26 + $0xa4] sm:$0xf0]  ;;  %v6984_v23 = vld [vmem:[#allocation2 + $0xc8] sm:$0xf0] }
  0xaf   : > { %v8032_v61 = vld [vmem:[%s9051_s26 + $0x2a4] sm:$0xf0] }
  0xb0   : > { %1922 = vmatpush.bf16.msrb.mxu3 %v7347_v29 }
  0xb3   : > { %1312 = vmatmul.bf16.gmra.mxu0 %v9220_v9  ;;  %1490 = vmatmul.bf16.gmra.mxu2 %v9220_v9 }
  0xb5   : > { %1401 = vmatmul.bf16.gmra.mxu1 %v9222_v10  ;;  %1579 = vmatmul.bf16.gmra.mxu3 %v9222_v10 }
  0xc3   : > { %1317 = vmatmul.bf16.gmra.mxu0 %v9236_v27  ;;  %1495 = vmatmul.bf16.gmra.mxu2 %v9236_v27 }
  0xc5   : > { %1406 = vmatmul.bf16.gmra.mxu1 %v9238_v28  ;;  %1584 = vmatmul.bf16.gmra.mxu3 %v9238_v28 }
  0xd3   : > { %1322 = vmatmul.bf16.gmra.mxu0 %v9244_v33  ;;  %1500 = vmatmul.bf16.gmra.mxu2 %v9244_v33 }
  0xd5   : > { %1411 = vmatmul.bf16.gmra.mxu1 %v9246_v34  ;;  %1589 = vmatmul.bf16.gmra.mxu3 %v9246_v34 }
  0xe3   : > { %1327 = vmatmul.bf16.gmra.mxu0 %v9260_v53  ;;  %1505 = vmatmul.bf16.gmra.mxu2 %v9260_v53 }
  0xe5   : > { %1416 = vmatmul.bf16.gmra.mxu1 %v9262_v54  ;;  %1594 = vmatmul.bf16.gmra.mxu3 %v9262_v54 }
  0xf3   : > { %1332 = vmatmul.bf16.gmra.mxu0 %v9268_v59  ;;  %1510 = vmatmul.bf16.gmra.mxu2 %v9268_v59 }
  0xf5   : > { %1421 = vmatmul.bf16.gmra.mxu1 %v9270_v60  ;;  %1599 = vmatmul.bf16.gmra.mxu3 %v9270_v60 }
 0x103   : > { %1337 = vmatmul.bf16.gmra.mxu0 %v9276_v1  ;;  %1515 = vmatmul.bf16.gmra.mxu2 %v9276_v1 }
 0x105   : > { %1426 = vmatmul.bf16.gmra.mxu1 %v9278_v2  ;;  %1604 = vmatmul.bf16.gmra.mxu3 %v9278_v2 }
 0x110   : > { %v1303_v12 = vpop.f32.mrf.mxu0 }
 0x112   : > { %v1392_v17 = vpop.f32.mrf.mxu1 }
 0x113   : > { %v9292_v20 = vadd.f32 %v1392_v17, %v1303_v12  ;;  %1342 = vmatmul.bf16.gmra.mxu0 %v9284_v11  ;;  %1520 = vmatmul.bf16.gmra.mxu2 %v9284_v11  ;;  %v9326_v12 = vor.u32 %v7935_v63, %v6968_v0 }
 0x115   : > { %1431 = vmatmul.bf16.gmra.mxu1 %v9286_v13  ;;  %1609 = vmatmul.bf16.gmra.mxu3 %v9286_v13  ;;  %15589 = vst [vmem:[#allocation33_spill] sm:$0xff] %v9326_v12 }
 0x116   : > { %v1481_v22 = vpop.f32.mrf.mxu2 }
 0x118   : > { %v1570_v26 = vpop.f32.mrf.mxu3  ;;  %v1305_v31 = vpop.f32.mrf.mxu0 }
 0x119   : > { %v9302_v32 = vadd.f32 %v1570_v26, %v1481_v22  ;;  %v7088_v22 = vld [vmem:[%s9051_s26 + $0xa8] sm:$0xf0] }
 0x11a   : > { %v1394_v36 = vpop.f32.mrf.mxu1  ;;  %v7091_v26 = vor.u32 %v7964_v18, %v7088_v22  ;;  %v6982_v18 = vld [vmem:[#allocation2 + $0xc0] sm:$0xf]  ;;  %v7939_v22 = vld [vmem:[#allocation2 + $0xc4] sm:$0xf] }
 0x11b   : > { %v9304_v37 = vadd.f32 %v1394_v36, %v1305_v31  ;;  %v6974_v31 = vld [vmem:[#allocation2 + $0xb0] sm:$0xf]  ;;  %v7937_v36 = vld [vmem:[#allocation2 + $0xb4] sm:$0xf] }
 0x11c   : > { %1833 = vmatpush.bf16.msrb.mxu2 %v7091_v26 }
 0x11e   : > { %v1483_v42 = vpop.f32.mrf.mxu2 }
 0x120   : > { %v1572_v45 = vpop.f32.mrf.mxu3  ;;  %v1308_v46 = vpop.f32.mrf.mxu0 }
 0x121   : > { %v9310_v49 = vadd.f32 %v1572_v45, %v1483_v42  ;;  %v9350_v42 = vor.u32 %v7938_v35, %v6974_v31  ;;  %v7087_v45 = vor.u32 %v7968_v40, %v7086_v39  ;;  %v9376_v35 = vor.u32 %v7939_v22, %v6984_v23  ;;  %v8020_v22 = vld [vmem:[%s9051_s26 + $0x24c] sm:$0xf] }
 0x122   : > { %v1397_v50 = vpop.f32.mrf.mxu1  ;;  %v7312_v23 = vld [vmem:[%s9051_s26 + $0x268] sm:$0xf0] }
 0x123   : > { %v9312_v51 = vadd.f32 %v1397_v50, %v1308_v46  ;;  %1347 = vmatmul.bf16.gmra.mxu0 %v9306_v43  ;;  %1525 = vmatmul.bf16.gmra.mxu2 %v9306_v43  ;;  %15593 = vst [vmem:[#allocation37_spill] sm:$0xff] %v9350_v42 }
 0x124   : > { %1655 = vmatpush.bf16.msrb.mxu0 %v7087_v45  ;;  %15603 = vst [vmem:[#allocation47_spill] sm:$0xff] %v9376_v35 }
 0x125   : > { %1436 = vmatmul.bf16.gmra.mxu1 %v9308_v47  ;;  %1614 = vmatmul.bf16.gmra.mxu3 %v9308_v47 }
 0x126   : > { %v1486_v52 = vpop.f32.mrf.mxu2 }
 0x128   : > { %v1575_v55 = vpop.f32.mrf.mxu3  ;;  %v9318_v56 = vpop.f32.mrf.mxu0 }
 0x129   : > { %v9320_v57 = vadd.f32 %v1575_v55, %v1486_v52  ;;  %v9354_v52 = vor.u32 %v7937_v36, %v6976_v38  ;;  %v7342_v55 = vld [vmem:[%s9051_s26 + $0x288] sm:$0xf] }
 0x12a   : > { %v9322_v58 = vpop.f32.mrf.mxu1  ;;  %v7343_v63 = vor.u32 %v8032_v61, %v7342_v55  ;;  %v7956_v55 = vld [vmem:[%s9051_s26 + $0x4c] sm:$0xf] }
 0x12b   : > { %15595 = vst [vmem:[#allocation39_spill] sm:$0xff] %v9354_v52  ;;  %v7056_v61 = vld [vmem:[%s9051_s26 + $0x68] sm:$0xf0] }
 0x12c   : > { %1744 = vmatpush.bf16.msrb.mxu1 %v7343_v63 }
 0x12e   : > { %v1488_v5 = vpop.f32.mrf.mxu2 }
 0x130   : > { %v1577_v7 = vpop.f32.mrf.mxu3  ;;  %v1313_v8 = vpop.f32.mrf.mxu0 }
 0x131   : > { %v9328_v14 = vadd.f32 %v1577_v7, %v1488_v5 }
 0x132   : > { %v1402_v15 = vpop.f32.mrf.mxu1 }
 0x133   : > { %1352 = vmatmul.bf16.gmra.mxu0 %v9324_v6  ;;  %v9331_v16 = vadd.f32 %v1402_v15, %v1313_v8  ;;  %1530 = vmatmul.bf16.gmra.mxu2 %v9324_v6 }
 0x135   : > { %1441 = vmatmul.bf16.gmra.mxu1 %v9326_v12  ;;  %1619 = vmatmul.bf16.gmra.mxu3 %v9326_v12 }
 0x136   : > { %v1491_v17 = vpop.f32.mrf.mxu2 }
 0x138   : > { %v1580_v19 = vpop.f32.mrf.mxu3  ;;  %v9337_v21 = vpop.f32.mrf.mxu0 }
 0x139   : > { %v9344_v30 = vadd.f32 %v1580_v19, %v1491_v17  ;;  %v7940_v19 = vld [vmem:[#allocation2 + $0xc4] sm:$0xf0] }
 0x13a   : > { %v9342_v25 = vpop.f32.mrf.mxu1  ;;  %v9372_v26 = vor.u32 %v7940_v19, %v6982_v18  ;;  %v7059_v18 = vor.u32 %v7956_v55, %v7056_v61 }
 0x13b   : > { %15590 = vst [vmem:[#allocation34_spill] sm:$0xff] %v9342_v25 }
 0x13c   : > { %15591 = vst [vmem:[#allocation35_spill] sm:$0xff] %v9344_v30  ;;  %1834 = vmatpush.bf16.msrb.mxu2 %v7059_v18 }
 0x13d   : > { %15601 = vst [vmem:[#allocation45_spill] sm:$0xff] %v9372_v26 }
 0x13e   : > { %v9348_v41 = vpop.f32.mrf.mxu2 }
 0x13f   : > { %15592 = vst [vmem:[#allocation36_spill] sm:$0xff] %v9348_v41  ;;  %v8016_v41 = vld [vmem:[%s9051_s26 + $0x224] sm:$0xf0] }
 0x140   : > { %v9352_v46 = vpop.f32.mrf.mxu3  ;;  %v1318_v50 = vpop.f32.mrf.mxu0 }
 0x141   : > { %15594 = vst [vmem:[#allocation38_spill] sm:$0xff] %v9352_v46 }
 0x142   : > { %v1407_v62 = vpop.f32.mrf.mxu1 }
 0x143   : > { %1357 = vmatmul.bf16.gmra.mxu0 %v9350_v42  ;;  %1535 = vmatmul.bf16.gmra.mxu2 %v9350_v42  ;;  %v9362_v0 = vadd.f32 %v1407_v62, %v1318_v50 }
 0x145   : > { %1446 = vmatmul.bf16.gmra.mxu1 %v9354_v52  ;;  %1624 = vmatmul.bf16.gmra.mxu3 %v9354_v52  ;;  %15596 = vst [vmem:[#allocation40_spill] sm:$0xff] %v9362_v0  ;;  %v7952_v0 = vld [vmem:[%s9051_s26 + $0x24] sm:$0xf0] }
 0x146   : > { %v1496_v5 = vpop.f32.mrf.mxu2 }
 0x148   : > { %v1585_v7 = vpop.f32.mrf.mxu3  ;;  %v9364_v8 = vpop.f32.mrf.mxu0 }
 0x149   : > { %15597 = vst [vmem:[#allocation41_spill] sm:$0xff] %v9364_v8  ;;  %v9368_v17 = vadd.f32 %v1585_v7, %v1496_v5 }
 0x14a   : > { %v9366_v15 = vpop.f32.mrf.mxu1 }
 0x14b   : > { %15598 = vst [vmem:[#allocation42_spill] sm:$0xff] %v9366_v15 }
 0x14c   : > { %15599 = vst [vmem:[#allocation43_spill] sm:$0xff] %v9368_v17  ;;  %v7941_v17 = vld [vmem:[#allocation2 + $0xd4] sm:$0xf] }
 0x14e   : > { %v9370_v24 = vpop.f32.mrf.mxu2 }
 0x14f   : > { %15600 = vst [vmem:[#allocation44_spill] sm:$0xff] %v9370_v24  ;;  %v8024_v24 = vld [vmem:[%s9051_s26 + $0x264] sm:$0xf0] }
 0x150   : > { %v9374_v29 = vpop.f32.mrf.mxu3  ;;  %v1323_v31 = vpop.f32.mrf.mxu0 }
 0x151   : > { %15602 = vst [vmem:[#allocation46_spill] sm:$0xff] %v9374_v29  ;;  %v7960_v29 = vld [vmem:[%s9051_s26 + $0x64] sm:$0xf0] }
 0x152   : > { %v1412_v36 = vpop.f32.mrf.mxu1 }
 0x153   : > { %1362 = vmatmul.bf16.gmra.mxu0 %v9372_v26  ;;  %1540 = vmatmul.bf16.gmra.mxu2 %v9372_v26  ;;  %v9386_v50 = vadd.f32 %v1412_v36, %v1323_v31  ;;  %v7315_v31 = vor.u32 %v8020_v22, %v7312_v23  ;;  %v6990_v36 = vld [vmem:[#allocation2 + $0xd0] sm:$0xf] }
 0x155   : > { %1451 = vmatmul.bf16.gmra.mxu1 %v9376_v35  ;;  %1629 = vmatmul.bf16.gmra.mxu3 %v9376_v35  ;;  %15606 = vst [vmem:[#allocation50_spill] sm:$0xff] %v9386_v50  ;;  %v7942_v50 = vld [vmem:[#allocation2 + $0xd4] sm:$0xf0] }
 0x156   : > { %v1501_v38 = vpop.f32.mrf.mxu2  ;;  %1923 = vmatpush.bf16.msrb.mxu3 %v7315_v31  ;;  %v9406_v18 = vor.u32 %v7942_v50, %v6990_v36 }
 0x158   : > { %v1590_v39 = vpop.f32.mrf.mxu3  ;;  %v9382_v40 = vpop.f32.mrf.mxu0  ;;  %15612 = vst [vmem:[#allocation56_spill] sm:$0xff] %v9406_v18 }
 0x159   : > { %15604 = vst [vmem:[#allocation48_spill] sm:$0xff] %v9382_v40  ;;  %v9390_v62 = vadd.f32 %v1590_v39, %v1501_v38  ;;  %v7054_v40 = vld [vmem:[%s9051_s26 + $0x48] sm:$0xf]  ;;  %v6992_v38 = vld [vmem:[#allocation2 + $0xd8] sm:$0xf0] }
 0x15a   : > { %v9384_v45 = vpop.f32.mrf.mxu1  ;;  %v7055_v39 = vor.u32 %v7960_v29, %v7054_v40  ;;  %v9408_v15 = vor.u32 %v7941_v17, %v6992_v38  ;;  %v6998_v17 = vld [vmem:[#allocation2 + $0xe0] sm:$0xf] }
 0x15b   : > { %15605 = vst [vmem:[#allocation49_spill] sm:$0xff] %v9384_v45  ;;  %v7310_v45 = vld [vmem:[%s9051_s26 + $0x248] sm:$0xf] }
 0x15c   : > { %15607 = vst [vmem:[#allocation51_spill] sm:$0xff] %v9390_v62  ;;  %1656 = vmatpush.bf16.msrb.mxu0 %v7055_v39 }
 0x15d   : > { %15613 = vst [vmem:[#allocation57_spill] sm:$0xff] %v9408_v15 }
 0x15e   : > { %v9392_v63 = vpop.f32.mrf.mxu2 }
 0x15f   : > { %15608 = vst [vmem:[#allocation52_spill] sm:$0xff] %v9392_v63  ;;  %v7311_v63 = vor.u32 %v8024_v24, %v7310_v45 }
 0x160   : > { %v9394_v5 = vpop.f32.mrf.mxu3  ;;  %v1328_v7 = vpop.f32.mrf.mxu0 }
 0x161   : > { %15609 = vst [vmem:[#allocation53_spill] sm:$0xff] %v9394_v5  ;;  %1745 = vmatpush.bf16.msrb.mxu1 %v7311_v63  ;;  %v7944_v63 = vld [vmem:[#allocation2 + $0xe4] sm:$0xf0] }
 0x162   : > { %v1417_v19 = vpop.f32.mrf.mxu1 }
 0x163   : > { %v9402_v5 = vadd.f32 %v1417_v19, %v1328_v7  ;;  %1367 = vmatmul.bf16.gmra.mxu0 %v9406_v18  ;;  %1545 = vmatmul.bf16.gmra.mxu2 %v9406_v18  ;;  %v9422_v7 = vor.u32 %v7944_v63, %v6998_v17  ;;  %v7943_v63 = vld [vmem:[#allocation2 + $0xe4] sm:$0xf] }
 0x165   : > { %15610 = vst [vmem:[#allocation54_spill] sm:$0xff] %v9402_v5  ;;  %1456 = vmatmul.bf16.gmra.mxu1 %v9408_v15  ;;  %1634 = vmatmul.bf16.gmra.mxu3 %v9408_v15 }
 0x166   : > { %v1506_v62 = vpop.f32.mrf.mxu2  ;;  %15618 = vst [vmem:[#allocation62_spill] sm:$0xff] %v9422_v7 }
 0x168   : > { %v1595_v55 = vpop.f32.mrf.mxu3  ;;  %v9404_v61 = vpop.f32.mrf.mxu0 }
 0x169   : > { %15611 = vst [vmem:[#allocation55_spill] sm:$0xff] %v9404_v61  ;;  %v9416_v24 = vadd.f32 %v1595_v55, %v1506_v62 }
 0x16a   : > { %v9410_v22 = vpop.f32.mrf.mxu1 }
 0x16b   : > { %15614 = vst [vmem:[#allocation58_spill] sm:$0xff] %v9410_v22 }
 0x16c   : > { %15615 = vst [vmem:[#allocation59_spill] sm:$0xff] %v9416_v24  ;;  %v7280_v24 = vld [vmem:[%s9051_s26 + $0x228] sm:$0xf0] }
 0x16e   : > { %v9418_v29 = vpop.f32.mrf.mxu2 }
 0x16f   : > { %15616 = vst [vmem:[#allocation60_spill] sm:$0xff] %v9418_v29  ;;  %v7948_v29 = vld [vmem:[%s9051_s26 + $0xc] sm:$0xf] }
 0x170   : > { %v9420_v40 = vpop.f32.mrf.mxu3  ;;  %v1333_v45 = vpop.f32.mrf.mxu0 }
 0x171   : > { %15617 = vst [vmem:[#allocation61_spill] sm:$0xff] %v9420_v40  ;;  %v7000_v40 = vld [vmem:[#allocation2 + $0xe8] sm:$0xf0] }
 0x172   : > { %v1422_v50 = vpop.f32.mrf.mxu1  ;;  %v9440_v61 = vor.u32 %v7943_v63, %v7000_v40 }
 0x173   : > { %1372 = vmatmul.bf16.gmra.mxu0 %v9422_v7  ;;  %1550 = vmatmul.bf16.gmra.mxu2 %v9422_v7  ;;  %v9434_v17 = vadd.f32 %v1422_v50, %v1333_v45 }
 0x174   : > { %15624 = vst [vmem:[#allocation68_spill] sm:$0xff] %v9440_v61 }
 0x175   : > { %15623 = vst [vmem:[#allocation67_spill] sm:$0xff] %v9434_v17  ;;  %1461 = vmatmul.bf16.gmra.mxu1 %v9440_v61  ;;  %1639 = vmatmul.bf16.gmra.mxu3 %v9440_v61  ;;  %v7278_v17 = vld [vmem:[%s9051_s26 + $0x208] sm:$0xf] }
 0x176   : > { %v1511_v19 = vpop.f32.mrf.mxu2 }
 0x178   : > { %v1600_v23 = vpop.f32.mrf.mxu3  ;;  %v9424_v31 = vpop.f32.mrf.mxu0 }
 0x179   : > { %15619 = vst [vmem:[#allocation63_spill] sm:$0xff] %v9424_v31  ;;  %v7024_v31 = vld [vmem:[%s9051_s26 + $0x28] sm:$0xf0]  ;;  %v9442_v8 = vadd.f32 %v1600_v23, %v1511_v19  ;;  %v7006_v19 = vld [vmem:[#allocation2 + $0xf0] sm:$0xf] }
 0x17a   : > { %v9426_v62 = vpop.f32.mrf.mxu1  ;;  %v7946_v23 = vld [vmem:[#allocation2 + $0xf4] sm:$0xf0] }
 0x17b   : > { %15620 = vst [vmem:[#allocation64_spill] sm:$0xff] %v9426_v62  ;;  %v8012_v62 = vld [vmem:[%s9051_s26 + $0x20c] sm:$0xf] }
 0x17c   : > { %v7283_v5 = vor.u32 %v8012_v62, %v7280_v24  ;;  %15625 = vst [vmem:[#allocation69_spill] sm:$0xff] %v9442_v8  ;;  %v7279_v24 = vor.u32 %v8016_v41, %v7278_v17 }
 0x17e   : > { %v9430_v36 = vpop.f32.mrf.mxu2  ;;  %1924 = vmatpush.bf16.msrb.mxu3 %v7283_v5  ;;  %1746 = vmatpush.bf16.msrb.mxu1 %v7279_v24  ;;  %v7008_v5 = vld [vmem:[#allocation2 + $0xf8] sm:$0xf0] }
 0x17f   : > { %15621 = vst [vmem:[#allocation65_spill] sm:$0xff] %v9430_v36  ;;  %v7027_v36 = vor.u32 %v7948_v29, %v7024_v31 }
 0x180   : > { %v9432_v38 = vpop.f32.mrf.mxu3  ;;  %v1338_v39 = vpop.f32.mrf.mxu0 }
 0x181   : > { %15622 = vst [vmem:[#allocation66_spill] sm:$0xff] %v9432_v38  ;;  %v7022_v38 = vld [vmem:[%s9051_s26 + $0x8] sm:$0xf]  ;;  %1835 = vmatpush.bf16.msrb.mxu2 %v7027_v36 }
 0x182   : > { %v1427_v55 = vpop.f32.mrf.mxu1  ;;  %v7023_v40 = vor.u32 %v7952_v0, %v7022_v38  ;;  %v7945_v0 = vld [vmem:[#allocation2 + $0xf4] sm:$0xf] }
 0x183   : > { %v9454_v29 = vadd.f32 %v1427_v55, %v1338_v39  ;;  %v9464_v36 = vor.u32 %v7945_v0, %v7008_v5 }
 0x184   : > { %1657 = vmatpush.bf16.msrb.mxu0 %v7023_v40 }
 0x185   : > { %15628 = vst [vmem:[#allocation72_spill] sm:$0xff] %v9454_v29  ;;  %1466 = vmatmul.bf16.gmra.mxu1 %v9464_v36  ;;  %1644 = vmatmul.bf16.gmra.mxu3 %v9464_v36  ;;  %v8009_v29 = vld [vmem:[%s9051_s26 + $0x1ec] sm:$0xf0] }
 0x186   : > { %v1516_v22 = vpop.f32.mrf.mxu2  ;;  %15632 = vst [vmem:[#allocation76_spill] sm:$0xff] %v9464_v36 }
 0x188   : > { %v1605_v46 = vpop.f32.mrf.mxu3  ;;  %v9446_v45 = vpop.f32.mrf.mxu0 }
 0x189   : > { %15626 = vst [vmem:[#allocation70_spill] sm:$0xff] %v9446_v45  ;;  %v9460_v45 = vor.u32 %v7946_v23, %v7006_v19  ;;  %v9466_v38 = vadd.f32 %v1605_v46, %v1516_v22 }
 0x18a   : > { %v9448_v50 = vpop.f32.mrf.mxu1 }
 0x18b   : > { %15627 = vst [vmem:[#allocation71_spill] sm:$0xff] %v9448_v50  ;;  %1377 = vmatmul.bf16.gmra.mxu0 %v9460_v45  ;;  %1555 = vmatmul.bf16.gmra.mxu2 %v9460_v45 }
 0x18c   : > { %15631 = vst [vmem:[#allocation75_spill] sm:$0xff] %v9460_v45 }
 0x18d   : > { %15633 = vst [vmem:[#allocation77_spill] sm:$0xff] %v9466_v38  ;;  %v7254_v38 = vld [vmem:[%s9051_s26 + $0x1d0] sm:$0xf] }
 0x18e   : > { %v9456_v31 = vpop.f32.mrf.mxu2 }
 0x18f   : > { %15629 = vst [vmem:[#allocation73_spill] sm:$0xff] %v9456_v31 }
 0x190   : > { %v9458_v62 = vpop.f32.mrf.mxu3  ;;  %v1343_v63 = vpop.f32.mrf.mxu0 }
 0x191   : > { %15630 = vst [vmem:[#allocation74_spill] sm:$0xff] %v9458_v62  ;;  %v7512_v62 = vld [vmem:[%s9051_s26 + $0x3f0] sm:$0xf0] }
 0x192   : > { %v1432_v50 = vpop.f32.mrf.mxu1 }
 0x193   : > { %v9480_v23 = vadd.f32 %v1432_v50, %v1343_v63 }
 0x195   : > { %15638 = vst [vmem:[#allocation82_spill] sm:$0xff] %v9480_v23  ;;  %1747 = vmatmul.bf16.vlgmr.msrb.gmra.mxu1 %v9198_v48  ;;  %1925 = vmatmul.bf16.vlgmr.msrb.gmra.mxu3 %v9198_v48 }
 0x196   : > { %v1521_v41 = vpop.f32.mrf.mxu2 }
 0x198   : > { %v1610_v39 = vpop.f32.mrf.mxu3  ;;  %v9468_v55 = vpop.f32.mrf.mxu0 }
 0x199   : > { %15634 = vst [vmem:[#allocation78_spill] sm:$0xff] %v9468_v55  ;;  %v9482_v0 = vadd.f32 %v1610_v39, %v1521_v41  ;;  %v8069_v55 = vld [vmem:[%s9051_s26 + $0x3d4] sm:$0xf]  ;;  %v7510_v41 = vld [vmem:[%s9051_s26 + $0x3d0] sm:$0xf] }
 0x19a   : > { %v9470_v17 = vpop.f32.mrf.mxu1  ;;  %v7515_v63 = vor.u32 %v8069_v55, %v7512_v62  ;;  %v8073_v39 = vld [vmem:[%s9051_s26 + $0x3ec] sm:$0xf0] }
 0x19b   : > { %15635 = vst [vmem:[#allocation79_spill] sm:$0xff] %v9470_v17  ;;  %1658 = vmatmul.bf16.vlgmr.msrb.gmra.mxu0 %v9194_v44  ;;  %1836 = vmatmul.bf16.vlgmr.msrb.gmra.mxu2 %v9194_v44  ;;  %v7256_v17 = vld [vmem:[%s9051_s26 + $0x1f0] sm:$0xf0]  ;;  %v7511_v8 = vor.u32 %v8073_v39, %v7510_v41 }
 0x19c   : > { %15639 = vst [vmem:[#allocation83_spill] sm:$0xff] %v9482_v0  ;;  %2273 = vmatpush.bf16.msra.mxu3 %v7515_v63  ;;  %v7997_v63 = vld [vmem:[%s9051_s26 + $0x194] sm:$0xf] }
 0x19d   : > { %2095 = vmatpush.bf16.msra.mxu1 %v7511_v8  ;;  %v7224_v41 = vld [vmem:[%s9051_s26 + $0x1b0] sm:$0xf0] }
 0x19e   : > { %v9474_v40 = vpop.f32.mrf.mxu2  ;;  %v7227_v39 = vor.u32 %v7997_v63, %v7224_v41 }
 0x19f   : > { %15636 = vst [vmem:[#allocation80_spill] sm:$0xff] %v9474_v40  ;;  %v8005_v40 = vld [vmem:[%s9051_s26 + $0x1d4] sm:$0xf] }
 0x1a0   : > { %v9476_v24 = vpop.f32.mrf.mxu3  ;;  %v1348_v19 = vpop.f32.mrf.mxu0  ;;  %v7259_v31 = vor.u32 %v8005_v40, %v7256_v17 }
 0x1a1   : > { %15637 = vst [vmem:[#allocation81_spill] sm:$0xff] %v9476_v24 }
 0x1a2   : > { %v1437_v46 = vpop.f32.mrf.mxu1  ;;  %2184 = vmatpush.bf16.msra.mxu2 %v7259_v31 }
 0x1a3   : > { %v9502_v25 = vadd.f32 %v1437_v46, %v1348_v19 }
 0x1a5   : > { %15644 = vst [vmem:[#allocation88_spill] sm:$0xff] %v9502_v25  ;;  %1752 = vmatmul.bf16.gmra.mxu1 %v9214_v4  ;;  %1930 = vmatmul.bf16.gmra.mxu3 %v9214_v4 }
 0x1a6   : > { %v1526_v22 = vpop.f32.mrf.mxu2  ;;  %2185 = vmatpush.bf16.msra.mxu2 %v7227_v39  ;;  %v7989_v39 = vld [vmem:[%s9051_s26 + $0x154] sm:$0xf] }
 0x1a8   : > { %v9484_v5 = vpop.f32.mrf.mxu0  ;;  %v1615_v24 = vpop.f32.mrf.mxu3 }
 0x1a9   : > { %15640 = vst [vmem:[#allocation84_spill] sm:$0xff] %v9484_v5  ;;  %v7255_v5 = vor.u32 %v8009_v29, %v7254_v38  ;;  %v9506_v31 = vadd.f32 %v1615_v24, %v1526_v22 }
 0x1aa   : > { %v9494_v50 = vpop.f32.mrf.mxu1 }
 0x1ab   : > { %15641 = vst [vmem:[#allocation85_spill] sm:$0xff] %v9494_v50  ;;  %2006 = vmatpush.bf16.msra.mxu0 %v7255_v5  ;;  %1841 = vmatmul.bf16.gmra.mxu2 %v9212_v3 }
 0x1ac   : > { %1663 = vmatmul.bf16.gmra.mxu0 %v9212_v3  ;;  %15645 = vst [vmem:[#allocation89_spill] sm:$0xff] %v9506_v31 }
 0x1ae   : > { %v9498_v0 = vpop.f32.mrf.mxu2 }
 0x1af   : > { %15642 = vst [vmem:[#allocation86_spill] sm:$0xff] %v9498_v0 }
 0x1b0   : > { %v1353_v23 = vpop.f32.mrf.mxu0  ;;  %v9500_v30 = vpop.f32.mrf.mxu3 }
 0x1b1   : > { %15643 = vst [vmem:[#allocation87_spill] sm:$0xff] %v9500_v30  ;;  %v8065_v30 = vld [vmem:[%s9051_s26 + $0x3ac] sm:$0xf0] }
 0x1b2   : > { %v1442_v62 = vpop.f32.mrf.mxu1 }
 0x1b3   : > { %v9518_v24 = vadd.f32 %v1442_v62, %v1353_v23  ;;  %v7222_v62 = vld [vmem:[%s9051_s26 + $0x190] sm:$0xf] }
 0x1b5   : > { %15649 = vst [vmem:[#allocation93_spill] sm:$0xff] %v9518_v24  ;;  %1757 = vmatmul.bf16.gmra.mxu1 %v9222_v10  ;;  %1935 = vmatmul.bf16.gmra.mxu3 %v9222_v10  ;;  %v7478_v24 = vld [vmem:[%s9051_s26 + $0x390] sm:$0xf] }
 0x1b6   : > { %v1531_v55 = vpop.f32.mrf.mxu2  ;;  %v7479_v31 = vor.u32 %v8065_v30, %v7478_v24 }
 0x1b8   : > { %v9508_v17 = vpop.f32.mrf.mxu0  ;;  %v1620_v8 = vpop.f32.mrf.mxu3  ;;  %2096 = vmatpush.bf16.msra.mxu1 %v7479_v31 }
 0x1b9   : > { %15646 = vst [vmem:[#allocation90_spill] sm:$0xff] %v9508_v17  ;;  %v9530_v17 = vadd.f32 %v1620_v8, %v1531_v55 }
 0x1ba   : > { %v9514_v38 = vpop.f32.mrf.mxu1 }
 0x1bb   : > { %15648 = vst [vmem:[#allocation92_spill] sm:$0xff] %v9514_v38  ;;  %1846 = vmatmul.bf16.gmra.mxu2 %v9220_v9  ;;  %v7480_v38 = vld [vmem:[%s9051_s26 + $0x3b0] sm:$0xf0] }
 0x1bc   : > { %1668 = vmatmul.bf16.gmra.mxu0 %v9220_v9  ;;  %15652 = vst [vmem:[#allocation96_spill] sm:$0xff] %v9530_v17 }
 0x1be   : > { %v9512_v29 = vpop.f32.mrf.mxu2 }
 0x1bf   : > { %15647 = vst [vmem:[#allocation91_spill] sm:$0xff] %v9512_v29  ;;  %v8061_v29 = vld [vmem:[%s9051_s26 + $0x394] sm:$0xf] }
 0x1c0   : > { %v1358_v40 = vpop.f32.mrf.mxu0  ;;  %v9520_v19 = vpop.f32.mrf.mxu3  ;;  %v7483_v0 = vor.u32 %v8061_v29, %v7480_v38 }
 0x1c1   : > { %15650 = vst [vmem:[#allocation94_spill] sm:$0xff] %v9520_v19  ;;  %v8001_v19 = vld [vmem:[%s9051_s26 + $0x1ac] sm:$0xf0] }
 0x1c2   : > { %v1447_v22 = vpop.f32.mrf.mxu1  ;;  %2274 = vmatpush.bf16.msra.mxu3 %v7483_v0 }
 0x1c3   : > { %v9540_v55 = vadd.f32 %v1447_v22, %v1358_v40 }
 0x1c5   : > { %15654 = vst [vmem:[#allocation98_spill] sm:$0xff] %v9540_v55  ;;  %1762 = vmatmul.bf16.gmra.mxu1 %v9238_v28  ;;  %1940 = vmatmul.bf16.gmra.mxu3 %v9238_v28 }
 0x1c6   : > { %v1536_v46 = vpop.f32.mrf.mxu2 }
 0x1c8   : > { %v9524_v5 = vpop.f32.mrf.mxu0  ;;  %v1625_v23 = vpop.f32.mrf.mxu3 }
 0x1c9   : > { %15651 = vst [vmem:[#allocation95_spill] sm:$0xff] %v9524_v5  ;;  %v7223_v5 = vor.u32 %v8001_v19, %v7222_v62  ;;  %v9546_v30 = vadd.f32 %v1625_v23, %v1536_v46  ;;  %v7192_v23 = vld [vmem:[%s9051_s26 + $0x170] sm:$0xf0] }
 0x1ca   : > { %v9538_v25 = vpop.f32.mrf.mxu1  ;;  %v7448_v62 = vld [vmem:[%s9051_s26 + $0x370] sm:$0xf0] }
 0x1cb   : > { %1851 = vmatmul.bf16.gmra.mxu2 %v9236_v27  ;;  %15653 = vst [vmem:[#allocation97_spill] sm:$0xff] %v9538_v25  ;;  %2007 = vmatpush.bf16.msra.mxu0 %v7223_v5  ;;  %v7446_v25 = vld [vmem:[%s9051_s26 + $0x350] sm:$0xf] }
 0x1cc   : > { %1673 = vmatmul.bf16.gmra.mxu0 %v9236_v27  ;;  %15656 = vst [vmem:[#allocation100_spill] sm:$0xff] %v9546_v30  ;;  %v8057_v30 = vld [vmem:[%s9051_s26 + $0x36c] sm:$0xf0] }
 0x1cd   : > { %v7447_v17 = vor.u32 %v8057_v30, %v7446_v25 }
 0x1ce   : > { %v1538_v50 = vpop.f32.mrf.mxu2 }
 0x1cf   : > { %2097 = vmatpush.bf16.msra.mxu1 %v7447_v17 }
 0x1d0   : > { %v1363_v63 = vpop.f32.mrf.mxu0  ;;  %v1627_v8 = vpop.f32.mrf.mxu3 }
 0x1d1   : > { %v9550_v31 = vadd.f32 %v1627_v8, %v1538_v50  ;;  %v8053_v50 = vld [vmem:[%s9051_s26 + $0x354] sm:$0xf] }
 0x1d2   : > { %v1452_v38 = vpop.f32.mrf.mxu1 }
 0x1d3   : > { %15657 = vst [vmem:[#allocation101_spill] sm:$0xff] %v9550_v31  ;;  %v9552_v40 = vadd.f32 %v1452_v38, %v1363_v63  ;;  %v7195_v38 = vor.u32 %v7989_v39, %v7192_v23 }
 0x1d5   : > { %15658 = vst [vmem:[#allocation102_spill] sm:$0xff] %v9552_v40  ;;  %1767 = vmatmul.bf16.gmra.mxu1 %v9246_v34  ;;  %1945 = vmatmul.bf16.gmra.mxu3 %v9246_v34  ;;  %v7451_v40 = vor.u32 %v8053_v50, %v7448_v62 }
 0x1d6   : > { %v1541_v29 = vpop.f32.mrf.mxu2  ;;  %2186 = vmatpush.bf16.msra.mxu2 %v7195_v38 }
 0x1d7   : > { %2275 = vmatpush.bf16.msra.mxu3 %v7451_v40 }
 0x1d8   : > { %v9544_v41 = vpop.f32.mrf.mxu0  ;;  %v1630_v0 = vpop.f32.mrf.mxu3 }
 0x1d9   : > { %15655 = vst [vmem:[#allocation99_spill] sm:$0xff] %v9544_v41  ;;  %v7993_v41 = vld [vmem:[%s9051_s26 + $0x16c] sm:$0xf0]  ;;  %v9566_v31 = vadd.f32 %v1630_v0, %v1541_v29 }
 0x1da   : > { %v9554_v19 = vpop.f32.mrf.mxu1 }
 0x1db   : > { %1856 = vmatmul.bf16.gmra.mxu2 %v9244_v33  ;;  %15659 = vst [vmem:[#allocation103_spill] sm:$0xff] %v9554_v19  ;;  %v7190_v19 = vld [vmem:[%s9051_s26 + $0x150] sm:$0xf] }
 0x1dc   : > { %1678 = vmatmul.bf16.gmra.mxu0 %v9244_v33  ;;  %15660 = vst [vmem:[#allocation104_spill] sm:$0xff] %v9566_v31  ;;  %v7191_v55 = vor.u32 %v7993_v41, %v7190_v19  ;;  %v7985_v31 = vld [vmem:[%s9051_s26 + $0x12c] sm:$0xf0] }
 0x1de   : > { %v1543_v24 = vpop.f32.mrf.mxu2  ;;  %2008 = vmatpush.bf16.msra.mxu0 %v7191_v55 }
 0x1e0   : > { %v1368_v46 = vpop.f32.mrf.mxu0  ;;  %v1632_v22 = vpop.f32.mrf.mxu3 }
 0x1e1   : > { %v9570_v34 = vadd.f32 %v1632_v22, %v1543_v24 }
 0x1e2   : > { %v1457_v63 = vpop.f32.mrf.mxu1 }
 0x1e3   : > { %15661 = vst [vmem:[#allocation105_spill] sm:$0xff] %v9570_v34  ;;  %v9572_v23 = vadd.f32 %v1457_v63, %v1368_v46  ;;  %v7981_v63 = vld [vmem:[%s9051_s26 + $0x114] sm:$0xf]  ;;  %v7158_v34 = vld [vmem:[%s9051_s26 + $0x110] sm:$0xf] }
 0x1e5   : > { %15662 = vst [vmem:[#allocation106_spill] sm:$0xff] %v9572_v23  ;;  %1772 = vmatmul.bf16.gmra.mxu1 %v9262_v54  ;;  %1950 = vmatmul.bf16.gmra.mxu3 %v9262_v54 }
 0x1e6   : > { %v1546_v5 = vpop.f32.mrf.mxu2 }
 0x1e8   : > { %v1370_v8 = vpop.f32.mrf.mxu0  ;;  %v1635_v39 = vpop.f32.mrf.mxu3 }
 0x1e9   : > { %v9576_v0 = vadd.f32 %v1635_v39, %v1546_v5  ;;  %v8045_v39 = vld [vmem:[%s9051_s26 + $0x314] sm:$0xf] }
 0x1ea   : > { %v1459_v50 = vpop.f32.mrf.mxu1 }
 0x1eb   : > { %1861 = vmatmul.bf16.gmra.mxu2 %v9260_v53  ;;  %15663 = vst [vmem:[#allocation107_spill] sm:$0xff] %v9576_v0  ;;  %v9580_v41 = vadd.f32 %v1459_v50, %v1370_v8  ;;  %v7160_v8 = vld [vmem:[%s9051_s26 + $0x130] sm:$0xf0] }
 0x1ec   : > { %1683 = vmatmul.bf16.gmra.mxu0 %v9260_v53 }
 0x1ed   : > { %15664 = vst [vmem:[#allocation108_spill] sm:$0xff] %v9580_v41 }
 0x1ee   : > { %v1548_v38 = vpop.f32.mrf.mxu2 }
 0x1f0   : > { %v1373_v29 = vpop.f32.mrf.mxu0  ;;  %v1637_v62 = vpop.f32.mrf.mxu3 }
 0x1f1   : > { %v9582_v30 = vadd.f32 %v1637_v62, %v1548_v38  ;;  %v7416_v38 = vld [vmem:[%s9051_s26 + $0x330] sm:$0xf0]  ;;  %v7163_v62 = vor.u32 %v7981_v63, %v7160_v8  ;;  %v7414_v63 = vld [vmem:[%s9051_s26 + $0x310] sm:$0xf] }
 0x1f2   : > { %v1462_v17 = vpop.f32.mrf.mxu1  ;;  %v8049_v8 = vld [vmem:[%s9051_s26 + $0x32c] sm:$0xf0] }
 0x1f3   : > { %15665 = vst [vmem:[#allocation109_spill] sm:$0xff] %v9582_v30  ;;  %v9584_v40 = vadd.f32 %v1462_v17, %v1373_v29  ;;  %v7419_v17 = vor.u32 %v8045_v39, %v7416_v38  ;;  %2187 = vmatpush.bf16.msra.mxu2 %v7163_v62 }
 0x1f5   : > { %15666 = vst [vmem:[#allocation110_spill] sm:$0xff] %v9584_v40  ;;  %1777 = vmatmul.bf16.gmra.mxu1 %v9270_v60  ;;  %1955 = vmatmul.bf16.gmra.mxu3 %v9270_v60  ;;  %v7159_v60 = vor.u32 %v7985_v31, %v7158_v34 }
 0x1f6   : > { %v1551_v25 = vpop.f32.mrf.mxu2  ;;  %2276 = vmatpush.bf16.msra.mxu3 %v7419_v17  ;;  %v7415_v17 = vor.u32 %v8049_v8, %v7414_v63 }
 0x1f7   : > { %2009 = vmatpush.bf16.msra.mxu0 %v7159_v60 }
 0x1f8   : > { %v1375_v55 = vpop.f32.mrf.mxu0  ;;  %v1640_v24 = vpop.f32.mrf.mxu3  ;;  %2098 = vmatpush.bf16.msra.mxu1 %v7415_v17 }
 0x1f9   : > { %v9596_v41 = vadd.f32 %v1640_v24, %v1551_v25 }
 0x1fa   : > { %v1464_v46 = vpop.f32.mrf.mxu1 }
 0x1fb   : > { %1866 = vmatmul.bf16.gmra.mxu2 %v9268_v59  ;;  %15667 = vst [vmem:[#allocation111_spill] sm:$0xff] %v9596_v41 }
 0x1fc   : > { %1688 = vmatmul.bf16.gmra.mxu0 %v9268_v59  ;;  %v8074_v59 = vld [vmem:[%s9051_s26 + $0x3f4] sm:$0xf0] }
 0x1fe   : > { %v1553_v19 = vpop.f32.mrf.mxu2 }
 0x200   : > { %v1642_v5 = vpop.f32.mrf.mxu3 }
 0x201   : > { %v9606_v25 = vadd.f32 %v1642_v5, %v1553_v19 }
 0x202   : > { %v1467_v50 = vpop.f32.mrf.mxu1 }
 0x203   : > { %15669 = vst [vmem:[#allocation113_spill] sm:$0xff] %v9606_v25 }
 0x205   : > { %1782 = vmatmul.bf16.gmra.mxu1 %v9278_v2  ;;  %1960 = vmatmul.bf16.gmra.mxu3 %v9278_v2  ;;  %v9604_v2 = vadd.f32 %v1464_v46, %v1375_v55 }
 0x207   : > { %15668 = vst [vmem:[#allocation112_spill] sm:$0xff] %v9604_v2 }
 0x208   : > { %v1378_v22 = vpop.f32.mrf.mxu0  ;;  %v1645_v30 = vpop.f32.mrf.mxu3 }
 0x209   : > { %v9608_v24 = vadd.f32 %v1467_v50, %v1378_v22  ;;  %v7973_v50 = vld [vmem:[%s9051_s26 + $0xd4] sm:$0xf] }
 0x20a   : > { %v1469_v0 = vpop.f32.mrf.mxu1 }
 0x20b   : > { %1871 = vmatmul.bf16.gmra.mxu2 %v9276_v1  ;;  %15670 = vst [vmem:[#allocation114_spill] sm:$0xff] %v9608_v24 }
 0x20c   : > { %1693 = vmatmul.bf16.gmra.mxu0 %v9276_v1 }
 0x20e   : > { %v1556_v29 = vpop.f32.mrf.mxu2 }
 0x20f   : > { %v9611_v34 = vadd.f32 %v1645_v30, %v1556_v29  ;;  %v7128_v29 = vld [vmem:[%s9051_s26 + $0xf0] sm:$0xf0] }
 0x210   : > { %v1380_v40 = vpop.f32.mrf.mxu0  ;;  %v1647_v39 = vpop.f32.mrf.mxu3 }
 0x211   : > { %15671 = vst [vmem:[#allocation115_spill] sm:$0xff] %v9611_v34  ;;  %v9613_v31 = vadd.f32 %v1469_v0, %v1380_v40 }
 0x212   : > { %v1748_v38 = vpop.f32.mrf.mxu1 }
 0x213   : > { %15672 = vst [vmem:[#allocation116_spill] sm:$0xff] %v9613_v31  ;;  %v8041_v31 = vld [vmem:[%s9051_s26 + $0x2ec] sm:$0xf0] }
 0x215   : > { %1965 = vmatmul.bf16.gmra.mxu3 %v9286_v13  ;;  %1787 = vmatmul.bf16.gmra.mxu1 %v9286_v13  ;;  %v7262_v13 = vld [vmem:[%s9051_s26 + $0x1d8] sm:$0xf] }
 0x216   : > { %v1558_v23 = vpop.f32.mrf.mxu2 }
 0x217   : > { %v9616_v60 = vadd.f32 %v1647_v39, %v1558_v23  ;;  %v8037_v39 = vld [vmem:[%s9051_s26 + $0x2d4] sm:$0xf] }
 0x218   : > { %v1659_v1 = vpop.f32.mrf.mxu0 }
 0x219   : > { %15673 = vst [vmem:[#allocation117_spill] sm:$0xff] %v9616_v60  ;;  %v9618_v63 = vadd.f32 %v1748_v38, %v1659_v1  ;;  %v7384_v38 = vld [vmem:[%s9051_s26 + $0x2f0] sm:$0xf0]  ;;  %v7382_v60 = vld [vmem:[%s9051_s26 + $0x2d0] sm:$0xf] }
 0x21a   : > { %v1750_v55 = vpop.f32.mrf.mxu1  ;;  %v7383_v24 = vor.u32 %v8041_v31, %v7382_v60 }
 0x21b   : > { %1876 = vmatmul.bf16.gmra.mxu2 %v9284_v11  ;;  %15674 = vst [vmem:[#allocation118_spill] sm:$0xff] %v9618_v63  ;;  %v7977_v63 = vld [vmem:[%s9051_s26 + $0xec] sm:$0xf0] }
 0x21c   : > { %1698 = vmatmul.bf16.gmra.mxu0 %v9284_v11  ;;  %v1926_v11 = vpop.f32.mrf.mxu3  ;;  %2099 = vmatpush.bf16.msra.mxu1 %v7383_v24 }
 0x21e   : > { %v1837_v62 = vpop.f32.mrf.mxu2 }
 0x21f   : > { %v9620_v46 = vadd.f32 %v1926_v11, %v1837_v62 }
 0x220   : > { %v1661_v41 = vpop.f32.mrf.mxu0 }
 0x221   : > { %15675 = vst [vmem:[#allocation119_spill] sm:$0xff] %v9620_v46  ;;  %v9622_v22 = vadd.f32 %v1750_v55, %v1661_v41  ;;  %v7131_v55 = vor.u32 %v7973_v50, %v7128_v29  ;;  %v7126_v46 = vld [vmem:[%s9051_s26 + $0xd0] sm:$0xf] }
 0x222   : > { %v1753_v0 = vpop.f32.mrf.mxu1  ;;  %v7127_v34 = vor.u32 %v7977_v63, %v7126_v46 }
 0x223   : > { %15676 = vst [vmem:[#allocation120_spill] sm:$0xff] %v9622_v22  ;;  %v7387_v22 = vor.u32 %v8037_v39, %v7384_v38  ;;  %2188 = vmatpush.bf16.msra.mxu2 %v7131_v55 }
 0x224   : > { %v1928_v23 = vpop.f32.mrf.mxu3  ;;  %2010 = vmatpush.bf16.msra.mxu0 %v7127_v34 }
 0x225   : > { %1970 = vmatmul.bf16.gmra.mxu3 %v9308_v47  ;;  %1792 = vmatmul.bf16.gmra.mxu1 %v9308_v47 }
 0x226   : > { %v1839_v19 = vpop.f32.mrf.mxu2  ;;  %2277 = vmatpush.bf16.msra.mxu3 %v7387_v22 }
 0x229   : > { %v1664_v5 = vpop.f32.mrf.mxu0 }
 0x22a   : > { %v1755_v41 = vpop.f32.mrf.mxu1  ;;  %v9642_v50 = vadd.f32 %v1753_v0, %v1664_v5  ;;  %v7965_v0 = vld [vmem:[%s9051_s26 + $0x94] sm:$0xf] }
 0x22b   : > { %1881 = vmatmul.bf16.gmra.mxu2 %v9306_v43 }
 0x22c   : > { %1703 = vmatmul.bf16.gmra.mxu0 %v9306_v43  ;;  %v1931_v30 = vpop.f32.mrf.mxu3  ;;  %15678 = vst [vmem:[#allocation122_spill] sm:$0xff] %v9642_v50 }
 0x22e   : > { %v1842_v1 = vpop.f32.mrf.mxu2 }
 0x22f   : > { %v9644_v29 = vadd.f32 %v1931_v30, %v1842_v1  ;;  %v7096_v1 = vld [vmem:[%s9051_s26 + $0xb0] sm:$0xf0] }
 0x230   : > { %v7352_v30 = vld [vmem:[%s9051_s26 + $0x2b0] sm:$0xf0] }
 0x231   : > { %v1666_v11 = vpop.f32.mrf.mxu0  ;;  %15679 = vst [vmem:[#allocation123_spill] sm:$0xff] %v9644_v29 }
 0x232   : > { %v1758_v17 = vpop.f32.mrf.mxu1  ;;  %v9646_v22 = vadd.f32 %v1755_v41, %v1666_v11  ;;  %v8029_v11 = vld [vmem:[%s9051_s26 + $0x294] sm:$0xf] }
 0x234   : > { %v1933_v8 = vpop.f32.mrf.mxu3  ;;  %15680 = vst [vmem:[#allocation124_spill] sm:$0xff] %v9646_v22 }
 0x235   : > { %1975 = vmatmul.bf16.gmra.mxu3 %v9326_v12  ;;  %1797 = vmatmul.bf16.gmra.mxu1 %v9326_v12 }
 0x236   : > { %v1844_v40 = vpop.f32.mrf.mxu2 }
 0x237   : > { %v9648_v55 = vadd.f32 %v1933_v8, %v1844_v40 }
 0x239   : > { %v1669_v62 = vpop.f32.mrf.mxu0  ;;  %15681 = vst [vmem:[#allocation125_spill] sm:$0xff] %v9648_v55 }
 0x23a   : > { %v1760_v38 = vpop.f32.mrf.mxu1  ;;  %v9650_v31 = vadd.f32 %v1758_v17, %v1669_v62 }
 0x23b   : > { %1886 = vmatmul.bf16.gmra.mxu2 %v9324_v6 }
 0x23c   : > { %1708 = vmatmul.bf16.gmra.mxu0 %v9324_v6  ;;  %v1936_v2 = vpop.f32.mrf.mxu3  ;;  %v9640_v6 = vadd.f32 %v1928_v23, %v1839_v19  ;;  %15682 = vst [vmem:[#allocation126_spill] sm:$0xff] %v9650_v31 }
 0x23e   : > { %v1847_v25 = vpop.f32.mrf.mxu2  ;;  %15677 = vst [vmem:[#allocation121_spill] sm:$0xff] %v9640_v6  ;;  %v7528_v6 = vmul.f32 -1.442695, %v9304_v37 }
 0x23f   : > { %v9654_v24 = vadd.f32 %v1936_v2, %v1847_v25  ;;  %v7099_v2 = vor.u32 %v7965_v0, %v7096_v1  ;;  %v7355_v25 = vor.u32 %v8029_v11, %v7352_v30  ;;  %v7350_v11 = vld [vmem:[%s9051_s26 + $0x290] sm:$0xf] }
 0x240   : > { %v8033_v30 = vld [vmem:[%s9051_s26 + $0x2ac] sm:$0xf0] }
 0x241   : > { %v1671_v39 = vpop.f32.mrf.mxu0  ;;  %15683 = vst [vmem:[#allocation127_spill] sm:$0xff] %v9654_v24  ;;  %2189 = vmatpush.bf16.msra.mxu2 %v7099_v2  ;;  %2278 = vmatpush.bf16.msra.mxu3 %v7355_v25 }
 0x242   : > { %v9656_v34 = vadd.f32 %v1760_v38, %v1671_v39  ;;  %v1763_v46 = vpop.f32.mrf.mxu1 }
 0x244   : > { %15684 = vst [vmem:[#allocation128_spill] sm:$0xff] %v9656_v34  ;;  %v1938_v63 = vpop.f32.mrf.mxu3 }
 0x245   : > { %1980 = vmatmul.bf16.gmra.mxu3 %v9354_v52  ;;  %1802 = vmatmul.bf16.gmra.mxu1 %v9354_v52 }
 0x246   : > { %v1849_v60 = vpop.f32.mrf.mxu2 }
 0x247   : > { %v9660_v5 = vadd.f32 %v1938_v63, %v1849_v60  ;;  %v7094_v63 = vld [vmem:[%s9051_s26 + $0x90] sm:$0xf] }
 0x249   : > { %v1674_v19 = vpop.f32.mrf.mxu0  ;;  %15685 = vst [vmem:[#allocation129_spill] sm:$0xff] %v9660_v5 }
 0x24a   : > { %v9662_v23 = vadd.f32 %v1763_v46, %v1674_v19  ;;  %v1765_v62 = vpop.f32.mrf.mxu1  ;;  %v7969_v19 = vld [vmem:[%s9051_s26 + $0xac] sm:$0xf0] }
 0x24b   : > { %1891 = vmatmul.bf16.gmra.mxu2 %v9350_v42  ;;  %v7095_v46 = vor.u32 %v7969_v19, %v7094_v63 }
 0x24c   : > { %1713 = vmatmul.bf16.gmra.mxu0 %v9350_v42  ;;  %15686 = vst [vmem:[#allocation130_spill] sm:$0xff] %v9662_v23  ;;  %v1941_v40 = vpop.f32.mrf.mxu3  ;;  %v7351_v23 = vor.u32 %v8033_v30, %v7350_v11 }
 0x24d   : > { %2011 = vmatpush.bf16.msra.mxu0 %v7095_v46 }
 0x24e   : > { %v1852_v41 = vpop.f32.mrf.mxu2  ;;  %2100 = vmatpush.bf16.msra.mxu1 %v7351_v23 }
 0x24f   : > { %v9682_v5 = vadd.f32 %v1941_v40, %v1852_v41 }
 0x251   : > { %v1676_v8 = vpop.f32.mrf.mxu0  ;;  %15689 = vst [vmem:[#allocation133_spill] sm:$0xff] %v9682_v5 }
 0x252   : > { %v1768_v60 = vpop.f32.mrf.mxu1  ;;  %v9684_v63 = vadd.f32 %v1765_v62, %v1676_v8  ;;  %v7957_v62 = vld [vmem:[%s9051_s26 + $0x54] sm:$0xf] }
 0x254   : > { %v1943_v39 = vpop.f32.mrf.mxu3  ;;  %15690 = vst [vmem:[#allocation134_spill] sm:$0xff] %v9684_v63 }
 0x255   : > { %1985 = vmatmul.bf16.gmra.mxu3 %v9376_v35  ;;  %1807 = vmatmul.bf16.gmra.mxu1 %v9376_v35  ;;  %v15716_v35 = vld [vmem:[#allocation34_spill] sm:$0xff] }
 0x256   : > { %v1854_v17 = vpop.f32.mrf.mxu2 }
 0x257   : > { %v9686_v19 = vadd.f32 %v1943_v39, %v1854_v17  ;;  %v7064_v17 = vld [vmem:[%s9051_s26 + $0x70] sm:$0xf0] }
 0x259   : > { %v1679_v38 = vpop.f32.mrf.mxu0  ;;  %15691 = vst [vmem:[#allocation135_spill] sm:$0xff] %v9686_v19  ;;  %v7961_v19 = vld [vmem:[%s9051_s26 + $0x6c] sm:$0xf0] }
 0x25a   : > { %v9678_v25 = vpop.f32.mrf.mxu1  ;;  %v9688_v46 = vadd.f32 %v1768_v60, %v1679_v38  ;;  %v7067_v60 = vor.u32 %v7957_v62, %v7064_v17 }
 0x25b   : > { %1896 = vmatmul.bf16.gmra.mxu2 %v9372_v26  ;;  %15688 = vst [vmem:[#allocation132_spill] sm:$0xff] %v9678_v25 }
 0x25c   : > { %1718 = vmatmul.bf16.gmra.mxu0 %v9372_v26  ;;  %v1946_v1 = vpop.f32.mrf.mxu3  ;;  %15692 = vst [vmem:[#allocation136_spill] sm:$0xff] %v9688_v46  ;;  %2190 = vmatpush.bf16.msra.mxu2 %v7067_v60  ;;  %v7062_v46 = vld [vmem:[%s9051_s26 + $0x50] sm:$0xf] }
 0x25d   : > { %v7063_v17 = vor.u32 %v7961_v19, %v7062_v46 }
 0x25e   : > { %v1857_v0 = vpop.f32.mrf.mxu2 }
 0x25f   : > { %v9696_v11 = vadd.f32 %v1946_v1, %v1857_v0  ;;  %2012 = vmatpush.bf16.msra.mxu0 %v7063_v17  ;;  %v7949_v17 = vld [vmem:[%s9051_s26 + $0x14] sm:$0xf] }
 0x261   : > { %v9676_v2 = vpop.f32.mrf.mxu0  ;;  %15695 = vst [vmem:[#allocation139_spill] sm:$0xff] %v9696_v11  ;;  %v7320_v11 = vld [vmem:[%s9051_s26 + $0x270] sm:$0xf0] }
 0x262   : > { %15687 = vst [vmem:[#allocation131_spill] sm:$0xff] %v9676_v2  ;;  %v1773_v41 = vpop.f32.mrf.mxu1 }
 0x264   : > { %v9694_v2 = vpop.f32.mrf.mxu3 }
 0x265   : > { %1990 = vmatmul.bf16.gmra.mxu3 %v9408_v15  ;;  %1812 = vmatmul.bf16.gmra.mxu1 %v9408_v15  ;;  %15694 = vst [vmem:[#allocation138_spill] sm:$0xff] %v9694_v2  ;;  %v8070_v15 = vld [vmem:[%s9051_s26 + $0x3dc] sm:$0xf] }
 0x266   : > { %v9692_v25 = vpop.f32.mrf.mxu2 }
 0x267   : > { %15693 = vst [vmem:[#allocation137_spill] sm:$0xff] %v9692_v25  ;;  %v8021_v25 = vld [vmem:[%s9051_s26 + $0x254] sm:$0xf] }
 0x268   : > { %v7323_v62 = vor.u32 %v8021_v25, %v7320_v11 }
 0x269   : > { %v1684_v23 = vpop.f32.mrf.mxu0 }
 0x26a   : > { %v9704_v38 = vpop.f32.mrf.mxu1  ;;  %2279 = vmatpush.bf16.msra.mxu3 %v7323_v62  ;;  %v9716_v34 = vadd.f32 %v1773_v41, %v1684_v23  ;;  %v7524_v62 = vmul.f32 -1.442695, %v9292_v20 }
 0x26b   : > { %1901 = vmatmul.bf16.gmra.mxu2 %v9406_v18  ;;  %15697 = vst [vmem:[#allocation141_spill] sm:$0xff] %v9704_v38  ;;  %v7318_v38 = vld [vmem:[%s9051_s26 + $0x250] sm:$0xf] }
 0x26c   : > { %1723 = vmatmul.bf16.gmra.mxu0 %v9406_v18  ;;  %v1951_v8 = vpop.f32.mrf.mxu3  ;;  %15698 = vst [vmem:[#allocation142_spill] sm:$0xff] %v9716_v34  ;;  %8225 = vpow2.f32 %v7524_v62 }
 0x26e   : > { %v1862_v40 = vpop.f32.mrf.mxu2 }
 0x26f   : > { %v9719_v55 = vadd.f32 %v1951_v8, %v1862_v40 }
 0x271   : > { %v9702_v39 = vpop.f32.mrf.mxu0  ;;  %15699 = vst [vmem:[#allocation143_spill] sm:$0xff] %v9719_v55 }
 0x272   : > { %15696 = vst [vmem:[#allocation140_spill] sm:$0xff] %v9702_v39  ;;  %v1778_v2 = vpop.f32.mrf.mxu1  ;;  %v8025_v39 = vld [vmem:[%s9051_s26 + $0x26c] sm:$0xf0] }
 0x273   : > { %v7319_v60 = vor.u32 %v8025_v39, %v7318_v38 }
 0x274   : > { %v1953_v1 = vpop.f32.mrf.mxu3 }
 0x275   : > { %1995 = vmatmul.bf16.gmra.mxu3 %v9440_v61  ;;  %1817 = vmatmul.bf16.gmra.mxu1 %v9440_v61 }
 0x276   : > { %v1864_v0 = vpop.f32.mrf.mxu2  ;;  %2101 = vmatpush.bf16.msra.mxu1 %v7319_v60  ;;  %v7032_v60 = vld [vmem:[%s9051_s26 + $0x30] sm:$0xf0] }
 0x277   : > { %v9722_v22 = vadd.f32 %v1953_v1, %v1864_v0 }
 0x279   : > { %v1689_v30 = vpop.f32.mrf.mxu0  ;;  %15700 = vst [vmem:[#allocation144_spill] sm:$0xff] %v9722_v22  ;;  %v7525_v22 = vmul.f32 -1.442695, %v9302_v32 }
 0x27a   : > { %v1780_v31 = vpop.f32.mrf.mxu1  ;;  %v9724_v25 = vadd.f32 %v1778_v2, %v1689_v30 }
 0x27b   : > { %1906 = vmatmul.bf16.gmra.mxu2 %v9422_v7  ;;  %8227 = vpow2.f32 %v7525_v22  ;;  %v7529_v22 = vmul.f32 -1.442695, %v9310_v49 }
 0x27c   : > { %1728 = vmatmul.bf16.gmra.mxu0 %v9422_v7  ;;  %v1956_v5 = vpop.f32.mrf.mxu3  ;;  %15701 = vst [vmem:[#allocation145_spill] sm:$0xff] %v9724_v25  ;;  %v8017_v25 = vld [vmem:[%s9051_s26 + $0x22c] sm:$0xf0]  ;;  %8229 = vpow2.f32 %v7528_v6  ;;  %v7532_v6 = vmul.f32 -1.442695, %v9312_v51 }
 0x27d   : > { %v7264_v7 = vld [vmem:[%s9051_s26 + $0x1f8] sm:$0xf0] }
 0x27e   : > { %v1867_v63 = vpop.f32.mrf.mxu2 }
 0x27f   : > { %v9726_v19 = vadd.f32 %v1956_v5, %v1867_v63 }
 0x281   : > { %v1691_v24 = vpop.f32.mrf.mxu0  ;;  %15702 = vst [vmem:[#allocation146_spill] sm:$0xff] %v9726_v19  ;;  %v8013_v19 = vld [vmem:[%s9051_s26 + $0x214] sm:$0xf] }
 0x282   : > { %v1783_v41 = vpop.f32.mrf.mxu1  ;;  %v9728_v39 = vadd.f32 %v1780_v31, %v1691_v24  ;;  %v7288_v31 = vld [vmem:[%s9051_s26 + $0x230] sm:$0xf0]  ;;  %v7030_v24 = vld [vmem:[%s9051_s26 + $0x10] sm:$0xf] }
 0x284   : > { %v1958_v11 = vpop.f32.mrf.mxu3  ;;  %15703 = vst [vmem:[#allocation147_spill] sm:$0xff] %v9728_v39  ;;  %v7286_v39 = vld [vmem:[%s9051_s26 + $0x210] sm:$0xf] }
 0x285   : > { %2000 = vmatmul.bf16.gmra.mxu3 %v9464_v36  ;;  %1822 = vmatmul.bf16.gmra.mxu1 %v9464_v36  ;;  %v7287_v50 = vor.u32 %v8017_v25, %v7286_v39 }
 0x286   : > { %v1869_v46 = vpop.f32.mrf.mxu2 }
 0x287   : > { %v9730_v40 = vadd.f32 %v1958_v11, %v1869_v46  ;;  %v7035_v46 = vor.u32 %v7949_v17, %v7032_v60  ;;  %v7291_v11 = vor.u32 %v8013_v19, %v7288_v31  ;;  %2102 = vmatpush.bf16.msra.mxu1 %v7287_v50  ;;  %v8226_v17 = vpop.eup %8225 }
 0x288   : > { %v9755_v25 = vadd.f32 1.0, %v8226_v17 }
 0x289   : > { %v1694_v23 = vpop.f32.mrf.mxu0  ;;  %15704 = vst [vmem:[#allocation148_spill] sm:$0xff] %v9730_v40  ;;  %v7953_v40 = vld [vmem:[%s9051_s26 + $0x2c] sm:$0xf0]  ;;  %2191 = vmatpush.bf16.msra.mxu2 %v7035_v46  ;;  %2280 = vmatpush.bf16.msra.mxu3 %v7291_v11  ;;  %v7537_v46 = vmul.f32 -1.442695, %v9328_v14 }
 0x28a   : > { %v1785_v5 = vpop.f32.mrf.mxu1  ;;  %v7031_v29 = vor.u32 %v7953_v40, %v7030_v24  ;;  %v9743_v36 = vadd.f32 %v1783_v41, %v1694_v23  ;;  %v8228_v23 = vpop.eup %8227  ;;  %8231 = vrcp.f32 %v9755_v25  ;;  %vm3235_vm1 = vweird.f32 %v9755_v25 }
 0x28b   : > { %1911 = vmatmul.bf16.gmra.mxu2 %v9460_v45  ;;  %v8230_v40 = vpop.eup %8229  ;;  %8233 = vpow2.f32 %v7529_v22 }
 0x28c   : > { %1733 = vmatmul.bf16.gmra.mxu0 %v9460_v45  ;;  %v1961_v38 = vpop.f32.mrf.mxu3  ;;  %15705 = vst [vmem:[#allocation149_spill] sm:$0xff] %v9743_v36  ;;  %8235 = vpow2.f32 %v7532_v6 }
 0x28d   : > { %2013 = vmatpush.bf16.msra.mxu0 %v7031_v29 }
 0x28e   : > { %v1872_v8 = vpop.f32.mrf.mxu2 }
 0x28f   : > { %v9745_v19 = vadd.f32 %v1961_v38, %v1872_v8 }
 0x291   : > { %v1696_v2 = vpop.f32.mrf.mxu0  ;;  %15706 = vst [vmem:[#allocation150_spill] sm:$0xff] %v9745_v19 }
 0x292   : > { %v1788_v30 = vpop.f32.mrf.mxu1  ;;  %v9747_v62 = vadd.f32 %v1785_v5, %v1696_v2  ;;  %v9780_v5 = vadd.f32 %v9322_v58, %v9318_v56 }
 0x294   : > { %v1963_v0 = vpop.f32.mrf.mxu3  ;;  %15707 = vst [vmem:[#allocation151_spill] sm:$0xff] %v9747_v62  ;;  %v7536_v31 = vmul.f32 -1.442695, %v9780_v5 }
 0x295   : > { %2281 = vmatmul.bf16.vlgmr.msra.gmra.mxu3 %v9198_v48  ;;  %2103 = vmatmul.bf16.vlgmr.msra.gmra.mxu1 %v9198_v48 }
 0x296   : > { %v1874_v63 = vpop.f32.mrf.mxu2 }
 0x297   : > { %v9749_v60 = vadd.f32 %v1963_v0, %v1874_v63  ;;  %v9782_v63 = vpop.eup %8231  ;;  %v7533_v0 = vmul.f32 -1.442695, %v9320_v57 }
 0x298   : > { %vm3236_vm2 = vweird.f32 %v9782_v63 }
 0x299   : > { %v1699_v1 = vpop.f32.mrf.mxu0  ;;  %15708 = vst [vmem:[#allocation152_spill] sm:$0xff] %v9749_v60  ;;  %vm9856_vm3 = vmor %vm3235_vm1, %vm3236_vm2 }
 0x29a   : > { %v1790_v61 = vpop.f32.mrf.mxu1  ;;  %v9757_v50 = vadd.f32 %v1788_v30, %v1699_v1  ;;  %v8234_v1 = vpop.eup %8233  ;;  %v3231_v30 = vmul.f32 %v9782_v63, %v9755_v25 }
 0x29b   : > { %2192 = vmatmul.bf16.vlgmr.msra.gmra.mxu2 %v9194_v44  ;;  %v8236_v24 = vpop.eup %8235  ;;  %v9805_v17 = vadd.f32 1.0, %v8234_v1 }
 0x29c   : > { %v1966_v34 = vpop.f32.mrf.mxu3  ;;  %2014 = vmatmul.bf16.vlgmr.msra.gmra.mxu0 %v9194_v44  ;;  %15709 = vst [vmem:[#allocation153_spill] sm:$0xff] %v9757_v50  ;;  %v9807_v22 = vadd.f32 1.0, %v8236_v24  ;;  %v7540_v50 = vmul.f32 -1.442695, %v9331_v16 }
 0x29d   : > { %vm3310_vm11 = vweird.f32 %v9805_v17 }
 0x29e   : > { %v1877_v55 = vpop.f32.mrf.mxu2  ;;  %vm3355_vm13 = vweird.f32 %v9807_v22 }
 0x29f   : > { %v9759_v29 = vadd.f32 %v1966_v34, %v1877_v55  ;;  %v9774_v55 = vadd.f32 1.0, %v8228_v23  ;;  %v9776_v34 = vadd.f32 1.0, %v8230_v40  ;;  %v3232_v23 = vsub.f32 1.0, %v3231_v30 }
 0x2a0   : > { %v3239_v40 = vand.u32 2147483647, %v9755_v25 }
 0x2a1   : > { %v1701_v45 = vpop.f32.mrf.mxu0  ;;  %15710 = vst [vmem:[#allocation154_spill] sm:$0xff] %v9759_v29  ;;  %8237 = vrcp.f32 %v9774_v55  ;;  %v3233_v30 = vmul.f32 %v9782_v63, %v3232_v23  ;;  %v3254_v36 = vand.u32 2147483647, %v9774_v55  ;;  %vm3250_vm4 = vweird.f32 %v9774_v55 }
 0x2a2   : > { %v9768_v8 = vadd.f32 %v1790_v61, %v1701_v45  ;;  %v9772_v2 = vpop.f32.mrf.mxu1  ;;  %8239 = vrcp.f32 %v9776_v34  ;;  %vm9826_vm0 = vcmp.eq.f32.partialorder %v3239_v40, 8.507059e+37  ;;  %v7520_v40 = vld [vmem:[%s9051_s26 + $0x3f8] sm:$0xf0]  ;;  %vm3295_vm5 = vweird.f32 %v9776_v34 }
 0x2a3   : > { %8241 = vpow2.f32 %v7533_v0  ;;  %v3234_v18 = vadd.f32 %v9782_v63, %v3233_v30  ;;  %vm9894_vm8 = vcmp.eq.f32.partialorder %v3254_v36, 8.507059e+37 }
 0x2a4   : > { %v9764_v39 = vpop.f32.mrf.mxu3  ;;  %15711 = vst [vmem:[#allocation155_spill] sm:$0xff] %v9768_v8  ;;  %8243 = vpow2.f32 %v7536_v31  ;;  %v3241_v8 = vand.u32 2147483648, %v9755_v25  ;;  %v8010_v25 = vld [vmem:[%s9051_s26 + $0x1f4] sm:$0xf0] }
 0x2a5   : > { %2286 = vmatmul.bf16.gmra.mxu3 %v9214_v4  ;;  %2108 = vmatmul.bf16.gmra.mxu1 %v9214_v4  ;;  %8245 = vpow2.f32 %v7537_v46  ;;  %v3256_v46 = vand.u32 2147483648, %v9774_v55  ;;  %v8006_v4 = vld [vmem:[%s9051_s26 + $0x1dc] sm:$0xf] }
 0x2a6   : > { %v9762_v41 = vpop.f32.mrf.mxu2  ;;  %8247 = vrcp.f32 %v9805_v17  ;;  %v3242_v19 = vor.u32 1.1754944e-38, %v3241_v8  ;;  %v7267_v43 = vor.u32 %v8006_v4, %v7264_v7 }
 0x2a7   : > { %v9803_v11 = vpop.eup %8237  ;;  %8249 = vrcp.f32 %v9807_v22  ;;  %v9846_v52 = vor.u32 1.1754944e-38, %v3256_v46  ;;  %v9864_v46 = vadd.f32 %v15716_v35, %v9337_v21  ;;  %v15717_v35 = vld [vmem:[#allocation35_spill] sm:$0xff] }
 0x2a8   : > { %v9809_v6 = vpop.eup %8239  ;;  %v3246_v29 = vmul.f32 %v9803_v11, %v9774_v55  ;;  %8251 = vpow2.f32 %v7540_v50  ;;  %v7518_v50 = vld [vmem:[%s9051_s26 + $0x3d8] sm:$0xf]  ;;  %vm3251_vm6 = vweird.f32 %v9803_v11  ;;  %2540 = vmatpush.bf16.msrb.mxu2 %v7267_v43  ;;  %v7541_v7 = vmul.f32 -1.442695, %v15717_v35  ;;  %v15742_v35 = vld [vmem:[#allocation40_spill] sm:$0xff] }
 0x2a9   : > { %v9770_v38 = vpop.f32.mrf.mxu0  ;;  %v3291_v31 = vmul.f32 %v9809_v6, %v9776_v34  ;;  %v8242_v24 = vpop.eup %8241  ;;  %vm3296_vm7 = vweird.f32 %v9809_v6  ;;  %v7544_v43 = vmul.f32 -1.442695, %v9864_v46  ;;  %vm9939_vm10 = vmor %vm3250_vm4, %vm3251_vm6 }
 0x2aa   : > { %v9798_v58 = vpop.f32.mrf.mxu1  ;;  %v8244_v60 = vpop.eup %8243  ;;  %v3247_v23 = vsub.f32 1.0, %v3246_v29  ;;  %v3299_v29 = vand.u32 2147483647, %v9776_v34  ;;  %v9848_v42 = vadd.f32 1.0, %v8242_v24  ;;  %v7523_v24 = vor.u32 %v8070_v15, %v7520_v40  ;;  %vm9961_vm12 = vmor %vm3295_vm5, %vm3296_vm7 }
 0x2ab   : > { %2197 = vmatmul.bf16.gmra.mxu2 %v9212_v3  ;;  %v8246_v44 = vpop.eup %8245  ;;  %v3292_v8 = vsub.f32 1.0, %v3291_v31  ;;  %v9850_v12 = vadd.f32 1.0, %v8244_v60  ;;  %v7519_v40 = vor.u32 %v8074_v59, %v7518_v50  ;;  %v3316_v59 = vand.u32 2147483648, %v9805_v17  ;;  %v15725_v50 = vld [vmem:[#allocation38_spill] sm:$0xff] }
 0x2ac   : > { %v9787_v45 = vpop.f32.mrf.mxu3  ;;  %2019 = vmatmul.bf16.gmra.mxu0 %v9212_v3  ;;  %v9844_v26 = vpop.eup %8247  ;;  %v9860_v31 = vadd.f32 1.0, %v8246_v44  ;;  %v3248_v60 = vmul.f32 %v9803_v11, %v3247_v23  ;;  %v3238_v44 = vsel %vm9856_vm3, %v9782_v63, %v3234_v18  ;;  %2629 = vmatpush.bf16.msrb.mxu3 %v7523_v24  ;;  %8253 = vrcp.f32 %v9848_v42 }
 0x2ad   : > { %v9852_v47 = vpop.eup %8249  ;;  %v3293_v21 = vmul.f32 %v9809_v6, %v3292_v8  ;;  %v3306_v4 = vmul.f32 %v9844_v26, %v9805_v17  ;;  %8255 = vrcp.f32 %v9850_v12  ;;  %v7263_v23 = vor.u32 %v8010_v25, %v7262_v13  ;;  %2451 = vmatpush.bf16.msrb.mxu1 %v7519_v40 }
 0x2ae   : > { %v9785_v61 = vpop.f32.mrf.mxu2  ;;  %v3351_v15 = vmul.f32 %v9852_v47, %v9807_v22  ;;  %v8252_v8 = vpop.eup %8251  ;;  %v3243_v30 = vsel %vm9826_vm0, %v3242_v19, %v3238_v44  ;;  %v3249_v24 = vadd.f32 %v9803_v11, %v3248_v60  ;;  %vm9898_vm9 = vcmp.eq.f32.partialorder %v3299_v29, 8.507059e+37  ;;  %v15724_v60 = vld [vmem:[#allocation36_spill] sm:$0xff] }
 0x2af   : > { %8257 = vrcp.f32 %v9860_v31  ;;  %v3294_v13 = vadd.f32 %v9809_v6, %v3293_v21  ;;  %v3307_v25 = vsub.f32 1.0, %v3306_v4  ;;  %2362 = vmatpush.bf16.msrb.mxu0 %v7263_v23  ;;  %v9907_v19 = vadd.f32 %v9764_v39, %v9762_v41 }
 0x2b0   : > { %v9911_v36 = vadd.f32 %v9772_v2, %v9770_v38  ;;  %8259 = vpow2.f32 %v7541_v7  ;;  %v9915_v44 = vadd.f32 %v15725_v50, %v15724_v60  ;;  %v9919_v21 = vadd.f32 %v9787_v45, %v9785_v61 }
 0x2b1   : > { %v9796_v56 = vpop.f32.mrf.mxu0  ;;  %15722 = vst [vmem:[#allocation34_spill] sm:$0xff] %v9907_v19  ;;  %v3352_v41 = vsub.f32 1.0, %v3351_v15  ;;  %8261 = vpow2.f32 %v7544_v43  ;;  %v15732_v45 = vand.u32 2147483648, %v9776_v34  ;;  %v3253_v55 = vsel %vm9939_vm10, %v9803_v11, %v3249_v24  ;;  %v7488_v19 = vld [vmem:[%s9051_s26 + $0x3b8] sm:$0xf0] }
 0x2b2   : > { %v9834_v48 = vpop.f32.mrf.mxu1  ;;  %15723 = vst [vmem:[#allocation156_spill] sm:$0xff] %v9911_v36  ;;  %v9923_v4 = vadd.f32 %v9798_v58, %v9796_v56  ;;  %v9933_v2 = vpop.eup %8253  ;;  %v3314_v58 = vand.u32 2147483647, %v9805_v17  ;;  %v3359_v15 = vand.u32 2147483647, %v9807_v22  ;;  %v3361_v7 = vand.u32 2147483648, %v9807_v22 }
 0x2b3   : > { %15726 = vst [vmem:[#allocation36_spill] sm:$0xff] %v9919_v21  ;;  %v3302_v56 = vor.u32 1.1754944e-38, %v15732_v45  ;;  %v7545_v11 = vmul.f32 -1.442695, %v9915_v44  ;;  %v3308_v34 = vmul.f32 %v9844_v26, %v3307_v25  ;;  %vm3311_vm14 = vweird.f32 %v9844_v26  ;;  %v7998_v21 = vld [vmem:[%s9051_s26 + $0x19c] sm:$0xf] }
 0x2b4   : > { %v9818_v0 = vpop.f32.mrf.mxu3  ;;  %15727 = vst [vmem:[#allocation38_spill] sm:$0xff] %v9923_v4  ;;  %v3366_v60 = vmul.f32 %v9933_v2, %v9848_v42  ;;  %vm9991_vm15 = vcmp.eq.f32.partialorder %v3314_v58, 8.507059e+37  ;;  %vm9997_vm0 = vcmp.eq.f32.partialorder %v3359_v15, 8.507059e+37  ;;  %v3376_v61 = vand.u32 2147483648, %v9848_v42  ;;  %vm10027_vm2 = vmor %vm3310_vm11, %vm3311_vm14  ;;  %v15772_v36 = vld [vmem:[#allocation21_spill] sm:$0xff] }
 0x2b5   : > { %2291 = vmatmul.bf16.gmra.mxu3 %v9222_v10  ;;  %2113 = vmatmul.bf16.gmra.mxu1 %v9222_v10  ;;  %v3309_v58 = vadd.f32 %v9844_v26, %v3308_v34  ;;  %vm3356_vm1 = vweird.f32 %v9852_v47  ;;  %vm3370_vm3 = vweird.f32 %v9848_v42  ;;  %v3374_v17 = vand.u32 2147483647, %v9848_v42  ;;  %v15755_v34 = vld [vmem:[#allocation44_spill] sm:$0xff] }
 0x2b6   : > { %v9816_v1 = vpop.f32.mrf.mxu2  ;;  %v3367_v15 = vsub.f32 1.0, %v3366_v60  ;;  %vm10040_vm4 = vmor %vm3355_vm13, %vm3356_vm1  ;;  %vm3415_vm5 = vweird.f32 %v9850_v12  ;;  %vm3371_vm6 = vweird.f32 %v9933_v2 }
 0x2b7   : > { %v9927_v39 = vadd.f32 %v9818_v0, %v9816_v1  ;;  %v9947_v1 = vadd.f32 1.0, %v8252_v8  ;;  %v3317_v8 = vor.u32 1.1754944e-38, %v3316_v59  ;;  %v3258_v59 = vsel %vm9894_vm8, %v9846_v52, %v3253_v55  ;;  %vm10113_vm11 = vmor %vm3370_vm3, %vm3371_vm6 }
 0x2b8   : > { %v7548_v52 = vmul.f32 -1.442695, %v15742_v35  ;;  %vm10074_vm7 = vcmp.eq.f32.partialorder %v3374_v17, 8.507059e+37 }
 0x2b9   : > { %v9832_v3 = vpop.f32.mrf.mxu0  ;;  %15728 = vst [vmem:[#allocation157_spill] sm:$0xff] %v9927_v39  ;;  %8263 = vrcp.f32 %v9947_v1  ;;  %v3481_v42 = vand.u32 2147483648, %v9947_v1 }
 0x2ba   : > { %v1800_v29 = vpop.f32.mrf.mxu1  ;;  %v9931_v38 = vadd.f32 %v9834_v48, %v9832_v3  ;;  %v9949_v48 = vpop.eup %8255  ;;  %v9952_v3 = vmul.f32 %v3243_v30, %v9292_v20  ;;  %v3298_v20 = vsel %vm9961_vm12, %v9809_v6, %v3294_v13  ;;  %v3353_v30 = vmul.f32 %v9852_v47, %v3352_v41 }
 0x2bb   : > { %2202 = vmatmul.bf16.gmra.mxu2 %v9220_v9  ;;  %v9967_v43 = vpop.eup %8257  ;;  %v3411_v6 = vmul.f32 %v9949_v48, %v9850_v12  ;;  %v3303_v25 = vsel %vm9898_vm9, %v3302_v56, %v3298_v20  ;;  %8265 = vpow2.f32 %v7545_v11  ;;  %v15744_v11 = vld [vmem:[#allocation41_spill] sm:$0xff]  ;;  %vm3416_vm8 = vweird.f32 %v9949_v48 }
 0x2bc   : > { %v1976_v63 = vpop.f32.mrf.mxu3  ;;  %2024 = vmatmul.bf16.gmra.mxu0 %v9220_v9  ;;  %15729 = vst [vmem:[#allocation158_spill] sm:$0xff] %v9931_v38  ;;  %v8260_v24 = vpop.eup %8259  ;;  %v3426_v50 = vmul.f32 %v9967_v43, %v9860_v31  ;;  %v3354_v55 = vadd.f32 %v9852_v47, %v3353_v30  ;;  %8267 = vpow2.f32 %v7548_v52  ;;  %vm3431_vm10 = vweird.f32 %v9967_v43  ;;  %vm10126_vm13 = vmor %vm3415_vm5, %vm3416_vm8 }
 0x2bd   : > { %15733 = vst [vmem:[#allocation159_spill] sm:$0xff] %v9952_v3  ;;  %v8262_v13 = vpop.eup %8261  ;;  %v10012_v0 = vadd.f32 1.0, %v8260_v24  ;;  %v15749_v24 = vld [vmem:[#allocation43_spill] sm:$0xff]  ;;  %v3436_v41 = vand.u32 2147483648, %v9860_v31  ;;  %vm3430_vm12 = vweird.f32 %v9860_v31 }
 0x2be   : > { %v1887_v18 = vpop.f32.mrf.mxu2  ;;  %v10014_v20 = vadd.f32 1.0, %v8262_v13  ;;  %v3427_v30 = vsub.f32 1.0, %v3426_v50  ;;  %v7549_v60 = vmul.f32 -1.442695, %v15749_v24  ;;  %v10045_v13 = vor.u32 1.1754944e-38, %v3376_v61  ;;  %vm10142_vm14 = vmor %vm3430_vm12, %vm3431_vm10 }
 0x2bf   : > { %v9973_v23 = vadd.f32 %v1976_v63, %v1887_v18  ;;  %v3358_v22 = vsel %vm10040_vm4, %v9852_v47, %v3354_v55  ;;  %8269 = vrcp.f32 %v10012_v0  ;;  %v3368_v50 = vmul.f32 %v9933_v2, %v3367_v15 }
 0x2c0   : > { %8271 = vrcp.f32 %v10014_v20  ;;  %vm3490_vm4 = vweird.f32 %v10012_v0  ;;  %vm3535_vm6 = vweird.f32 %v10014_v20 }
 0x2c1   : > { %v1711_v62 = vpop.f32.mrf.mxu0  ;;  %15736 = vst [vmem:[#allocation160_spill] sm:$0xff] %v9973_v23  ;;  %8273 = vpow2.f32 %v7549_v60 }
 0x2c2   : > { %v9975_v40 = vadd.f32 %v1800_v29, %v1711_v62  ;;  %v3362_v29 = vor.u32 1.1754944e-38, %v3361_v7  ;;  %v10007_v56 = vpop.f32.mrf.mxu1  ;;  %v3412_v7 = vsub.f32 1.0, %v3411_v6  ;;  %v10033_v6 = vpop.eup %8263 }
 0x2c3   : > { %v3471_v55 = vmul.f32 %v10033_v6, %v9947_v1 }
 0x2c4   : > { %15737 = vst [vmem:[#allocation161_spill] sm:$0xff] %v9975_v40  ;;  %v1978_v63 = vpop.f32.mrf.mxu3  ;;  %v15745_v40 = vld [vmem:[#allocation42_spill] sm:$0xff]  ;;  %v3413_v61 = vmul.f32 %v9949_v48, %v3412_v7  ;;  %v3363_v62 = vsel %vm9997_vm0, %v3362_v29, %v3358_v22  ;;  %vm3476_vm0 = vweird.f32 %v10033_v6  ;;  %v3494_v7 = vand.u32 2147483647, %v10012_v0 }
 0x2c5   : > { %2296 = vmatmul.bf16.gmra.mxu3 %v9238_v28  ;;  %2118 = vmatmul.bf16.gmra.mxu1 %v9238_v28  ;;  %v3472_v22 = vsub.f32 1.0, %v3471_v55  ;;  %v10120_v55 = vmul.f32 %v3363_v62, %v9312_v51  ;;  %v3479_v62 = vand.u32 2147483647, %v9947_v1 }
 0x2c6   : > { %v1889_v18 = vpop.f32.mrf.mxu2 }
 0x2c7   : > { %v10003_v45 = vadd.f32 %v1978_v63, %v1889_v18  ;;  %v10018_v18 = vadd.f32 %v15745_v40, %v15744_v11  ;;  %v10021_v63 = vmul.f32 %v3258_v59, %v9302_v32  ;;  %v10036_v40 = vmul.f32 %v3303_v25, %v9304_v37  ;;  %v8266_v25 = vpop.eup %8265  ;;  %v15756_v32 = vld [vmem:[#allocation46_spill] sm:$0xff]  ;;  %15762 = vst [vmem:[#allocation44_spill] sm:$0xff] %v10120_v55  ;;  %v15782_v55 = vld [vmem:[#allocation53_spill] sm:$0xff] }
 0x2c8   : > { %v3313_v37 = vsel %vm10027_vm2, %v9844_v26, %v3309_v58  ;;  %v3419_v59 = vand.u32 2147483647, %v9850_v12  ;;  %v3428_v58 = vmul.f32 %v9967_v43, %v3427_v30  ;;  %v3421_v11 = vand.u32 2147483648, %v9850_v12  ;;  %v8268_v17 = vpop.eup %8267 }
 0x2c9   : > { %15743 = vst [vmem:[#allocation40_spill] sm:$0xff] %v10003_v45  ;;  %v10005_v54 = vpop.f32.mrf.mxu0  ;;  %v7552_v26 = vmul.f32 -1.442695, %v10018_v18  ;;  %v3318_v15 = vsel %vm9991_vm15, %v3317_v8, %v3313_v37  ;;  %v10081_v45 = vadd.f32 %v15756_v32, %v15755_v34  ;;  %v10094_v60 = vadd.f32 1.0, %v8266_v25  ;;  %v10099_v38 = vpop.eup %8269 }
 0x2ca   : > { %15746 = vst [vmem:[#allocation41_spill] sm:$0xff] %v10021_v63  ;;  %v10085_v23 = vpop.f32.mrf.mxu1  ;;  %vm10090_vm9 = vcmp.eq.f32.partialorder %v3419_v59, 8.507059e+37  ;;  %v3369_v37 = vadd.f32 %v9933_v2, %v3368_v50  ;;  %v3414_v34 = vadd.f32 %v9949_v48, %v3413_v61  ;;  %v3434_v32 = vand.u32 2147483647, %v9860_v31  ;;  %v10104_v59 = vpop.eup %8271 }
 0x2cb   : > { %15750 = vst [vmem:[#allocation42_spill] sm:$0xff] %v10036_v40  ;;  %2207 = vmatmul.bf16.gmra.mxu2 %v9236_v27  ;;  %8275 = vpow2.f32 %v7552_v26  ;;  %v3429_v29 = vadd.f32 %v9967_v43, %v3428_v58  ;;  %v10107_v25 = vmul.f32 %v3318_v15, %v9310_v49  ;;  %v3422_v61 = vor.u32 1.1754944e-38, %v3421_v11  ;;  %v8274_v58 = vpop.eup %8273 }
 0x2cc   : > { %2029 = vmatmul.bf16.gmra.mxu0 %v9236_v27  ;;  %v10065_v47 = vpop.f32.mrf.mxu3  ;;  %v7553_v26 = vmul.f32 -1.442695, %v10081_v45  ;;  %8277 = vrcp.f32 %v10094_v60  ;;  %v10132_v15 = vadd.f32 1.0, %v8268_v17  ;;  %v3373_v31 = vsel %vm10113_vm11, %v9933_v2, %v3369_v37 }
 0x2cd   : > { %15759 = vst [vmem:[#allocation43_spill] sm:$0xff] %v10107_v25  ;;  %v3418_v51 = vsel %vm10126_vm13, %v9949_v48, %v3414_v34  ;;  %vm10146_vm15 = vcmp.eq.f32.partialorder %v3434_v32, 8.507059e+37  ;;  %v3433_v2 = vsel %vm10142_vm14, %v9967_v43, %v3429_v29  ;;  %v3437_v17 = vor.u32 1.1754944e-38, %v3436_v41 }
 0x2ce   : > { %v10063_v52 = vpop.f32.mrf.mxu2  ;;  %v3473_v37 = vmul.f32 %v10033_v6, %v3472_v22  ;;  %v3496_v48 = vand.u32 2147483648, %v10012_v0  ;;  %v3486_v50 = vmul.f32 %v10099_v38, %v10012_v0  ;;  %v3531_v32 = vmul.f32 %v10104_v59, %v10014_v20 }
 0x2cf   : > { %v10160_v49 = vadd.f32 1.0, %v8274_v58  ;;  %8279 = vpow2.f32 %v7553_v26  ;;  %v3378_v43 = vsel %vm10074_vm7, %v10045_v13, %v3373_v31  ;;  %v3423_v29 = vsel %vm10090_vm9, %v3422_v61, %v3418_v51  ;;  %v15771_v13 = vld [vmem:[#allocation50_spill] sm:$0xff] }
 0x2d0   : > { %v10171_v41 = vor.u32 1.1754944e-38, %v3481_v42  ;;  %8281 = vrcp.f32 %v10132_v15  ;;  %v3438_v22 = vsel %vm10146_vm15, %v3437_v17, %v3433_v2  ;;  %vm10177_vm1 = vcmp.eq.f32.partialorder %v3479_v62, 8.507059e+37 }
 0x2d1   : > { %v10083_v30 = vpop.f32.mrf.mxu0  ;;  %v8276_v34 = vpop.eup %8275  ;;  %v7556_v58 = vmul.f32 -1.442695, %v15771_v13  ;;  %v3474_v31 = vadd.f32 %v10033_v6, %v3473_v37  ;;  %v10190_v51 = vor.u32 1.1754944e-38, %v3496_v48  ;;  %v3541_v12 = vand.u32 2147483648, %v10014_v20 }
 0x2d2   : > { %v10185_v61 = vpop.f32.mrf.mxu1  ;;  %v10187_v42 = vpop.eup %8277  ;;  %v10193_v11 = vadd.f32 1.0, %v8276_v34  ;;  %v3487_v62 = vsub.f32 1.0, %v3486_v50  ;;  %v3532_v2 = vsub.f32 1.0, %v3531_v32  ;;  %v3539_v17 = vand.u32 2147483647, %v10014_v20 }
 0x2d3   : > { %8283 = vrcp.f32 %v10160_v49  ;;  %v10201_v37 = vmul.f32 %v3378_v43, %v9320_v57  ;;  %v10204_v48 = vmul.f32 %v3423_v29, %v9780_v5  ;;  %v10207_v34 = vmul.f32 %v3438_v22, %v9328_v14  ;;  %v7232_v50 = vld [vmem:[%s9051_s26 + $0x1b8] sm:$0xf0]  ;;  %v15779_v43 = vld [vmem:[#allocation48_spill] sm:$0xff]  ;;  %v15780_v29 = vld [vmem:[#allocation49_spill] sm:$0xff] }
 0x2d4   : > { %v10164_v4 = vpop.f32.mrf.mxu3  ;;  %vm3475_vm2 = vweird.f32 %v9947_v1  ;;  %v8062_v32 = vld [vmem:[%s9051_s26 + $0x39c] sm:$0xf]  ;;  %v3546_v14 = vmul.f32 %v10187_v42, %v10094_v60  ;;  %8285 = vpow2.f32 %v7556_v58  ;;  %v10227_v22 = vadd.f32 %v15780_v29, %v15779_v43  ;;  %v7230_v58 = vld [vmem:[%s9051_s26 + $0x198] sm:$0xf]  ;;  %v15781_v57 = vld [vmem:[#allocation52_spill] sm:$0xff] }
 0x2d5   : > { %2301 = vmatmul.bf16.gmra.mxu3 %v15772_v36  ;;  %15773 = vst [vmem:[#allocation46_spill] sm:$0xff] %v10201_v37  ;;  %2123 = vmatmul.bf16.gmra.mxu1 %v15772_v36  ;;  %v8280_v28 = vpop.eup %8279  ;;  %vm10217_vm3 = vmor %vm3475_vm2, %vm3476_vm0  ;;  %v15778_v5 = vld [vmem:[#allocation51_spill] sm:$0xff]  ;;  %vm3491_vm5 = vweird.f32 %v10099_v38  ;;  %v10235_v27 = vor.u32 1.1754944e-38, %v3541_v12  ;;  %8287 = vrcp.f32 %v10193_v11  ;;  %v3488_v10 = vmul.f32 %v10099_v38, %v3487_v62 }
 0x2d6   : > { %v10162_v39 = vpop.f32.mrf.mxu2  ;;  %15774 = vst [vmem:[#allocation50_spill] sm:$0xff] %v10204_v48  ;;  %v7557_v1 = vmul.f32 -1.442695, %v15778_v5  ;;  %v10229_v36 = vpop.eup %8281  ;;  %v3533_v9 = vmul.f32 %v10104_v59, %v3532_v2  ;;  %v7235_v43 = vor.u32 %v7998_v21, %v7232_v50  ;;  %v7491_v29 = vor.u32 %v8062_v32, %v7488_v19  ;;  %v8002_v48 = vld [vmem:[%s9051_s26 + $0x1b4] sm:$0xf0]  ;;  %vm10304_vm11 = vmor %vm3490_vm4, %vm3491_vm5 }
 0x2d7   : > { %15775 = vst [vmem:[#allocation162_spill] sm:$0xff] %v10207_v34  ;;  %v7486_v34 = vld [vmem:[%s9051_s26 + $0x398] sm:$0xf]  ;;  %v10247_v12 = vadd.f32 1.0, %v8280_v28  ;;  %v10251_v25 = vadd.f32 %v15782_v55, %v15781_v57  ;;  %vm10255_vm7 = vcmp.eq.f32.partialorder %v3494_v7, 8.507059e+37  ;;  %v3547_v19 = vsub.f32 1.0, %v3546_v14 }
 0x2d8   : > { %v8066_v37 = vld [vmem:[%s9051_s26 + $0x3b4] sm:$0xf0]  ;;  %v3591_v21 = vmul.f32 %v10229_v36, %v10132_v15  ;;  %8289 = vpow2.f32 %v7557_v1  ;;  %v7560_v50 = vmul.f32 -1.442695, %v10227_v22  ;;  %2541 = vmatpush.bf16.msrb.mxu2 %v7235_v43  ;;  %2630 = vmatpush.bf16.msrb.mxu3 %v7491_v29  ;;  %vm3536_vm8 = vweird.f32 %v10104_v59 }
 0x2d9   : > { %v10183_v8 = vpop.f32.mrf.mxu0  ;;  %v10253_v62 = vpop.eup %8283  ;;  %v7231_v7 = vor.u32 %v8002_v48, %v7230_v58  ;;  %v7487_v57 = vor.u32 %v8066_v37, %v7486_v34  ;;  %v3489_v14 = vadd.f32 %v10099_v38, %v3488_v10  ;;  %v3534_v63 = vadd.f32 %v10104_v59, %v3533_v9  ;;  %vm10335_vm14 = vmor %vm3535_vm6, %vm3536_vm8  ;;  %v15806_v1 = vld [vmem:[#allocation35_spill] sm:$0xff] }
 0x2da   : > { %v8286_v40 = vpop.eup %8285  ;;  %vm10268_vm9 = vcmp.eq.f32.partialorder %v3539_v17, 8.507059e+37  ;;  %vm3550_vm10 = vweird.f32 %v10094_v60  ;;  %v10275_v43 = vadd.f32 %v10007_v56, %v10005_v54  ;;  %v10283_v26 = vpop.f32.mrf.mxu1  ;;  %v3606_v9 = vmul.f32 %v10253_v62, %v10160_v49 }
 0x2db   : > { %2212 = vmatmul.bf16.gmra.mxu2 %v9244_v33  ;;  %v10285_v10 = vpop.eup %8287  ;;  %8291 = vrcp.f32 %v10247_v12  ;;  %v7561_v17 = vmul.f32 -1.442695, %v10251_v25  ;;  %2363 = vmatpush.bf16.msrb.mxu0 %v7231_v7  ;;  %v10293_v54 = vadd.f32 %v10085_v23, %v10083_v30  ;;  %v3548_v56 = vmul.f32 %v10187_v42, %v3547_v19  ;;  %v15800_v19 = vld [vmem:[#allocation54_spill] sm:$0xff] }
 0x2dc   : > { %2034 = vmatmul.bf16.gmra.mxu0 %v9244_v33  ;;  %v3478_v33 = vsel %vm10217_vm3, %v10033_v6, %v3474_v31  ;;  %v3554_v6 = vand.u32 2147483647, %v10094_v60  ;;  %v3556_v31 = vand.u32 2147483648, %v10094_v60  ;;  %v1986_v32 = vpop.f32.mrf.mxu3  ;;  %15787 = vst [vmem:[#allocation51_spill] sm:$0xff] %v10275_v43  ;;  %2452 = vmatpush.bf16.msrb.mxu1 %v7487_v57  ;;  %8293 = vpow2.f32 %v7560_v50 }
 0x2dd   : > { %v3483_v55 = vsel %vm10177_vm1, %v10171_v41, %v3478_v33  ;;  %v10279_v33 = vadd.f32 %v10065_v47, %v10063_v52  ;;  %15789 = vst [vmem:[#allocation49_spill] sm:$0xff] %v10293_v54  ;;  %v3592_v52 = vsub.f32 1.0, %v3591_v21  ;;  %v10298_v47 = vadd.f32 %v10164_v4, %v10162_v39 }
 0x2de   : > { %v1897_v28 = vpop.f32.mrf.mxu2  ;;  %v3599_v48 = vand.u32 2147483647, %v10132_v15  ;;  %v10309_v23 = vadd.f32 1.0, %v8286_v40  ;;  %v10313_v30 = vadd.f32 %v10185_v61, %v10183_v8  ;;  %v8290_v4 = vpop.eup %8289  ;;  %v3493_v39 = vsel %vm10304_vm11, %v10099_v38, %v3489_v14  ;;  %v15809_v38 = vld [vmem:[#allocation58_spill] sm:$0xff] }
 0x2df   : > { %15788 = vst [vmem:[#allocation48_spill] sm:$0xff] %v10279_v33  ;;  %v10315_v34 = vadd.f32 %v1986_v32, %v1897_v28  ;;  %vm10320_vm12 = vcmp.eq.f32.partialorder %v3554_v6, 8.507059e+37  ;;  %vm3595_vm13 = vweird.f32 %v10132_v15  ;;  %v3601_v40 = vand.u32 2147483648, %v10132_v15  ;;  %v15817_v15 = vld [vmem:[#allocation61_spill] sm:$0xff] }
 0x2e0   : > { %15790 = vst [vmem:[#allocation52_spill] sm:$0xff] %v10298_v47  ;;  %v3651_v58 = vmul.f32 %v10285_v10, %v10193_v11  ;;  %v10329_v8 = vmul.f32 %v3483_v55, %v9331_v16  ;;  %vm3551_vm15 = vweird.f32 %v10187_v42  ;;  %v3607_v61 = vsub.f32 1.0, %v3606_v9 }
 0x2e1   : > { %v10281_v41 = vpop.f32.mrf.mxu0  ;;  %15793 = vst [vmem:[#allocation53_spill] sm:$0xff] %v10313_v30  ;;  %8295 = vpow2.f32 %v7561_v17  ;;  %v3538_v29 = vsel %vm10335_vm14, %v10104_v59, %v3534_v63  ;;  %v3549_v6 = vadd.f32 %v10187_v42, %v3548_v56  ;;  %v3593_v16 = vmul.f32 %v10229_v36, %v3592_v52  ;;  %v10346_v50 = vpop.eup %8291  ;;  %vm10373_vm1 = vmor %vm3550_vm10, %vm3551_vm15 }
 0x2e2   : > { %15794 = vst [vmem:[#allocation163_spill] sm:$0xff] %v10315_v34  ;;  %v7564_v21 = vmul.f32 -1.442695, %v15800_v19  ;;  %v3498_v20 = vsel %vm10255_vm7, %v10190_v51, %v3493_v39  ;;  %v3557_v28 = vor.u32 1.1754944e-38, %v3556_v31  ;;  %8297 = vrcp.f32 %v10309_v23  ;;  %v8294_v55 = vpop.eup %8293  ;;  %v15803_v51 = vld [vmem:[#allocation23_spill] sm:$0xff] }
 0x2e3   : > { %15797 = vst [vmem:[#allocation164_spill] sm:$0xff] %v10329_v8  ;;  %v10352_v32 = vadd.f32 1.0, %v8290_v4  ;;  %vm10354_vm0 = vcmp.eq.f32.partialorder %v3599_v48, 8.507059e+37  ;;  %v3602_v59 = vor.u32 1.1754944e-38, %v3601_v40  ;;  %v3614_v7 = vand.u32 2147483647, %v10160_v49  ;;  %v10391_v48 = vpop.f32.mrf.mxu1 }
 0x2e4   : > { %v3616_v57 = vand.u32 2147483648, %v10160_v49  ;;  %v3652_v14 = vsub.f32 1.0, %v3651_v58  ;;  %v10362_v2 = vpop.f32.mrf.mxu3  ;;  %v3543_v31 = vsel %vm10268_vm9, %v10235_v27, %v3538_v29  ;;  %vm3596_vm2 = vweird.f32 %v10229_v36  ;;  %v15808_v58 = vld [vmem:[#allocation55_spill] sm:$0xff] }
 0x2e5   : > { %2306 = vmatmul.bf16.gmra.mxu3 %v15803_v51  ;;  %v3608_v56 = vmul.f32 %v10253_v62, %v3607_v61  ;;  %vm3610_vm3 = vweird.f32 %v10160_v49  ;;  %2128 = vmatmul.bf16.gmra.mxu1 %v15803_v51  ;;  %v10383_v27 = vmul.f32 %v3498_v20, %v15806_v1  ;;  %v3553_v60 = vsel %vm10373_vm1, %v10187_v42, %v3549_v6  ;;  %vm10421_vm5 = vmor %vm3595_vm13, %vm3596_vm2  ;;  %v7200_v34 = vld [vmem:[%s9051_s26 + $0x178] sm:$0xf0] }
 0x2e6   : > { %v10360_v9 = vpop.f32.mrf.mxu2  ;;  %v3594_v52 = vadd.f32 %v10229_v36, %v3593_v16  ;;  %8299 = vpow2.f32 %v7564_v21  ;;  %v3666_v39 = vmul.f32 %v10346_v50, %v10247_v12  ;;  %v10396_v40 = vadd.f32 1.0, %v8294_v55  ;;  %v15813_v21 = vld [vmem:[#allocation59_spill] sm:$0xff] }
 0x2e7   : > { %15807 = vst [vmem:[#allocation54_spill] sm:$0xff] %v10383_v27  ;;  %v8296_v4 = vpop.eup %8295  ;;  %8301 = vrcp.f32 %v10352_v32  ;;  %v10400_v61 = vadd.f32 %v15809_v38, %v15808_v58  ;;  %v10403_v42 = vmul.f32 %v3543_v31, %v9864_v46  ;;  %vm10405_vm4 = vcmp.eq.f32.partialorder %v3614_v7, 8.507059e+37 }
 0x2e8   : > { %v3617_v6 = vor.u32 1.1754944e-38, %v3616_v57  ;;  %v3653_v16 = vmul.f32 %v10285_v10, %v3652_v14  ;;  %v7565_v20 = vmul.f32 -1.442695, %v15813_v21  ;;  %v10411_v17 = vpop.eup %8297  ;;  %v10415_v55 = vsel %vm10320_vm12, %v3557_v28, %v3553_v60  ;;  %v15816_v14 = vld [vmem:[#allocation60_spill] sm:$0xff] }
 0x2e9   : > { %v10389_v37 = vpop.f32.mrf.mxu0  ;;  %15810 = vst [vmem:[#allocation35_spill] sm:$0xff] %v10403_v42  ;;  %v3609_v7 = vadd.f32 %v10253_v62, %v3608_v56  ;;  %vm3611_vm6 = vweird.f32 %v10253_v62  ;;  %v3659_v57 = vand.u32 2147483647, %v10193_v11  ;;  %v3598_v0 = vsel %vm10421_vm5, %v10229_v36, %v3594_v52 }
 0x2ea   : > { %vm3655_vm7 = vweird.f32 %v10193_v11  ;;  %v10432_v28 = vadd.f32 1.0, %v8296_v4  ;;  %v10436_v31 = vadd.f32 %v15817_v15, %v15816_v14  ;;  %v3661_v1 = vand.u32 2147483648, %v10193_v11  ;;  %vm10443_vm8 = vmor %vm3610_vm3, %vm3611_vm6 }
 0x2eb   : > { %2217 = vmatmul.bf16.gmra.mxu2 %v9260_v53  ;;  %v3667_v60 = vsub.f32 1.0, %v3666_v39  ;;  %8303 = vrcp.f32 %v10396_v40  ;;  %v7568_v56 = vmul.f32 -1.442695, %v10400_v61  ;;  %v3654_v52 = vadd.f32 %v10285_v10, %v3653_v16  ;;  %v10486_v36 = vpop.f32.mrf.mxu1 }
 0x2ec   : > { %2039 = vmatmul.bf16.gmra.mxu0 %v9260_v53  ;;  %v8300_v58 = vpop.eup %8299  ;;  %vm3656_vm9 = vweird.f32 %v10285_v10  ;;  %v3711_v4 = vmul.f32 %v10411_v17, %v10309_v23  ;;  %8305 = vpow2.f32 %v7565_v20  ;;  %v10453_v38 = vpop.f32.mrf.mxu3  ;;  %v3603_v49 = vsel %vm10354_vm0, %v3602_v59, %v3598_v0  ;;  %v7990_v20 = vld [vmem:[%s9051_s26 + $0x15c] sm:$0xf]  ;;  %v7198_v53 = vld [vmem:[%s9051_s26 + $0x158] sm:$0xf] }
 0x2ed   : > { %v10455_v46 = vpop.eup %8301  ;;  %v3613_v14 = vsel %vm10443_vm8, %v10253_v62, %v3609_v7  ;;  %vm10462_vm10 = vcmp.eq.f32.partialorder %v3659_v57, 8.507059e+37  ;;  %v3676_v15 = vand.u32 2147483648, %v10247_v12  ;;  %v3674_v30 = vand.u32 2147483647, %v10247_v12  ;;  %vm10477_vm11 = vmor %vm3655_vm7, %vm3656_vm9  ;;  %v7456_v62 = vld [vmem:[%s9051_s26 + $0x378] sm:$0xf0] }
 0x2ee   : > { %v10451_v39 = vpop.f32.mrf.mxu2  ;;  %v3721_v47 = vand.u32 2147483648, %v10309_v23  ;;  %8307 = vrcp.f32 %v10432_v28  ;;  %v7569_v63 = vmul.f32 -1.442695, %v10436_v31  ;;  %v3668_v59 = vmul.f32 %v10346_v50, %v3667_v60 }
 0x2ef   : > { %v10482_v7 = vadd.f32 1.0, %v8300_v58  ;;  %8309 = vpow2.f32 %v7568_v56  ;;  %v7203_v57 = vor.u32 %v7990_v20, %v7200_v34  ;;  %v3658_v11 = vsel %vm10477_vm11, %v10285_v10, %v3654_v52  ;;  %v8054_v20 = vld [vmem:[%s9051_s26 + $0x35c] sm:$0xf] }
 0x2f0   : > { %v3662_v54 = vor.u32 1.1754944e-38, %v3661_v1  ;;  %v3712_v33 = vsub.f32 1.0, %v3711_v4  ;;  %v3726_v43 = vmul.f32 %v10455_v46, %v10352_v32  ;;  %v3618_v58 = vsel %vm10405_vm4, %v3617_v6, %v3613_v14 }
 0x2f1   : > { %v10484_v0 = vpop.f32.mrf.mxu0  ;;  %v10493_v60 = vpop.eup %8303  ;;  %vm3670_vm12 = vweird.f32 %v10247_v12  ;;  %v10498_v34 = vor.u32 1.1754944e-38, %v3676_v15  ;;  %v3736_v56 = vand.u32 2147483648, %v10352_v32  ;;  %2542 = vmatpush.bf16.msrb.mxu2 %v7203_v57  ;;  %vm3671_vm13 = vweird.f32 %v10346_v50 }
 0x2f2   : > { %v8306_v10 = vpop.eup %8305  ;;  %v3719_v1 = vand.u32 2147483647, %v10309_v23  ;;  %v10505_v52 = vor.u32 1.1754944e-38, %v3721_v47  ;;  %8311 = vpow2.f32 %v7569_v63  ;;  %v3663_v29 = vsel %vm10462_vm10, %v3662_v54, %v3658_v11  ;;  %v15826_v63 = vld [vmem:[#allocation24_spill] sm:$0xff]  ;;  %vm10531_vm15 = vmor %vm3670_vm12, %vm3671_vm13 }
 0x2f3   : > { %v3669_v6 = vadd.f32 %v10346_v50, %v3668_v59  ;;  %vm10510_vm14 = vcmp.eq.f32.partialorder %v3674_v30, 8.507059e+37  ;;  %v3734_v14 = vand.u32 2147483647, %v10352_v32  ;;  %8313 = vrcp.f32 %v10482_v7  ;;  %v15827_v30 = vld [vmem:[#allocation25_spill] sm:$0xff] }
 0x2f4   : > { %v10516_v15 = vpop.eup %8307  ;;  %v3713_v47 = vmul.f32 %v10411_v17, %v3712_v33  ;;  %v3727_v57 = vsub.f32 1.0, %v3726_v43  ;;  %v3771_v16 = vmul.f32 %v10493_v60, %v10396_v40  ;;  %v7459_v54 = vor.u32 %v8054_v20, %v7456_v62  ;;  %v15831_v62 = vld [vmem:[#allocation67_spill] sm:$0xff] }
 0x2f5   : > { %2311 = vmatmul.bf16.gmra.mxu3 %v15827_v30  ;;  %v8310_v59 = vpop.eup %8309  ;;  %v10525_v11 = vmul.f32 %v10415_v55, %v9915_v44  ;;  %v10535_v33 = vor.u32 1.1754944e-38, %v3736_v56  ;;  %v10537_v20 = vadd.f32 1.0, %v8306_v10  ;;  %v7572_v51 = vmul.f32 -1.442695, %v15831_v62  ;;  %2133 = vmatmul.bf16.gmra.mxu1 %v15827_v30  ;;  %v7994_v56 = vld [vmem:[%s9051_s26 + $0x174] sm:$0xf0] }
 0x2f6   : > { %v10544_v44 = vmul.f32 %v3603_v49, %v15742_v35  ;;  %v10547_v12 = vmul.f32 %v3618_v58, %v15749_v24  ;;  %v10550_v55 = vmul.f32 %v3663_v29, %v10018_v18  ;;  %vm3715_vm0 = vweird.f32 %v10309_v23  ;;  %2631 = vmatpush.bf16.msrb.mxu3 %v7459_v54  ;;  %v7454_v10 = vld [vmem:[%s9051_s26 + $0x358] sm:$0xf]  ;;  %v10556_v42 = vpop.f32.mrf.mxu2  ;;  %v15837_v30 = vld [vmem:[#allocation69_spill] sm:$0xff] }
 0x2f7   : > { %15828 = vst [vmem:[#allocation55_spill] sm:$0xff] %v10525_v11  ;;  %v8058_v11 = vld [vmem:[%s9051_s26 + $0x374] sm:$0xf0]  ;;  %v3673_v35 = vsel %vm10531_vm15, %v10346_v50, %v3669_v6  ;;  %vm3716_vm1 = vweird.f32 %v10411_v17  ;;  %v3779_v24 = vand.u32 2147483647, %v10396_v40  ;;  %v3786_v18 = vmul.f32 %v10516_v15, %v10432_v28 }
 0x2f8   : > { %15832 = vst [vmem:[#allocation58_spill] sm:$0xff] %v10544_v44  ;;  %v8312_v49 = vpop.eup %8311  ;;  %v3714_v58 = vadd.f32 %v10411_v17, %v3713_v47  ;;  %vm10568_vm2 = vcmp.eq.f32.partialorder %v3719_v1, 8.507059e+37  ;;  %v3728_v54 = vmul.f32 %v10455_v46, %v3727_v57  ;;  %vm3730_vm3 = vweird.f32 %v10352_v32  ;;  %v10582_v1 = vpop.f32.mrf.mxu1  ;;  %vm10604_vm5 = vmor %vm3715_vm0, %vm3716_vm1 }
 0x2f9   : > { %15833 = vst [vmem:[#allocation59_spill] sm:$0xff] %v10547_v12  ;;  %v3772_v43 = vsub.f32 1.0, %v3771_v16  ;;  %v10574_v50 = vadd.f32 1.0, %v8310_v59  ;;  %v10576_v6 = vpop.eup %8313  ;;  %8315 = vrcp.f32 %v10537_v20  ;;  %v7199_v12 = vor.u32 %v7994_v56, %v7198_v53  ;;  %v10580_v47 = vpop.f32.mrf.mxu0  ;;  %v15838_v16 = vld [vmem:[#allocation63_spill] sm:$0xff]  ;;  %v15839_v59 = vld [vmem:[#allocation64_spill] sm:$0xff]  ;;  %v15840_v53 = vld [vmem:[#allocation65_spill] sm:$0xff] }
 0x2fa   : > { %15834 = vst [vmem:[#allocation60_spill] sm:$0xff] %v10550_v55  ;;  %v7573_v55 = vmul.f32 -1.442695, %v15837_v30  ;;  %v7455_v44 = vor.u32 %v8058_v11, %v7454_v10  ;;  %v3781_v27 = vand.u32 2147483648, %v10396_v40  ;;  %v3794_v57 = vand.u32 2147483647, %v10432_v28 }
 0x2fb   : > { %2222 = vmatmul.bf16.gmra.mxu2 %v15826_v63  ;;  %8317 = vpow2.f32 %v7572_v51  ;;  %v10588_v8 = vadd.f32 %v15839_v59, %v15838_v16  ;;  %vm3731_vm4 = vweird.f32 %v10455_v46  ;;  %v3787_v62 = vsub.f32 1.0, %v3786_v18  ;;  %v15841_v11 = vld [vmem:[#allocation66_spill] sm:$0xff]  ;;  %2364 = vmatpush.bf16.msrb.mxu0 %v7199_v12 }
 0x2fc   : > { %2044 = vmatmul.bf16.gmra.mxu0 %v15826_v63  ;;  %v10558_v63 = vpop.f32.mrf.mxu3  ;;  %v10591_v3 = vadd.f32 1.0, %v8312_v49  ;;  %v10595_v56 = vadd.f32 %v15841_v11, %v15840_v53  ;;  %2453 = vmatpush.bf16.msrb.mxu1 %v7455_v44  ;;  %v3678_v10 = vsel %vm10510_vm14, %v10498_v34, %v3673_v35  ;;  %vm10608_vm6 = vcmp.eq.f32.partialorder %v3734_v14, 8.507059e+37  ;;  %vm10651_vm9 = vmor %vm3730_vm3, %vm3731_vm4 }
 0x2fd   : > { %v3796_v49 = vand.u32 2147483648, %v10432_v28  ;;  %v3831_v44 = vmul.f32 %v10576_v6, %v10482_v7  ;;  %8319 = vrcp.f32 %v10574_v50  ;;  %v3718_v34 = vsel %vm10604_vm5, %v10411_v17, %v3714_v58 }
 0x2fe   : > { %v3729_v23 = vadd.f32 %v10455_v46, %v3728_v54  ;;  %v3773_v4 = vmul.f32 %v10493_v60, %v3772_v43  ;;  %8321 = vpow2.f32 %v7573_v55  ;;  %v7576_v14 = vmul.f32 -1.442695, %v10588_v8 }
 0x2ff   : > { %v10624_v12 = vadd.f32 %v10283_v26, %v10281_v41  ;;  %v10628_v35 = vadd.f32 %v10362_v2, %v10360_v9  ;;  %v10632_v16 = vadd.f32 %v10391_v48, %v10389_v37  ;;  %v10634_v17 = vpop.eup %8315  ;;  %vm3775_vm7 = vweird.f32 %v10396_v40  ;;  %v1907_v37 = vpop.f32.mrf.mxu2 }
 0x300   : > { %v3788_v55 = vmul.f32 %v10516_v15, %v3787_v62  ;;  %8323 = vrcp.f32 %v10591_v3  ;;  %v7577_v58 = vmul.f32 -1.442695, %v10595_v56  ;;  %v10641_v26 = vmul.f32 %v3678_v10, %v10081_v45  ;;  %v1820_v51 = vpop.f32.mrf.mxu1 }
 0x301   : > { %15846 = vst [vmem:[#allocation61_spill] sm:$0xff] %v10624_v12  ;;  %v8318_v41 = vpop.eup %8317  ;;  %v3782_v9 = vor.u32 1.1754944e-38, %v3781_v27  ;;  %vm3790_vm8 = vweird.f32 %v10432_v28  ;;  %v3832_v2 = vsub.f32 1.0, %v3831_v44  ;;  %v3723_v54 = vsel %vm10568_vm2, %v10505_v52, %v3718_v34  ;;  %v1731_v10 = vpop.f32.mrf.mxu0  ;;  %v15855_v44 = vld [vmem:[#allocation72_spill] sm:$0xff] }
 0x302   : > { %15847 = vst [vmem:[#allocation69_spill] sm:$0xff] %v10628_v35  ;;  %vm3776_vm10 = vweird.f32 %v10493_v60  ;;  %vm10656_vm11 = vcmp.eq.f32.partialorder %v3779_v24, 8.507059e+37  ;;  %vm3791_vm12 = vweird.f32 %v10516_v15  ;;  %vm10661_vm13 = vcmp.eq.f32.partialorder %v3794_v57, 8.507059e+37 }
 0x303   : > { %15848 = vst [vmem:[#allocation63_spill] sm:$0xff] %v10632_v16  ;;  %v3797_v52 = vor.u32 1.1754944e-38, %v3796_v49  ;;  %v10665_v29 = vpop.eup %8319  ;;  %v3733_v32 = vsel %vm10651_vm9, %v10455_v46, %v3729_v23  ;;  %v3774_v43 = vadd.f32 %v10493_v60, %v3773_v4  ;;  %vm3835_vm14 = vweird.f32 %v10482_v7  ;;  %v15857_v4 = vld [vmem:[#allocation26_spill] sm:$0xff]  ;;  %vm10696_vm15 = vmor %vm3775_vm7, %vm3776_vm10 }
 0x304   : > { %v1996_v48 = vpop.f32.mrf.mxu3  ;;  %v3839_v24 = vand.u32 2147483647, %v10482_v7  ;;  %8325 = vpow2.f32 %v7576_v14  ;;  %v8322_v59 = vpop.eup %8321  ;;  %v3789_v57 = vadd.f32 %v10516_v15, %v3788_v55  ;;  %v3846_v53 = vmul.f32 %v10634_v17, %v10537_v20  ;;  %v15858_v14 = vld [vmem:[#allocation27_spill] sm:$0xff]  ;;  %vm10718_vm1 = vmor %vm3790_vm8, %vm3791_vm12  ;;  %v15896_v16 = vld [vmem:[#allocation82_spill] sm:$0xff] }
 0x305   : > { %v10676_v11 = vadd.f32 1.0, %v8318_v41  ;;  %8327 = vpow2.f32 %v7577_v58  ;;  %v3833_v46 = vmul.f32 %v10576_v6, %v3832_v2  ;;  %v3841_v49 = vand.u32 2147483648, %v10482_v7  ;;  %2316 = vmatmul.bf16.gmra.mxu3 %v15858_v14  ;;  %2138 = vmatmul.bf16.gmra.mxu1 %v15858_v14  ;;  %v15875_v41 = vld [vmem:[#allocation77_spill] sm:$0xff]  ;;  %v8050_v14 = vld [vmem:[%s9051_s26 + $0x334] sm:$0xf0] }
 0x306   : > { %v7580_v34 = vmul.f32 -1.442695, %v15855_v44  ;;  %v10683_v23 = vadd.f32 %v10453_v38, %v10451_v39  ;;  %v10687_v55 = vpop.eup %8323  ;;  %v3738_v58 = vsel %vm10608_vm6, %v10535_v33, %v3733_v32  ;;  %vm3836_vm0 = vweird.f32 %v10576_v6 }
 0x307   : > { %v10703_v39 = vadd.f32 %v10486_v36, %v10484_v0  ;;  %v10707_v38 = vadd.f32 %v10558_v63, %v10556_v42  ;;  %v3778_v40 = vsel %vm10696_vm15, %v10493_v60, %v3774_v43  ;;  %v10724_v42 = vadd.f32 %v10582_v1, %v10580_v47  ;;  %vm10761_vm3 = vmor %vm3835_vm14, %vm3836_vm0 }
 0x308   : > { %15856 = vst [vmem:[#allocation64_spill] sm:$0xff] %v10683_v23  ;;  %v10726_v0 = vadd.f32 %v1996_v48, %v1907_v37  ;;  %v10728_v36 = vadd.f32 %v1820_v51, %v1731_v10  ;;  %v3793_v60 = vsel %vm10718_vm1, %v10516_v15, %v3789_v57  ;;  %v3847_v63 = vsub.f32 1.0, %v3846_v53  ;;  %v10777_v51 = vpop.f32.mrf.mxu1  ;;  %v15881_v15 = vld [vmem:[#allocation73_spill] sm:$0xff] }
 0x309   : > { %15861 = vst [vmem:[#allocation65_spill] sm:$0xff] %v10703_v39  ;;  %v3891_v28 = vmul.f32 %v10665_v29, %v10574_v50  ;;  %8329 = vrcp.f32 %v10676_v11  ;;  %v3834_v2 = vadd.f32 %v10576_v6, %v3833_v46  ;;  %v3906_v47 = vmul.f32 %v10687_v55, %v10591_v3  ;;  %v10775_v7 = vpop.f32.mrf.mxu0 }
 0x30a   : > { %15862 = vst [vmem:[#allocation66_spill] sm:$0xff] %v10707_v38  ;;  %v8326_v18 = vpop.eup %8325  ;;  %v10739_v1 = vadd.f32 1.0, %v8322_v59  ;;  %8331 = vpow2.f32 %v7580_v34  ;;  %v10742_v48 = vmul.f32 %v3723_v54, %v15771_v13  ;;  %vm10744_vm2 = vcmp.eq.f32.partialorder %v3839_v24, 8.507059e+37  ;;  %v1909_v13 = vpop.f32.mrf.mxu2 }
 0x30b   : > { %2227 = vmatmul.bf16.gmra.mxu2 %v15857_v4  ;;  %15865 = vst [vmem:[#allocation72_spill] sm:$0xff] %v10724_v42  ;;  %v8328_v37 = vpop.eup %8327  ;;  %v3842_v62 = vor.u32 1.1754944e-38, %v3841_v49  ;;  %v3856_v32 = vand.u32 2147483648, %v10537_v20  ;;  %v10750_v43 = vmul.f32 %v3738_v58, %v15778_v5  ;;  %v3783_v57 = vsel %vm10656_vm11, %v3782_v9, %v3778_v40 }
 0x30c   : > { %2049 = vmatmul.bf16.gmra.mxu0 %v15857_v4  ;;  %15866 = vst [vmem:[#allocation165_spill] sm:$0xff] %v10726_v0  ;;  %v3798_v59 = vsel %vm10661_vm13, %v3797_v52, %v3793_v60  ;;  %v3854_v53 = vand.u32 2147483647, %v10537_v20  ;;  %v1998_v54 = vpop.f32.mrf.mxu3  ;;  %v3848_v5 = vmul.f32 %v10634_v17, %v3847_v63  ;;  %vm3850_vm4 = vweird.f32 %v10537_v20 }
 0x30d   : > { %15867 = vst [vmem:[#allocation166_spill] sm:$0xff] %v10728_v36  ;;  %v3892_v9 = vsub.f32 1.0, %v3891_v28  ;;  %v10767_v45 = vadd.f32 1.0, %v8326_v18  ;;  %v3838_v27 = vsel %vm10761_vm3, %v10576_v6, %v3834_v2  ;;  %v3907_v52 = vsub.f32 1.0, %v3906_v47  ;;  %v15878_v28 = vld [vmem:[#allocation70_spill] sm:$0xff] }
 0x30e   : > { %15870 = vst [vmem:[#allocation167_spill] sm:$0xff] %v10750_v43  ;;  %8333 = vrcp.f32 %v10739_v1  ;;  %v10773_v10 = vadd.f32 1.0, %v8328_v37  ;;  %v10782_v49 = vmul.f32 %v3783_v57, %v10227_v22  ;;  %v10785_v34 = vmul.f32 %v3798_v59, %v10251_v25  ;;  %v15879_v22 = vld [vmem:[#allocation71_spill] sm:$0xff] }
 0x30f   : > { %v10779_v46 = vpop.eup %8329  ;;  %v3857_v58 = vor.u32 1.1754944e-38, %v3856_v32  ;;  %v7581_v6 = vmul.f32 -1.442695, %v15875_v41  ;;  %vm3851_vm5 = vweird.f32 %v10634_v17  ;;  %vm10789_vm6 = vcmp.eq.f32.partialorder %v3854_v53, 8.507059e+37 }
 0x310   : > { %15873 = vst [vmem:[#allocation168_spill] sm:$0xff] %v10782_v49  ;;  %v8332_v40 = vpop.eup %8331  ;;  %v3899_v60 = vand.u32 2147483647, %v10574_v50  ;;  %v3901_v63 = vand.u32 2147483648, %v10574_v50  ;;  %v10797_v18 = vadd.f32 %v15879_v22, %v15878_v28  ;;  %v3843_v25 = vsel %vm10744_vm2, %v3842_v62, %v3838_v27  ;;  %v15882_v62 = vld [vmem:[#allocation74_spill] sm:$0xff]  ;;  %vm10823_vm8 = vmor %vm3850_vm4, %vm3851_vm5  ;;  %v15912_v49 = vld [vmem:[#allocation81_spill] sm:$0xff] }
 0x311   : > { %15874 = vst [vmem:[#allocation169_spill] sm:$0xff] %v10785_v34  ;;  %v3849_v2 = vadd.f32 %v10634_v17, %v3848_v5  ;;  %v3893_v47 = vmul.f32 %v10665_v29, %v3892_v9  ;;  %8335 = vrcp.f32 %v10767_v45  ;;  %v3908_v37 = vmul.f32 %v10687_v55, %v3907_v52  ;;  %v10850_v36 = vpop.f32.mrf.mxu0  ;;  %v15889_v5 = vld [vmem:[#allocation29_spill] sm:$0xff] }
 0x312   : > { %v3951_v32 = vmul.f32 %v10779_v46, %v10676_v11  ;;  %8337 = vrcp.f32 %v10773_v10  ;;  %v10808_v57 = vadd.f32 %v1998_v54, %v1909_v13  ;;  %vm3895_vm7 = vweird.f32 %v10574_v50  ;;  %v10834_v52 = vpop.f32.mrf.mxu2 }
 0x313   : > { %v10811_v59 = vadd.f32 1.0, %v8332_v40  ;;  %8339 = vpow2.f32 %v7581_v6  ;;  %v10815_v53 = vadd.f32 %v15882_v62, %v15881_v15  ;;  %vm10827_vm9 = vcmp.eq.f32.partialorder %v3899_v60, 8.507059e+37  ;;  %v7982_v62 = vld [vmem:[%s9051_s26 + $0x11c] sm:$0xf] }
 0x314   : > { %15880 = vst [vmem:[#allocation77_spill] sm:$0xff] %v10808_v57  ;;  %v10817_v24 = vpop.eup %8333  ;;  %v3914_v54 = vand.u32 2147483647, %v10591_v3  ;;  %v3916_v9 = vand.u32 2147483648, %v10591_v3  ;;  %v7584_v27 = vmul.f32 -1.442695, %v10797_v18  ;;  %v10836_v6 = vpop.f32.mrf.mxu3  ;;  %v10839_v20 = vmul.f32 %v3843_v25, %v15800_v19 }
 0x315   : > { %v3853_v40 = vsel %vm10823_vm8, %v10634_v17, %v3849_v2  ;;  %vm3896_vm10 = vweird.f32 %v10665_v29  ;;  %v3902_v60 = vor.u32 1.1754944e-38, %v3901_v63  ;;  %v3894_v28 = vadd.f32 %v10665_v29, %v3893_v47  ;;  %v7168_v57 = vld [vmem:[%s9051_s26 + $0x138] sm:$0xf0]  ;;  %v10852_v19 = vpop.f32.mrf.mxu1  ;;  %v15888_v25 = vld [vmem:[#allocation28_spill] sm:$0xff]  ;;  %2321 = vmatmul.bf16.gmra.mxu3 %v15889_v5  ;;  %2143 = vmatmul.bf16.gmra.mxu1 %v15889_v5 }
 0x316   : > { %15887 = vst [vmem:[#allocation70_spill] sm:$0xff] %v10839_v20  ;;  %v3909_v22 = vadd.f32 %v10687_v55, %v3908_v37  ;;  %vm3911_vm11 = vweird.f32 %v10687_v55  ;;  %v3952_v15 = vsub.f32 1.0, %v3951_v32  ;;  %vm3910_vm12 = vweird.f32 %v10591_v3  ;;  %vm10871_vm13 = vmor %vm3895_vm7, %vm3896_vm10 }
 0x317   : > { %v10856_v17 = vpop.eup %8335  ;;  %v3966_v63 = vmul.f32 %v10817_v24, %v10739_v1  ;;  %8341 = vrcp.f32 %v10811_v59  ;;  %v7585_v2 = vmul.f32 -1.442695, %v10815_v53  ;;  %vm10875_vm14 = vcmp.eq.f32.partialorder %v3914_v54, 8.507059e+37  ;;  %vm10884_vm15 = vmor %vm3910_vm12, %vm3911_vm11 }
 0x318   : > { %v10865_v47 = vpop.eup %8337  ;;  %v3917_v32 = vor.u32 1.1754944e-38, %v3916_v9  ;;  %v3961_v0 = vand.u32 2147483648, %v10676_v11  ;;  %8343 = vpow2.f32 %v7584_v27  ;;  %v3858_v38 = vsel %vm10789_vm6, %v3857_v58, %v3853_v40 }
 0x319   : > { %v8340_v42 = vpop.eup %8339  ;;  %vm3955_vm0 = vweird.f32 %v10676_v11  ;;  %v3959_v54 = vand.u32 2147483647, %v10676_v11  ;;  %v7171_v39 = vor.u32 %v7982_v62, %v7168_v57  ;;  %v3898_v9 = vsel %vm10871_vm13, %v10665_v29, %v3894_v28 }
 0x31a   : > { %v3913_v33 = vsel %vm10884_vm15, %v10687_v55, %v3909_v22  ;;  %v3953_v58 = vmul.f32 %v10779_v46, %v3952_v15  ;;  %v3976_v27 = vand.u32 2147483648, %v10739_v1  ;;  %v3967_v40 = vsub.f32 1.0, %v3966_v63  ;;  %v10908_v22 = vpop.f32.mrf.mxu2 }
 0x31b   : > { %2232 = vmatmul.bf16.gmra.mxu2 %v15888_v25  ;;  %v4011_v23 = vmul.f32 %v10856_v17, %v10767_v45  ;;  %8345 = vpow2.f32 %v7585_v2  ;;  %v7588_v35 = vmul.f32 -1.442695, %v15896_v16  ;;  %v10902_v57 = vmul.f32 %v3858_v38, %v15813_v21  ;;  %v15900_v38 = vld [vmem:[#allocation83_spill] sm:$0xff] }
 0x31c   : > { %2054 = vmatmul.bf16.gmra.mxu0 %v15888_v25  ;;  %2543 = vmatpush.bf16.msrb.mxu2 %v7171_v39  ;;  %v3962_v29 = vor.u32 1.1754944e-38, %v3961_v0  ;;  %v4026_v28 = vmul.f32 %v10865_v47, %v10773_v10  ;;  %v10906_v55 = vadd.f32 1.0, %v8340_v42  ;;  %v10910_v15 = vpop.f32.mrf.mxu3  ;;  %v3903_v63 = vsel %vm10827_vm9, %v3902_v60, %v3898_v9  ;;  %v10929_v60 = vpop.f32.mrf.mxu0  ;;  %v7986_v25 = vld [vmem:[%s9051_s26 + $0x134] sm:$0xf0] }
 0x31d   : > { %15897 = vst [vmem:[#allocation71_spill] sm:$0xff] %v10902_v57  ;;  %v10912_v62 = vpop.eup %8341  ;;  %vm10916_vm1 = vcmp.eq.f32.partialorder %v3959_v54, 8.507059e+37  ;;  %vm3970_vm2 = vweird.f32 %v10739_v1  ;;  %v3974_v21 = vand.u32 2147483647, %v10739_v1  ;;  %v7589_v42 = vmul.f32 -1.442695, %v15900_v38  ;;  %v10931_v50 = vpop.f32.mrf.mxu1 }
 0x31e   : > { %v8344_v0 = vpop.eup %8343  ;;  %v3918_v2 = vsel %vm10875_vm14, %v3917_v32, %v3913_v33  ;;  %vm3956_vm3 = vweird.f32 %v10779_v46  ;;  %v10926_v37 = vor.u32 1.1754944e-38, %v3976_v27  ;;  %v4021_v13 = vand.u32 2147483648, %v10767_v45 }
 0x31f   : > { %v3954_v54 = vadd.f32 %v10779_v46, %v3953_v58  ;;  %v3968_v9 = vmul.f32 %v10817_v24, %v3967_v40  ;;  %v4012_v12 = vsub.f32 1.0, %v4011_v23  ;;  %8347 = vpow2.f32 %v7588_v35  ;;  %v7424_v35 = vld [vmem:[%s9051_s26 + $0x338] sm:$0xf0]  ;;  %vm10954_vm5 = vmor %vm3955_vm0, %vm3956_vm3 }
 0x320   : > { %v10936_v3 = vmul.f32 %v3903_v63, %v10400_v61  ;;  %v4019_v32 = vand.u32 2147483647, %v10767_v45  ;;  %v4027_v33 = vsub.f32 1.0, %v4026_v28  ;;  %8349 = vrcp.f32 %v10906_v55  ;;  %v8046_v61 = vld [vmem:[%s9051_s26 + $0x31c] sm:$0xf] }
 0x321   : > { %v8346_v27 = vpop.eup %8345  ;;  %vm4015_vm4 = vweird.f32 %v10767_v45  ;;  %v4071_v5 = vmul.f32 %v10912_v62, %v10811_v59  ;;  %v10943_v58 = vadd.f32 1.0, %v8344_v0  ;;  %8351 = vpow2.f32 %v7589_v42 }
 0x322   : > { %15901 = vst [vmem:[#allocation73_spill] sm:$0xff] %v10936_v3  ;;  %v10948_v23 = vmul.f32 %v3918_v2, %v10436_v31  ;;  %vm3971_vm6 = vweird.f32 %v10817_v24  ;;  %vm10959_vm7 = vcmp.eq.f32.partialorder %v3974_v21, 8.507059e+37  ;;  %v10963_v63 = vor.u32 1.1754944e-38, %v4021_v13  ;;  %v7166_v31 = vld [vmem:[%s9051_s26 + $0x118] sm:$0xf]  ;;  %v2193_v57 = vpop.f32.mrf.mxu2 }
 0x323   : > { %v4036_v42 = vand.u32 2147483648, %v10773_v10  ;;  %v3958_v0 = vsel %vm10954_vm5, %v10779_v46, %v3954_v54  ;;  %v3969_v11 = vadd.f32 %v10817_v24, %v3968_v9  ;;  %v4013_v2 = vmul.f32 %v10856_v17, %v4012_v12  ;;  %v7422_v21 = vld [vmem:[%s9051_s26 + $0x318] sm:$0xf]  ;;  %v15907_v12 = vld [vmem:[#allocation78_spill] sm:$0xff]  ;;  %vm10994_vm10 = vmor %vm3970_vm2, %vm3971_vm6 }
 0x324   : > { %15902 = vst [vmem:[#allocation74_spill] sm:$0xff] %v10948_v23  ;;  %vm4030_vm8 = vweird.f32 %v10773_v10  ;;  %v4028_v4 = vmul.f32 %v10865_v47, %v4027_v33  ;;  %v10978_v23 = vadd.f32 1.0, %v8346_v27  ;;  %v7427_v3 = vor.u32 %v8046_v61, %v7424_v35  ;;  %v2282_v20 = vpop.f32.mrf.mxu3  ;;  %v15908_v54 = vld [vmem:[#allocation79_spill] sm:$0xff] }
 0x325   : > { %v8348_v40 = vpop.eup %8347  ;;  %vm4016_vm9 = vweird.f32 %v10856_v17  ;;  %v4072_v46 = vsub.f32 1.0, %v4071_v5  ;;  %8353 = vrcp.f32 %v10943_v58  ;;  %v10984_v9 = vadd.f32 %v15908_v54, %v15907_v12  ;;  %v2017_v12 = vpop.f32.mrf.mxu0 }
 0x326   : > { %v10986_v34 = vpop.eup %8349  ;;  %v3963_v33 = vsel %vm10916_vm1, %v3962_v29, %v3958_v0  ;;  %v10998_v5 = vor.u32 1.1754944e-38, %v4036_v42  ;;  %2632 = vmatpush.bf16.msrb.mxu3 %v7427_v3  ;;  %v7167_v61 = vor.u32 %v7986_v25, %v7166_v31  ;;  %v7423_v35 = vor.u32 %v8050_v14, %v7422_v21  ;;  %v2106_v54 = vpop.f32.mrf.mxu1  ;;  %v15911_v0 = vld [vmem:[#allocation80_spill] sm:$0xff]  ;;  %v15913_v42 = vld [vmem:[#allocation30_spill] sm:$0xff]  ;;  %v15914_v3 = vld [vmem:[#allocation31_spill] sm:$0xff] }
 0x327   : > { %v8352_v13 = vpop.eup %8351  ;;  %v3973_v29 = vsel %vm10994_vm10, %v10817_v24, %v3969_v11  ;;  %v4014_v39 = vadd.f32 %v10856_v17, %v4013_v2  ;;  %v4079_v1 = vand.u32 2147483647, %v10811_v59  ;;  %v11007_v43 = vadd.f32 %v15912_v49, %v15911_v0  ;;  %2148 = vmatmul.bf16.gmra.mxu1 %v15914_v3  ;;  %2326 = vmatmul.bf16.gmra.mxu3 %v15914_v3  ;;  %vm11036_vm13 = vmor %vm4015_vm4, %vm4016_vm9  ;;  %v15942_v14 = vld [vmem:[#allocation32_spill] sm:$0xff]  ;;  %v8042_v3 = vld [vmem:[%s9051_s26 + $0x2f4] sm:$0xf0] }
 0x328   : > { %vm11011_vm11 = vcmp.eq.f32.partialorder %v4019_v32, 8.507059e+37  ;;  %v4029_v25 = vadd.f32 %v10865_v47, %v4028_v4  ;;  %vm4031_vm12 = vweird.f32 %v10865_v47  ;;  %8355 = vrcp.f32 %v10978_v23  ;;  %2365 = vmatpush.bf16.msrb.mxu0 %v7167_v61  ;;  %2454 = vmatpush.bf16.msrb.mxu1 %v7423_v35  ;;  %v15925_v35 = vld [vmem:[#allocation159_spill] sm:$0xff] }
 0x329   : > { %v11018_v24 = vadd.f32 1.0, %v8348_v40  ;;  %v4073_v49 = vmul.f32 %v10912_v62, %v4072_v46  ;;  %v7592_v31 = vmul.f32 -1.442695, %v10984_v9  ;;  %v11024_v32 = vadd.f32 %v10777_v51, %v10775_v7  ;;  %vm11061_vm14 = vmor %vm4030_vm8, %vm4031_vm12 }
 0x32a   : > { %v11028_v11 = vadd.f32 %v10836_v6, %v10834_v52  ;;  %v4081_v2 = vand.u32 2147483648, %v10811_v59  ;;  %v4086_v7 = vmul.f32 %v10986_v34, %v10906_v55  ;;  %v11043_v51 = vadd.f32 1.0, %v8352_v13  ;;  %v2195_v28 = vpop.f32.mrf.mxu2  ;;  %v15941_v13 = vld [vmem:[#allocation89_spill] sm:$0xff] }
 0x32b   : > { %15917 = vst [vmem:[#allocation82_spill] sm:$0xff] %v11024_v32  ;;  %2237 = vmatmul.bf16.gmra.mxu2 %v15913_v42  ;;  %v11047_v52 = vadd.f32 %v10852_v19, %v10850_v36  ;;  %v11049_v6 = vpop.eup %8353  ;;  %v3978_v45 = vsel %vm10959_vm7, %v10926_v37, %v3973_v29  ;;  %v4018_v21 = vsel %vm11036_vm13, %v10856_v17, %v4014_v39  ;;  %v7593_v36 = vmul.f32 -1.442695, %v11007_v43 }
 0x32c   : > { %2059 = vmatmul.bf16.gmra.mxu0 %v15913_v42  ;;  %15918 = vst [vmem:[#allocation83_spill] sm:$0xff] %v11028_v11  ;;  %v11068_v19 = vadd.f32 %v10910_v15, %v10908_v22  ;;  %v4033_v37 = vsel %vm11061_vm14, %v10865_v47, %v4029_v25  ;;  %vm4076_vm15 = vweird.f32 %v10912_v62  ;;  %8357 = vrcp.f32 %v11018_v24  ;;  %v2284_v40 = vpop.f32.mrf.mxu3 }
 0x32d   : > { %15921 = vst [vmem:[#allocation78_spill] sm:$0xff] %v11047_v52  ;;  %v2105_v17 = vadd.f32 %v10931_v50, %v10929_v60  ;;  %v4074_v46 = vadd.f32 %v10912_v62, %v4073_v49  ;;  %8359 = vpow2.f32 %v7592_v31  ;;  %v2283_v27 = vadd.f32 %v2282_v20, %v2193_v57  ;;  %v11084_v39 = vpop.f32.mrf.mxu0  ;;  %v15926_v50 = vld [vmem:[#allocation41_spill] sm:$0xff]  ;;  %v15927_v20 = vld [vmem:[#allocation42_spill] sm:$0xff] }
 0x32e   : > { %15924 = vst [vmem:[#allocation79_spill] sm:$0xff] %v11068_v19  ;;  %v2107_v61 = vadd.f32 %v2106_v54, %v2017_v12  ;;  %v11078_v22 = vpop.eup %8355  ;;  %v4087_v15 = vsub.f32 1.0, %v4086_v7  ;;  %v4131_v47 = vmul.f32 %v11049_v6, %v10943_v58  ;;  %8361 = vrcp.f32 %v11043_v51  ;;  %v11086_v60 = vpop.f32.mrf.mxu1  ;;  %v15928_v54 = vld [vmem:[#allocation67_spill] sm:$0xff] }
 0x32f   : > { %v5278_v29 = vmul.f32 %v15925_v35, %v2105_v17  ;;  %8363 = vpow2.f32 %v7593_v36  ;;  %v11089_v0 = vmul.f32 %v15926_v50, %v2283_v27  ;;  %v11092_v12 = vadd.f32 %v2284_v40, %v2195_v28  ;;  %v7974_v28 = vld [vmem:[%s9051_s26 + $0xdc] sm:$0xf] }
 0x330   : > { %v5282_v57 = vmul.f32 %v15927_v20, %v2107_v61  ;;  %v11095_v25 = vmul.f32 %v3963_v33, %v15928_v54  ;;  %v15929_v49 = vand.u32 2147483647, %v10773_v10  ;;  %vm4075_vm1 = vweird.f32 %v10811_v59  ;;  %v7136_v35 = vld [vmem:[%s9051_s26 + $0xf8] sm:$0xf0]  ;;  %v15972_v20 = vld [vmem:[#allocation93_spill] sm:$0xff] }
 0x331   : > { %v4096_v31 = vand.u32 2147483648, %v10906_v55  ;;  %v4023_v4 = vsel %vm11011_vm11, %v10963_v63, %v4018_v21  ;;  %vm11105_vm2 = vcmp.eq.f32.partialorder %v4079_v1, 8.507059e+37  ;;  %v4146_v33 = vmul.f32 %v11078_v22, %v10978_v23  ;;  %vm11118_vm3 = vmor %vm4075_vm1, %vm4076_vm15 }
 0x332   : > { %vm4035_vm0 = vcmp.eq.f32.partialorder %v15929_v49, 8.507059e+37  ;;  %v11111_v10 = vpop.eup %8357  ;;  %v11114_v59 = vmul.f32 %v3978_v45, %v15837_v30  ;;  %v4082_v63 = vor.u32 1.1754944e-38, %v4081_v2  ;;  %v11123_v1 = vpack.c.bf16 %v5282_v57, %v5278_v29  ;;  %v11141_v29 = vpop.f32.mrf.mxu2 }
 0x333   : > { %v4038_v7 = vsel %vm4035_vm0, %v10998_v5, %v4033_v37  ;;  %v4094_v5 = vand.u32 2147483647, %v10906_v55  ;;  %v8360_v21 = vpop.eup %8359  ;;  %v4078_v36 = vsel %vm11118_vm3, %v10912_v62, %v4074_v46  ;;  %v4088_v30 = vmul.f32 %v10986_v34, %v4087_v15  ;;  %v15936_v37 = vld [vmem:[#allocation88_spill] sm:$0xff] }
 0x334   : > { %15932 = vst [vmem:[#allocation80_spill] sm:$0xff] %v11114_v59  ;;  %v4132_v45 = vsub.f32 1.0, %v4131_v47  ;;  %v7596_v17 = vmul.f32 -1.442695, %v15936_v37  ;;  %v11131_v40 = vpop.eup %8361  ;;  %v11134_v27 = vmul.f32 %v4023_v4, %v10588_v8  ;;  %v11137_v2 = vmul.f32 %v4038_v7, %v10595_v56  ;;  %v11143_v62 = vpop.f32.mrf.mxu3 }
 0x335   : > { %15935 = vst [vmem:[#allocation81_spill] sm:$0xff] %v11123_v1  ;;  %vm4090_vm4 = vweird.f32 %v10906_v55  ;;  %v4097_v61 = vor.u32 1.1754944e-38, %v4096_v31  ;;  %v8364_v46 = vpop.eup %8363  ;;  %v4139_v15 = vand.u32 2147483647, %v10943_v58  ;;  %v4141_v47 = vand.u32 2147483648, %v10943_v58  ;;  %v11158_v49 = vpop.f32.mrf.mxu0  ;;  %v15962_v1 = vld [vmem:[#allocation86_spill] sm:$0xff] }
 0x336   : > { %15937 = vst [vmem:[#allocation159_spill] sm:$0xff] %v11134_v27  ;;  %v4147_v50 = vsub.f32 1.0, %v4146_v33  ;;  %v4191_v8 = vmul.f32 %v11111_v10, %v11018_v24  ;;  %v4083_v56 = vsel %vm11105_vm2, %v4082_v63, %v4078_v36  ;;  %vm4091_vm5 = vweird.f32 %v10986_v34  ;;  %v11160_v31 = vpop.f32.mrf.mxu1  ;;  %v15943_v63 = vld [vmem:[#allocation33_spill] sm:$0xff]  ;;  %v15944_v36 = vld [vmem:[#allocation84_spill] sm:$0xff] }
 0x337   : > { %15938 = vst [vmem:[#allocation41_spill] sm:$0xff] %v11137_v2  ;;  %vm11152_vm6 = vcmp.eq.f32.partialorder %v4094_v5, 8.507059e+37  ;;  %v11156_v57 = vadd.f32 1.0, %v8360_v21  ;;  %v7139_v54 = vor.u32 %v7974_v28, %v7136_v35  ;;  %v4089_v4 = vadd.f32 %v10986_v34, %v4088_v30  ;;  %2153 = vmatmul.bf16.gmra.mxu1 %v15943_v63  ;;  %v15945_v28 = vld [vmem:[#allocation85_spill] sm:$0xff]  ;;  %2331 = vmatmul.bf16.gmra.mxu3 %v15943_v63  ;;  %vm11190_vm9 = vmor %vm4090_vm4, %vm4091_vm5  ;;  %v15963_v63 = vld [vmem:[#allocation87_spill] sm:$0xff] }
 0x338   : > { %v4133_v7 = vmul.f32 %v11049_v6, %v4132_v45  ;;  %8365 = vpow2.f32 %v7596_v17  ;;  %v7597_v33 = vmul.f32 -1.442695, %v15941_v13  ;;  %vm4135_vm7 = vweird.f32 %v10943_v58 }
 0x339   : > { %v4206_v5 = vmul.f32 %v11131_v40, %v11043_v51  ;;  %v11170_v21 = vadd.f32 1.0, %v8364_v46  ;;  %v11174_v35 = vadd.f32 %v15945_v28, %v15944_v36  ;;  %2544 = vmatpush.bf16.msrb.mxu2 %v7139_v54  ;;  %vm11176_vm8 = vcmp.eq.f32.partialorder %v4139_v15, 8.507059e+37 }
 0x33a   : > { %v4142_v45 = vor.u32 1.1754944e-38, %v4141_v47  ;;  %v4148_v17 = vmul.f32 %v11078_v22, %v4147_v50  ;;  %v4192_v19 = vsub.f32 1.0, %v4191_v8  ;;  %v11184_v46 = vmul.f32 %v4083_v56, %v15855_v44  ;;  %v11205_v36 = vpop.f32.mrf.mxu2 }
 0x33b   : > { %2242 = vmatmul.bf16.gmra.mxu2 %v15942_v14  ;;  %v4154_v47 = vand.u32 2147483647, %v10978_v23  ;;  %v4156_v50 = vand.u32 2147483648, %v10978_v23  ;;  %8367 = vrcp.f32 %v11156_v57  ;;  %v4093_v8 = vsel %vm11190_vm9, %v10986_v34, %v4089_v4 }
 0x33c   : > { %2064 = vmatmul.bf16.gmra.mxu0 %v15942_v14  ;;  %15948 = vst [vmem:[#allocation42_spill] sm:$0xff] %v11184_v46  ;;  %v4134_v44 = vadd.f32 %v11049_v6, %v4133_v7  ;;  %vm4136_vm10 = vweird.f32 %v11049_v6  ;;  %8369 = vpow2.f32 %v7597_v33  ;;  %v4199_v55 = vand.u32 2147483647, %v11018_v24  ;;  %v11207_v28 = vpop.f32.mrf.mxu3 }
 0x33d   : > { %v4207_v56 = vsub.f32 1.0, %v4206_v5  ;;  %8371 = vrcp.f32 %v11170_v21  ;;  %v7600_v54 = vmul.f32 -1.442695, %v11174_v35  ;;  %v4149_v15 = vadd.f32 %v11078_v22, %v4148_v17  ;;  %vm11215_vm13 = vmor %vm4135_vm7, %vm4136_vm10  ;;  %v11225_v11 = vpop.f32.mrf.mxu0 }
 0x33e   : > { %v8366_v52 = vpop.eup %8365  ;;  %vm4150_vm11 = vweird.f32 %v10978_v23  ;;  %vm4151_vm12 = vweird.f32 %v11078_v22  ;;  %v4193_v34 = vmul.f32 %v11111_v10, %v4192_v19  ;;  %vm11219_vm14 = vcmp.eq.f32.partialorder %v4154_v47, 8.507059e+37  ;;  %v11227_v32 = vpop.f32.mrf.mxu1 }
 0x33f   : > { %v4157_v33 = vor.u32 1.1754944e-38, %v4156_v50  ;;  %v4201_v5 = vand.u32 2147483648, %v11018_v24  ;;  %v4214_v17 = vand.u32 2147483647, %v11043_v51  ;;  %v4098_v58 = vsel %vm11152_vm6, %v4097_v61, %v4093_v8  ;;  %vm11240_vm1 = vmor %vm4150_vm11, %vm4151_vm12 }
 0x340   : > { %v4138_v19 = vsel %vm11215_vm13, %v11049_v6, %v4134_v44  ;;  %vm4195_vm15 = vweird.f32 %v11018_v24  ;;  %vm4210_vm0 = vweird.f32 %v11043_v51  ;;  %vm11244_vm2 = vcmp.eq.f32.partialorder %v4199_v55, 8.507059e+37 }
 0x341   : > { %v11236_v47 = vpop.eup %8367  ;;  %v4208_v61 = vmul.f32 %v11131_v40, %v4207_v56  ;;  %v11249_v6 = vadd.f32 1.0, %v8366_v52  ;;  %8373 = vpow2.f32 %v7600_v54  ;;  %v4153_v23 = vsel %vm11240_vm1, %v11078_v22, %v4149_v15  ;;  %v8038_v22 = vld [vmem:[%s9051_s26 + $0x2dc] sm:$0xf] }
 0x342   : > { %v8370_v8 = vpop.eup %8369  ;;  %v4194_v44 = vadd.f32 %v11111_v10, %v4193_v34  ;;  %vm4196_vm3 = vweird.f32 %v11111_v10  ;;  %v4216_v55 = vand.u32 2147483648, %v11043_v51  ;;  %v4143_v52 = vsel %vm11176_vm8, %v4142_v45, %v4138_v19  ;;  %v7392_v45 = vld [vmem:[%s9051_s26 + $0x2f8] sm:$0xf0] }
 0x343   : > { %v11257_v4 = vpop.eup %8371  ;;  %v4202_v56 = vor.u32 1.1754944e-38, %v4201_v5  ;;  %vm11261_vm4 = vcmp.eq.f32.partialorder %v4214_v17, 8.507059e+37  ;;  %v4261_v50 = vand.u32 2147483648, %v11156_v57  ;;  %v11268_v15 = vmul.f32 %v4098_v58, %v15875_v41  ;;  %v7134_v5 = vld [vmem:[%s9051_s26 + $0xd8] sm:$0xf]  ;;  %vm11286_vm6 = vmor %vm4195_vm15, %vm4196_vm3 }
 0x344   : > { %vm4211_vm5 = vweird.f32 %v11131_v40  ;;  %v4251_v34 = vmul.f32 %v11236_v47, %v11156_v57  ;;  %v11275_v30 = vadd.f32 %v15963_v63, %v15962_v1  ;;  %v7978_v17 = vld [vmem:[%s9051_s26 + $0xf4] sm:$0xf0]  ;;  %v4158_v19 = vsel %vm11219_vm14, %v4157_v33, %v4153_v23  ;;  %v11294_v63 = vpop.f32.mrf.mxu2  ;;  %v11296_v14 = vpop.f32.mrf.mxu3 }
 0x345   : > { %15961 = vst [vmem:[#allocation67_spill] sm:$0xff] %v11268_v15  ;;  %v4209_v58 = vadd.f32 %v11131_v40, %v4208_v61  ;;  %8375 = vrcp.f32 %v11249_v6  ;;  %v11292_v1 = vadd.f32 1.0, %v8370_v8  ;;  %v11299_v7 = vmul.f32 %v4143_v52, %v10797_v18  ;;  %v7390_v61 = vld [vmem:[%s9051_s26 + $0x2d8] sm:$0xf]  ;;  %v2027_v18 = vpop.f32.mrf.mxu0  ;;  %vm11320_vm7 = vmor %vm4210_vm0, %vm4211_vm5 }
 0x346   : > { %v4198_v24 = vsel %vm11286_vm6, %v11111_v10, %v4194_v44  ;;  %v4217_v33 = vor.u32 1.1754944e-38, %v4216_v55  ;;  %v11306_v23 = vmul.f32 %v11257_v4, %v11170_v21  ;;  %v11311_v15 = vor.u32 1.1754944e-38, %v4261_v50  ;;  %v2116_v52 = vpop.f32.mrf.mxu1  ;;  %v7102_v10 = vld [vmem:[%s9051_s26 + $0x98] sm:$0xf]  ;;  %v15978_v55 = vld [vmem:[#allocation90_spill] sm:$0xff] }
 0x347   : > { %15966 = vst [vmem:[#allocation88_spill] sm:$0xff] %v11299_v7  ;;  %v8374_v8 = vpop.eup %8373  ;;  %v7395_v46 = vor.u32 %v8038_v22, %v7392_v45  ;;  %v7135_v2 = vor.u32 %v7978_v17, %v7134_v5  ;;  %v11314_v7 = vmul.f32 %v4158_v19, %v10815_v53  ;;  %v4252_v44 = vsub.f32 1.0, %v4251_v34  ;;  %v15970_v22 = vld [vmem:[#allocation37_spill] sm:$0xff]  ;;  %v15971_v45 = vld [vmem:[#allocation39_spill] sm:$0xff] }
 0x348   : > { %v7601_v50 = vmul.f32 -1.442695, %v11275_v30  ;;  %2158 = vmatmul.bf16.gmra.mxu1 %v15971_v45  ;;  %v11330_v53 = vsel %vm11244_vm2, %v4202_v56, %v4198_v24  ;;  %v4213_v51 = vsel %vm11320_vm7, %v11131_v40, %v4209_v58  ;;  %8377 = vrcp.f32 %v11292_v1  ;;  %2336 = vmatmul.bf16.gmra.mxu3 %v15971_v45  ;;  %v7966_v24 = vld [vmem:[%s9051_s26 + $0x9c] sm:$0xf] }
 0x349   : > { %15967 = vst [vmem:[#allocation89_spill] sm:$0xff] %v11314_v7  ;;  %2633 = vmatpush.bf16.msrb.mxu3 %v7395_v46  ;;  %2366 = vmatpush.bf16.msrb.mxu0 %v7135_v2  ;;  %v7391_v34 = vor.u32 %v8042_v3, %v7390_v61  ;;  %v11338_v19 = vadd.f32 1.0, %v8374_v8  ;;  %v7604_v56 = vmul.f32 -1.442695, %v15972_v20  ;;  %v15973_v3 = vld [vmem:[#allocation43_spill] sm:$0xff]  ;;  %v2110_v46 = vadd.f32 %v11086_v60, %v11084_v39  ;;  %v15982_v7 = vld [vmem:[#allocation50_spill] sm:$0xff] }
 0x34a   : > { %v5283_v2 = vmul.f32 %v15973_v3, %v11092_v12  ;;  %v2288_v41 = vadd.f32 %v11143_v62, %v11141_v29  ;;  %v2112_v58 = vadd.f32 %v11160_v31, %v11158_v49  ;;  %v7104_v61 = vld [vmem:[%s9051_s26 + $0xb8] sm:$0xf0]  ;;  %v11357_v8 = vsel %vm11261_vm4, %v4217_v33, %v4213_v51  ;;  %v15975_v31 = vld [vmem:[#allocation44_spill] sm:$0xff]  ;;  %v15976_v33 = vld [vmem:[#allocation46_spill] sm:$0xff] }
 0x34b   : > { %2247 = vmatmul.bf16.gmra.mxu2 %v15970_v22  ;;  %v11343_v40 = vpop.eup %8375  ;;  %2455 = vmatpush.bf16.msrb.mxu1 %v7391_v34  ;;  %v11360_v12 = vmul.f32 %v11236_v47, %v4252_v44  ;;  %v2290_v39 = vadd.f32 %v11207_v28, %v11205_v36  ;;  %v2115_v60 = vadd.f32 %v11227_v32, %v11225_v11  ;;  %v8030_v29 = vld [vmem:[%s9051_s26 + $0x29c] sm:$0xf]  ;;  %8379 = vpow2.f32 %v7601_v50  ;;  %v7970_v34 = vld [vmem:[%s9051_s26 + $0xb4] sm:$0xf0]  ;;  %v15977_v11 = vld [vmem:[#allocation96_spill] sm:$0xff] }
 0x34c   : > { %2069 = vmatmul.bf16.gmra.mxu0 %v15970_v22  ;;  %v7360_v62 = vld [vmem:[%s9051_s26 + $0x2b8] sm:$0xf0]  ;;  %v11370_v49 = vpack.c.bf16 %v5283_v2, %v11089_v0  ;;  %v5286_v54 = vmul.f32 %v15975_v31, %v2110_v46  ;;  %v5287_v51 = vmul.f32 %v15976_v33, %v2288_v41  ;;  %v7358_v44 = vld [vmem:[%s9051_s26 + $0x298] sm:$0xf]  ;;  %v2205_v36 = vpop.f32.mrf.mxu2  ;;  %v2294_v28 = vpop.f32.mrf.mxu3  ;;  %v11379_v32 = vmul.f32 %v11343_v40, %v11249_v6  ;;  %v15979_v0 = vld [vmem:[#allocation92_spill] sm:$0xff] }
 0x34d   : > { %v8034_v3 = vld [vmem:[%s9051_s26 + $0x2b4] sm:$0xf0]  ;;  %v7605_v50 = vmul.f32 -1.442695, %v15977_v11  ;;  %v11384_v2 = vadd.f32 %v15979_v0, %v15978_v55  ;;  %v15980_v46 = vld [vmem:[#allocation162_spill] sm:$0xff]  ;;  %vm4256_vm8 = vweird.f32 %v11236_v47  ;;  %v15981_v33 = vld [vmem:[#allocation164_spill] sm:$0xff]  ;;  %v7107_v17 = vor.u32 %v7966_v24, %v7104_v61  ;;  %v2030_v45 = vpop.f32.mrf.mxu0 }
 0x34e   : > { %15974 = vst [vmem:[#allocation84_spill] sm:$0xff] %v11370_v49  ;;  %v5291_v41 = vmul.f32 %v15980_v46, %v2290_v39  ;;  %v11387_v31 = vpop.eup %8377  ;;  %v5294_v5 = vmul.f32 %v15981_v33, %v2115_v60  ;;  %v7363_v42 = vor.u32 %v8030_v29, %v7360_v62  ;;  %v2293_v49 = vadd.f32 %v11296_v14, %v11294_v63  ;;  %v2119_v22 = vpop.f32.mrf.mxu1  ;;  %v7958_v55 = vld [vmem:[%s9051_s26 + $0x5c] sm:$0xf]  ;;  %v7070_v60 = vld [vmem:[%s9051_s26 + $0x58] sm:$0xf]  ;;  %v15983_v14 = vld [vmem:[#allocation54_spill] sm:$0xff] }
 0x34f   : > { %v7072_v0 = vld [vmem:[%s9051_s26 + $0x78] sm:$0xf0]  ;;  %v5290_v39 = vmul.f32 %v15982_v7, %v2112_v58  ;;  %v7103_v46 = vor.u32 %v7970_v34, %v7102_v10  ;;  %v7359_v27 = vor.u32 %v8034_v3, %v7358_v44  ;;  %v2117_v59 = vadd.f32 %v2116_v52, %v2027_v18  ;;  %2545 = vmatpush.bf16.msrb.mxu2 %v7107_v17  ;;  %v7962_v29 = vld [vmem:[%s9051_s26 + $0x74] sm:$0xf0]  ;;  %v15986_v44 = vld [vmem:[#allocation58_spill] sm:$0xff] }
 0x350   : > { %v8022_v11 = vld [vmem:[%s9051_s26 + $0x25c] sm:$0xf]  ;;  %vm4255_vm9 = vweird.f32 %v11156_v57  ;;  %8381 = vrcp.f32 %v11338_v19  ;;  %2634 = vmatpush.bf16.msrb.mxu3 %v7363_v42  ;;  %v5295_v63 = vmul.f32 %v15983_v14, %v2293_v49  ;;  %v2295_v24 = vadd.f32 %v2294_v28, %v2205_v36  ;;  %v7326_v62 = vld [vmem:[%s9051_s26 + $0x258] sm:$0xf] }
 0x351   : > { %v7328_v20 = vld [vmem:[%s9051_s26 + $0x278] sm:$0xf0]  ;;  %v2120_v61 = vadd.f32 %v2119_v22, %v2030_v45  ;;  %v8026_v7 = vld [vmem:[%s9051_s26 + $0x274] sm:$0xf0]  ;;  %v11407_v58 = vmul.f32 %v11387_v31, %v11292_v1  ;;  %8383 = vpow2.f32 %v7604_v56  ;;  %2367 = vmatpush.bf16.msrb.mxu0 %v7103_v46  ;;  %2456 = vmatpush.bf16.msrb.mxu1 %v7359_v27  ;;  %v7075_v10 = vor.u32 %v7958_v55, %v7072_v0  ;;  %v8380_v34 = vpop.eup %8379  ;;  %vm11466_vm13 = vmor %vm4255_vm9, %vm4256_vm8 }
 0x352   : > { %v15984_v18 = vld [vmem:[#allocation35_spill] sm:$0xff]  ;;  %v7608_v42 = vmul.f32 -1.442695, %v11384_v2  ;;  %v7331_v45 = vor.u32 %v8022_v11, %v7328_v20  ;;  %v4312_v3 = vsub.f32 1.0, %v11379_v32  ;;  %v7071_v36 = vor.u32 %v7962_v29, %v7070_v60 }
 0x353   : > { %v5298_v52 = vmul.f32 %v15984_v18, %v2117_v59  ;;  %v15985_v17 = vld [vmem:[#allocation55_spill] sm:$0xff]  ;;  %v5302_v22 = vmul.f32 %v15986_v44, %v2120_v61  ;;  %v7327_v28 = vor.u32 %v8026_v7, %v7326_v62  ;;  %v11414_v33 = vpack.c.bf16 %v5290_v39, %v5286_v54  ;;  %2546 = vmatpush.bf16.msrb.mxu2 %v7075_v10 }
 0x354   : > { %v5299_v49 = vmul.f32 %v15985_v17, %v2295_v24  ;;  %8385 = vpow2.f32 %v7605_v50  ;;  %v2208_v56 = vpop.f32.mrf.mxu2  ;;  %v2297_v27 = vpop.f32.mrf.mxu3  ;;  %2635 = vmatpush.bf16.msrb.mxu3 %v7331_v45  ;;  %v11416_v59 = vpack.c.bf16 %v5291_v41, %v5287_v51  ;;  %v11424_v20 = vmul.f32 %v11330_v53, %v15896_v16  ;;  %v15994_v51 = vld [vmem:[#allocation91_spill] sm:$0xff]  ;;  %v15995_v50 = vld [vmem:[#allocation94_spill] sm:$0xff] }
 0x355   : > { %15987 = vst [vmem:[#allocation85_spill] sm:$0xff] %v11414_v33  ;;  %v11418_v55 = vpack.c.bf16 %v5298_v52, %v5294_v5  ;;  %v15991_v32 = vand.u32 2147483647, %v11156_v57  ;;  %vm4270_vm11 = vweird.f32 %v11170_v21  ;;  %v11433_v11 = vadd.f32 1.0, %v8380_v34  ;;  %2368 = vmatpush.bf16.msrb.mxu0 %v7071_v36  ;;  %2457 = vmatpush.bf16.msrb.mxu1 %v7327_v28  ;;  %v2032_v60 = vpop.f32.mrf.mxu0  ;;  %v15997_v62 = vld [vmem:[#allocation59_spill] sm:$0xff]  ;;  %v16077_v33 = vld [vmem:[#allocation106_spill] sm:$0xff] }
 0x356   : > { %15988 = vst [vmem:[#allocation86_spill] sm:$0xff] %v11416_v59  ;;  %v11420_v0 = vpack.c.bf16 %v5299_v49, %v5295_v63  ;;  %v11437_v5 = vadd.f32 %v15995_v50, %v15994_v51  ;;  %v2298_v41 = vadd.f32 %v2297_v27, %v2208_v56  ;;  %v11439_v39 = vpop.eup %8381  ;;  %v11443_v16 = vmul.f32 %v11357_v8, %v15900_v38  ;;  %v2121_v14 = vpop.f32.mrf.mxu1  ;;  %v15998_v38 = vld [vmem:[#allocation45_spill] sm:$0xff]  ;;  %v15999_v8 = vld [vmem:[#allocation47_spill] sm:$0xff]  ;;  %v16003_v49 = vld [vmem:[#allocation60_spill] sm:$0xff] }
 0x357   : > { %15989 = vst [vmem:[#allocation87_spill] sm:$0xff] %v11418_v55  ;;  %vm11428_vm10 = vcmp.eq.f32.partialorder %v15991_v32, 8.507059e+37  ;;  %v4254_v53 = vadd.f32 %v11236_v47, %v11360_v12  ;;  %v4321_v46 = vand.u32 2147483648, %v11249_v6  ;;  %8387 = vpow2.f32 %v7608_v42  ;;  %v8384_v63 = vpop.eup %8383  ;;  %v16022_v27 = vld [vmem:[#allocation100_spill] sm:$0xff] }
 0x358   : > { %15990 = vst [vmem:[#allocation43_spill] sm:$0xff] %v11420_v0  ;;  %v15996_v24 = vand.u32 2147483648, %v11170_v21  ;;  %v4319_v29 = vand.u32 2147483647, %v11249_v6  ;;  %v5303_v7 = vmul.f32 %v15997_v62, %v2298_v41  ;;  %v2122_v18 = vadd.f32 %v2121_v14, %v2032_v60  ;;  %2163 = vmatmul.bf16.gmra.mxu1 %v15999_v8  ;;  %2341 = vmatmul.bf16.gmra.mxu3 %v15999_v8  ;;  %v16047_v0 = vld [vmem:[#allocation62_spill] sm:$0xff]  ;;  %v16048_v55 = vld [vmem:[#allocation68_spill] sm:$0xff] }
 0x359   : > { %v16000_v12 = vsub.f32 1.0, %v11306_v23  ;;  %v4313_v10 = vmul.f32 %v11343_v40, %v4312_v3  ;;  %vm4315_vm12 = vweird.f32 %v11249_v6  ;;  %v4327_v34 = vsub.f32 1.0, %v11407_v58 }
 0x35a   : > { %v11450_v61 = vor.u32 1.1754944e-38, %v15996_v24  ;;  %v4371_v17 = vmul.f32 %v11439_v39, %v11338_v19  ;;  %8389 = vrcp.f32 %v11433_v11  ;;  %v7609_v23 = vmul.f32 -1.442695, %v11437_v5  ;;  %v8386_v58 = vpop.eup %8385 }
 0x35b   : > { %v4268_v52 = vmul.f32 %v11257_v4, %v16000_v12  ;;  %v5306_v44 = vmul.f32 %v16003_v49, %v2122_v18  ;;  %2252 = vmatmul.bf16.gmra.mxu2 %v15998_v38  ;;  %v4258_v57 = vsel %vm11466_vm13, %v11236_v47, %v4254_v53  ;;  %v4322_v45 = vor.u32 1.1754944e-38, %v4321_v46  ;;  %v16009_v47 = vld [vmem:[#allocation98_spill] sm:$0xff] }
 0x35c   : > { %2074 = vmatmul.bf16.gmra.mxu0 %v15998_v38  ;;  %vm4330_vm14 = vweird.f32 %v11292_v1  ;;  %v4334_v3 = vand.u32 2147483647, %v11292_v1  ;;  %v4336_v36 = vand.u32 2147483648, %v11292_v1  ;;  %vm4271_vm15 = vweird.f32 %v11257_v4  ;;  %v2210_v14 = vpop.f32.mrf.mxu2  ;;  %v2299_v24 = vpop.f32.mrf.mxu3 }
 0x35d   : > { %v16004_v28 = vand.u32 2147483647, %v11170_v21  ;;  %vm4316_vm1 = vweird.f32 %v11343_v40  ;;  %vm11491_vm2 = vcmp.eq.f32.partialorder %v4319_v29, 8.507059e+37  ;;  %v7612_v32 = vmul.f32 -1.442695, %v16009_v47  ;;  %v8388_v50 = vpop.eup %8387  ;;  %vm11512_vm3 = vmor %vm4270_vm11, %vm4271_vm15  ;;  %v16024_v21 = vld [vmem:[#allocation97_spill] sm:$0xff] }
 0x35e   : > { %v11496_v51 = vpack.c.bf16 %v5306_v44, %v5302_v22  ;;  %v4269_v41 = vadd.f32 %v11257_v4, %v4268_v52  ;;  %v4314_v53 = vadd.f32 %v11343_v40, %v4313_v10  ;;  %v4328_v46 = vmul.f32 %v11387_v31, %v4327_v34  ;;  %v2035_v10 = vpop.f32.mrf.mxu0  ;;  %v2124_v34 = vpop.f32.mrf.mxu1  ;;  %vm11525_vm5 = vmor %vm4315_vm12, %vm4316_vm1 }
 0x35f   : > { %vm11486_vm0 = vcmp.eq.f32.partialorder %v16004_v28, 8.507059e+37  ;;  %v11501_v60 = vadd.f32 1.0, %v8384_v63  ;;  %v4372_v62 = vsub.f32 1.0, %v4371_v17  ;;  %v11503_v29 = vadd.f32 1.0, %v8386_v58  ;;  %v7950_v58 = vld [vmem:[%s9051_s26 + $0x1c] sm:$0xf] }
 0x360   : > { %16010 = vst [vmem:[#allocation44_spill] sm:$0xff] %v11496_v51  ;;  %8391 = vpow2.f32 %v7609_v23  ;;  %v2300_v18 = vadd.f32 %v2299_v24, %v2210_v14  ;;  %v4263_v22 = vsel %vm11428_vm10, %v11311_v15, %v4258_v57  ;;  %vm4331_vm4 = vweird.f32 %v11387_v31  ;;  %v11519_v15 = vpop.eup %8389  ;;  %v7040_v57 = vld [vmem:[%s9051_s26 + $0x38] sm:$0xf0] }
 0x361   : > { %v4379_v63 = vand.u32 2147483647, %v11338_v19  ;;  %v4381_v52 = vand.u32 2147483648, %v11338_v19  ;;  %v11529_v54 = vadd.f32 1.0, %v8388_v50  ;;  %8393 = vpow2.f32 %v7612_v32  ;;  %v8014_v28 = vld [vmem:[%s9051_s26 + $0x21c] sm:$0xf]  ;;  %vm11564_vm7 = vmor %vm4330_vm14, %vm4331_vm4 }
 0x362   : > { %v5307_v42 = vmul.f32 %v10641_v26, %v2300_v18  ;;  %v2125_v17 = vadd.f32 %v2124_v34, %v2035_v10  ;;  %v4273_v23 = vsel %vm11512_vm3, %v11257_v4, %v4269_v41  ;;  %v4318_v49 = vsel %vm11525_vm5, %v11343_v40, %v4314_v53  ;;  %v7296_v53 = vld [vmem:[%s9051_s26 + $0x238] sm:$0xf0]  ;;  %v16030_v4 = vld [vmem:[#allocation168_spill] sm:$0xff] }
 0x363   : > { %v4329_v6 = vadd.f32 %v11387_v31, %v4328_v46  ;;  %8395 = vrcp.f32 %v11501_v60  ;;  %v4373_v44 = vmul.f32 %v11439_v39, %v4372_v62  ;;  %vm11550_vm6 = vcmp.eq.f32.partialorder %v4334_v3, 8.507059e+37  ;;  %v16023_v34 = vld [vmem:[#allocation95_spill] sm:$0xff] }
 0x364   : > { %8397 = vrcp.f32 %v11503_v29  ;;  %v11543_v26 = vmul.f32 %v10742_v48, %v2125_v17  ;;  %v11548_v32 = vpack.c.bf16 %v5307_v42, %v5303_v7  ;;  %v4337_v40 = vor.u32 1.1754944e-38, %v4336_v36  ;;  %v2213_v62 = vpop.f32.mrf.mxu2  ;;  %v2302_v18 = vpop.f32.mrf.mxu3 }
 0x365   : > { %v4386_v50 = vmul.f32 %v11519_v15, %v11433_v11  ;;  %v7043_v41 = vor.u32 %v7950_v58, %v7040_v57  ;;  %v11558_v14 = vmul.f32 %v4263_v22, %v10984_v9  ;;  %v11568_v7 = vor.u32 1.1754944e-38, %v4381_v52 }
 0x366   : > { %16015 = vst [vmem:[#allocation46_spill] sm:$0xff] %v11548_v32  ;;  %v8392_v46 = vpop.eup %8391  ;;  %8399 = vrcp.f32 %v11529_v54  ;;  %v7299_v3 = vor.u32 %v8014_v28, %v7296_v53  ;;  %v4278_v36 = vsel %vm11486_vm0, %v11450_v61, %v4273_v23  ;;  %v4323_v9 = vsel %vm11491_vm2, %v4322_v45, %v4318_v49  ;;  %v2037_v17 = vpop.f32.mrf.mxu0  ;;  %v16026_v28 = vld [vmem:[#allocation56_spill] sm:$0xff]  ;;  %v7954_v53 = vld [vmem:[%s9051_s26 + $0x34] sm:$0xf0] }
 0x367   : > { %v4333_v1 = vsel %vm11564_vm7, %v11387_v31, %v4329_v6  ;;  %vm4376_vm8 = vweird.f32 %v11439_v39  ;;  %vm11580_vm9 = vcmp.eq.f32.partialorder %v4379_v63, 8.507059e+37  ;;  %2547 = vmatpush.bf16.msrb.mxu2 %v7043_v41  ;;  %v8394_v22 = vpop.eup %8393  ;;  %v4374_v56 = vadd.f32 %v11439_v39, %v4373_v44  ;;  %v2126_v23 = vpop.f32.mrf.mxu1  ;;  %v16025_v44 = vld [vmem:[#allocation167_spill] sm:$0xff] }
 0x368   : > { %v4394_v61 = vand.u32 2147483647, %v11433_v11  ;;  %v7613_v45 = vmul.f32 -1.442695, %v16022_v27  ;;  %v2303_v12 = vadd.f32 %v2302_v18, %v2213_v62  ;;  %2636 = vmatpush.bf16.msrb.mxu3 %v7299_v3  ;;  %v4387_v63 = vsub.f32 1.0, %v4386_v50  ;;  %v16027_v50 = vld [vmem:[#allocation57_spill] sm:$0xff] }
 0x369   : > { %v11587_v31 = vpop.eup %8395  ;;  %v4396_v52 = vand.u32 2147483648, %v11433_v11  ;;  %v11590_v10 = vadd.f32 1.0, %v8392_v46  ;;  %v11594_v42 = vadd.f32 %v16024_v21, %v16023_v34  ;;  %v11599_v6 = vmul.f32 %v4278_v36, %v11007_v43  ;;  %2168 = vmatmul.bf16.gmra.mxu1 %v16027_v50  ;;  %v7038_v41 = vld [vmem:[%s9051_s26 + $0x18] sm:$0xf]  ;;  %2346 = vmatmul.bf16.gmra.mxu3 %v16027_v50 }
 0x36a   : > { %v11596_v49 = vpop.eup %8397  ;;  %vm4375_vm10 = vweird.f32 %v11338_v19  ;;  %v11603_v58 = vmul.f32 %v16025_v44, %v2303_v12  ;;  %v2127_v57 = vadd.f32 %v2126_v23, %v2037_v17  ;;  %v7294_v46 = vld [vmem:[%s9051_s26 + $0x218] sm:$0xf]  ;;  %v11611_v48 = vmul.f32 %v4323_v9, %v15936_v37 }
 0x36b   : > { %v4338_v43 = vsel %vm11550_vm6, %v4337_v40, %v4333_v1  ;;  %vm11617_vm11 = vmor %vm4375_vm10, %vm4376_vm8  ;;  %vm4390_vm12 = vweird.f32 %v11433_v11  ;;  %v11622_v3 = vadd.f32 1.0, %v8394_v22  ;;  %v7039_v36 = vor.u32 %v7954_v53, %v7038_v41  ;;  %v8018_v62 = vld [vmem:[%s9051_s26 + $0x234] sm:$0xf0]  ;;  %2257 = vmatmul.bf16.gmra.mxu2 %v16026_v28 }
 0x36c   : > { %2079 = vmatmul.bf16.gmra.mxu0 %v16026_v28  ;;  %v11625_v18 = vpop.eup %8399  ;;  %v4378_v37 = vsel %vm11617_vm11, %v11439_v39, %v4374_v56  ;;  %8401 = vpow2.f32 %v7613_v45  ;;  %v5314_v40 = vmul.f32 %v16030_v4, %v2127_v57  ;;  %v7295_v9 = vor.u32 %v8018_v62, %v7294_v46  ;;  %v16031_v56 = vld [vmem:[#allocation101_spill] sm:$0xff]  ;;  %v2304_v57 = vpop.f32.mrf.mxu3  ;;  %v16099_v50 = vld [vmem:[#allocation67_spill] sm:$0xff] }
 0x36d   : > { %v4388_v1 = vmul.f32 %v11519_v15, %v4387_v63  ;;  %v4431_v22 = vmul.f32 %v11587_v31, %v11501_v60  ;;  %v4446_v12 = vmul.f32 %v11596_v49, %v11503_v29  ;;  %v7616_v34 = vmul.f32 -1.442695, %v11594_v42  ;;  %2369 = vmatpush.bf16.msrb.mxu0 %v7039_v36  ;;  %v16035_v4 = vld [vmem:[#allocation169_spill] sm:$0xff] }
 0x36e   : > { %v11640_v39 = vmul.f32 %v4338_v43, %v15941_v13  ;;  %8403 = vrcp.f32 %v11590_v10  ;;  %v7617_v45 = vmul.f32 -1.442695, %v16031_v56  ;;  %2458 = vmatpush.bf16.msrb.mxu1 %v7295_v9  ;;  %v11645_v21 = vpack.c.bf16 %v5314_v40, %v11543_v26  ;;  %v2215_v13 = vpop.f32.mrf.mxu2  ;;  %v2040_v43 = vpop.f32.mrf.mxu0 }
 0x36f   : > { %vm11647_vm13 = vcmp.eq.f32.partialorder %v4394_v61, 8.507059e+37  ;;  %v4397_v17 = vor.u32 1.1754944e-38, %v4396_v52  ;;  %v4441_v23 = vand.u32 2147483648, %v11501_v60  ;;  %v4491_v44 = vmul.f32 %v11625_v18, %v11529_v54  ;;  %v2129_v19 = vpop.f32.mrf.mxu1 }
 0x370   : > { %16032 = vst [vmem:[#allocation90_spill] sm:$0xff] %v11645_v21  ;;  %8405 = vrcp.f32 %v11622_v3  ;;  %v4383_v41 = vsel %vm11580_vm9, %v11568_v7, %v4378_v37  ;;  %vm4391_vm14 = vweird.f32 %v11519_v15  ;;  %v4439_v26 = vand.u32 2147483647, %v11501_v60 }
 0x371   : > { %v2305_v61 = vadd.f32 %v2304_v57, %v2215_v13  ;;  %v4389_v52 = vadd.f32 %v11519_v15, %v4388_v1  ;;  %v4432_v53 = vsub.f32 1.0, %v4431_v22  ;;  %v4447_v46 = vsub.f32 1.0, %v4446_v12  ;;  %v16036_v1 = vld [vmem:[#allocation102_spill] sm:$0xff]  ;;  %vm11676_vm0 = vmor %vm4390_vm12, %vm4391_vm14 }
 0x372   : > { %8407 = vpow2.f32 %v7616_v34  ;;  %v8402_v36 = vpop.eup %8401  ;;  %v4456_v62 = vand.u32 2147483648, %v11503_v29  ;;  %v2130_v24 = vadd.f32 %v2129_v19, %v2040_v43  ;;  %v11664_v7 = vmul.f32 %v4383_v41, %v11174_v35 }
 0x373   : > { %8409 = vpow2.f32 %v7617_v45  ;;  %v5315_v40 = vmul.f32 %v16035_v4, %v2305_v61  ;;  %vm4435_vm15 = vweird.f32 %v11501_v60  ;;  %v11667_v37 = vor.u32 1.1754944e-38, %v4441_v23  ;;  %v16039_v45 = vld [vmem:[#allocation70_spill] sm:$0xff]  ;;  %v16041_v4 = vld [vmem:[#allocation104_spill] sm:$0xff] }
 0x374   : > { %v4492_v9 = vsub.f32 1.0, %v4491_v44  ;;  %v7620_v22 = vmul.f32 -1.442695, %v16036_v1  ;;  %v11670_v12 = vpop.eup %8403  ;;  %vm4450_vm1 = vweird.f32 %v11503_v29  ;;  %v4454_v35 = vand.u32 2147483647, %v11503_v29 }
 0x375   : > { %v5318_v23 = vmul.f32 %v16039_v45, %v2130_v24  ;;  %v11684_v44 = vpack.c.bf16 %v5315_v40, %v11603_v58  ;;  %v4393_v57 = vsel %vm11676_vm0, %v11519_v15, %v4389_v52  ;;  %v4433_v11 = vmul.f32 %v11587_v31, %v4432_v53 }
 0x376   : > { %v11686_v13 = vpop.eup %8405  ;;  %v4448_v41 = vmul.f32 %v11596_v49, %v4447_v46  ;;  %vm4495_vm2 = vweird.f32 %v11529_v54  ;;  %v11694_v61 = vadd.f32 1.0, %v8402_v36  ;;  %v11696_v43 = vor.u32 1.1754944e-38, %v4456_v62  ;;  %v2218_v46 = vpop.f32.mrf.mxu2 }
 0x377   : > { %16040 = vst [vmem:[#allocation92_spill] sm:$0xff] %v11684_v44  ;;  %v4499_v19 = vand.u32 2147483647, %v11529_v54  ;;  %v4501_v58 = vand.u32 2147483648, %v11529_v54  ;;  %v7621_v40 = vmul.f32 -1.442695, %v16041_v4  ;;  %vm4436_vm3 = vweird.f32 %v11587_v31  ;;  %v2307_v36 = vpop.f32.mrf.mxu3  ;;  %v2042_v63 = vpop.f32.mrf.mxu0 }
 0x378   : > { %v8408_v24 = vpop.eup %8407  ;;  %vm11702_vm4 = vcmp.eq.f32.partialorder %v4439_v26, 8.507059e+37  ;;  %v4493_v52 = vmul.f32 %v11625_v18, %v4492_v9  ;;  %v4506_v53 = vmul.f32 %v11670_v12, %v11590_v10  ;;  %8411 = vpow2.f32 %v7620_v22  ;;  %vm11735_vm8 = vmor %vm4435_vm15, %vm4436_vm3  ;;  %v16059_v54 = vld [vmem:[#allocation99_spill] sm:$0xff] }
 0x379   : > { %v8410_v62 = vpop.eup %8409  ;;  %v4398_v34 = vsel %vm11647_vm13, %v4397_v17, %v4393_v57  ;;  %vm4451_vm5 = vweird.f32 %v11596_v49  ;;  %vm11712_vm6 = vcmp.eq.f32.partialorder %v4454_v35, 8.507059e+37  ;;  %v4551_v26 = vmul.f32 %v11686_v13, %v11622_v3  ;;  %v2131_v17 = vpop.f32.mrf.mxu1  ;;  %v16046_v35 = vld [vmem:[#allocation71_spill] sm:$0xff]  ;;  %2173 = vmatmul.bf16.gmra.mxu1 %v16048_v55  ;;  %2351 = vmatmul.bf16.gmra.mxu3 %v16048_v55 }
 0x37a   : > { %v2308_v9 = vadd.f32 %v2307_v36, %v2218_v46  ;;  %v4434_v44 = vadd.f32 %v11587_v31, %v4433_v11  ;;  %v4449_v22 = vadd.f32 %v11596_v49, %v4448_v41  ;;  %v4516_v21 = vand.u32 2147483648, %v11590_v10  ;;  %vm11756_vm10 = vmor %vm4450_vm1, %vm4451_vm5 }
 0x37b   : > { %8413 = vrcp.f32 %v11694_v61  ;;  %v11722_v57 = vadd.f32 1.0, %v8408_v24  ;;  %v2132_v51 = vadd.f32 %v2131_v17, %v2042_v63  ;;  %v4494_v11 = vadd.f32 %v11625_v18, %v4493_v52  ;;  %v16053_v52 = vld [vmem:[#allocation73_spill] sm:$0xff]  ;;  %2262 = vmatmul.bf16.gmra.mxu2 %v16047_v0 }
 0x37c   : > { %8415 = vpow2.f32 %v7621_v40  ;;  %v5319_v32 = vmul.f32 %v16046_v35, %v2308_v9  ;;  %2084 = vmatmul.bf16.gmra.mxu0 %v16047_v0  ;;  %vm4496_vm7 = vweird.f32 %v11625_v18  ;;  %v4507_v41 = vsub.f32 1.0, %v4506_v53 }
 0x37d   : > { %v11729_v46 = vadd.f32 1.0, %v8410_v62  ;;  %vm11739_vm9 = vcmp.eq.f32.partialorder %v4499_v19, 8.507059e+37  ;;  %v4502_v36 = vor.u32 1.1754944e-38, %v4501_v58  ;;  %v4552_v9 = vsub.f32 1.0, %v4551_v26  ;;  %vm11771_vm12 = vmor %vm4495_vm2, %vm4496_vm7 }
 0x37e   : > { %v5322_v63 = vmul.f32 %v16053_v52, %v2132_v51  ;;  %v8412_v53 = vpop.eup %8411  ;;  %v11747_v62 = vmul.f32 %v4398_v34, %v11275_v30  ;;  %v4438_v60 = vsel %vm11735_vm8, %v11587_v31, %v4434_v44  ;;  %vm4510_vm11 = vweird.f32 %v11590_v10  ;;  %v16060_v34 = vld [vmem:[#allocation103_spill] sm:$0xff] }
 0x37f   : > { %v4514_v51 = vand.u32 2147483647, %v11590_v10  ;;  %v11762_v58 = vor.u32 1.1754944e-38, %v4516_v21  ;;  %v4453_v30 = vsel %vm11756_vm10, %v11596_v49, %v4449_v22  ;;  %vm4555_vm13 = vweird.f32 %v11622_v3  ;;  %v2220_v22 = vpop.f32.mrf.mxu2  ;;  %v2309_v17 = vpop.f32.mrf.mxu3 }
 0x380   : > { %8417 = vrcp.f32 %v11722_v57  ;;  %v11777_v31 = vpack.c.bf16 %v5322_v63, %v5318_v23  ;;  %v4498_v49 = vsel %vm11771_vm12, %v11625_v18, %v4494_v11  ;;  %v4508_v44 = vmul.f32 %v11670_v12, %v4507_v41  ;;  %v2045_v15 = vpop.f32.mrf.mxu0 }
 0x381   : > { %v11779_v21 = vpop.eup %8413  ;;  %8419 = vrcp.f32 %v11729_v46  ;;  %v11788_v26 = vadd.f32 %v16060_v34, %v16059_v54  ;;  %v4443_v23 = vsel %vm11702_vm4, %v11667_v37, %v4438_v60  ;;  %v4553_v40 = vmul.f32 %v11686_v13, %v4552_v9  ;;  %v2134_v9 = vpop.f32.mrf.mxu1  ;;  %v8122_v34 = vld [vmem:[%s9057_s7 + $0x174] sm:$0xf0] }
 0x382   : > { %16058 = vst [vmem:[#allocation162_spill] sm:$0xff] %v11777_v31  ;;  %v8416_v35 = vpop.eup %8415  ;;  %v11794_v52 = vadd.f32 1.0, %v8412_v53  ;;  %v2310_v18 = vadd.f32 %v2309_v17, %v2220_v22  ;;  %v4458_v11 = vsel %vm11712_vm6, %v11696_v43, %v4453_v30  ;;  %vm4511_vm14 = vweird.f32 %v11670_v12  ;;  %v16063_v43 = vld [vmem:[#allocation74_spill] sm:$0xff]  ;;  %v8138_v31 = vld [vmem:[%s9057_s7 + $0x1f4] sm:$0xf0] }
 0x383   : > { %vm11800_vm15 = vcmp.eq.f32.partialorder %v4514_v51, 8.507059e+37  ;;  %v4559_v63 = vand.u32 2147483647, %v11622_v3  ;;  %v4561_v37 = vand.u32 2147483648, %v11622_v3  ;;  %v4503_v53 = vsel %vm11739_vm9, %v4502_v36, %v4498_v49  ;;  %v7838_v49 = vld [vmem:[%s9057_s7 + $0x170] sm:$0xf]  ;;  %vm11849_vm2 = vmor %vm4510_vm11, %vm4511_vm14 }
 0x384   : > { %vm4556_vm0 = vweird.f32 %v11686_v13  ;;  %v5323_v45 = vmul.f32 %v16063_v43, %v2310_v18  ;;  %v2135_v60 = vadd.f32 %v2134_v9, %v2045_v15  ;;  %v4509_v19 = vadd.f32 %v11670_v12, %v4508_v44  ;;  %v7902_v44 = vld [vmem:[%s9057_s7 + $0x1f0] sm:$0xf] }
 0x385   : > { %v4566_v51 = vmul.f32 %v11779_v21, %v11694_v61  ;;  %v11813_v30 = vadd.f32 1.0, %v8416_v35  ;;  %v7624_v29 = vmul.f32 -1.442695, %v11788_v26  ;;  %v4554_v24 = vadd.f32 %v11686_v13, %v4553_v40  ;;  %v16065_v35 = vld [vmem:[#allocation93_spill] sm:$0xff]  ;;  %vm11860_vm3 = vmor %vm4555_vm13, %vm4556_vm0 }
 0x386   : > { %v11816_v54 = vpop.eup %8417  ;;  %8421 = vrcp.f32 %v11794_v52  ;;  %v11821_v36 = vmul.f32 %v11095_v25, %v2135_v60  ;;  %v11826_v22 = vpack.c.bf16 %v5323_v45, %v5319_v32  ;;  %v11831_v18 = vmul.f32 %v4443_v23, %v16065_v35  ;;  %v16068_v40 = vld [vmem:[#allocation105_spill] sm:$0xff]  ;;  %v16069_v25 = vld [vmem:[#allocation96_spill] sm:$0xff] }
 0x387   : > { %v11828_v17 = vpop.eup %8419  ;;  %vm11833_vm1 = vcmp.eq.f32.partialorder %v4559_v63, 8.507059e+37  ;;  %v7625_v9 = vmul.f32 -1.442695, %v16068_v40  ;;  %v7839_v43 = vor.u32 %v8122_v34, %v7838_v49  ;;  %v11840_v60 = vmul.f32 %v4458_v11, %v16069_v25  ;;  %v16075_v25 = vld [vmem:[#allocation75_spill] sm:$0xff]  ;;  %v16076_v32 = vld [vmem:[#allocation76_spill] sm:$0xff] }
 0x388   : > { %16064 = vst [vmem:[#allocation164_spill] sm:$0xff] %v11826_v22  ;;  %v11843_v59 = vmul.f32 %v4503_v53, %v11384_v2  ;;  %v4562_v23 = vor.u32 1.1754944e-38, %v4561_v37  ;;  %v7903_v63 = vor.u32 %v8138_v31, %v7902_v44  ;;  %v4513_v45 = vsel %vm11849_vm2, %v11670_v12, %v4509_v19  ;;  %v2223_v37 = vpop.f32.mrf.mxu2  ;;  %v2312_v31 = vpop.f32.mrf.mxu3  ;;  %v7774_v2 = vld [vmem:[%s9057_s7 + $0xf0] sm:$0xf] }
 0x389   : > { %v4567_v11 = vsub.f32 1.0, %v4566_v51  ;;  %v4611_v10 = vmul.f32 %v11816_v54, %v11722_v57  ;;  %8423 = vrcp.f32 %v11813_v30  ;;  %6096 = vmatpush.bf16.msra.mxu2 %v7839_v43  ;;  %v4558_v12 = vsel %vm11860_vm3, %v11686_v13, %v4554_v24  ;;  %v2047_v34 = vpop.f32.mrf.mxu0  ;;  %v2136_v44 = vpop.f32.mrf.mxu1  ;;  %v16074_v24 = vld [vmem:[#allocation80_spill] sm:$0xff]  ;;  %2178 = vmatmul.bf16.gmra.mxu1 %v16076_v32 }
 0x38a   : > { %v4626_v3 = vmul.f32 %v11828_v17, %v11729_v46  ;;  %8425 = vpow2.f32 %v7624_v29  ;;  %v2313_v53 = vadd.f32 %v2312_v31, %v2223_v37  ;;  %6185 = vmatpush.bf16.msra.mxu3 %v7903_v63  ;;  %v4574_v19 = vand.u32 2147483647, %v11694_v61  ;;  %v8090_v63 = vld [vmem:[%s9057_s7 + $0x74] sm:$0xf0] }
 0x38b   : > { %v4576_v51 = vand.u32 2147483648, %v11694_v61  ;;  %v4621_v49 = vand.u32 2147483648, %v11722_v57  ;;  %8427 = vpow2.f32 %v7625_v9  ;;  %v4518_v29 = vsel %vm11800_vm15, %v11762_v58, %v4513_v45  ;;  %v7710_v9 = vld [vmem:[%s9057_s7 + $0x70] sm:$0xf]  ;;  %v8106_v45 = vld [vmem:[%s9057_s7 + $0xf4] sm:$0xf0]  ;;  %2267 = vmatmul.bf16.gmra.mxu2 %v16075_v25  ;;  %2356 = vmatmul.bf16.gmra.mxu3 %v16076_v32 }
 0x38c   : > { %v11875_v13 = vpop.eup %8421  ;;  %vm4570_vm4 = vweird.f32 %v11694_v61  ;;  %v11882_v35 = vmul.f32 %v16074_v24, %v2313_v53  ;;  %v2137_v43 = vadd.f32 %v2136_v44, %v2047_v34  ;;  %2089 = vmatmul.bf16.gmra.mxu0 %v16075_v25  ;;  %v4563_v37 = vsel %vm11833_vm1, %v4562_v23, %v4558_v12  ;;  %v16078_v24 = vld [vmem:[#allocation159_spill] sm:$0xff]  ;;  %v16089_v61 = vld [vmem:[#allocation109_spill] sm:$0xff] }
 0x38d   : > { %v4568_v31 = vmul.f32 %v11779_v21, %v4567_v11  ;;  %v4612_v41 = vsub.f32 1.0, %v4611_v10  ;;  %v7711_v58 = vor.u32 %v8090_v63, %v7710_v9  ;;  %v4627_v22 = vsub.f32 1.0, %v4626_v3  ;;  %v16079_v10 = vld [vmem:[#allocation107_spill] sm:$0xff] }
 0x38e   : > { %v7628_v53 = vmul.f32 -1.442695, %v16077_v33  ;;  %v5330_v34 = vmul.f32 %v16078_v24, %v2137_v43  ;;  %v7775_v44 = vor.u32 %v8106_v45, %v7774_v2  ;;  %v11900_v15 = vmul.f32 %v4518_v29, %v11437_v5 }
 0x38f   : > { %v11897_v55 = vpop.eup %8423  ;;  %v4577_v23 = vor.u32 1.1754944e-38, %v4576_v51  ;;  %v4671_v11 = vmul.f32 %v11875_v13, %v11794_v52  ;;  %v7629_v12 = vmul.f32 -1.442695, %v16079_v10  ;;  %5918 = vmatpush.bf16.msra.mxu0 %v7711_v58  ;;  %vm4571_vm5 = vweird.f32 %v11779_v21 }
 0x390   : > { %v8426_v3 = vpop.eup %8425  ;;  %vm11906_vm6 = vcmp.eq.f32.partialorder %v4574_v19, 8.507059e+37  ;;  %vm4615_vm7 = vweird.f32 %v11722_v57  ;;  %v4619_v9 = vand.u32 2147483647, %v11722_v57  ;;  %v11912_v5 = vor.u32 1.1754944e-38, %v4621_v49  ;;  %6007 = vmatpush.bf16.msra.mxu1 %v7775_v44  ;;  %v2225_v45 = vpop.f32.mrf.mxu2  ;;  %v16083_v44 = vld [vmem:[#allocation108_spill] sm:$0xff]  ;;  %vm11934_vm9 = vmor %vm4570_vm4, %vm4571_vm5 }
 0x391   : > { %v11915_v51 = vpack.c.bf16 %v5330_v34, %v11821_v36  ;;  %v8428_v29 = vpop.eup %8427  ;;  %v11918_v63 = vmul.f32 %v4563_v37, %v16009_v47  ;;  %v4569_v2 = vadd.f32 %v11779_v21, %v4568_v31  ;;  %v4613_v19 = vmul.f32 %v11816_v54, %v4612_v41  ;;  %v2314_v24 = vpop.f32.mrf.mxu3 }
 0x392   : > { %vm4630_vm8 = vweird.f32 %v11729_v46  ;;  %v4634_v58 = vand.u32 2147483647, %v11729_v46  ;;  %v4628_v49 = vmul.f32 %v11828_v17, %v4627_v22  ;;  %8429 = vpow2.f32 %v7628_v53  ;;  %v2050_v31 = vpop.f32.mrf.mxu0  ;;  %v2139_v41 = vpop.f32.mrf.mxu1 }
 0x393   : > { %16082 = vst [vmem:[#allocation50_spill] sm:$0xff] %v11915_v51  ;;  %v7632_v36 = vmul.f32 -1.442695, %v16083_v44  ;;  %v2315_v34 = vadd.f32 %v2314_v24, %v2225_v45  ;;  %v4672_v51 = vsub.f32 1.0, %v4671_v11  ;;  %v4686_v47 = vmul.f32 %v11897_v55, %v11813_v30  ;;  %v16086_v11 = vld [vmem:[#allocation41_spill] sm:$0xff] }
 0x394   : > { %v11928_v37 = vadd.f32 1.0, %v8426_v3  ;;  %8431 = vpow2.f32 %v7629_v12  ;;  %v4636_v22 = vand.u32 2147483648, %v11729_v46  ;;  %v11939_v53 = vadd.f32 1.0, %v8428_v29 }
 0x395   : > { %v5331_v45 = vmul.f32 %v16086_v11, %v2315_v34  ;;  %v2140_v24 = vadd.f32 %v2139_v41, %v2050_v31  ;;  %v4573_v12 = vsel %vm11934_vm9, %v11779_v21, %v4569_v2  ;;  %vm4616_vm10 = vweird.f32 %v11816_v54  ;;  %v16092_v34 = vld [vmem:[#allocation42_spill] sm:$0xff] }
 0x396   : > { %vm11946_vm11 = vcmp.eq.f32.partialorder %v4619_v9, 8.507059e+37  ;;  %vm4631_vm12 = vweird.f32 %v11828_v17  ;;  %v7633_v25 = vmul.f32 -1.442695, %v16089_v61  ;;  %v4614_v29 = vadd.f32 %v11816_v54, %v4613_v19  ;;  %v16094_v19 = vld [vmem:[#allocation110_spill] sm:$0xff]  ;;  %vm11973_vm15 = vmor %vm4615_vm7, %vm4616_vm10 }
 0x397   : > { %vm11953_vm13 = vcmp.eq.f32.partialorder %v4634_v58, 8.507059e+37  ;;  %8433 = vpow2.f32 %v7632_v36  ;;  %v5334_v32 = vmul.f32 %v16092_v34, %v2140_v24  ;;  %v11959_v21 = vpack.c.bf16 %v5331_v45, %v11882_v35  ;;  %vm11986_vm0 = vmor %vm4630_vm8, %vm4631_vm12 }
 0x398   : > { %v4629_v9 = vadd.f32 %v11828_v17, %v4628_v49  ;;  %v4673_v2 = vmul.f32 %v11875_v13, %v4672_v51  ;;  %v4687_v31 = vsub.f32 1.0, %v4686_v47  ;;  %8435 = vrcp.f32 %v11928_v37  ;;  %v8430_v41 = vpop.eup %8429 }
 0x399   : > { %16093 = vst [vmem:[#allocation54_spill] sm:$0xff] %v11959_v21  ;;  %v4637_v11 = vor.u32 1.1754944e-38, %v4636_v22  ;;  %vm4675_vm14 = vweird.f32 %v11794_v52  ;;  %8437 = vrcp.f32 %v11939_v53  ;;  %v7636_v58 = vmul.f32 -1.442695, %v16094_v19  ;;  %v2228_v22 = vpop.f32.mrf.mxu2  ;;  %v2317_v45 = vpop.f32.mrf.mxu3 }
 0x39a   : > { %v8432_v36 = vpop.eup %8431  ;;  %v4578_v35 = vsel %vm11906_vm6, %v4577_v23, %v4573_v12  ;;  %v4679_v49 = vand.u32 2147483647, %v11794_v52  ;;  %v4681_v47 = vand.u32 2147483648, %v11794_v52  ;;  %8439 = vpow2.f32 %v7633_v25  ;;  %v2052_v46 = vpop.f32.mrf.mxu0 }
 0x39b   : > { %v4618_v43 = vsel %vm11973_vm15, %v11816_v54, %v4614_v29  ;;  %vm4676_vm1 = vweird.f32 %v11875_v13  ;;  %v4694_v23 = vand.u32 2147483647, %v11813_v30  ;;  %v2318_v24 = vadd.f32 %v2317_v45, %v2228_v22  ;;  %v2141_v34 = vpop.f32.mrf.mxu1  ;;  %v16100_v22 = vld [vmem:[#allocation12_spill] sm:$0xff]  ;;  %v16101_v45 = vld [vmem:[#allocation13_spill] sm:$0xff] }
 0x39c   : > { %v4633_v25 = vsel %vm11986_vm0, %v11828_v17, %v4629_v9  ;;  %v4674_v12 = vadd.f32 %v11875_v13, %v4673_v2  ;;  %v4688_v54 = vmul.f32 %v11897_v55, %v4687_v31  ;;  %v11997_v29 = vadd.f32 1.0, %v8430_v41  ;;  %2370 = vmatmul.bf16.vlgmr.msrb.gmra.mxu0 %v16100_v22  ;;  %2459 = vmatmul.bf16.vlgmr.msrb.gmra.mxu1 %v16101_v45  ;;  %vm12024_vm4 = vmor %vm4675_vm14, %vm4676_vm1 }
 0x39d   : > { %v8434_v51 = vpop.eup %8433  ;;  %v11999_v21 = vadd.f32 1.0, %v8432_v36  ;;  %8441 = vpow2.f32 %v7636_v58  ;;  %v5335_v28 = vmul.f32 %v16099_v50, %v2318_v24  ;;  %v2142_v8 = vadd.f32 %v2141_v34, %v2052_v46  ;;  %2548 = vmatmul.bf16.vlgmr.msrb.gmra.mxu2 %v16100_v22  ;;  %2637 = vmatmul.bf16.vlgmr.msrb.gmra.mxu3 %v16101_v45 }
 0x39e   : > { %v12004_v17 = vpop.eup %8435  ;;  %vm12006_vm2 = vcmp.eq.f32.partialorder %v4679_v49, 8.507059e+37  ;;  %v4682_v2 = vor.u32 1.1754944e-38, %v4681_v47  ;;  %vm4690_vm3 = vweird.f32 %v11813_v30  ;;  %v4696_v31 = vand.u32 2147483648, %v11813_v30  ;;  %v16108_v47 = vld [vmem:[#allocation88_spill] sm:$0xff] }
 0x39f   : > { %v12012_v41 = vpop.eup %8437  ;;  %v12015_v50 = vmul.f32 %v4578_v35, %v16022_v27  ;;  %v4623_v58 = vsel %vm11946_vm11, %v11912_v5, %v4618_v43  ;;  %vm12028_vm5 = vcmp.eq.f32.partialorder %v4694_v23, 8.507059e+37  ;;  %v5338_v57 = vmul.f32 %v16108_v47, %v2142_v8 }
 0x3a0   : > { %v8440_v27 = vpop.eup %8439  ;;  %v4638_v5 = vsel %vm11953_vm13, %v4637_v11, %v4633_v25  ;;  %v4678_v52 = vsel %vm12024_vm4, %v11875_v13, %v4674_v12  ;;  %vm4691_vm6 = vweird.f32 %v11897_v55  ;;  %8443 = vrcp.f32 %v11997_v29 }
 0x3a1   : > { %v4689_v3 = vadd.f32 %v11897_v55, %v4688_v54  ;;  %v4731_v8 = vmul.f32 %v12004_v17, %v11928_v37  ;;  %8445 = vrcp.f32 %v11999_v21  ;;  %v12046_v35 = vpack.c.bf16 %v5338_v57, %v5334_v32  ;;  %v2230_v23 = vpop.f32.mrf.mxu2  ;;  %v2319_v24 = vpop.f32.mrf.mxu3  ;;  %vm12067_vm7 = vmor %vm4690_vm3, %vm4691_vm6 }
 0x3a2   : > { %v12049_v0 = vmul.f32 %v4623_v58, %v11594_v42  ;;  %v4697_v11 = vor.u32 1.1754944e-38, %v4696_v31  ;;  %v4746_v13 = vmul.f32 %v12012_v41, %v11939_v53  ;;  %v12053_v43 = vadd.f32 1.0, %v8434_v51  ;;  %v2055_v45 = vpop.f32.mrf.mxu0 }
 0x3a3   : > { %16109 = vst [vmem:[#allocation35_spill] sm:$0xff] %v12046_v35  ;;  %v8442_v25 = vpop.eup %8441  ;;  %v12056_v12 = vmul.f32 %v4638_v5, %v16031_v56  ;;  %v4739_v54 = vand.u32 2147483647, %v11928_v37  ;;  %v12059_v46 = vadd.f32 1.0, %v8440_v27  ;;  %v2320_v32 = vadd.f32 %v2319_v24, %v2230_v23  ;;  %v2144_v31 = vpop.f32.mrf.mxu1  ;;  %v16115_v5 = vld [vmem:[#allocation111_spill] sm:$0xff] }
 0x3a4   : > { %16110 = vst [vmem:[#allocation55_spill] sm:$0xff] %v12049_v0  ;;  %v4683_v42 = vsel %vm12006_vm2, %v4682_v2, %v4678_v52  ;;  %v4741_v51 = vand.u32 2147483648, %v11928_v37  ;;  %v4754_v56 = vand.u32 2147483647, %v11939_v53  ;;  %v4756_v22 = vand.u32 2147483648, %v11939_v53  ;;  %v16114_v2 = vld [vmem:[#allocation89_spill] sm:$0xff] }
 0x3a5   : > { %16111 = vst [vmem:[#allocation58_spill] sm:$0xff] %v12056_v12  ;;  %v4693_v9 = vsel %vm12067_vm7, %v11897_v55, %v4689_v3  ;;  %v4732_v30 = vsub.f32 1.0, %v4731_v8  ;;  %v5339_v58 = vmul.f32 %v16114_v2, %v2320_v32  ;;  %v2145_v36 = vadd.f32 %v2144_v31, %v2055_v45  ;;  %v7830_v3 = vld [vmem:[%s9057_s7 + $0x160] sm:$0xf]  ;;  %v8120_v8 = vld [vmem:[%s9057_s7 + $0x164] sm:$0xf0] }
 0x3a6   : > { %v12078_v47 = vpop.eup %8443  ;;  %v4747_v57 = vsub.f32 1.0, %v4746_v13  ;;  %8447 = vrcp.f32 %v12053_v43  ;;  %v12081_v27 = vadd.f32 1.0, %v8442_v25  ;;  %v7637_v52 = vmul.f32 -1.442695, %v16115_v5  ;;  %v7894_v13 = vld [vmem:[%s9057_s7 + $0x1e0] sm:$0xf] }
 0x3a7   : > { %v12084_v23 = vpop.eup %8445  ;;  %v12087_v24 = vmul.f32 %v4683_v42, %v16036_v1  ;;  %vm4735_vm8 = vweird.f32 %v11928_v37  ;;  %8449 = vrcp.f32 %v12059_v46  ;;  %v12092_v55 = vmul.f32 %v11424_v20, %v2145_v36  ;;  %v8136_v45 = vld [vmem:[%s9057_s7 + $0x1e4] sm:$0xf0]  ;;  %v16125_v12 = vld [vmem:[#allocation112_spill] sm:$0xff] }
 0x3a8   : > { %v12097_v25 = vpack.c.bf16 %v5339_v58, %v5335_v28  ;;  %v4698_v32 = vsel %vm12028_vm5, %v4697_v11, %v4693_v9  ;;  %vm4750_vm9 = vweird.f32 %v11939_v53  ;;  %v4801_v1 = vand.u32 2147483648, %v11997_v29 }
 0x3a9   : > { %16116 = vst [vmem:[#allocation91_spill] sm:$0xff] %v12087_v24  ;;  %v4816_v42 = vand.u32 2147483648, %v11999_v21  ;;  %v7831_v34 = vor.u32 %v8120_v8, %v7830_v3  ;;  %v4733_v31 = vmul.f32 %v12004_v17, %v4732_v30  ;;  %v12106_v20 = vor.u32 1.1754944e-38, %v4741_v51  ;;  %v2233_v9 = vpop.f32.mrf.mxu2  ;;  %v2322_v58 = vpop.f32.mrf.mxu3  ;;  %v8088_v51 = vld [vmem:[%s9057_s7 + $0x64] sm:$0xf0] }
 0x3aa   : > { %16117 = vst [vmem:[#allocation94_spill] sm:$0xff] %v12097_v25  ;;  %v12108_v2 = vor.u32 1.1754944e-38, %v4756_v22  ;;  %v7895_v36 = vor.u32 %v8136_v45, %v7894_v13  ;;  %v4748_v28 = vmul.f32 %v12012_v41, %v4747_v57  ;;  %v4791_v49 = vmul.f32 %v12078_v47, %v11997_v29  ;;  %v2057_v13 = vpop.f32.mrf.mxu0  ;;  %v7766_v25 = vld [vmem:[%s9057_s7 + $0xe0] sm:$0xf] }
 0x3ab   : > { %v4806_v11 = vmul.f32 %v12084_v23, %v11999_v21  ;;  %8451 = vpow2.f32 %v7637_v52  ;;  %6097 = vmatpush.bf16.msra.mxu2 %v7831_v34  ;;  %v12116_v3 = vmul.f32 %v4698_v32, %v16041_v4  ;;  %v2323_v22 = vadd.f32 %v2322_v58, %v2233_v9  ;;  %v2146_v32 = vpop.f32.mrf.mxu1  ;;  %v16123_v9 = vld [vmem:[#allocation14_spill] sm:$0xff]  ;;  %v7702_v58 = vld [vmem:[%s9057_s7 + $0x60] sm:$0xf] }
 0x3ac   : > { %8453 = vrcp.f32 %v12081_v27  ;;  %6186 = vmatpush.bf16.msra.mxu3 %v7895_v36  ;;  %v12120_v30 = vpop.eup %8447  ;;  %vm4736_vm10 = vweird.f32 %v12004_v17  ;;  %vm12123_vm11 = vcmp.eq.f32.partialorder %v4739_v54, 8.507059e+37  ;;  %v12127_v52 = vor.u32 1.1754944e-38, %v4801_v1  ;;  %2375 = vmatmul.bf16.gmra.mxu0 %v16123_v9 }
 0x3ad   : > { %16118 = vst [vmem:[#allocation59_spill] sm:$0xff] %v12116_v3  ;;  %v4814_v4 = vand.u32 2147483647, %v11999_v21  ;;  %v12130_v8 = vor.u32 1.1754944e-38, %v4816_v42  ;;  %v12132_v34 = vpop.eup %8449  ;;  %v4734_v45 = vadd.f32 %v12004_v17, %v4733_v31  ;;  %vm4751_vm12 = vweird.f32 %v12012_v41  ;;  %v16124_v42 = vld [vmem:[#allocation15_spill] sm:$0xff]  ;;  %2553 = vmatmul.bf16.gmra.mxu2 %v16123_v9  ;;  %vm12160_vm14 = vmor %vm4735_vm8, %vm4736_vm10  ;;  %v16131_v9 = vld [vmem:[#allocation114_spill] sm:$0xff] }
 0x3ae   : > { %vm12136_vm13 = vcmp.eq.f32.partialorder %v4754_v56, 8.507059e+37  ;;  %v12141_v1 = vmul.f32 %v11443_v16, %v2323_v22  ;;  %v2147_v36 = vadd.f32 %v2146_v32, %v2057_v13  ;;  %2464 = vmatmul.bf16.gmra.mxu1 %v16124_v42  ;;  %v4749_v35 = vadd.f32 %v12012_v41, %v4748_v28  ;;  %v8104_v56 = vld [vmem:[%s9057_s7 + $0xe4] sm:$0xf0]  ;;  %2642 = vmatmul.bf16.gmra.mxu3 %v16124_v42  ;;  %vm12179_vm1 = vmor %vm4750_vm9, %vm4751_vm12 }
 0x3af   : > { %v4792_v31 = vsub.f32 1.0, %v4791_v49  ;;  %v4807_v38 = vsub.f32 1.0, %v4806_v11  ;;  %v7703_v3 = vor.u32 %v8088_v51, %v7702_v58  ;;  %v4851_v24 = vmul.f32 %v12120_v30, %v12053_v43  ;;  %v16128_v11 = vld [vmem:[#allocation113_spill] sm:$0xff]  ;;  %v16133_v58 = vld [vmem:[#allocation115_spill] sm:$0xff] }
 0x3b0   : > { %v7640_v16 = vmul.f32 -1.442695, %v16125_v12  ;;  %v5346_v22 = vmul.f32 %v11558_v14, %v2147_v36  ;;  %v7767_v13 = vor.u32 %v8104_v56, %v7766_v25  ;;  %vm4795_vm15 = vweird.f32 %v11997_v29 }
 0x3b1   : > { %v8452_v32 = vpop.eup %8451  ;;  %vm4796_vm0 = vweird.f32 %v12078_v47  ;;  %v4859_v14 = vand.u32 2147483647, %v12053_v43  ;;  %v4866_v49 = vmul.f32 %v12132_v34, %v12059_v46  ;;  %v7641_v25 = vmul.f32 -1.442695, %v16128_v11  ;;  %5919 = vmatpush.bf16.msra.mxu0 %v7703_v3  ;;  %v2235_v28 = vpop.f32.mrf.mxu2 }
 0x3b2   : > { %v12170_v51 = vpop.eup %8453  ;;  %v4738_v37 = vsel %vm12160_vm14, %v12004_v17, %v4734_v45  ;;  %vm4810_vm2 = vweird.f32 %v11999_v21  ;;  %vm4811_vm3 = vweird.f32 %v12084_v23  ;;  %v7644_v3 = vmul.f32 -1.442695, %v16131_v9  ;;  %6008 = vmatpush.bf16.msra.mxu1 %v7767_v13  ;;  %v2324_v11 = vpop.f32.mrf.mxu3  ;;  %vm12239_vm7 = vmor %vm4795_vm15, %vm4796_vm0 }
 0x3b3   : > { %v12187_v42 = vpack.c.bf16 %v5346_v22, %v12092_v55  ;;  %v4753_v17 = vsel %vm12179_vm1, %v12012_v41, %v4749_v35  ;;  %v4793_v53 = vmul.f32 %v12078_v47, %v4792_v31  ;;  %v4808_v45 = vmul.f32 %v12084_v23, %v4807_v38  ;;  %v2060_v41 = vpop.f32.mrf.mxu0  ;;  %v2149_v35 = vpop.f32.mrf.mxu1  ;;  %vm12252_vm9 = vmor %vm4810_vm2, %vm4811_vm3 }
 0x3b4   : > { %v7645_v56 = vmul.f32 -1.442695, %v16133_v58  ;;  %v4852_v12 = vsub.f32 1.0, %v4851_v24  ;;  %v12195_v0 = vadd.f32 1.0, %v8452_v32  ;;  %8455 = vpow2.f32 %v7640_v16 }
 0x3b5   : > { %16132 = vst [vmem:[#allocation60_spill] sm:$0xff] %v12187_v42  ;;  %v2325_v13 = vadd.f32 %v2324_v11, %v2235_v28  ;;  %v4861_v55 = vand.u32 2147483648, %v12053_v43  ;;  %v4867_v22 = vsub.f32 1.0, %v4866_v49  ;;  %v4911_v36 = vmul.f32 %v12170_v51, %v12081_v27 }
 0x3b6   : > { %8457 = vpow2.f32 %v7641_v25  ;;  %v4743_v38 = vsel %vm12123_vm11, %v12106_v20, %v4738_v37  ;;  %v16134_v31 = vand.u32 2147483647, %v11997_v29  ;;  %vm12209_vm5 = vcmp.eq.f32.partialorder %v4814_v4, 8.507059e+37 }
 0x3b7   : > { %8459 = vpow2.f32 %v7644_v3  ;;  %v5347_v32 = vmul.f32 %v11599_v6, %v2325_v13  ;;  %v2150_v49 = vadd.f32 %v2149_v35, %v2060_v41  ;;  %v4758_v11 = vsel %vm12136_vm13, %v12108_v2, %v4753_v17 }
 0x3b8   : > { %vm12205_vm4 = vcmp.eq.f32.partialorder %v16134_v31, 8.507059e+37  ;;  %v4794_v20 = vadd.f32 %v12078_v47, %v4793_v53  ;;  %v4809_v57 = vadd.f32 %v12084_v23, %v4808_v45  ;;  %8461 = vpow2.f32 %v7645_v56 }
 0x3b9   : > { %v4853_v25 = vmul.f32 %v12120_v30, %v4852_v12  ;;  %8463 = vrcp.f32 %v12195_v0  ;;  %v5350_v4 = vmul.f32 %v11611_v48, %v2150_v49  ;;  %v12223_v37 = vpack.c.bf16 %v5347_v32, %v12141_v1  ;;  %v16142_v1 = vld [vmem:[#allocation116_spill] sm:$0xff]  ;;  %v2238_v13 = vpop.f32.mrf.mxu2 }
 0x3ba   : > { %vm4855_vm6 = vweird.f32 %v12053_v43  ;;  %v12226_v6 = vor.u32 1.1754944e-38, %v4861_v55  ;;  %v4868_v2 = vmul.f32 %v12132_v34, %v4867_v22  ;;  %v4912_v54 = vsub.f32 1.0, %v4911_v36  ;;  %v8456_v3 = vpop.eup %8455  ;;  %v16147_v36 = vld [vmem:[#allocation117_spill] sm:$0xff] }
 0x3bb   : > { %16139 = vst [vmem:[#allocation98_spill] sm:$0xff] %v12223_v37  ;;  %v12230_v17 = vmul.f32 %v4743_v38, %v11788_v26  ;;  %v12233_v12 = vmul.f32 %v4758_v11, %v16068_v40  ;;  %vm4870_vm8 = vweird.f32 %v12059_v46  ;;  %v7648_v53 = vmul.f32 -1.442695, %v16142_v1  ;;  %v2062_v49 = vpop.f32.mrf.mxu0  ;;  %v2151_v11 = vpop.f32.mrf.mxu1  ;;  %v16149_v40 = vld [vmem:[#allocation17_spill] sm:$0xff] }
 0x3bc   : > { %v8458_v45 = vpop.eup %8457  ;;  %v4798_v26 = vsel %vm12239_vm7, %v12078_v47, %v4794_v20  ;;  %vm4856_vm10 = vweird.f32 %v12120_v30  ;;  %vm12257_vm11 = vcmp.eq.f32.partialorder %v4859_v14, 8.507059e+37  ;;  %v4874_v56 = vand.u32 2147483647, %v12059_v46  ;;  %v2327_v47 = vpop.f32.mrf.mxu3 }
 0x3bd   : > { %v4876_v28 = vand.u32 2147483648, %v12059_v46  ;;  %v8460_v55 = vpop.eup %8459  ;;  %v4813_v21 = vsel %vm12252_vm9, %v12084_v23, %v4809_v57  ;;  %v4854_v22 = vadd.f32 %v12120_v30, %v4853_v25  ;;  %v7649_v41 = vmul.f32 -1.442695, %v16147_v36  ;;  %v16148_v25 = vld [vmem:[#allocation16_spill] sm:$0xff]  ;;  %vm12290_vm13 = vmor %vm4855_vm6, %vm4856_vm10 }
 0x3be   : > { %v2328_v35 = vadd.f32 %v2327_v47, %v2238_v13  ;;  %v8462_v14 = vpop.eup %8461  ;;  %v4869_v38 = vadd.f32 %v12132_v34, %v4868_v2  ;;  %vm4871_vm12 = vweird.f32 %v12132_v34  ;;  %v4913_v31 = vmul.f32 %v12170_v51, %v4912_v54  ;;  %2380 = vmatmul.bf16.gmra.mxu0 %v16148_v25  ;;  %2469 = vmatmul.bf16.gmra.mxu1 %v16149_v40 }
 0x3bf   : > { %v12271_v32 = vadd.f32 1.0, %v8456_v3  ;;  %v12273_v20 = vpop.eup %8463  ;;  %v12275_v48 = vadd.f32 1.0, %v8458_v45  ;;  %8465 = vpow2.f32 %v7648_v53  ;;  %v2152_v57 = vadd.f32 %v2151_v11, %v2062_v49  ;;  %2558 = vmatmul.bf16.gmra.mxu2 %v16148_v25  ;;  %2647 = vmatmul.bf16.gmra.mxu3 %v16149_v40  ;;  %vm12310_vm15 = vmor %vm4870_vm8, %vm4871_vm12  ;;  %v7822_v3 = vld [vmem:[%s9057_s7 + $0x150] sm:$0xf] }
 0x3c0   : > { %v5351_v23 = vmul.f32 %v11640_v39, %v2328_v35  ;;  %v4803_v2 = vsel %vm12205_vm4, %v12127_v52, %v4798_v26  ;;  %v4818_v54 = vsel %vm12209_vm5, %v12130_v8, %v4813_v21  ;;  %vm12294_vm14 = vcmp.eq.f32.partialorder %v4874_v56, 8.507059e+37  ;;  %v8118_v39 = vld [vmem:[%s9057_s7 + $0x154] sm:$0xf0] }
 0x3c1   : > { %v4877_v53 = vor.u32 1.1754944e-38, %v4876_v28  ;;  %v4858_v52 = vsel %vm12290_vm13, %v12120_v30, %v4854_v22  ;;  %v12301_v24 = vadd.f32 1.0, %v8460_v55  ;;  %8467 = vpow2.f32 %v7649_v41  ;;  %v2240_v47 = vpop.f32.mrf.mxu2 }
 0x3c2   : > { %v5354_v8 = vmul.f32 %v11664_v7, %v2152_v57  ;;  %vm4916_vm0 = vweird.f32 %v12170_v51  ;;  %v4926_v30 = vmul.f32 %v12273_v20, %v12195_v0  ;;  %8469 = vrcp.f32 %v12271_v32 }
 0x3c3   : > { %v12318_v7 = vadd.f32 1.0, %v8462_v14  ;;  %v4873_v16 = vsel %vm12310_vm15, %v12132_v34, %v4869_v38  ;;  %v4914_v45 = vadd.f32 %v12170_v51, %v4913_v31  ;;  %8471 = vrcp.f32 %v12275_v48  ;;  %v16159_v14 = vld [vmem:[#allocation118_spill] sm:$0xff] }
 0x3c4   : > { %v12325_v46 = vpack.c.bf16 %v5354_v8, %v5350_v4  ;;  %v12328_v26 = vmul.f32 %v4803_v2, %v16077_v33  ;;  %v12331_v56 = vmul.f32 %v4818_v54, %v16079_v10  ;;  %v4919_v28 = vand.u32 2147483647, %v12081_v27  ;;  %v2329_v55 = vpop.f32.mrf.mxu3 }
 0x3c5   : > { %v4921_v13 = vand.u32 2147483648, %v12081_v27  ;;  %v8466_v21 = vpop.eup %8465  ;;  %v4863_v34 = vsel %vm12257_vm11, %v12226_v6, %v4858_v52  ;;  %vm4915_vm1 = vweird.f32 %v12081_v27  ;;  %8473 = vrcp.f32 %v12301_v24  ;;  %v2065_v6 = vpop.f32.mrf.mxu0 }
 0x3c6   : > { %16156 = vst [vmem:[#allocation100_spill] sm:$0xff] %v12325_v46  ;;  %v2330_v33 = vadd.f32 %v2329_v55, %v2240_v47  ;;  %v4878_v10 = vsel %vm12294_vm14, %v4877_v53, %v4873_v16  ;;  %vm12344_vm2 = vmor %vm4915_vm1, %vm4916_vm0  ;;  %v4927_v22 = vsub.f32 1.0, %v4926_v30  ;;  %v4936_v41 = vand.u32 2147483648, %v12195_v0  ;;  %v2154_v27 = vpop.f32.mrf.mxu1  ;;  %v7886_v53 = vld [vmem:[%s9057_s7 + $0x1d0] sm:$0xf] }
 0x3c7   : > { %8475 = vrcp.f32 %v12318_v7  ;;  %v8468_v29 = vpop.eup %8467  ;;  %v4918_v35 = vsel %vm12344_vm2, %v12170_v51, %v4914_v45  ;;  %v7526_v38 = vmul.f32 -1.442695, %v16159_v14  ;;  %v2155_v49 = vadd.f32 %v2154_v27, %v2065_v6  ;;  %v8134_v16 = vld [vmem:[%s9057_s7 + $0x1d4] sm:$0xf0]  ;;  %v8100_v46 = vld [vmem:[%s9057_s7 + $0xc4] sm:$0xf0] }
 0x3c8   : > { %v5355_v31 = vmul.f32 %v11747_v62, %v2330_v33  ;;  %v12355_v11 = vpop.eup %8469  ;;  %vm4920_vm3 = vcmp.eq.f32.partialorder %v4919_v28, 8.507059e+37  ;;  %v4922_v57 = vor.u32 1.1754944e-38, %v4921_v13  ;;  %v4934_v25 = vand.u32 2147483647, %v12195_v0  ;;  %v16162_v28 = vld [vmem:[#allocation120_spill] sm:$0xff] }
 0x3c9   : > { %v12358_v40 = vadd.f32 1.0, %v8466_v21  ;;  %v12360_v2 = vpop.eup %8471  ;;  %v12363_v54 = vmul.f32 %v4863_v34, %v16083_v44  ;;  %v12366_v51 = vmul.f32 %v4878_v10, %v16089_v61  ;;  %v12369_v62 = vmul.f32 %v11831_v18, %v2155_v49  ;;  %v16161_v61 = vld [vmem:[#allocation119_spill] sm:$0xff]  ;;  %v2243_v10 = vpop.f32.mrf.mxu2 }
 0x3ca   : > { %v12374_v52 = vpack.c.bf16 %v5355_v31, %v5351_v23  ;;  %v4923_v8 = vsel %vm4920_vm3, %v4922_v57, %v4918_v35  ;;  %v4928_v43 = vmul.f32 %v12273_v20, %v4927_v22  ;;  %vm4930_vm4 = vweird.f32 %v12195_v0 }
 0x3cb   : > { %v12378_v30 = vor.u32 1.1754944e-38, %v4936_v41  ;;  %v7823_v44 = vor.u32 %v8118_v39, %v7822_v3  ;;  %v12381_v45 = vpop.eup %8473  ;;  %8477 = vpow2.f32 %v7526_v38  ;;  %v7527_v18 = vmul.f32 -1.442695, %v16161_v61  ;;  %v16165_v39 = vld [vmem:[#allocation18_spill] sm:$0xff] }
 0x3cc   : > { %16160 = vst [vmem:[#allocation95_spill] sm:$0xff] %v12374_v52  ;;  %v7530_v13 = vmul.f32 -1.442695, %v16162_v28  ;;  %v7887_v47 = vor.u32 %v8134_v16, %v7886_v53  ;;  %v4971_v23 = vmul.f32 %v12355_v11, %v12271_v32  ;;  %v4986_v34 = vmul.f32 %v12360_v2, %v12275_v48  ;;  %v2332_v4 = vpop.f32.mrf.mxu3  ;;  %v16166_v53 = vld [vmem:[#allocation19_spill] sm:$0xff] }
 0x3cd   : > { %v12385_v55 = vpop.eup %8475  ;;  %v12392_v33 = vadd.f32 1.0, %v8468_v29  ;;  %6098 = vmatpush.bf16.msra.mxu2 %v7823_v44  ;;  %v12395_v22 = vmul.f32 %v4923_v8, %v16094_v19  ;;  %v4981_v41 = vand.u32 2147483648, %v12271_v32  ;;  %8479 = vrcp.f32 %v12358_v40  ;;  %v2067_v31 = vpop.f32.mrf.mxu0  ;;  %v7694_v8 = vld [vmem:[%s9057_s7 + $0x50] sm:$0xf] }
 0x3ce   : > { %v2333_v6 = vadd.f32 %v2332_v4, %v2243_v10  ;;  %6187 = vmatpush.bf16.msra.mxu3 %v7887_v47  ;;  %v12400_v27 = vadd.f32 %v12273_v20, %v4928_v43  ;;  %vm12402_vm5 = vcmp.eq.f32.partialorder %v4934_v25, 8.507059e+37  ;;  %v4994_v35 = vand.u32 2147483647, %v12275_v48  ;;  %v2156_v49 = vpop.f32.mrf.mxu1  ;;  %2385 = vmatmul.bf16.gmra.mxu0 %v16165_v39  ;;  %v8086_v43 = vld [vmem:[%s9057_s7 + $0x54] sm:$0xf0] }
 0x3cf   : > { %v4996_v19 = vand.u32 2147483648, %v12275_v48  ;;  %v5031_v38 = vmul.f32 %v12381_v45, %v12301_v24  ;;  %vm4931_vm6 = vweird.f32 %v12273_v20  ;;  %v5046_v57 = vmul.f32 %v12385_v55, %v12318_v7  ;;  %2474 = vmatmul.bf16.gmra.mxu1 %v16166_v53  ;;  %v7758_v44 = vld [vmem:[%s9057_s7 + $0xd0] sm:$0xf]  ;;  %v8102_v4 = vld [vmem:[%s9057_s7 + $0xd4] sm:$0xf0]  ;;  %2563 = vmatmul.bf16.gmra.mxu2 %v16165_v39 }
 0x3d0   : > { %v12414_v25 = vmul.f32 %v11840_v60, %v2333_v6  ;;  %v2157_v3 = vadd.f32 %v2156_v49, %v2067_v31  ;;  %v4972_v16 = vsub.f32 1.0, %v4971_v23  ;;  %v4987_v47 = vsub.f32 1.0, %v4986_v34  ;;  %2652 = vmatmul.bf16.gmra.mxu3 %v16166_v53  ;;  %vm12439_vm8 = vmor %vm4930_vm4, %vm4931_vm6 }
 0x3d1   : > { %8481 = vrcp.f32 %v12392_v33  ;;  %v7695_v10 = vor.u32 %v8086_v43, %v7694_v8  ;;  %v8478_v21 = vpop.eup %8477  ;;  %v5041_v52 = vand.u32 2147483648, %v12301_v24  ;;  %v7759_v6 = vor.u32 %v8102_v4, %v7758_v44  ;;  %v2245_v39 = vpop.f32.mrf.mxu2 }
 0x3d2   : > { %8483 = vpow2.f32 %v7527_v18  ;;  %v5362_v60 = vmul.f32 %v11843_v59, %v2157_v3  ;;  %vm4975_vm7 = vweird.f32 %v12271_v32  ;;  %v12428_v31 = vor.u32 1.1754944e-38, %v4981_v41 }
 0x3d3   : > { %v12430_v23 = vor.u32 1.1754944e-38, %v4996_v19  ;;  %v5032_v34 = vsub.f32 1.0, %v5031_v38  ;;  %v5039_v49 = vand.u32 2147483647, %v12301_v24  ;;  %5920 = vmatpush.bf16.msra.mxu0 %v7695_v10  ;;  %v12433_v8 = vpop.eup %8479  ;;  %vm4976_vm9 = vweird.f32 %v12355_v11  ;;  %6009 = vmatpush.bf16.msra.mxu1 %v7759_v6 }
 0x3d4   : > { %vm4990_vm10 = vweird.f32 %v12275_v48  ;;  %v5047_v18 = vsub.f32 1.0, %v5046_v57  ;;  %v5054_v41 = vand.u32 2147483647, %v12318_v7  ;;  %v12447_v19 = vpack.c.bf16 %v5362_v60, %v12369_v62  ;;  %v2334_v57 = vpop.f32.mrf.mxu3  ;;  %vm12510_vm3 = vmor %vm4975_vm7, %vm4976_vm9 }
 0x3d5   : > { %v4933_v0 = vsel %vm12439_vm8, %v12273_v20, %v12400_v27  ;;  %v4973_v38 = vmul.f32 %v12355_v11, %v4972_v16  ;;  %v4988_v3 = vmul.f32 %v12360_v2, %v4987_v47  ;;  %vm5035_vm11 = vweird.f32 %v12301_v24  ;;  %v16170_v16 = vld [vmem:[#allocation121_spill] sm:$0xff]  ;;  %v2070_v10 = vpop.f32.mrf.mxu0 }
 0x3d6   : > { %16169 = vst [vmem:[#allocation97_spill] sm:$0xff] %v12447_v19  ;;  %8485 = vpow2.f32 %v7530_v13  ;;  %vm4991_vm12 = vweird.f32 %v12360_v2  ;;  %v12457_v53 = vor.u32 1.1754944e-38, %v5041_v52  ;;  %vm5050_vm13 = vweird.f32 %v12318_v7  ;;  %v2159_v4 = vpop.f32.mrf.mxu1 }
 0x3d7   : > { %v12460_v62 = vadd.f32 1.0, %v8478_v21  ;;  %v2335_v43 = vadd.f32 %v2334_v57, %v2245_v39  ;;  %v12462_v44 = vpop.eup %8481  ;;  %v5033_v20 = vmul.f32 %v12381_v45, %v5032_v34  ;;  %v5056_v27 = vand.u32 2147483648, %v12318_v7 }
 0x3d8   : > { %v5091_v13 = vmul.f32 %v12433_v8, %v12358_v40  ;;  %v7531_v47 = vmul.f32 -1.442695, %v16170_v16  ;;  %v8484_v52 = vpop.eup %8483  ;;  %v4938_v21 = vsel %vm12402_vm5, %v12378_v30, %v4933_v0  ;;  %v16171_v60 = vand.u32 2147483647, %v12271_v32  ;;  %vm12528_vm5 = vmor %vm4990_vm10, %vm4991_vm12  ;;  %v16196_v30 = vld [vmem:[#allocation112_spill] sm:$0xff] }
 0x3d9   : > { %vm12478_vm15 = vcmp.eq.f32.partialorder %v4994_v35, 8.507059e+37  ;;  %v5048_v59 = vmul.f32 %v12385_v55, %v5047_v18  ;;  %v5363_v39 = vmul.f32 %v11900_v15, %v2335_v43  ;;  %v2160_v57 = vadd.f32 %v2159_v4, %v2070_v10  ;;  %v16183_v4 = vld [vmem:[#allocation122_spill] sm:$0xff] }
 0x3da   : > { %vm12474_vm14 = vcmp.eq.f32.partialorder %v16171_v60, 8.507059e+37  ;;  %v4974_v19 = vadd.f32 %v12355_v11, %v4973_v38  ;;  %v4989_v29 = vadd.f32 %v12360_v2, %v4988_v3  ;;  %vm5036_vm0 = vweird.f32 %v12381_v45 }
 0x3db   : > { %vm12487_vm1 = vcmp.eq.f32.partialorder %v5039_v49, 8.507059e+37  ;;  %v5101_v35 = vand.u32 2147483648, %v12358_v40  ;;  %vm12492_vm2 = vcmp.eq.f32.partialorder %v5054_v41, 8.507059e+37  ;;  %v5106_v15 = vmul.f32 %v12462_v44, %v12392_v33  ;;  %vm12542_vm7 = vmor %vm5035_vm11, %vm5036_vm0 }
 0x3dc   : > { %8487 = vrcp.f32 %v12460_v62  ;;  %v5366_v18 = vmul.f32 %v11918_v63, %v2160_v57  ;;  %v12501_v38 = vpack.c.bf16 %v5363_v39, %v12414_v25  ;;  %v8486_v49 = vpop.eup %8485  ;;  %v5034_v3 = vadd.f32 %v12381_v45, %v5033_v20 }
 0x3dd   : > { %v5092_v43 = vsub.f32 1.0, %v5091_v13  ;;  %v12504_v10 = vadd.f32 1.0, %v8484_v52  ;;  %8489 = vpow2.f32 %v7531_v47  ;;  %v5049_v63 = vadd.f32 %v12385_v55, %v5048_v59  ;;  %v2248_v59 = vpop.f32.mrf.mxu2 }
 0x3de   : > { %16180 = vst [vmem:[#allocation167_spill] sm:$0xff] %v12501_v38  ;;  %vm5051_vm4 = vweird.f32 %v12385_v55  ;;  %v5099_v25 = vand.u32 2147483647, %v12358_v40  ;;  %v7534_v20 = vmul.f32 -1.442695, %v16183_v4  ;;  %v12519_v13 = vmul.f32 %v4938_v21, %v16115_v5  ;;  %v2337_v5 = vpop.f32.mrf.mxu3 }
 0x3df   : > { %v4978_v47 = vsel %vm12510_vm3, %v12355_v11, %v4974_v19  ;;  %v5057_v52 = vor.u32 1.1754944e-38, %v5056_v27  ;;  %vm5095_vm6 = vweird.f32 %v12358_v40  ;;  %v12533_v60 = vor.u32 1.1754944e-38, %v5101_v35  ;;  %vm12555_vm8 = vmor %vm5050_vm13, %vm5051_vm4  ;;  %v2161_v35 = vpop.f32.mrf.mxu1 }
 0x3e0   : > { %v4993_v21 = vsel %vm12528_vm5, %v12360_v2, %v4989_v29  ;;  %v5107_v11 = vsub.f32 1.0, %v5106_v15  ;;  %v12546_v19 = vadd.f32 1.0, %v8486_v49  ;;  %v2338_v27 = vadd.f32 %v2337_v5, %v2248_v59  ;;  %v2072_v29 = vpop.f32.mrf.mxu0 }
 0x3e1   : > { %v5038_v39 = vsel %vm12542_vm7, %v12381_v45, %v5034_v3  ;;  %v5093_v24 = vmul.f32 %v12433_v8, %v5092_v43  ;;  %v5114_v57 = vand.u32 2147483647, %v12392_v33  ;;  %8491 = vrcp.f32 %v12504_v10  ;;  %v16190_v3 = vld [vmem:[#allocation20_spill] sm:$0xff]  ;;  %v16191_v43 = vld [vmem:[#allocation21_spill] sm:$0xff] }
 0x3e2   : > { %v12562_v15 = vpop.eup %8487  ;;  %v5053_v45 = vsel %vm12555_vm8, %v12385_v55, %v5049_v63  ;;  %vm5110_vm9 = vweird.f32 %v12392_v33  ;;  %8493 = vpow2.f32 %v7534_v20  ;;  %v5367_v7 = vmul.f32 %v12015_v50, %v2338_v27  ;;  %2390 = vmatmul.bf16.gmra.mxu0 %v16190_v3  ;;  %2479 = vmatmul.bf16.gmra.mxu1 %v16191_v43  ;;  %v16194_v63 = vld [vmem:[#allocation123_spill] sm:$0xff]  ;;  %v8132_v55 = vld [vmem:[%s9057_s7 + $0x1c4] sm:$0xf0] }
 0x3e3   : > { %v2162_v49 = vadd.f32 %v2161_v35, %v2072_v29  ;;  %v8490_v41 = vpop.eup %8489  ;;  %v4983_v32 = vsel %vm12474_vm14, %v12428_v31, %v4978_v47  ;;  %v4998_v59 = vsel %vm12478_vm15, %v12430_v23, %v4993_v21  ;;  %vm12577_vm10 = vcmp.eq.f32.partialorder %v5099_v25, 8.507059e+37  ;;  %v16195_v31 = vld [vmem:[#allocation55_spill] sm:$0xff]  ;;  %2568 = vmatmul.bf16.gmra.mxu2 %v16190_v3  ;;  %2657 = vmatmul.bf16.gmra.mxu3 %v16191_v43  ;;  %v16197_v47 = vld [vmem:[#allocation113_spill] sm:$0xff]  ;;  %v16203_v43 = vld [vmem:[#allocation124_spill] sm:$0xff] }
 0x3e4   : > { %v5116_v50 = vand.u32 2147483648, %v12392_v33  ;;  %v7535_v20 = vmul.f32 -1.442695, %v16194_v63  ;;  %v5043_v5 = vsel %vm12487_vm1, %v12457_v53, %v5038_v39  ;;  %v5108_v48 = vmul.f32 %v12462_v44, %v5107_v11 }
 0x3e5   : > { %8495 = vrcp.f32 %v12546_v19  ;;  %v5370_v6 = vmul.f32 %v16195_v31, %v2162_v49  ;;  %v5058_v23 = vsel %vm12492_vm2, %v5057_v52, %v5053_v45  ;;  %v5094_v34 = vadd.f32 %v12433_v8, %v5093_v24  ;;  %v2250_v2 = vpop.f32.mrf.mxu2 }
 0x3e6   : > { %vm5096_vm11 = vweird.f32 %v12433_v8  ;;  %v3261_v53 = vmul.f32 %v12562_v15, %v12460_v62  ;;  %v12598_v25 = vmul.f32 %v4983_v32, %v16196_v30  ;;  %v12601_v21 = vmul.f32 %v4998_v59, %v16197_v47  ;;  %v2339_v24 = vpop.f32.mrf.mxu3 }
 0x3e7   : > { %v12603_v11 = vadd.f32 1.0, %v8490_v41  ;;  %v12605_v27 = vpack.c.bf16 %v5370_v6, %v5366_v18  ;;  %v12607_v39 = vpop.eup %8491  ;;  %v12610_v0 = vmul.f32 %v5043_v5, %v16131_v9  ;;  %vm5111_vm12 = vweird.f32 %v12462_v44  ;;  %vm12624_vm14 = vmor %vm5095_vm6, %vm5096_vm11  ;;  %v2164_v40 = vpop.f32.mrf.mxu1  ;;  %v16205_v5 = vld [vmem:[#allocation58_spill] sm:$0xff]  ;;  %v7814_v9 = vld [vmem:[%s9057_s7 + $0x140] sm:$0xf] }
 0x3e8   : > { %vm12613_vm13 = vcmp.eq.f32.partialorder %v5114_v57, 8.507059e+37  ;;  %8497 = vpow2.f32 %v7535_v20  ;;  %v8494_v29 = vpop.eup %8493  ;;  %v12618_v35 = vmul.f32 %v5058_v23, %v16133_v58  ;;  %v5109_v18 = vadd.f32 %v12462_v44, %v5108_v48  ;;  %v2075_v32 = vpop.f32.mrf.mxu0  ;;  %vm12643_vm15 = vmor %vm5110_vm9, %vm5111_vm12 }
 0x3e9   : > { %16198 = vst [vmem:[#allocation168_spill] sm:$0xff] %v12605_v27  ;;  %v5117_v57 = vor.u32 1.1754944e-38, %v5116_v50  ;;  %v2340_v45 = vadd.f32 %v2339_v24, %v2250_v2  ;;  %v5098_v49 = vsel %vm12624_vm14, %v12433_v8, %v5094_v34  ;;  %v3262_v3 = vsub.f32 1.0, %v3261_v53  ;;  %v16204_v50 = vld [vmem:[#allocation125_spill] sm:$0xff]  ;;  %v16208_v53 = vld [vmem:[#allocation126_spill] sm:$0xff]  ;;  %v16209_v2 = vld [vmem:[#allocation91_spill] sm:$0xff] }
 0x3ea   : > { %v3271_v58 = vand.u32 2147483648, %v12460_v62  ;;  %v7538_v41 = vmul.f32 -1.442695, %v16203_v43  ;;  %8499 = vrcp.f32 %v12603_v11  ;;  %v7539_v20 = vmul.f32 -1.442695, %v16204_v50 }
 0x3eb   : > { %v12634_v59 = vpop.eup %8495  ;;  %v5371_v48 = vmul.f32 %v16205_v5, %v2340_v45  ;;  %v2165_v31 = vadd.f32 %v2164_v40, %v2075_v32  ;;  %vm3265_vm0 = vweird.f32 %v12460_v62  ;;  %v3269_v6 = vand.u32 2147483647, %v12460_v62  ;;  %v8116_v45 = vld [vmem:[%s9057_s7 + $0x144] sm:$0xf0]  ;;  %v7878_v32 = vld [vmem:[%s9057_s7 + $0x1c0] sm:$0xf] }
 0x3ec   : > { %v3276_v23 = vmul.f32 %v12607_v39, %v12504_v10  ;;  %v12651_v34 = vadd.f32 1.0, %v8494_v29  ;;  %v7542_v30 = vmul.f32 -1.442695, %v16208_v53  ;;  %v5103_v33 = vsel %vm12577_vm10, %v12533_v60, %v5098_v49 }
 0x3ed   : > { %v5113_v47 = vsel %vm12643_vm15, %v12462_v44, %v5109_v18  ;;  %v12661_v24 = vmul.f32 %v16209_v2, %v2165_v31  ;;  %v12666_v40 = vpack.c.bf16 %v5371_v48, %v5367_v7  ;;  %v3263_v5 = vmul.f32 %v12562_v15, %v3262_v3 }
 0x3ee   : > { %v8498_v29 = vpop.eup %8497  ;;  %v3321_v27 = vmul.f32 %v12634_v59, %v12546_v19  ;;  %8501 = vpow2.f32 %v7538_v41  ;;  %v7815_v60 = vor.u32 %v8116_v45, %v7814_v9  ;;  %v12672_v49 = vor.u32 1.1754944e-38, %v3271_v58  ;;  %v2253_v41 = vpop.f32.mrf.mxu2  ;;  %v16213_v45 = vld [vmem:[#allocation59_spill] sm:$0xff] }
 0x3ef   : > { %16210 = vst [vmem:[#allocation101_spill] sm:$0xff] %v12666_v40  ;;  %v3284_v44 = vand.u32 2147483647, %v12504_v10  ;;  %8503 = vpow2.f32 %v7539_v20  ;;  %v7879_v18 = vor.u32 %v8132_v55, %v7878_v32  ;;  %v5118_v31 = vsel %vm12613_vm13, %v5117_v57, %v5113_v47  ;;  %v2342_v48 = vpop.f32.mrf.mxu3  ;;  %v2166_v2 = vpop.f32.mrf.mxu1  ;;  %v8084_v55 = vld [vmem:[%s9057_s7 + $0x44] sm:$0xf0] }
 0x3f0   : > { %vm3266_vm1 = vweird.f32 %v12562_v15  ;;  %vm12678_vm2 = vcmp.eq.f32.partialorder %v3269_v6, 8.507059e+37  ;;  %v3277_v3 = vsub.f32 1.0, %v3276_v23  ;;  %8505 = vpow2.f32 %v7542_v30  ;;  %6099 = vmatpush.bf16.msra.mxu2 %v7815_v60  ;;  %v12682_v58 = vpop.eup %8499  ;;  %v2077_v47 = vpop.f32.mrf.mxu0  ;;  %v16214_v60 = vld [vmem:[#allocation22_spill] sm:$0xff] }
 0x3f1   : > { %v3286_v8 = vand.u32 2147483648, %v12504_v10  ;;  %8507 = vrcp.f32 %v12651_v34  ;;  %v12686_v52 = vadd.f32 1.0, %v8498_v29  ;;  %v2343_v57 = vadd.f32 %v2342_v48, %v2253_v41  ;;  %6188 = vmatpush.bf16.msra.mxu3 %v7879_v18  ;;  %v7750_v18 = vld [vmem:[%s9057_s7 + $0xc0] sm:$0xf]  ;;  %vm12715_vm4 = vmor %vm3265_vm0, %vm3266_vm1 }
 0x3f2   : > { %v3264_v20 = vadd.f32 %v12562_v15, %v3263_v5  ;;  %v3322_v6 = vsub.f32 1.0, %v3321_v27  ;;  %v3329_v23 = vand.u32 2147483647, %v12546_v19  ;;  %v3331_v30 = vand.u32 2147483648, %v12546_v19  ;;  %2395 = vmatmul.bf16.gmra.mxu0 %v16214_v60  ;;  %v16215_v5 = vld [vmem:[#allocation23_spill] sm:$0xff] }
 0x3f3   : > { %v12692_v9 = vmul.f32 %v5103_v33, %v16142_v1  ;;  %vm3280_vm3 = vweird.f32 %v12504_v10  ;;  %v12696_v32 = vmul.f32 %v16213_v45, %v2343_v57  ;;  %v2167_v29 = vadd.f32 %v2166_v2, %v2077_v47  ;;  %2484 = vmatmul.bf16.gmra.mxu1 %v16215_v5  ;;  %v7686_v27 = vld [vmem:[%s9057_s7 + $0x40] sm:$0xf]  ;;  %v16216_v33 = vld [vmem:[#allocation127_spill] sm:$0xff]  ;;  %2573 = vmatmul.bf16.gmra.mxu2 %v16214_v60 }
 0x3f4   : > { %v8502_v41 = vpop.eup %8501  ;;  %v3278_v48 = vmul.f32 %v12607_v39, %v3277_v3  ;;  %v3336_v1 = vmul.f32 %v12682_v58, %v12603_v11  ;;  %v7543_v40 = vmul.f32 -1.442695, %v16216_v33  ;;  %v7687_v38 = vor.u32 %v8084_v55, %v7686_v27  ;;  %2662 = vmatmul.bf16.gmra.mxu3 %v16215_v5 }
 0x3f5   : > { %v8504_v57 = vpop.eup %8503  ;;  %v12709_v47 = vmul.f32 %v5118_v31, %v16147_v36  ;;  %8509 = vrcp.f32 %v12686_v52  ;;  %v5378_v3 = vmul.f32 %v12230_v17, %v2167_v29  ;;  %v7751_v45 = vor.u32 %v8100_v46, %v7750_v18 }
 0x3f6   : > { %v8506_v27 = vpop.eup %8505  ;;  %v3268_v36 = vsel %vm12715_vm4, %v12562_v15, %v3264_v20  ;;  %vm12726_vm5 = vcmp.eq.f32.partialorder %v3284_v44, 8.507059e+37  ;;  %v3287_v31 = vor.u32 1.1754944e-38, %v3286_v8  ;;  %v3323_v55 = vmul.f32 %v12634_v59, %v3322_v6  ;;  %5921 = vmatpush.bf16.msra.mxu0 %v7687_v38  ;;  %v2255_v20 = vpop.f32.mrf.mxu2 }
 0x3f7   : > { %v12731_v37 = vpop.eup %8507  ;;  %vm3281_vm6 = vweird.f32 %v12607_v39  ;;  %vm3325_vm7 = vweird.f32 %v12546_v19  ;;  %v12735_v17 = vadd.f32 1.0, %v8502_v41  ;;  %6010 = vmatpush.bf16.msra.mxu1 %v7751_v45  ;;  %v12738_v46 = vpack.c.bf16 %v5378_v3, %v12661_v24  ;;  %v2344_v6 = vpop.f32.mrf.mxu3  ;;  %v16226_v45 = vld [vmem:[#allocation128_spill] sm:$0xff] }
 0x3f8   : > { %v3279_v15 = vadd.f32 %v12607_v39, %v3278_v48  ;;  %vm12741_vm8 = vcmp.eq.f32.partialorder %v3329_v23, 8.507059e+37  ;;  %v3332_v8 = vor.u32 1.1754944e-38, %v3331_v30  ;;  %v3337_v38 = vsub.f32 1.0, %v3336_v1  ;;  %v2169_v41 = vpop.f32.mrf.mxu1  ;;  %vm12763_vm10 = vmor %vm3280_vm3, %vm3281_vm6 }
 0x3f9   : > { %16221 = vst [vmem:[#allocation169_spill] sm:$0xff] %v12738_v46  ;;  %8511 = vpow2.f32 %v7543_v40  ;;  %v3273_v29 = vsel %vm12678_vm2, %v12672_v49, %v3268_v36  ;;  %vm3326_vm9 = vweird.f32 %v12634_v59  ;;  %v12749_v60 = vadd.f32 1.0, %v8504_v57  ;;  %v2080_v40 = vpop.f32.mrf.mxu0  ;;  %v16234_v36 = vld [vmem:[#allocation24_spill] sm:$0xff] }
 0x3fa   : > { %v2345_v24 = vadd.f32 %v2344_v6, %v2255_v20  ;;  %v3324_v5 = vadd.f32 %v12634_v59, %v3323_v55  ;;  %v3344_v23 = vand.u32 2147483647, %v12603_v11  ;;  %v3381_v30 = vmul.f32 %v12731_v37, %v12651_v34  ;;  %vm12782_vm11 = vmor %vm3325_vm7, %vm3326_vm9  ;;  %v16247_v20 = vld [vmem:[#allocation134_spill] sm:$0xff] }
 0x3fb   : > { %v12755_v18 = vadd.f32 1.0, %v8506_v27  ;;  %v12757_v48 = vpop.eup %8509  ;;  %v3346_v7 = vand.u32 2147483648, %v12603_v11  ;;  %8513 = vrcp.f32 %v12735_v17  ;;  %v2170_v57 = vadd.f32 %v2169_v41, %v2080_v40 }
 0x3fc   : > { %v5379_v1 = vmul.f32 %v12233_v12, %v2345_v24  ;;  %v12771_v2 = vmul.f32 %v3273_v29, %v16159_v14  ;;  %v3283_v3 = vsel %vm12763_vm10, %v12607_v39, %v3279_v15  ;;  %v3338_v10 = vmul.f32 %v12682_v58, %v3337_v38 }
 0x3fd   : > { %v7546_v27 = vmul.f32 -1.442695, %v16226_v45  ;;  %vm3340_vm12 = vweird.f32 %v12603_v11  ;;  %8515 = vrcp.f32 %v12749_v60  ;;  %v5382_v12 = vmul.f32 %v12328_v26, %v2170_v57 }
 0x3fe   : > { %v12790_v14 = vpack.c.bf16 %v5379_v1, %v12696_v32  ;;  %v3328_v55 = vsel %vm12782_vm11, %v12634_v59, %v3324_v5  ;;  %v3382_v15 = vsub.f32 1.0, %v3381_v30  ;;  %v3396_v19 = vmul.f32 %v12757_v48, %v12686_v52  ;;  %v2258_v24 = vpop.f32.mrf.mxu2 }
 0x3ff   : > { %v8512_v39 = vpop.eup %8511  ;;  %8517 = vrcp.f32 %v12755_v18  ;;  %v3288_v38 = vsel %vm12726_vm5, %v3287_v31, %v3283_v3  ;;  %vm12800_vm13 = vcmp.eq.f32.partialorder %v3344_v23, 8.507059e+37  ;;  %v3347_v26 = vor.u32 1.1754944e-38, %v3346_v7  ;;  %v2347_v5 = vpop.f32.mrf.mxu3 }
 0x400   : > { %16229 = vst [vmem:[#allocation102_spill] sm:$0xff] %v12790_v14  ;;  %v3391_v32 = vand.u32 2147483648, %v12651_v34  ;;  %v3339_v6 = vadd.f32 %v12682_v58, %v3338_v10  ;;  %vm3341_vm14 = vweird.f32 %v12682_v58  ;;  %v3389_v59 = vand.u32 2147483647, %v12651_v34  ;;  %v2171_v57 = vpop.f32.mrf.mxu1  ;;  %v16259_v14 = vld [vmem:[#allocation136_spill] sm:$0xff] }
 0x401   : > { %v3406_v29 = vand.u32 2147483648, %v12686_v52  ;;  %v12809_v30 = vpop.eup %8513  ;;  %v3333_v62 = vsel %vm12741_vm8, %v3332_v8, %v3328_v55  ;;  %vm3385_vm15 = vweird.f32 %v12651_v34  ;;  %v12814_v31 = vadd.f32 1.0, %v8512_v39  ;;  %v2082_v1 = vpop.f32.mrf.mxu0  ;;  %vm12827_vm0 = vmor %vm3340_vm12, %vm3341_vm14  ;;  %v16235_v39 = vld [vmem:[#allocation25_spill] sm:$0xff] }
 0x402   : > { %v2348_v23 = vadd.f32 %v2347_v5, %v2258_v24  ;;  %v12817_v40 = vmul.f32 %v3288_v38, %v16161_v61  ;;  %v3383_v41 = vmul.f32 %v12731_v37, %v3382_v15  ;;  %v3397_v49 = vsub.f32 1.0, %v3396_v19  ;;  %2400 = vmatmul.bf16.gmra.mxu0 %v16234_v36 }
 0x403   : > { %v3404_v7 = vand.u32 2147483647, %v12686_v52  ;;  %v12821_v3 = vpop.eup %8515  ;;  %v3392_v8 = vor.u32 1.1754944e-38, %v3391_v32  ;;  %8519 = vpow2.f32 %v7546_v27  ;;  %v2172_v10 = vadd.f32 %v2171_v57, %v2082_v1  ;;  %2489 = vmatmul.bf16.gmra.mxu1 %v16235_v39  ;;  %v16238_v32 = vld [vmem:[#allocation129_spill] sm:$0xff]  ;;  %2578 = vmatmul.bf16.gmra.mxu2 %v16234_v36 }
 0x404   : > { %v5383_v61 = vmul.f32 %v12331_v56, %v2348_v23  ;;  %v12837_v15 = vmul.f32 %v3333_v62, %v16162_v28  ;;  %v3343_v11 = vsel %vm12827_vm0, %v12682_v58, %v3339_v6  ;;  %vm12842_vm1 = vcmp.eq.f32.partialorder %v3389_v59, 8.507059e+37  ;;  %2667 = vmatmul.bf16.gmra.mxu3 %v16235_v39 }
 0x405   : > { %v12834_v55 = vpop.eup %8517  ;;  %v12846_v27 = vor.u32 1.1754944e-38, %v3406_v29  ;;  %v3441_v56 = vmul.f32 %v12809_v30, %v12735_v17  ;;  %v3451_v38 = vand.u32 2147483648, %v12735_v17  ;;  %8521 = vrcp.f32 %v12814_v31 }
 0x406   : > { %v7547_v28 = vmul.f32 -1.442695, %v16238_v32  ;;  %v5386_v24 = vmul.f32 %v12363_v54, %v2172_v10  ;;  %v3384_v58 = vadd.f32 %v12731_v37, %v3383_v41  ;;  %vm3386_vm2 = vweird.f32 %v12731_v37  ;;  %v2260_v57 = vpop.f32.mrf.mxu2 }
 0x407   : > { %v3398_v6 = vmul.f32 %v12757_v48, %v3397_v49  ;;  %vm3400_vm3 = vweird.f32 %v12686_v52  ;;  %v3456_v59 = vmul.f32 %v12821_v3, %v12749_v60  ;;  %v3348_v29 = vsel %vm12800_vm13, %v3347_v26, %v3343_v11  ;;  %v16240_v49 = vld [vmem:[#allocation130_spill] sm:$0xff]  ;;  %v2349_v44 = vpop.f32.mrf.mxu3  ;;  %vm12876_vm5 = vmor %vm3385_vm15, %vm3386_vm2 }
 0x408   : > { %v3466_v54 = vand.u32 2147483648, %v12749_v60  ;;  %v3501_v5 = vmul.f32 %v12834_v55, %v12755_v18  ;;  %v12867_v62 = vpack.c.bf16 %v5386_v24, %v5382_v12  ;;  %vm3401_vm4 = vweird.f32 %v12757_v48 }
 0x409   : > { %v3442_v23 = vsub.f32 1.0, %v3441_v56  ;;  %v3449_v41 = vand.u32 2147483647, %v12735_v17  ;;  %v7550_v1 = vmul.f32 -1.442695, %v16240_v49  ;;  %v8520_v10 = vpop.eup %8519  ;;  %vm3445_vm6 = vweird.f32 %v12735_v17  ;;  %v2085_v24 = vpop.f32.mrf.mxu0  ;;  %vm12928_vm11 = vmor %vm3400_vm3, %vm3401_vm4 }
 0x40a   : > { %16239 = vst [vmem:[#allocation70_spill] sm:$0xff] %v12867_v62  ;;  %v12881_v12 = vor.u32 1.1754944e-38, %v3451_v38  ;;  %v3464_v26 = vand.u32 2147483647, %v12749_v60  ;;  %8523 = vpow2.f32 %v7547_v28  ;;  %v2350_v36 = vadd.f32 %v2349_v44, %v2260_v57  ;;  %v2174_v62 = vpop.f32.mrf.mxu1  ;;  %v16245_v57 = vld [vmem:[#allocation133_spill] sm:$0xff] }
 0x40b   : > { %v12885_v39 = vmul.f32 %v3348_v29, %v16170_v16  ;;  %v3388_v11 = vsel %vm12876_vm5, %v12731_v37, %v3384_v58  ;;  %v12891_v34 = vadd.f32 %v12757_v48, %v3398_v6  ;;  %v3457_v56 = vsub.f32 1.0, %v3456_v59  ;;  %v12893_v38 = vpop.eup %8521 }
 0x40c   : > { %vm12895_vm7 = vcmp.eq.f32.partialorder %v3404_v7, 8.507059e+37  ;;  %v12899_v16 = vor.u32 1.1754944e-38, %v3466_v54  ;;  %v3502_v29 = vsub.f32 1.0, %v3501_v5  ;;  %v5387_v37 = vmul.f32 %v12366_v51, %v2350_v36  ;;  %v7806_v54 = vld [vmem:[%s9057_s7 + $0x130] sm:$0xf] }
 0x40d   : > { %v2175_v58 = vadd.f32 %v2174_v62, %v2085_v24  ;;  %v3443_v6 = vmul.f32 %v12809_v30, %v3442_v23  ;;  %vm3460_vm8 = vweird.f32 %v12749_v60  ;;  %v12904_v59 = vadd.f32 1.0, %v8520_v10  ;;  %v8114_v5 = vld [vmem:[%s9057_s7 + $0x134] sm:$0xf0]  ;;  %v7870_v62 = vld [vmem:[%s9057_s7 + $0x1b0] sm:$0xf] }
 0x40e   : > { %8525 = vpow2.f32 %v7550_v1  ;;  %v7551_v7 = vmul.f32 -1.442695, %v16245_v57  ;;  %v3393_v44 = vsel %vm12842_vm1, %v3392_v8, %v3388_v11  ;;  %vm3446_vm9 = vweird.f32 %v12809_v30  ;;  %v8130_v36 = vld [vmem:[%s9057_s7 + $0x1b4] sm:$0xf0] }
 0x40f   : > { %vm3505_vm10 = vweird.f32 %v12755_v18  ;;  %v12912_v51 = vmul.f32 %v12395_v22, %v2175_v58  ;;  %v12917_v23 = vpack.c.bf16 %v5387_v37, %v5383_v61  ;;  %v3458_v10 = vmul.f32 %v12821_v3, %v3457_v56  ;;  %vm12958_vm15 = vmor %vm3445_vm6, %vm3446_vm9 }
 0x410   : > { %v3516_v1 = vmul.f32 %v12893_v38, %v12814_v31  ;;  %v7554_v19 = vmul.f32 -1.442695, %v16247_v20  ;;  %v7807_v8 = vor.u32 %v8114_v5, %v7806_v54  ;;  %v8524_v11 = vpop.eup %8523  ;;  %vm12932_vm12 = vcmp.eq.f32.partialorder %v3449_v41, 8.507059e+37  ;;  %v2352_v5 = vpop.f32.mrf.mxu3 }
 0x411   : > { %16246 = vst [vmem:[#allocation104_spill] sm:$0xff] %v12917_v23  ;;  %v3503_v56 = vmul.f32 %v12834_v55, %v3502_v29  ;;  %v3509_v24 = vand.u32 2147483647, %v12755_v18  ;;  %v3511_v37 = vand.u32 2147483648, %v12755_v18  ;;  %v7871_v58 = vor.u32 %v8130_v36, %v7870_v62  ;;  %v2263_v29 = vpop.f32.mrf.mxu2  ;;  %v16254_v62 = vld [vmem:[#allocation135_spill] sm:$0xff] }
 0x412   : > { %v3403_v52 = vsel %vm12928_vm11, %v12757_v48, %v12891_v34  ;;  %v3444_v54 = vadd.f32 %v12809_v30, %v3443_v6  ;;  %vm3461_vm13 = vweird.f32 %v12821_v3  ;;  %vm12945_vm14 = vcmp.eq.f32.partialorder %v3464_v26, 8.507059e+37  ;;  %6100 = vmatpush.bf16.msra.mxu2 %v7807_v8  ;;  %v2176_v8 = vpop.f32.mrf.mxu1 }
 0x413   : > { %8527 = vpow2.f32 %v7551_v7  ;;  %v12950_v23 = vmul.f32 %v3393_v44, %v16183_v4  ;;  %v7555_v36 = vmul.f32 -1.442695, %v16254_v62  ;;  %v2353_v48 = vadd.f32 %v2352_v5, %v2263_v29  ;;  %6189 = vmatpush.bf16.msra.mxu3 %v7871_v58  ;;  %v2087_v44 = vpop.f32.mrf.mxu0  ;;  %v16257_v29 = vld [vmem:[#allocation26_spill] sm:$0xff]  ;;  %v16258_v5 = vld [vmem:[#allocation27_spill] sm:$0xff]  ;;  %vm12987_vm1 = vmor %vm3460_vm8, %vm3461_vm13 }
 0x414   : > { %8529 = vrcp.f32 %v12904_v59  ;;  %v8526_v34 = vpop.eup %8525  ;;  %v3459_v4 = vadd.f32 %v12821_v3, %v3458_v10  ;;  %v3517_v6 = vsub.f32 1.0, %v3516_v1  ;;  %v12963_v7 = vadd.f32 1.0, %v8524_v11  ;;  %2405 = vmatmul.bf16.gmra.mxu0 %v16257_v29  ;;  %2494 = vmatmul.bf16.gmra.mxu1 %v16258_v5  ;;  %v7678_v10 = vld [vmem:[%s9057_s7 + $0x30] sm:$0xf]  ;;  %v8082_v1 = vld [vmem:[%s9057_s7 + $0x34] sm:$0xf0] }
 0x415   : > { %8531 = vpow2.f32 %v7554_v19  ;;  %v3504_v22 = vadd.f32 %v12834_v55, %v3503_v56  ;;  %vm3506_vm0 = vweird.f32 %v12834_v55  ;;  %v12968_v17 = vmul.f32 %v12519_v13, %v2353_v48  ;;  %v7742_v11 = vld [vmem:[%s9057_s7 + $0xb0] sm:$0xf]  ;;  %v8098_v48 = vld [vmem:[%s9057_s7 + $0xb4] sm:$0xf0]  ;;  %2583 = vmatmul.bf16.gmra.mxu2 %v16257_v29  ;;  %2672 = vmatmul.bf16.gmra.mxu3 %v16258_v5 }
 0x416   : > { %v2177_v58 = vadd.f32 %v2176_v8, %v2087_v44  ;;  %v3408_v19 = vsel %vm12895_vm7, %v12846_v27, %v3403_v52  ;;  %v3448_v56 = vsel %vm12958_vm15, %v12809_v30, %v3444_v54  ;;  %v7558_v46 = vmul.f32 -1.442695, %v16259_v14  ;;  %vm13003_vm2 = vmor %vm3505_vm10, %vm3506_vm0 }
 0x417   : > { %v7679_v13 = vor.u32 %v8082_v1, %v7678_v10  ;;  %v12991_v8 = vadd.f32 1.0, %v8526_v34  ;;  %8533 = vpow2.f32 %v7555_v36  ;;  %v7743_v30 = vor.u32 %v8098_v48, %v7742_v11 }
 0x418   : > { %v5394_v27 = vmul.f32 %v12598_v25, %v2177_v58  ;;  %v3463_v52 = vsel %vm12987_vm1, %v12821_v3, %v3459_v4  ;;  %vm13007_vm3 = vcmp.eq.f32.partialorder %v3509_v24, 8.507059e+37  ;;  %v3518_v54 = vmul.f32 %v12893_v38, %v3517_v6  ;;  %v2354_v29 = vpop.f32.mrf.mxu3  ;;  %v16273_v25 = vld [vmem:[#allocation131_spill] sm:$0xff] }
 0x419   : > { %v8528_v28 = vpop.eup %8527  ;;  %8535 = vrcp.f32 %v12963_v7  ;;  %5922 = vmatpush.bf16.msra.mxu0 %v7679_v13  ;;  %v13016_v3 = vmul.f32 %v3408_v19, %v16194_v63  ;;  %v3508_v18 = vsel %vm13003_vm2, %v12834_v55, %v3504_v22  ;;  %v3512_v34 = vor.u32 1.1754944e-38, %v3511_v37  ;;  %6011 = vmatpush.bf16.msra.mxu1 %v7743_v30  ;;  %v2265_v63 = vpop.f32.mrf.mxu2 }
 0x41a   : > { %v13013_v36 = vpop.eup %8529  ;;  %v13022_v24 = vpack.c.bf16 %v5394_v27, %v12912_v51  ;;  %v3453_v4 = vsel %vm12932_vm12, %v12881_v12, %v3448_v56  ;;  %v3524_v6 = vand.u32 2147483647, %v12814_v31  ;;  %v3526_v58 = vand.u32 2147483648, %v12814_v31  ;;  %v2179_v5 = vpop.f32.mrf.mxu1 }
 0x41b   : > { %v8532_v26 = vpop.eup %8531  ;;  %8537 = vpow2.f32 %v7558_v46  ;;  %v3468_v55 = vsel %vm12945_vm14, %v12899_v16, %v3463_v52  ;;  %vm3521_vm4 = vweird.f32 %v12893_v38  ;;  %v2355_v51 = vadd.f32 %v2354_v29, %v2265_v63  ;;  %v2090_v22 = vpop.f32.mrf.mxu0 }
 0x41c   : > { %16266 = vst [vmem:[#allocation71_spill] sm:$0xff] %v13022_v24  ;;  %8539 = vrcp.f32 %v12991_v8  ;;  %v3513_v61 = vsel %vm13007_vm3, %v3512_v34, %v3508_v18  ;;  %v3519_v12 = vadd.f32 %v12893_v38, %v3518_v54  ;;  %v3561_v37 = vmul.f32 %v13013_v36, %v12904_v59  ;;  %v16274_v54 = vld [vmem:[#allocation132_spill] sm:$0xff]  ;;  %v16294_v24 = vld [vmem:[#allocation143_spill] sm:$0xff] }
 0x41d   : > { %v13039_v46 = vadd.f32 1.0, %v8528_v28  ;;  %v8534_v10 = vpop.eup %8533  ;;  %vm3520_vm5 = vweird.f32 %v12814_v31  ;;  %v13042_v16 = vadd.f32 1.0, %v8532_v26  ;;  %v5395_v41 = vmul.f32 %v12601_v21, %v2355_v51  ;;  %v16275_v26 = vld [vmem:[#allocation137_spill] sm:$0xff] }
 0x41e   : > { %v2180_v1 = vadd.f32 %v2179_v5, %v2090_v22  ;;  %v13048_v19 = vmul.f32 %v3453_v4, %v16203_v43  ;;  %vm13050_vm6 = vcmp.eq.f32.partialorder %v3524_v6, 8.507059e+37  ;;  %v3527_v13 = vor.u32 1.1754944e-38, %v3526_v58  ;;  %vm13063_vm7 = vmor %vm3520_vm5, %vm3521_vm4  ;;  %v16276_v4 = vld [vmem:[#allocation138_spill] sm:$0xff] }
 0x41f   : > { %v13045_v11 = vpop.eup %8535  ;;  %v3571_v48 = vand.u32 2147483648, %v12904_v59  ;;  %v13056_v44 = vmul.f32 %v3468_v55, %v16204_v50  ;;  %v13059_v31 = vmul.f32 %v3513_v61, %v16208_v53  ;;  %v13069_v27 = vpack.c.bf16 %v5395_v41, %v12968_v17 }
 0x420   : > { %v5398_v43 = vmul.f32 %v12610_v0, %v2180_v1  ;;  %v3523_v50 = vsel %vm13063_vm7, %v12893_v38, %v3519_v12  ;;  %v3562_v28 = vsub.f32 1.0, %v3561_v37  ;;  %8541 = vrcp.f32 %v13039_v46  ;;  %v16272_v0 = vld [vmem:[#allocation139_spill] sm:$0xff]  ;;  %v2357_v63 = vpop.f32.mrf.mxu3 }
 0x421   : > { %16271 = vst [vmem:[#allocation73_spill] sm:$0xff] %v13069_v27  ;;  %v8538_v30 = vpop.eup %8537  ;;  %v13075_v53 = vadd.f32 1.0, %v8534_v10  ;;  %v3576_v60 = vmul.f32 %v13045_v11, %v12963_v7  ;;  %8543 = vrcp.f32 %v13042_v16  ;;  %v7559_v17 = vmul.f32 -1.442695, %v16272_v0  ;;  %v2268_v58 = vpop.f32.mrf.mxu2 }
 0x422   : > { %v13077_v52 = vpop.eup %8539  ;;  %v13085_v18 = vadd.f32 %v16274_v54, %v16273_v25  ;;  %vm3565_vm8 = vweird.f32 %v12904_v59  ;;  %v3569_v38 = vand.u32 2147483647, %v12904_v59  ;;  %v13089_v34 = vor.u32 1.1754944e-38, %v3571_v48  ;;  %v2181_v10 = vpop.f32.mrf.mxu1  ;;  %v16278_v48 = vld [vmem:[#allocation29_spill] sm:$0xff] }
 0x423   : > { %v13093_v6 = vadd.f32 %v16276_v4, %v16275_v26  ;;  %v3528_v29 = vsel %vm13050_vm6, %v3527_v13, %v3523_v50  ;;  %v3586_v55 = vand.u32 2147483648, %v12963_v7  ;;  %v13098_v51 = vadd.f32 1.0, %v8538_v30  ;;  %v2092_v5 = vpop.f32.mrf.mxu0  ;;  %v16277_v13 = vld [vmem:[#allocation28_spill] sm:$0xff] }
 0x424   : > { %v2358_v61 = vadd.f32 %v2357_v63, %v2268_v58  ;;  %v3563_v12 = vmul.f32 %v13013_v36, %v3562_v28  ;;  %v3621_v37 = vmul.f32 %v13077_v52, %v12991_v8  ;;  %v3631_v22 = vand.u32 2147483648, %v12991_v8  ;;  %2410 = vmatmul.bf16.gmra.mxu0 %v16277_v13  ;;  %2499 = vmatmul.bf16.gmra.mxu1 %v16278_v48 }
 0x425   : > { %8545 = vrcp.f32 %v13075_v53  ;;  %v3577_v41 = vsub.f32 1.0, %v3576_v60  ;;  %v2182_v56 = vadd.f32 %v2181_v10, %v2092_v5  ;;  %v13111_v30 = vmul.f32 %v3528_v29, %v16216_v33  ;;  %2588 = vmatmul.bf16.gmra.mxu2 %v16277_v13  ;;  %2677 = vmatmul.bf16.gmra.mxu3 %v16278_v48 }
 0x426   : > { %8547 = vpow2.f32 %v7559_v17  ;;  %v5399_v1 = vmul.f32 %v12618_v35, %v2358_v61  ;;  %v13108_v21 = vpop.eup %8541  ;;  %v3584_v50 = vand.u32 2147483647, %v12963_v7  ;;  %v3629_v28 = vand.u32 2147483647, %v12991_v8 }
 0x427   : > { %v3646_v25 = vand.u32 2147483648, %v13039_v46  ;;  %v13116_v60 = vpop.eup %8543  ;;  %vm13118_vm9 = vcmp.eq.f32.partialorder %v3569_v38, 8.507059e+37  ;;  %vm3580_vm10 = vweird.f32 %v12963_v7  ;;  %v13123_v17 = vor.u32 1.1754944e-38, %v3586_v55 }
 0x428   : > { %8549 = vrcp.f32 %v13098_v51  ;;  %v7562_v33 = vmul.f32 -1.442695, %v13085_v18  ;;  %v5402_v54 = vmul.f32 %v12692_v9, %v2182_v56  ;;  %v3564_v26 = vadd.f32 %v13013_v36, %v3563_v12  ;;  %v2359_v10 = vpop.f32.mrf.mxu3  ;;  %v16287_v56 = vld [vmem:[#allocation141_spill] sm:$0xff] }
 0x429   : > { %vm3566_vm11 = vweird.f32 %v13013_v36  ;;  %v3622_v38 = vsub.f32 1.0, %v3621_v37  ;;  %v3691_v4 = vand.u32 2147483648, %v13042_v16  ;;  %v3578_v58 = vmul.f32 %v13045_v11, %v3577_v41  ;;  %v2270_v5 = vpop.f32.mrf.mxu2 }
 0x42a   : > { %v13134_v63 = vor.u32 1.1754944e-38, %v3631_v22  ;;  %v3636_v29 = vmul.f32 %v13108_v21, %v13039_v46  ;;  %v13138_v55 = vpack.c.bf16 %v5402_v54, %v5398_v43  ;;  %vm3581_vm12 = vweird.f32 %v13045_v11  ;;  %vm13152_vm13 = vmor %vm3565_vm8, %vm3566_vm11  ;;  %v2460_v61 = vpop.f32.mrf.mxu1 }
 0x42b   : > { %v13140_v9 = vpop.eup %8545  ;;  %v13144_v12 = vor.u32 1.1754944e-38, %v3646_v25  ;;  %v3681_v37 = vmul.f32 %v13116_v60, %v13042_v16  ;;  %vm13156_vm14 = vcmp.eq.f32.partialorder %v3584_v50, 8.507059e+37  ;;  %vm3625_vm15 = vweird.f32 %v12991_v8  ;;  %v2371_v54 = vpop.f32.mrf.mxu0  ;;  %v16286_v50 = vld [vmem:[#allocation140_spill] sm:$0xff]  ;;  %vm13199_vm2 = vmor %vm3580_vm10, %vm3581_vm12 }
 0x42c   : > { %16281 = vst [vmem:[#allocation99_spill] sm:$0xff] %v13138_v55  ;;  %v8548_v22 = vpop.eup %8547  ;;  %vm3626_vm0 = vweird.f32 %v13077_v52  ;;  %8551 = vpow2.f32 %v7562_v33  ;;  %v2360_v13 = vadd.f32 %v2359_v10, %v2270_v5  ;;  %v3568_v59 = vsel %vm13152_vm13, %v13013_v36, %v3564_v26 }
 0x42d   : > { %v3623_v48 = vmul.f32 %v13077_v52, %v3622_v38  ;;  %v13167_v25 = vor.u32 1.1754944e-38, %v3691_v4  ;;  %v3579_v33 = vadd.f32 %v13045_v11, %v3578_v58  ;;  %v3637_v5 = vsub.f32 1.0, %v3636_v29  ;;  %v8112_v29 = vld [vmem:[%s9057_s7 + $0x124] sm:$0xf0]  ;;  %vm13230_vm6 = vmor %vm3625_vm15, %vm3626_vm0 }
 0x42e   : > { %v13170_v55 = vpop.eup %8549  ;;  %v5403_v10 = vmul.f32 %v12709_v47, %v2360_v13  ;;  %v2461_v43 = vadd.f32 %v2460_v61, %v2371_v54  ;;  %v3682_v36 = vsub.f32 1.0, %v3681_v37  ;;  %v3696_v26 = vmul.f32 %v13140_v9, %v13075_v53  ;;  %v7798_v47 = vld [vmem:[%s9057_s7 + $0x120] sm:$0xf] }
 0x42f   : > { %v13176_v38 = vadd.f32 1.0, %v8548_v22  ;;  %v7563_v4 = vmul.f32 -1.442695, %v13093_v6  ;;  %vm3641_vm1 = vweird.f32 %v13108_v21  ;;  %v13182_v27 = vadd.f32 %v16287_v56, %v16286_v50  ;;  %v7862_v61 = vld [vmem:[%s9057_s7 + $0x1a0] sm:$0xf]  ;;  %v16293_v56 = vld [vmem:[#allocation142_spill] sm:$0xff] }
 0x430   : > { %v13185_v58 = vmul.f32 %v12771_v2, %v2461_v43  ;;  %v13190_v37 = vpack.c.bf16 %v5403_v10, %v5399_v1  ;;  %v3573_v22 = vsel %vm13118_vm9, %v13089_v34, %v3568_v59  ;;  %vm13203_vm3 = vcmp.eq.f32.partialorder %v3629_v28, 8.507059e+37  ;;  %v8128_v59 = vld [vmem:[%s9057_s7 + $0x1a4] sm:$0xf0] }
 0x431   : > { %vm3640_vm4 = vweird.f32 %v13039_v46  ;;  %v3741_v1 = vmul.f32 %v13170_v55, %v13098_v51  ;;  %v7566_v35 = vmul.f32 -1.442695, %v16293_v56  ;;  %v7799_v34 = vor.u32 %v8112_v29, %v7798_v47  ;;  %v2549_v47 = vpop.f32.mrf.mxu2  ;;  %v2638_v29 = vpop.f32.mrf.mxu3 }
 0x432   : > { %16288 = vst [vmem:[#allocation103_spill] sm:$0xff] %v13190_v37  ;;  %v8552_v50 = vpop.eup %8551  ;;  %v3583_v7 = vsel %vm13199_vm2, %v13045_v11, %v3579_v33  ;;  %v3624_v54 = vadd.f32 %v13077_v52, %v3623_v48  ;;  %vm3685_vm5 = vweird.f32 %v13042_v16  ;;  %v3706_v28 = vand.u32 2147483648, %v13075_v53  ;;  %v2462_v41 = vpop.f32.mrf.mxu1  ;;  %vm13291_vm12 = vmor %vm3640_vm4, %vm3641_vm1 }
 0x433   : > { %v7863_v10 = vor.u32 %v8128_v59, %v7862_v61  ;;  %v3638_v43 = vmul.f32 %v13108_v21, %v3637_v5  ;;  %v3697_v37 = vsub.f32 1.0, %v3696_v26  ;;  %8553 = vpow2.f32 %v7563_v4  ;;  %6101 = vmatpush.bf16.msra.mxu2 %v7799_v34  ;;  %v2373_v4 = vpop.f32.mrf.mxu0  ;;  %v16301_v34 = vld [vmem:[#allocation31_spill] sm:$0xff]  ;;  %v7670_v59 = vld [vmem:[%s9057_s7 + $0x20] sm:$0xf] }
 0x434   : > { %v7567_v42 = vmul.f32 -1.442695, %v16294_v24  ;;  %v3683_v56 = vmul.f32 %v13116_v60, %v3682_v36  ;;  %8555 = vrcp.f32 %v13176_v38  ;;  %v7570_v11 = vmul.f32 -1.442695, %v13182_v27  ;;  %2504 = vmatmul.bf16.gmra.mxu1 %v16301_v34 }
 0x435   : > { %v2639_v48 = vadd.f32 %v2638_v29, %v2549_v47  ;;  %6190 = vmatpush.bf16.msra.mxu3 %v7863_v10  ;;  %v3588_v33 = vsel %vm13156_vm14, %v13123_v17, %v3583_v7  ;;  %vm3700_vm7 = vweird.f32 %v13075_v53  ;;  %v3742_v36 = vsub.f32 1.0, %v3741_v1  ;;  %v7734_v7 = vld [vmem:[%s9057_s7 + $0xa0] sm:$0xf]  ;;  %v8096_v29 = vld [vmem:[%s9057_s7 + $0xa4] sm:$0xf0] }
 0x436   : > { %v13235_v26 = vadd.f32 1.0, %v8552_v50  ;;  %8557 = vpow2.f32 %v7566_v35  ;;  %v3628_v17 = vsel %vm13230_vm6, %v13077_v52, %v3624_v54  ;;  %v16297_v8 = vand.u32 2147483647, %v13039_v46  ;;  %v16300_v35 = vld [vmem:[#allocation30_spill] sm:$0xff]  ;;  %v8080_v50 = vld [vmem:[%s9057_s7 + $0x24] sm:$0xf0]  ;;  %2682 = vmatmul.bf16.gmra.mxu3 %v16301_v34 }
 0x437   : > { %vm3686_vm9 = vweird.f32 %v13116_v60  ;;  %v13248_v13 = vmul.f32 %v12817_v40, %v2639_v48  ;;  %v2463_v1 = vadd.f32 %v2462_v41, %v2373_v4  ;;  %2415 = vmatmul.bf16.gmra.mxu0 %v16300_v35  ;;  %v3639_v52 = vadd.f32 %v13108_v21, %v3638_v43  ;;  %2593 = vmatmul.bf16.gmra.mxu2 %v16300_v35 }
 0x438   : > { %vm13242_vm8 = vcmp.eq.f32.partialorder %v16297_v8, 8.507059e+37  ;;  %v16302_v54 = vand.u32 2147483647, %v13042_v16  ;;  %v3698_v47 = vmul.f32 %v13140_v9, %v3697_v37  ;;  %8559 = vpow2.f32 %v7567_v42  ;;  %vm13302_vm13 = vmor %vm3685_vm5, %vm3686_vm9 }
 0x439   : > { %v7671_v40 = vor.u32 %v8080_v50, %v7670_v59  ;;  %v3684_v48 = vadd.f32 %v13116_v60, %v3683_v56  ;;  %8561 = vpow2.f32 %v7570_v11  ;;  %v5284_v5 = vmul.f32 %v12837_v15, %v2463_v1  ;;  %v8554_v4 = vpop.eup %8553 }
 0x43a   : > { %vm13258_vm10 = vcmp.eq.f32.partialorder %v16302_v54, 8.507059e+37  ;;  %v7735_v43 = vor.u32 %v8096_v29, %v7734_v7  ;;  %v13269_v41 = vmul.f32 %v3573_v22, %v16226_v45  ;;  %v16305_v8 = vand.u32 2147483647, %v13075_v53  ;;  %v13279_v15 = vpop.eup %8555 }
 0x43b   : > { %v3743_v37 = vmul.f32 %v13170_v55, %v3742_v36  ;;  %8563 = vrcp.f32 %v13235_v26  ;;  %5923 = vmatpush.bf16.msra.mxu0 %v7671_v40  ;;  %v13282_v56 = vmul.f32 %v3588_v33, %v16238_v32  ;;  %v3633_v45 = vsel %vm13203_vm3, %v13134_v63, %v3628_v17  ;;  %v16313_v63 = vld [vmem:[#allocation144_spill] sm:$0xff]  ;;  %v2376_v54 = vpop.f32.mrf.mxu0 }
 0x43c   : > { %vm13273_vm11 = vcmp.eq.f32.partialorder %v16305_v8, 8.507059e+37  ;;  %v3707_v11 = vor.u32 1.1754944e-38, %v3706_v28  ;;  %v13296_v36 = vpack.c.bf16 %v5284_v5, %v13185_v58  ;;  %6012 = vmatpush.bf16.msra.mxu1 %v7735_v43  ;;  %v8558_v1 = vpop.eup %8557  ;;  %v3699_v46 = vadd.f32 %v13140_v9, %v3698_v47  ;;  %v2551_v58 = vpop.f32.mrf.mxu2 }
 0x43d   : > { %vm3701_vm14 = vweird.f32 %v13140_v9  ;;  %vm3745_vm15 = vweird.f32 %v13098_v51  ;;  %v7571_v2 = vmul.f32 -1.442695, %v16313_v63  ;;  %v2640_v28 = vpop.f32.mrf.mxu3  ;;  %v3643_v33 = vsel %vm13291_vm12, %v13108_v21, %v3639_v52  ;;  %v2465_v47 = vpop.f32.mrf.mxu1 }
 0x43e   : > { %16310 = vst [vmem:[#allocation74_spill] sm:$0xff] %v13296_v36  ;;  %v3688_v16 = vsel %vm13302_vm13, %v13116_v60, %v3684_v48  ;;  %v3751_v17 = vand.u32 2147483648, %v13098_v51  ;;  %v2641_v35 = vadd.f32 %v2640_v28, %v2551_v58  ;;  %v8560_v34 = vpop.eup %8559  ;;  %v3744_v59 = vadd.f32 %v13170_v55, %v3743_v37  ;;  %vm13327_vm1 = vmor %vm3700_vm7, %vm3701_vm14 }
 0x43f   : > { %vm3746_vm0 = vweird.f32 %v13170_v55  ;;  %v3756_v50 = vmul.f32 %v13279_v15, %v13176_v38  ;;  %v13321_v7 = vadd.f32 1.0, %v8554_v4  ;;  %v8562_v21 = vpop.eup %8561  ;;  %v3749_v52 = vand.u32 2147483647, %v13098_v51  ;;  %v16316_v4 = vld [vmem:[#allocation145_spill] sm:$0xff] }
 0x440   : > { %v13332_v40 = vadd.f32 1.0, %v8558_v1  ;;  %v5285_v29 = vmul.f32 %v12885_v39, %v2641_v35  ;;  %v2466_v48 = vadd.f32 %v2465_v47, %v2376_v54  ;;  %v3648_v43 = vsel %vm13242_vm8, %v13144_v12, %v3643_v33  ;;  %vm13351_vm2 = vmor %vm3745_vm15, %vm3746_vm0  ;;  %v16324_v39 = vld [vmem:[#allocation146_spill] sm:$0xff] }
 0x441   : > { %v13335_v5 = vpop.eup %8563  ;;  %v3703_v53 = vsel %vm13327_vm1, %v13140_v9, %v3699_v46  ;;  %8565 = vpow2.f32 %v7571_v2  ;;  %v7574_v8 = vmul.f32 -1.442695, %v16316_v4  ;;  %v3693_v37 = vsel %vm13258_vm10, %v13167_v25, %v3688_v16 }
 0x442   : > { %v3752_v12 = vor.u32 1.1754944e-38, %v3751_v17  ;;  %v13356_v61 = vpack.c.bf16 %v5285_v29, %v13248_v13  ;;  %v5288_v9 = vmul.f32 %v12950_v23, %v2466_v48  ;;  %v3748_v22 = vsel %vm13351_vm2, %v13170_v55, %v3744_v59  ;;  %v16320_v59 = vld [vmem:[#allocation32_spill] sm:$0xff] }
 0x443   : > { %v3757_v10 = vsub.f32 1.0, %v3756_v50  ;;  %8567 = vrcp.f32 %v13321_v7  ;;  %v13363_v25 = vadd.f32 1.0, %v8560_v34  ;;  %v3708_v51 = vsel %vm13273_vm11, %v3707_v11, %v3703_v53  ;;  %v2378_v16 = vpop.f32.mrf.mxu0  ;;  %v16321_v50 = vld [vmem:[#allocation33_spill] sm:$0xff] }
 0x444   : > { %16319 = vst [vmem:[#allocation93_spill] sm:$0xff] %v13356_v61  ;;  %v3801_v1 = vmul.f32 %v13335_v5, %v13235_v26  ;;  %8569 = vrcp.f32 %v13332_v40  ;;  %v13370_v13 = vadd.f32 1.0, %v8562_v21  ;;  %v13373_v23 = vmul.f32 %v3633_v45, %v16240_v49  ;;  %v2554_v32 = vpop.f32.mrf.mxu2  ;;  %2509 = vmatmul.bf16.gmra.mxu1 %v16321_v50 }
 0x445   : > { %vm3750_vm3 = vcmp.eq.f32.partialorder %v3749_v52, 8.507059e+37  ;;  %v3766_v55 = vand.u32 2147483648, %v13176_v38  ;;  %8571 = vpow2.f32 %v7574_v8  ;;  %v2643_v46 = vpop.f32.mrf.mxu3  ;;  %v13377_v2 = vmul.f32 %v3648_v43, %v16245_v57  ;;  %v2467_v17 = vpop.f32.mrf.mxu1 }
 0x446   : > { %v3753_v42 = vsel %vm3750_vm3, %v3752_v12, %v3748_v22  ;;  %v3764_v11 = vand.u32 2147483647, %v13176_v38  ;;  %v2644_v58 = vadd.f32 %v2643_v46, %v2554_v32  ;;  %v13381_v33 = vmul.f32 %v3693_v37, %v16247_v20  ;;  %2687 = vmatmul.bf16.gmra.mxu3 %v16321_v50 }
 0x447   : > { %v8566_v28 = vpop.eup %8565  ;;  %v13384_v49 = vmul.f32 %v3708_v51, %v16254_v62  ;;  %v3758_v45 = vmul.f32 %v13279_v15, %v3757_v10  ;;  %8573 = vrcp.f32 %v13363_v25  ;;  %v3802_v35 = vsub.f32 1.0, %v3801_v1  ;;  %2420 = vmatmul.bf16.gmra.mxu0 %v16320_v59  ;;  %2598 = vmatmul.bf16.gmra.mxu2 %v16320_v59 }
 0x448   : > { %8575 = vrcp.f32 %v13370_v13  ;;  %v5289_v57 = vmul.f32 %v13016_v3, %v2644_v58  ;;  %v2468_v34 = vadd.f32 %v2467_v17, %v2378_v16  ;;  %v13395_v62 = vmul.f32 %v3753_v42, %v16259_v14 }
 0x449   : > { %v13392_v20 = vpop.eup %8567  ;;  %vm3760_vm4 = vweird.f32 %v13176_v38  ;;  %v3767_v54 = vor.u32 1.1754944e-38, %v3766_v55  ;;  %v3811_v47 = vand.u32 2147483648, %v13235_v26  ;;  %vm13401_vm5 = vcmp.eq.f32.partialorder %v3764_v11, 8.507059e+37 }
 0x44a   : > { %v13399_v21 = vpop.eup %8569  ;;  %v3809_v3 = vand.u32 2147483647, %v13235_v26  ;;  %v3826_v52 = vand.u32 2147483648, %v13321_v7  ;;  %v13407_v29 = vadd.f32 1.0, %v8566_v28  ;;  %v5292_v14 = vmul.f32 %v13048_v19, %v2468_v34 }
 0x44b   : > { %v8572_v48 = vpop.eup %8571  ;;  %v3759_v43 = vadd.f32 %v13279_v15, %v3758_v45  ;;  %vm3761_vm6 = vweird.f32 %v13279_v15  ;;  %vm3805_vm7 = vweird.f32 %v13235_v26  ;;  %v3871_v53 = vand.u32 2147483648, %v13332_v40 }
 0x44c   : > { %v3803_v8 = vmul.f32 %v13335_v5, %v3802_v35  ;;  %v3816_v37 = vmul.f32 %v13392_v20, %v13321_v7  ;;  %v7575_v19 = vmul.f32 -1.442695, %v16324_v39  ;;  %v13420_v12 = vpack.c.bf16 %v5292_v14, %v5288_v9  ;;  %v2556_v32 = vpop.f32.mrf.mxu2  ;;  %vm13434_vm8 = vmor %vm3760_vm4, %vm3761_vm6  ;;  %v2381_v35 = vpop.f32.mrf.mxu0 }
 0x44d   : > { %v13422_v22 = vpop.eup %8573  ;;  %v3812_v10 = vor.u32 1.1754944e-38, %v3811_v47  ;;  %v3824_v51 = vand.u32 2147483647, %v13321_v7  ;;  %v3861_v1 = vmul.f32 %v13399_v21, %v13332_v40  ;;  %v3869_v55 = vand.u32 2147483647, %v13332_v40  ;;  %v2645_v46 = vpop.f32.mrf.mxu3 }
 0x44e   : > { %16325 = vst [vmem:[#allocation105_spill] sm:$0xff] %v13420_v12  ;;  %v13428_v42 = vpop.eup %8575  ;;  %vm13438_vm9 = vcmp.eq.f32.partialorder %v3809_v3, 8.507059e+37  ;;  %v13442_v58 = vor.u32 1.1754944e-38, %v3826_v52  ;;  %8577 = vrcp.f32 %v13407_v29  ;;  %v13445_v28 = vadd.f32 1.0, %v8572_v48  ;;  %v2470_v34 = vpop.f32.mrf.mxu1 }
 0x44f   : > { %v2646_v45 = vadd.f32 %v2645_v46, %v2556_v32  ;;  %v3763_v16 = vsel %vm13434_vm8, %v13279_v15, %v3759_v43  ;;  %vm3806_vm10 = vweird.f32 %v13335_v5  ;;  %v13451_v38 = vor.u32 1.1754944e-38, %v3871_v53  ;;  %v7790_v43 = vld [vmem:[%s9057_s7 + $0x110] sm:$0xf]  ;;  %v8110_v53 = vld [vmem:[%s9057_s7 + $0x114] sm:$0xf0] }
 0x450   : > { %v3886_v17 = vand.u32 2147483648, %v13363_v25  ;;  %v3804_v59 = vadd.f32 %v13335_v5, %v3803_v8  ;;  %v3817_v50 = vsub.f32 1.0, %v3816_v37  ;;  %v2471_v3 = vadd.f32 %v2470_v34, %v2381_v35  ;;  %vm13476_vm12 = vmor %vm3805_vm7, %vm3806_vm10 }
 0x451   : > { %v5293_v47 = vmul.f32 %v13056_v44, %v2646_v45  ;;  %v3862_v52 = vsub.f32 1.0, %v3861_v1  ;;  %v3876_v15 = vmul.f32 %v13422_v22, %v13363_v25  ;;  %v3921_v14 = vmul.f32 %v13428_v42, %v13370_v13  ;;  %v7854_v44 = vld [vmem:[%s9057_s7 + $0x190] sm:$0xf]  ;;  %v16333_v1 = vld [vmem:[#allocation147_spill] sm:$0xff] }
 0x452   : > { %8579 = vpow2.f32 %v7575_v19  ;;  %vm3820_vm11 = vweird.f32 %v13321_v7  ;;  %v13463_v48 = vmul.f32 %v13059_v31, %v2471_v3  ;;  %v3768_v37 = vsel %vm13401_vm5, %v3767_v54, %v3763_v16 }
 0x453   : > { %8581 = vrcp.f32 %v13445_v28  ;;  %v13468_v8 = vpack.c.bf16 %v5293_v47, %v5289_v57  ;;  %vm3865_vm13 = vweird.f32 %v13332_v40  ;;  %v7578_v32 = vmul.f32 -1.442695, %v16333_v1  ;;  %v8126_v57 = vld [vmem:[%s9057_s7 + $0x194] sm:$0xf0] }
 0x454   : > { %v7791_v46 = vor.u32 %v8110_v53, %v7790_v43  ;;  %v13484_v9 = vpop.eup %8577  ;;  %v3808_v54 = vsel %vm13476_vm12, %v13335_v5, %v3804_v59  ;;  %v3818_v26 = vmul.f32 %v13392_v20, %v3817_v50  ;;  %vm3821_vm14 = vweird.f32 %v13392_v20  ;;  %v2559_v47 = vpop.f32.mrf.mxu2  ;;  %v16334_v5 = vld [vmem:[#allocation148_spill] sm:$0xff] }
 0x455   : > { %16330 = vst [vmem:[#allocation96_spill] sm:$0xff] %v13468_v8  ;;  %v7855_v60 = vor.u32 %v8126_v57, %v7854_v44  ;;  %v3863_v45 = vmul.f32 %v13399_v21, %v3862_v52  ;;  %v3877_v16 = vsub.f32 1.0, %v3876_v15  ;;  %v13492_v35 = vor.u32 1.1754944e-38, %v3886_v17  ;;  %v2648_v3 = vpop.f32.mrf.mxu3  ;;  %v2383_v15 = vpop.f32.mrf.mxu0  ;;  %v16339_v57 = vld [vmem:[#allocation37_spill] sm:$0xff]  ;;  %v8094_v8 = vld [vmem:[%s9057_s7 + $0x94] sm:$0xf0]  ;;  %vm13543_vm4 = vmor %vm3820_vm11, %vm3821_vm14 }
 0x456   : > { %v3922_v34 = vsub.f32 1.0, %v3921_v14  ;;  %6102 = vmatpush.bf16.msra.mxu2 %v7791_v46  ;;  %v13495_v43 = vmul.f32 %v3768_v37, %v16272_v0  ;;  %v3929_v53 = vand.u32 2147483647, %v13370_v13  ;;  %v7579_v59 = vmul.f32 -1.442695, %v16334_v5  ;;  %v2472_v14 = vpop.f32.mrf.mxu1 }
 0x457   : > { %v2649_v50 = vadd.f32 %v2648_v3, %v2559_v47  ;;  %6191 = vmatpush.bf16.msra.mxu3 %v7855_v60  ;;  %v3813_v52 = vsel %vm13438_vm9, %v3812_v10, %v3808_v54  ;;  %vm3880_vm15 = vweird.f32 %v13363_v25  ;;  %v3931_v17 = vand.u32 2147483648, %v13370_v13  ;;  %2425 = vmatmul.bf16.gmra.mxu0 %v16339_v57  ;;  %v7662_v54 = vld [vmem:[%s9057_s7 + $0x10] sm:$0xf] }
 0x458   : > { %v8580_v19 = vpop.eup %8579  ;;  %v3936_v0 = vmul.f32 %v13484_v9, %v13407_v29  ;;  %8583 = vpow2.f32 %v7578_v32  ;;  %v3819_v37 = vadd.f32 %v13392_v20, %v3818_v26  ;;  %vm13510_vm0 = vcmp.eq.f32.partialorder %v3824_v51, 8.507059e+37  ;;  %v16340_v51 = vld [vmem:[#allocation39_spill] sm:$0xff]  ;;  %v7726_v60 = vld [vmem:[%s9057_s7 + $0x90] sm:$0xf]  ;;  %2603 = vmatmul.bf16.gmra.mxu2 %v16339_v57 }
 0x459   : > { %v13505_v44 = vpop.eup %8581  ;;  %vm3866_vm1 = vweird.f32 %v13399_v21  ;;  %vm13517_vm2 = vcmp.eq.f32.partialorder %v3869_v55, 8.507059e+37  ;;  %vm3925_vm3 = vweird.f32 %v13370_v13  ;;  %v13523_v32 = vmul.f32 %v13111_v30, %v2649_v50  ;;  %2514 = vmatmul.bf16.gmra.mxu1 %v16340_v51  ;;  %v8078_v26 = vld [vmem:[%s9057_s7 + $0x14] sm:$0xf0]  ;;  %2692 = vmatmul.bf16.gmra.mxu3 %v16340_v51 }
 0x45a   : > { %v2473_v46 = vadd.f32 %v2472_v14, %v2383_v15  ;;  %v3864_v47 = vadd.f32 %v13399_v21, %v3863_v45  ;;  %v3878_v55 = vmul.f32 %v13422_v22, %v3877_v16  ;;  %v3923_v3 = vmul.f32 %v13428_v42, %v3922_v34  ;;  %vm13558_vm6 = vmor %vm3865_vm13, %vm3866_vm1  ;;  %v16363_v14 = vld [vmem:[#allocation153_spill] sm:$0xff] }
 0x45b   : > { %v7663_v31 = vor.u32 %v8078_v26, %v7662_v54  ;;  %v13534_v12 = vadd.f32 1.0, %v8580_v19  ;;  %8585 = vpow2.f32 %v7579_v59  ;;  %v7727_v50 = vor.u32 %v8094_v8, %v7726_v60  ;;  %v16346_v8 = vld [vmem:[#allocation150_spill] sm:$0xff] }
 0x45c   : > { %v5300_v30 = vmul.f32 %v13269_v41, %v2473_v46  ;;  %vm3881_vm5 = vweird.f32 %v13422_v22  ;;  %v3937_v16 = vsub.f32 1.0, %v3936_v0  ;;  %v3981_v34 = vmul.f32 %v13505_v44, %v13445_v28  ;;  %v16343_v41 = vld [vmem:[#allocation149_spill] sm:$0xff]  ;;  %v2561_v57 = vpop.f32.mrf.mxu2 }
 0x45d   : > { %v7582_v59 = vmul.f32 -1.442695, %v16343_v41  ;;  %5924 = vmatpush.bf16.msra.mxu0 %v7663_v31  ;;  %v13552_v19 = vmul.f32 %v3813_v52, %v13085_v18  ;;  %vm3926_vm7 = vweird.f32 %v13428_v42  ;;  %v7583_v0 = vmul.f32 -1.442695, %v16346_v8  ;;  %6013 = vmatpush.bf16.msra.mxu1 %v7727_v50  ;;  %v2650_v51 = vpop.f32.mrf.mxu3  ;;  %vm13593_vm11 = vmor %vm3880_vm15, %vm3881_vm5 }
 0x45e   : > { %v13565_v15 = vpack.c.bf16 %v5300_v30, %v13463_v48  ;;  %v8584_v31 = vpop.eup %8583  ;;  %v3823_v18 = vsel %vm13543_vm4, %v13392_v20, %v3819_v37  ;;  %v3868_v40 = vsel %vm13558_vm6, %v13399_v21, %v3864_v47  ;;  %v16348_v52 = vand.u32 2147483647, %v13363_v25  ;;  %v2386_v47 = vpop.f32.mrf.mxu0  ;;  %vm13610_vm12 = vmor %vm3925_vm3, %vm3926_vm7 }
 0x45f   : > { %vm13579_vm9 = vcmp.eq.f32.partialorder %v3929_v53, 8.507059e+37  ;;  %v3932_v48 = vor.u32 1.1754944e-38, %v3931_v17  ;;  %vm3940_vm10 = vweird.f32 %v13407_v29  ;;  %v3879_v20 = vadd.f32 %v13422_v22, %v3878_v55  ;;  %v16353_v53 = vld [vmem:[#allocation151_spill] sm:$0xff]  ;;  %v2475_v30 = vpop.f32.mrf.mxu1 }
 0x460   : > { %16347 = vst [vmem:[#allocation80_spill] sm:$0xff] %v13565_v15  ;;  %vm13575_vm8 = vcmp.eq.f32.partialorder %v16348_v52, 8.507059e+37  ;;  %v3924_v37 = vadd.f32 %v13428_v42, %v3923_v3  ;;  %8587 = vrcp.f32 %v13534_v12  ;;  %v2651_v21 = vadd.f32 %v2650_v51, %v2561_v57 }
 0x461   : > { %v3938_v54 = vmul.f32 %v13484_v9, %v3937_v16  ;;  %v3982_v26 = vsub.f32 1.0, %v3981_v34  ;;  %8589 = vpow2.f32 %v7582_v59  ;;  %v7586_v60 = vmul.f32 -1.442695, %v16353_v53  ;;  %v8586_v17 = vpop.eup %8585 }
 0x462   : > { %v13597_v3 = vadd.f32 1.0, %v8584_v31  ;;  %8591 = vpow2.f32 %v7583_v0  ;;  %v5301_v50 = vmul.f32 %v13282_v56, %v2651_v21  ;;  %v2476_v45 = vadd.f32 %v2475_v30, %v2386_v47  ;;  %v16358_v56 = vld [vmem:[#allocation152_spill] sm:$0xff] }
 0x463   : > { %v3828_v16 = vsel %vm13510_vm0, %v13442_v58, %v3823_v18  ;;  %v3873_v34 = vsel %vm13517_vm2, %v13451_v38, %v3868_v40  ;;  %v3944_v59 = vand.u32 2147483647, %v13407_v29  ;;  %v7587_v7 = vmul.f32 -1.442695, %v16358_v56 }
 0x464   : > { %v3883_v58 = vsel %vm13593_vm11, %v13422_v22, %v3879_v20  ;;  %v3928_v38 = vsel %vm13610_vm12, %v13428_v42, %v3924_v37  ;;  %v5304_v10 = vmul.f32 %v13373_v23, %v2476_v45  ;;  %v13624_v13 = vpack.c.bf16 %v5301_v50, %v13523_v32  ;;  %v16360_v32 = vld [vmem:[#allocation142_spill] sm:$0xff]  ;;  %v2564_v51 = vpop.f32.mrf.mxu2  ;;  %v16364_v50 = vld [vmem:[#allocation45_spill] sm:$0xff]  ;;  %v16365_v45 = vld [vmem:[#allocation47_spill] sm:$0xff] }
 0x465   : > { %v3939_v11 = vadd.f32 %v13484_v9, %v3938_v54  ;;  %vm3941_vm13 = vweird.f32 %v13484_v9  ;;  %v13628_v0 = vadd.f32 1.0, %v8586_v17  ;;  %8593 = vpow2.f32 %v7586_v60  ;;  %v2653_v20 = vpop.f32.mrf.mxu3 }
 0x466   : > { %16359 = vst [vmem:[#allocation106_spill] sm:$0xff] %v13624_v13  ;;  %v13630_v31 = vpop.eup %8587  ;;  %v13633_v22 = vmul.f32 %v3828_v16, %v13093_v6  ;;  %v3946_v18 = vand.u32 2147483648, %v13407_v29  ;;  %v3983_v42 = vmul.f32 %v13505_v44, %v3982_v26  ;;  %8595 = vrcp.f32 %v13597_v3  ;;  %vm13652_vm14 = vmor %vm3940_vm10, %vm3941_vm13 }
 0x467   : > { %v8590_v23 = vpop.eup %8589  ;;  %v13639_v40 = vmul.f32 %v3873_v34, %v16360_v32  ;;  %v3989_v52 = vand.u32 2147483647, %v13445_v28  ;;  %v3991_v57 = vand.u32 2147483648, %v13445_v28  ;;  %8597 = vpow2.f32 %v7587_v7  ;;  %v2477_v29 = vpop.f32.mrf.mxu1  ;;  %2430 = vmatmul.bf16.gmra.mxu0 %v16364_v50 }
 0x468   : > { %v8592_v37 = vpop.eup %8591  ;;  %v3888_v6 = vsel %vm13575_vm8, %v13492_v35, %v3883_v58  ;;  %v3933_v21 = vsel %vm13579_vm9, %v3932_v48, %v3928_v38  ;;  %vm3986_vm15 = vweird.f32 %v13505_v44  ;;  %v2654_v26 = vadd.f32 %v2653_v20, %v2564_v51  ;;  %v2388_v48 = vpop.f32.mrf.mxu0  ;;  %2608 = vmatmul.bf16.gmra.mxu2 %v16364_v50 }
 0x469   : > { %v3943_v60 = vsel %vm13652_vm14, %v13484_v9, %v3939_v11  ;;  %v3996_v35 = vmul.f32 %v13630_v31, %v13534_v12  ;;  %8599 = vrcp.f32 %v13628_v0  ;;  %v7590_v46 = vmul.f32 -1.442695, %v16363_v14  ;;  %2519 = vmatmul.bf16.gmra.mxu1 %v16365_v45  ;;  %2697 = vmatmul.bf16.gmra.mxu3 %v16365_v45 }
 0x46a   : > { %v3984_v47 = vadd.f32 %v13505_v44, %v3983_v42  ;;  %v13665_v30 = vadd.f32 1.0, %v8590_v23  ;;  %v5305_v17 = vmul.f32 %v13377_v2, %v2654_v26  ;;  %v2478_v55 = vadd.f32 %v2477_v29, %v2388_v48 }
 0x46b   : > { %v8594_v9 = vpop.eup %8593  ;;  %vm3945_vm0 = vcmp.eq.f32.partialorder %v3944_v59, 8.507059e+37  ;;  %v3947_v16 = vor.u32 1.1754944e-38, %v3946_v18  ;;  %vm3985_vm1 = vweird.f32 %v13445_v28  ;;  %v13671_v34 = vadd.f32 1.0, %v8592_v37 }
 0x46c   : > { %v13673_v25 = vpop.eup %8595  ;;  %v13676_v7 = vmul.f32 %v3888_v6, %v16294_v24  ;;  %vm13678_vm2 = vcmp.eq.f32.partialorder %v3989_v52, 8.507059e+37  ;;  %v4006_v2 = vand.u32 2147483648, %v13534_v12  ;;  %v5308_v38 = vmul.f32 %v13381_v33, %v2478_v55  ;;  %vm13691_vm3 = vmor %vm3985_vm1, %vm3986_vm15  ;;  %v2566_v20 = vpop.f32.mrf.mxu2  ;;  %v7846_v24 = vld [vmem:[%s9057_s7 + $0x180] sm:$0xf] }
 0x46d   : > { %v8598_v28 = vpop.eup %8597  ;;  %v13687_v59 = vmul.f32 %v3933_v21, %v13182_v27  ;;  %v3948_v11 = vsel %vm3945_vm0, %v3947_v16, %v3943_v60  ;;  %v3997_v18 = vsub.f32 1.0, %v3996_v35  ;;  %8601 = vpow2.f32 %v7590_v46  ;;  %v16371_v60 = vld [vmem:[#allocation154_spill] sm:$0xff]  ;;  %v7718_v16 = vld [vmem:[%s9057_s7 + $0x80] sm:$0xf] }
 0x46e   : > { %v3988_v33 = vsel %vm13691_vm3, %v13505_v44, %v3984_v47  ;;  %v3992_v42 = vor.u32 1.1754944e-38, %v3991_v57  ;;  %8603 = vrcp.f32 %v13665_v30  ;;  %v13699_v23 = vpack.c.bf16 %v5308_v38, %v5304_v10  ;;  %v2655_v44 = vpop.f32.mrf.mxu3  ;;  %v16385_v38 = vld [vmem:[#allocation34_spill] sm:$0xff] }
 0x46f   : > { %v13701_v27 = vpop.eup %8599  ;;  %vm4000_vm4 = vweird.f32 %v13534_v12  ;;  %v4004_v32 = vand.u32 2147483647, %v13534_v12  ;;  %v4041_v52 = vmul.f32 %v13673_v25, %v13597_v3  ;;  %8605 = vrcp.f32 %v13671_v34  ;;  %v2480_v48 = vpop.f32.mrf.mxu1 }
 0x470   : > { %16370 = vst [vmem:[#allocation159_spill] sm:$0xff] %v13699_v23  ;;  %v13708_v51 = vadd.f32 1.0, %v8594_v9  ;;  %v13711_v57 = vmul.f32 %v3948_v11, %v16313_v63  ;;  %v13713_v10 = vor.u32 1.1754944e-38, %v4006_v2  ;;  %v13715_v37 = vadd.f32 1.0, %v8598_v28  ;;  %v2391_v46 = vpop.f32.mrf.mxu0  ;;  %v7782_v28 = vld [vmem:[%s9057_s7 + $0x100] sm:$0xf] }
 0x471   : > { %v2656_v6 = vadd.f32 %v2655_v44, %v2566_v20  ;;  %v3993_v21 = vsel %vm13678_vm2, %v3992_v42, %v3988_v33  ;;  %v3998_v54 = vmul.f32 %v13630_v31, %v3997_v18  ;;  %v4051_v26 = vand.u32 2147483648, %v13597_v3  ;;  %v8108_v11 = vld [vmem:[%s9057_s7 + $0x104] sm:$0xf0] }
 0x472   : > { %v13722_v35 = vmul.f32 -1.442695, %v16371_v60  ;;  %v4056_v63 = vmul.f32 %v13701_v27, %v13628_v0  ;;  %v4066_v29 = vand.u32 2147483648, %v13628_v0  ;;  %v2481_v55 = vadd.f32 %v2480_v48, %v2391_v46  ;;  %v7654_v46 = vld [vmem:[%s9057_s7] sm:$0xf] }
 0x473   : > { %v5309_v47 = vmul.f32 %v13384_v49, %v2656_v6  ;;  %v8602_v50 = vpop.eup %8601  ;;  %v4042_v45 = vsub.f32 1.0, %v4041_v52  ;;  %v4049_v9 = vand.u32 2147483647, %v13597_v3  ;;  %8607 = vrcp.f32 %v13708_v51  ;;  %v8124_v52 = vld [vmem:[%s9057_s7 + $0x184] sm:$0xf0] }
 0x474   : > { %v13731_v58 = vpop.eup %8603  ;;  %v13734_v2 = vmul.f32 %v3993_v21, %v16316_v4  ;;  %vm13736_vm5 = vcmp.eq.f32.partialorder %v4004_v32, 8.507059e+37  ;;  %8609 = vrcp.f32 %v13715_v37  ;;  %v13742_v49 = vmul.f32 %v13395_v62, %v2481_v55  ;;  %v2569_v48 = vpop.f32.mrf.mxu2 }
 0x475   : > { %v13747_v18 = vpack.c.bf16 %v5309_v47, %v5305_v17  ;;  %v13749_v33 = vpop.eup %8605  ;;  %v3999_v42 = vadd.f32 %v13630_v31, %v3998_v54  ;;  %vm4001_vm6 = vweird.f32 %v13630_v31  ;;  %v4111_v4 = vand.u32 2147483648, %v13665_v30  ;;  %v8076_v54 = vld [vmem:[%s9057_s7 + $0x4] sm:$0xf0] }
 0x476   : > { %v7783_v32 = vor.u32 %v8108_v11, %v7782_v28  ;;  %vm4045_vm7 = vweird.f32 %v13597_v3  ;;  %v13756_v20 = vor.u32 1.1754944e-38, %v4051_v26  ;;  %v4057_v62 = vsub.f32 1.0, %v4056_v63  ;;  %v2658_v47 = vpop.f32.mrf.mxu3  ;;  %vm13769_vm8 = vmor %vm4000_vm4, %vm4001_vm6  ;;  %v16381_v26 = vld [vmem:[#allocation57_spill] sm:$0xff] }
 0x477   : > { %16374 = vst [vmem:[#allocation107_spill] sm:$0xff] %v13747_v18  ;;  %v13758_v44 = vor.u32 1.1754944e-38, %v4066_v29  ;;  %v7847_v6 = vor.u32 %v8124_v52, %v7846_v24  ;;  %v4043_v17 = vmul.f32 %v13673_v25, %v4042_v45  ;;  %v4101_v21 = vmul.f32 %v13731_v58, %v13665_v30  ;;  %v16377_v24 = vld [vmem:[#allocation155_spill] sm:$0xff]  ;;  %v2482_v52 = vpop.f32.mrf.mxu1 }
 0x478   : > { %6103 = vmatpush.bf16.msra.mxu2 %v7783_v32  ;;  %vm4046_vm9 = vweird.f32 %v13673_v25  ;;  %v4116_v63 = vmul.f32 %v13749_v33, %v13671_v34  ;;  %v13776_v29 = vadd.f32 1.0, %v8602_v50  ;;  %v2659_v55 = vadd.f32 %v2658_v47, %v2569_v48  ;;  %v2393_v32 = vpop.f32.mrf.mxu0  ;;  %v16380_v47 = vld [vmem:[#allocation56_spill] sm:$0xff] }
 0x479   : > { %6192 = vmatpush.bf16.msra.mxu3 %v7847_v6  ;;  %v13778_v45 = vpop.eup %8607  ;;  %v4003_v12 = vsel %vm13769_vm8, %v13630_v31, %v3999_v42  ;;  %vm4060_vm10 = vweird.f32 %v13628_v0  ;;  %v13784_v28 = vor.u32 1.1754944e-38, %v4111_v4  ;;  %v4126_v11 = vand.u32 2147483648, %v13671_v34  ;;  %2435 = vmatmul.bf16.gmra.mxu0 %v16380_v47  ;;  %vm13836_vm0 = vmor %vm4045_vm7, %vm4046_vm9 }
 0x47a   : > { %v7594_v50 = vmul.f32 -1.442695, %v16377_v24  ;;  %v13788_v6 = vpop.eup %8609  ;;  %vm13790_vm11 = vcmp.eq.f32.partialorder %v4049_v9, 8.507059e+37  ;;  %v4058_v31 = vmul.f32 %v13701_v27, %v4057_v62  ;;  %vm4061_vm12 = vweird.f32 %v13701_v27  ;;  %2524 = vmatmul.bf16.gmra.mxu1 %v16381_v26  ;;  %v8092_v62 = vld [vmem:[%s9057_s7 + $0x84] sm:$0xf0]  ;;  %2613 = vmatmul.bf16.gmra.mxu2 %v16380_v47 }
 0x47b   : > { %v13797_v42 = vmul.f32 %v13495_v43, %v2659_v55  ;;  %v2483_v4 = vadd.f32 %v2482_v52, %v2393_v32  ;;  %v4044_v9 = vadd.f32 %v13673_v25, %v4043_v17  ;;  %v4102_v18 = vsub.f32 1.0, %v4101_v21  ;;  %2702 = vmatmul.bf16.gmra.mxu3 %v16381_v26  ;;  %v16389_v52 = vld [vmem:[#allocation156_spill] sm:$0xff]  ;;  %vm13860_vm3 = vmor %vm4060_vm10, %vm4061_vm12 }
 0x47c   : > { %8611 = vpow2.f32 %v13722_v35  ;;  %v7655_v23 = vor.u32 %v8076_v54, %v7654_v46  ;;  %v4117_v13 = vsub.f32 1.0, %v4116_v63  ;;  %v7719_v55 = vor.u32 %v8092_v62, %v7718_v16  ;;  %v2571_v47 = vpop.f32.mrf.mxu2 }
 0x47d   : > { %8613 = vrcp.f32 %v13776_v29  ;;  %v5316_v43 = vmul.f32 %v13552_v19, %v2483_v4  ;;  %v4008_v32 = vsel %vm13736_vm5, %v13713_v10, %v4003_v12  ;;  %vm4105_vm13 = vweird.f32 %v13665_v30 }
 0x47e   : > { %v4161_v35 = vmul.f32 %v13778_v45, %v13708_v51  ;;  %v4176_v17 = vmul.f32 %v13788_v6, %v13715_v37  ;;  %8615 = vpow2.f32 %v7594_v50  ;;  %5925 = vmatpush.bf16.msra.mxu0 %v7655_v23  ;;  %v16382_v19 = vand.u32 2147483647, %v13628_v0  ;;  %6014 = vmatpush.bf16.msra.mxu1 %v7719_v55  ;;  %v2660_v26 = vpop.f32.mrf.mxu3 }
 0x47f   : > { %vm4120_vm15 = vweird.f32 %v13671_v34  ;;  %v4169_v10 = vand.u32 2147483647, %v13708_v51  ;;  %v4171_v16 = vand.u32 2147483648, %v13708_v51  ;;  %v7595_v54 = vmul.f32 -1.442695, %v16385_v38 }
 0x480   : > { %vm13821_vm14 = vcmp.eq.f32.partialorder %v16382_v19, 8.507059e+37  ;;  %v13830_v46 = vpack.c.bf16 %v5316_v43, %v13742_v49  ;;  %v4059_v63 = vadd.f32 %v13701_v27, %v4058_v31  ;;  %v4103_v12 = vmul.f32 %v13731_v58, %v4102_v18  ;;  %v2396_v31 = vpop.f32.mrf.mxu0  ;;  %v2485_v19 = vpop.f32.mrf.mxu1 }
 0x481   : > { %v13842_v50 = vor.u32 1.1754944e-38, %v4126_v11  ;;  %v7598_v4 = vmul.f32 -1.442695, %v16389_v52  ;;  %v13846_v49 = vmul.f32 %v4008_v32, %v16324_v39  ;;  %v4048_v3 = vsel %vm13836_vm0, %v13673_v25, %v4044_v9 }
 0x482   : > { %16386 = vst [vmem:[#allocation108_spill] sm:$0xff] %v13830_v46  ;;  %v4118_v62 = vmul.f32 %v13749_v33, %v4117_v13  ;;  %v2661_v43 = vadd.f32 %v2660_v26, %v2571_v47  ;;  %v8612_v55 = vpop.eup %8611  ;;  %vm4106_vm1 = vweird.f32 %v13731_v58  ;;  %vm4121_vm2 = vweird.f32 %v13749_v33 }
 0x483   : > { %v4162_v18 = vsub.f32 1.0, %v4161_v35  ;;  %v4177_v11 = vsub.f32 1.0, %v4176_v17  ;;  %v13854_v46 = vpop.eup %8613  ;;  %v16392_v13 = vand.u32 2147483647, %v13665_v30  ;;  %v13870_v9 = vor.u32 1.1754944e-38, %v4171_v16  ;;  %vm13903_vm7 = vmor %vm4105_vm13, %vm4106_vm1 }
 0x484   : > { %8617 = vpow2.f32 %v7595_v54  ;;  %v5317_v32 = vmul.f32 %v13633_v22, %v2661_v43  ;;  %v2486_v35 = vadd.f32 %v2485_v19, %v2396_v31  ;;  %v8616_v17 = vpop.eup %8615  ;;  %v4053_v0 = vsel %vm13790_vm11, %v13756_v20, %v4048_v3  ;;  %v16399_v3 = vld [vmem:[#allocation36_spill] sm:$0xff]  ;;  %vm13922_vm9 = vmor %vm4120_vm15, %vm4121_vm2 }
 0x485   : > { %vm13866_vm4 = vcmp.eq.f32.partialorder %v16392_v13, 8.507059e+37  ;;  %v4063_v23 = vsel %vm13860_vm3, %v13701_v27, %v4059_v63  ;;  %v4104_v47 = vadd.f32 %v13731_v58, %v4103_v12  ;;  %v16395_v26 = vand.u32 2147483647, %v13671_v34 }
 0x486   : > { %vm4165_vm6 = vweird.f32 %v13708_v51  ;;  %8619 = vpow2.f32 %v7598_v4  ;;  %v4119_v22 = vadd.f32 %v13749_v33, %v4118_v62  ;;  %v13888_v54 = vadd.f32 1.0, %v8612_v55  ;;  %v2663_v31 = vpop.f32.mrf.mxu3 }
 0x487   : > { %vm13882_vm5 = vcmp.eq.f32.partialorder %v16395_v26, 8.507059e+37  ;;  %v5320_v20 = vmul.f32 %v13639_v40, %v2486_v35  ;;  %v13892_v48 = vpack.c.bf16 %v5317_v32, %v13797_v42  ;;  %v4163_v27 = vmul.f32 %v13778_v45, %v4162_v18  ;;  %v16408_v26 = vld [vmem:[#allocation68_spill] sm:$0xff] }
 0x488   : > { %v4178_v63 = vmul.f32 %v13788_v6, %v4177_v11  ;;  %v4221_v12 = vmul.f32 %v13854_v46, %v13776_v29  ;;  %v7599_v43 = vmul.f32 -1.442695, %v16399_v3  ;;  %vm4180_vm8 = vweird.f32 %v13715_v37  ;;  %v2398_v35 = vpop.f32.mrf.mxu0 }
 0x489   : > { %16398 = vst [vmem:[#allocation41_spill] sm:$0xff] %v13892_v48  ;;  %v4184_v40 = vand.u32 2147483647, %v13715_v37  ;;  %v4186_v42 = vand.u32 2147483648, %v13715_v37  ;;  %v13910_v62 = vadd.f32 1.0, %v8616_v17  ;;  %v13913_v55 = vmul.f32 %v4053_v0, %v16333_v1  ;;  %v2574_v1 = vpop.f32.mrf.mxu2  ;;  %v2487_v17 = vpop.f32.mrf.mxu1  ;;  %v16406_v0 = vld [vmem:[#allocation38_spill] sm:$0xff] }
 0x48a   : > { %v4068_v18 = vsel %vm13821_vm14, %v13758_v44, %v4063_v23  ;;  %vm4166_vm10 = vweird.f32 %v13778_v45  ;;  %vm13927_vm11 = vcmp.eq.f32.partialorder %v4169_v10, 8.507059e+37  ;;  %vm4181_vm12 = vweird.f32 %v13788_v6  ;;  %v8618_v21 = vpop.eup %8617  ;;  %2529 = vmatmul.bf16.gmra.mxu1 %v16408_v26 }
 0x48b   : > { %v4108_v44 = vsel %vm13903_vm7, %v13731_v58, %v4104_v47  ;;  %v4123_v34 = vsel %vm13922_vm9, %v13749_v33, %v4119_v22  ;;  %8621 = vrcp.f32 %v13888_v54  ;;  %v2664_v19 = vadd.f32 %v2663_v31, %v2574_v1  ;;  %v16407_v33 = vld [vmem:[#allocation62_spill] sm:$0xff]  ;;  %vm13965_vm14 = vmor %vm4165_vm6, %vm4166_vm10  ;;  %2707 = vmatmul.bf16.gmra.mxu3 %v16408_v26 }
 0x48c   : > { %v8620_v10 = vpop.eup %8619  ;;  %v4164_v39 = vadd.f32 %v13778_v45, %v4163_v27  ;;  %v4179_v13 = vadd.f32 %v13788_v6, %v4178_v63  ;;  %v4222_v32 = vsub.f32 1.0, %v4221_v12  ;;  %8623 = vpow2.f32 %v7599_v43  ;;  %2440 = vmatmul.bf16.gmra.mxu0 %v16407_v33  ;;  %2618 = vmatmul.bf16.gmra.mxu2 %v16407_v33  ;;  %vm13982_vm15 = vmor %vm4180_vm8, %vm4181_vm12 }
 0x48d   : > { %8625 = vrcp.f32 %v13910_v62  ;;  %v7602_v58 = vmul.f32 -1.442695, %v16406_v0  ;;  %v5321_v23 = vmul.f32 %v13676_v7, %v2664_v19  ;;  %v2488_v47 = vadd.f32 %v2487_v17, %v2398_v35 }
 0x48e   : > { %v13947_v22 = vmul.f32 %v4068_v18, %v16334_v5  ;;  %v4113_v27 = vsel %vm13866_vm4, %v13784_v28, %v4108_v44  ;;  %vm13952_vm13 = vcmp.eq.f32.partialorder %v4184_v40, 8.507059e+37  ;;  %v13956_v12 = vadd.f32 1.0, %v8618_v21  ;;  %v16417_v21 = vld [vmem:[#allocation158_spill] sm:$0xff]  ;;  %v2665_v19 = vpop.f32.mrf.mxu3 }
 0x48f   : > { %v4128_v7 = vsel %vm13882_vm5, %v13842_v50, %v4123_v34  ;;  %v4229_v28 = vand.u32 2147483647, %v13776_v29  ;;  %v13970_v25 = vadd.f32 1.0, %v8620_v10  ;;  %v5324_v43 = vmul.f32 %v13687_v59, %v2488_v47  ;;  %v8137_v5 = vld [vmem:[%s9057_s7 + $0x1f4] sm:$0xf] }
 0x490   : > { %v4168_v50 = vsel %vm13965_vm14, %v13778_v45, %v4164_v39  ;;  %v4187_v16 = vor.u32 1.1754944e-38, %v4186_v42  ;;  %v4223_v4 = vmul.f32 %v13854_v46, %v4222_v32  ;;  %v4231_v59 = vand.u32 2147483648, %v13776_v29  ;;  %v16415_v45 = vld [vmem:[#allocation157_spill] sm:$0xff]  ;;  %v2401_v32 = vpop.f32.mrf.mxu0 }
 0x491   : > { %v13988_v40 = vpop.eup %8621  ;;  %v4183_v18 = vsel %vm13982_vm15, %v13788_v6, %v4179_v13  ;;  %8627 = vpow2.f32 %v7602_v58  ;;  %v7603_v30 = vmul.f32 -1.442695, %v16415_v45  ;;  %v13994_v1 = vpack.c.bf16 %v5324_v43, %v5320_v20  ;;  %v2576_v34 = vpop.f32.mrf.mxu2 }
 0x492   : > { %v8624_v37 = vpop.eup %8623  ;;  %v13997_v31 = vmul.f32 %v4113_v27, %v16343_v41  ;;  %v14000_v42 = vmul.f32 %v4128_v7, %v16346_v8  ;;  %8629 = vrcp.f32 %v13956_v12  ;;  %v7606_v44 = vmul.f32 -1.442695, %v16417_v21  ;;  %v7840_v7 = vld [vmem:[%s9057_s7 + $0x178] sm:$0xf0] }
 0x493   : > { %16416 = vst [vmem:[#allocation109_spill] sm:$0xff] %v13994_v1  ;;  %v14004_v10 = vpop.eup %8625  ;;  %v4173_v6 = vsel %vm13927_vm11, %v13870_v9, %v4168_v50  ;;  %vm14009_vm0 = vcmp.eq.f32.partialorder %v4229_v28, 8.507059e+37  ;;  %8631 = vrcp.f32 %v13970_v25  ;;  %v2666_v41 = vadd.f32 %v2665_v19, %v2576_v34  ;;  %v2490_v9 = vpop.f32.mrf.mxu1  ;;  %v16424_v19 = vld [vmem:[#allocation161_spill] sm:$0xff] }
 0x494   : > { %v4188_v8 = vsel %vm13952_vm13, %v4187_v16, %v4183_v18  ;;  %v4224_v39 = vadd.f32 %v13854_v46, %v4223_v4  ;;  %vm4226_vm1 = vweird.f32 %v13854_v46  ;;  %v4232_v13 = vor.u32 1.1754944e-38, %v4231_v59  ;;  %v7904_v16 = vld [vmem:[%s9057_s7 + $0x1f8] sm:$0xf0]  ;;  %v16423_v59 = vld [vmem:[#allocation160_spill] sm:$0xff] }
 0x495   : > { %v4236_v11 = vmul.f32 %v13988_v40, %v13888_v54  ;;  %8633 = vpow2.f32 %v7603_v30  ;;  %v5325_v35 = vmul.f32 %v13711_v57, %v2666_v41  ;;  %v2491_v17 = vadd.f32 %v2490_v9, %v2401_v32  ;;  %v8121_v57 = vld [vmem:[%s9057_s7 + $0x174] sm:$0xf] }
 0x496   : > { %v4246_v58 = vand.u32 2147483648, %v13888_v54  ;;  %v4281_v47 = vmul.f32 %v14004_v10, %v13910_v62  ;;  %v14024_v33 = vadd.f32 1.0, %v8624_v37  ;;  %8635 = vpow2.f32 %v7606_v44 }
 0x497   : > { %v8628_v26 = vpop.eup %8627  ;;  %v14027_v27 = vmul.f32 %v4173_v6, %v16353_v53  ;;  %vm4225_vm2 = vweird.f32 %v13776_v29  ;;  %v14031_v63 = vmul.f32 %v13734_v2, %v2491_v17  ;;  %v14036_v28 = vpack.c.bf16 %v5325_v35, %v5321_v23 }
 0x498   : > { %v14038_v43 = vpop.eup %8629  ;;  %v14041_v50 = vmul.f32 %v4188_v8, %v16358_v56  ;;  %vm14045_vm3 = vmor %vm4225_vm2, %vm4226_vm1  ;;  %v4244_v29 = vand.u32 2147483647, %v13888_v54  ;;  %v4291_v2 = vand.u32 2147483648, %v13910_v62  ;;  %v7843_v51 = vor.u32 %v8121_v57, %v7840_v7  ;;  %v2668_v8 = vpop.f32.mrf.mxu3 }
 0x499   : > { %16420 = vst [vmem:[#allocation42_spill] sm:$0xff] %v14036_v28  ;;  %v14052_v4 = vpop.eup %8631  ;;  %v4228_v23 = vsel %vm14045_vm3, %v13854_v46, %v4224_v39  ;;  %v4237_v56 = vsub.f32 1.0, %v4236_v11  ;;  %v14058_v18 = vmul.f32 -1.442695, %v16423_v59  ;;  %v7907_v30 = vor.u32 %v8137_v5, %v7904_v16  ;;  %v2579_v41 = vpop.f32.mrf.mxu2  ;;  %v7712_v16 = vld [vmem:[%s9057_s7 + $0x78] sm:$0xf0] }
 0x49a   : > { %v14060_v37 = vor.u32 1.1754944e-38, %v4246_v58  ;;  %v4282_v44 = vsub.f32 1.0, %v4281_v47  ;;  %v14062_v34 = vadd.f32 1.0, %v8628_v26  ;;  %v14065_v6 = vmul.f32 -1.442695, %v16424_v19  ;;  %6452 = vmatpush.bf16.msrb.mxu2 %v7843_v51  ;;  %v16425_v47 = vld [vmem:[#allocation40_spill] sm:$0xff]  ;;  %v2403_v57 = vpop.f32.mrf.mxu0 }
 0x49b   : > { %v8634_v32 = vpop.eup %8633  ;;  %vm4240_vm4 = vweird.f32 %v13888_v54  ;;  %v4289_v46 = vand.u32 2147483647, %v13910_v62  ;;  %v4296_v39 = vmul.f32 %v14038_v43, %v13956_v12  ;;  %8637 = vrcp.f32 %v14024_v33  ;;  %6541 = vmatpush.bf16.msrb.mxu3 %v7907_v30  ;;  %v2492_v7 = vpop.f32.mrf.mxu1  ;;  %v8089_v51 = vld [vmem:[%s9057_s7 + $0x74] sm:$0xf] }
 0x49c   : > { %v2669_v9 = vadd.f32 %v2668_v8, %v2579_v41  ;;  %v8636_v11 = vpop.eup %8635  ;;  %v4233_v35 = vsel %vm14009_vm0, %v4232_v13, %v4228_v23  ;;  %v14074_v17 = vor.u32 1.1754944e-38, %v4291_v2  ;;  %v4341_v58 = vmul.f32 %v14052_v4, %v13970_v25  ;;  %v16426_v13 = vld [vmem:[#allocation75_spill] sm:$0xff]  ;;  %v16427_v2 = vld [vmem:[#allocation76_spill] sm:$0xff]  ;;  %v8105_v23 = vld [vmem:[%s9057_s7 + $0xf4] sm:$0xf] }
 0x49d   : > { %v14079_v26 = vmul.f32 -1.442695, %v16425_v47  ;;  %v4238_v5 = vmul.f32 %v13988_v40, %v4237_v56  ;;  %vm4285_vm5 = vweird.f32 %v13910_v62  ;;  %v2493_v20 = vadd.f32 %v2492_v7, %v2403_v57  ;;  %2445 = vmatmul.bf16.gmra.mxu0 %v16426_v13  ;;  %2534 = vmatmul.bf16.gmra.mxu1 %v16427_v2  ;;  %v7776_v8 = vld [vmem:[%s9057_s7 + $0xf8] sm:$0xf0] }
 0x49e   : > { %v14084_v53 = vmul.f32 %v13846_v49, %v2669_v9  ;;  %v4283_v30 = vmul.f32 %v14004_v10, %v4282_v44  ;;  %8639 = vrcp.f32 %v14062_v34  ;;  %v14093_v41 = vadd.f32 1.0, %v8634_v32  ;;  %2623 = vmatmul.bf16.gmra.mxu2 %v16426_v13  ;;  %2712 = vmatmul.bf16.gmra.mxu3 %v16427_v2 }
 0x49f   : > { %v7715_v56 = vor.u32 %v8089_v51, %v7712_v16  ;;  %v4297_v28 = vsub.f32 1.0, %v4296_v39  ;;  %v14096_v1 = vadd.f32 1.0, %v8636_v11  ;;  %v5332_v49 = vmul.f32 %v13913_v55, %v2493_v20 }
 0x4a0   : > { %v7779_v9 = vor.u32 %v8105_v23, %v7776_v8  ;;  %v14102_v57 = vmul.f32 %v4233_v35, %v16363_v14  ;;  %vm4241_vm6 = vweird.f32 %v13988_v40  ;;  %vm14105_vm7 = vcmp.eq.f32.partialorder %v4244_v29, 8.507059e+37  ;;  %v2670_v13 = vpop.f32.mrf.mxu3 }
 0x4a1   : > { %v4306_v32 = vand.u32 2147483648, %v13956_v12  ;;  %v4342_v39 = vsub.f32 1.0, %v4341_v58  ;;  %6274 = vmatpush.bf16.msrb.mxu0 %v7715_v56  ;;  %v14110_v11 = vpop.eup %8637  ;;  %vm14112_vm8 = vcmp.eq.f32.partialorder %v4289_v46, 8.507059e+37  ;;  %vm4300_vm9 = vweird.f32 %v13956_v12  ;;  %v2581_v46 = vpop.f32.mrf.mxu2  ;;  %vm14136_vm12 = vmor %vm4240_vm4, %vm4241_vm6 }
 0x4a2   : > { %v4304_v14 = vand.u32 2147483647, %v13956_v12  ;;  %v4349_v35 = vand.u32 2147483647, %v13970_v25  ;;  %v4351_v29 = vand.u32 2147483648, %v13970_v25  ;;  %6363 = vmatpush.bf16.msrb.mxu1 %v7779_v9  ;;  %v14121_v7 = vpack.c.bf16 %v5332_v49, %v14031_v63 }
 0x4a3   : > { %v4239_v58 = vadd.f32 %v13988_v40, %v4238_v5  ;;  %v4284_v20 = vadd.f32 %v14004_v10, %v4283_v30  ;;  %vm4286_vm10 = vweird.f32 %v14004_v10  ;;  %8641 = vrcp.f32 %v14093_v41  ;;  %v2406_v30 = vpop.f32.mrf.mxu0  ;;  %v2495_v56 = vpop.f32.mrf.mxu1 }
 0x4a4   : > { %v4298_v2 = vmul.f32 %v14038_v43, %v4297_v28  ;;  %vm4345_vm11 = vweird.f32 %v13970_v25  ;;  %8643 = vrcp.f32 %v14096_v1  ;;  %v2671_v51 = vadd.f32 %v2670_v13, %v2581_v46  ;;  %v14130_v16 = vpop.eup %8639  ;;  %vm14148_vm13 = vmor %vm4285_vm5, %vm4286_vm10 }
 0x4a5   : > { %v4307_v5 = vor.u32 1.1754944e-38, %v4306_v32  ;;  %v4343_v23 = vmul.f32 %v14052_v4, %v4342_v39  ;;  %v4356_v28 = vmul.f32 %v14110_v11, %v14024_v33  ;;  %8645 = vpow2.f32 %v14058_v18 }
 0x4a6   : > { %vm14152_vm14 = vcmp.eq.f32.partialorder %v4304_v14, 8.507059e+37  ;;  %v4352_v49 = vor.u32 1.1754944e-38, %v4351_v29  ;;  %v4366_v9 = vand.u32 2147483648, %v14024_v33  ;;  %v5333_v32 = vmul.f32 %v13947_v22, %v2671_v51 }
 0x4a7   : > { %v2496_v18 = vadd.f32 %v2495_v56, %v2406_v30  ;;  %v4243_v39 = vsel %vm14136_vm12, %v13988_v40, %v4239_v58  ;;  %v4288_v62 = vsel %vm14148_vm13, %v14004_v10, %v4284_v20  ;;  %vm4301_vm15 = vweird.f32 %v14038_v43  ;;  %v16441_v20 = vld [vmem:[#allocation51_spill] sm:$0xff] }
 0x4a8   : > { %vm14165_vm0 = vcmp.eq.f32.partialorder %v4349_v35, 8.507059e+37  ;;  %v4364_v29 = vand.u32 2147483647, %v14024_v33  ;;  %v4299_v46 = vadd.f32 %v14038_v43, %v4298_v2  ;;  %v4401_v22 = vmul.f32 %v14130_v16, %v14062_v34  ;;  %vm14198_vm2 = vmor %vm4300_vm9, %vm4301_vm15  ;;  %v2673_v54 = vpop.f32.mrf.mxu3 }
 0x4a9   : > { %v5336_v13 = vmul.f32 %v13997_v31, %v2496_v18  ;;  %v14175_v40 = vpack.c.bf16 %v5333_v32, %v14084_v53  ;;  %v14177_v58 = vpop.eup %8641  ;;  %v4344_v10 = vadd.f32 %v14052_v4, %v4343_v23  ;;  %vm4346_vm1 = vweird.f32 %v14052_v4  ;;  %v16442_v31 = vld [vmem:[#allocation48_spill] sm:$0xff]  ;;  %v2584_v44 = vpop.f32.mrf.mxu2 }
 0x4aa   : > { %v4357_v35 = vsub.f32 1.0, %v4356_v28  ;;  %v7614_v51 = vmul.f32 -1.442695, %v16441_v20  ;;  %v14182_v63 = vpop.eup %8643  ;;  %v4248_v2 = vsel %vm14105_vm7, %v14060_v37, %v4243_v39  ;;  %v14187_v30 = vor.u32 1.1754944e-38, %v4366_v9  ;;  %vm14213_vm4 = vmor %vm4345_vm11, %vm4346_vm1  ;;  %v16447_v28 = vld [vmem:[#allocation81_spill] sm:$0xff] }
 0x4ab   : > { %16440 = vst [vmem:[#allocation110_spill] sm:$0xff] %v14175_v40  ;;  %8647 = vpow2.f32 %v14065_v6  ;;  %v7615_v53 = vmul.f32 -1.442695, %v16442_v31  ;;  %v8646_v56 = vpop.eup %8645  ;;  %v4293_v23 = vsel %vm14112_vm8, %v14074_v17, %v4288_v62  ;;  %vm4360_vm3 = vweird.f32 %v14024_v33  ;;  %v2408_v25 = vpop.f32.mrf.mxu0 }
 0x4ac   : > { %v4409_v37 = vand.u32 2147483647, %v14062_v34  ;;  %v4411_v6 = vand.u32 2147483648, %v14062_v34  ;;  %8649 = vpow2.f32 %v14079_v26  ;;  %v4303_v17 = vsel %vm14198_vm2, %v14038_v43, %v4299_v46  ;;  %v2497_v39 = vpop.f32.mrf.mxu1 }
 0x4ad   : > { %v4402_v55 = vsub.f32 1.0, %v4401_v22  ;;  %v4416_v9 = vmul.f32 %v14177_v58, %v14093_v41  ;;  %v2674_v32 = vadd.f32 %v2673_v54, %v2584_v44  ;;  %v4348_v26 = vsel %vm14213_vm4, %v14052_v4, %v4344_v10  ;;  %5926 = vmatmul.bf16.vlgmr.msra.gmra.mxu0 %v16447_v28  ;;  %v16448_v44 = vld [vmem:[#allocation84_spill] sm:$0xff] }
 0x4ae   : > { %v4358_v18 = vmul.f32 %v14110_v11, %v4357_v35  ;;  %v4461_v43 = vmul.f32 %v14182_v63, %v14096_v1  ;;  %8651 = vpow2.f32 %v7614_v51  ;;  %vm4405_vm5 = vweird.f32 %v14062_v34  ;;  %6015 = vmatmul.bf16.vlgmr.msra.gmra.mxu1 %v16448_v44  ;;  %6104 = vmatmul.bf16.vlgmr.msra.gmra.mxu2 %v13296_v36 }
 0x4af   : > { %v14226_v62 = vadd.f32 1.0, %v8646_v56  ;;  %8653 = vpow2.f32 %v7615_v53  ;;  %v5337_v46 = vmul.f32 %v14000_v42, %v2674_v32  ;;  %v2498_v22 = vadd.f32 %v2497_v39, %v2408_v25  ;;  %6193 = vmatmul.bf16.vlgmr.msra.gmra.mxu3 %v13356_v61 }
 0x4b0   : > { %v14232_v4 = vmul.f32 %v4248_v2, %v16371_v60  ;;  %v4308_v10 = vsel %vm14152_vm14, %v4307_v5, %v4303_v17  ;;  %vm4361_vm6 = vweird.f32 %v14110_v11  ;;  %vm4406_vm7 = vweird.f32 %v14130_v16 }
 0x4b1   : > { %v8648_v35 = vpop.eup %8647  ;;  %v4353_v51 = vsel %vm14165_vm0, %v4352_v49, %v4348_v26  ;;  %vm14240_vm8 = vcmp.eq.f32.partialorder %v4364_v29, 8.507059e+37  ;;  %v4403_v53 = vmul.f32 %v14130_v16, %v4402_v55  ;;  %v4417_v56 = vsub.f32 1.0, %v4416_v9  ;;  %v2675_v55 = vpop.f32.mrf.mxu3  ;;  %vm14272_vm10 = vmor %vm4360_vm3, %vm4361_vm6 }
 0x4b2   : > { %v5340_v60 = vmul.f32 %v14027_v27, %v2498_v22  ;;  %v8650_v5 = vpop.eup %8649  ;;  %v14249_v8 = vmul.f32 %v4293_v23, %v16377_v24  ;;  %v4359_v14 = vadd.f32 %v14110_v11, %v4358_v18  ;;  %v14252_v49 = vor.u32 1.1754944e-38, %v4411_v6  ;;  %v2586_v6 = vpop.f32.mrf.mxu2  ;;  %vm14302_vm14 = vmor %vm4405_vm5, %vm4406_vm7 }
 0x4b3   : > { %v4426_v29 = vand.u32 2147483648, %v14093_v41  ;;  %v4424_v2 = vand.u32 2147483647, %v14093_v41  ;;  %v4462_v54 = vsub.f32 1.0, %v4461_v43  ;;  %8655 = vrcp.f32 %v14226_v62  ;;  %v2411_v39 = vpop.f32.mrf.mxu0 }
 0x4b4   : > { %v14257_v27 = vpack.c.bf16 %v5340_v60, %v5336_v13  ;;  %v8652_v17 = vpop.eup %8651  ;;  %v14260_v12 = vmul.f32 %v4308_v10, %v16385_v38  ;;  %v14263_v24 = vmul.f32 %v4353_v51, %v16389_v52  ;;  %vm4420_vm9 = vweird.f32 %v14093_v41 }
 0x4b5   : > { %v14266_v23 = vadd.f32 1.0, %v8648_v35  ;;  %v8654_v9 = vpop.eup %8653  ;;  %v4404_v38 = vadd.f32 %v14130_v16, %v4403_v53  ;;  %vm14277_vm11 = vcmp.eq.f32.partialorder %v4409_v37, 8.507059e+37  ;;  %v4418_v32 = vmul.f32 %v14177_v58, %v4417_v56  ;;  %v2500_v37 = vpop.f32.mrf.mxu1  ;;  %v16457_v35 = vld [vmem:[#allocation49_spill] sm:$0xff] }
 0x4b6   : > { %v14282_v26 = vadd.f32 1.0, %v8650_v5  ;;  %v2676_v18 = vadd.f32 %v2675_v55, %v2586_v6  ;;  %v4363_v43 = vsel %vm14272_vm10, %v14110_v11, %v4359_v14  ;;  %v14287_v33 = vor.u32 1.1754944e-38, %v4426_v29  ;;  %v8119_v29 = vld [vmem:[%s9057_s7 + $0x164] sm:$0xf] }
 0x4b7   : > { %vm4465_vm12 = vweird.f32 %v14096_v1  ;;  %v4469_v25 = vand.u32 2147483647, %v14096_v1  ;;  %vm14291_vm13 = vcmp.eq.f32.partialorder %v4424_v2, 8.507059e+37  ;;  %v4463_v10 = vmul.f32 %v14182_v63, %v4462_v54  ;;  %v7832_v2 = vld [vmem:[%s9057_s7 + $0x168] sm:$0xf0] }
 0x4b8   : > { %v7618_v51 = vmul.f32 -1.442695, %v16457_v35  ;;  %v5341_v11 = vmul.f32 %v14041_v50, %v2676_v18  ;;  %v2501_v53 = vadd.f32 %v2500_v37, %v2411_v39  ;;  %vm4421_vm15 = vweird.f32 %v14177_v58  ;;  %v8135_v54 = vld [vmem:[%s9057_s7 + $0x1e4] sm:$0xf]  ;;  %v7896_v18 = vld [vmem:[%s9057_s7 + $0x1e8] sm:$0xf0] }
 0x4b9   : > { %8657 = vrcp.f32 %v14266_v23  ;;  %v14308_v60 = vadd.f32 1.0, %v8652_v17  ;;  %v14310_v5 = vadd.f32 1.0, %v8654_v9  ;;  %v14312_v14 = vpop.eup %8655  ;;  %v4419_v50 = vadd.f32 %v14177_v58, %v4418_v32  ;;  %v16460_v9 = vld [vmem:[#allocation52_spill] sm:$0xff]  ;;  %vm14338_vm1 = vmor %vm4420_vm9, %vm4421_vm15 }
 0x4ba   : > { %8659 = vrcp.f32 %v14282_v26  ;;  %v14317_v34 = vmul.f32 %v14102_v57, %v2501_v53  ;;  %v14322_v6 = vpack.c.bf16 %v5341_v11, %v5337_v46  ;;  %v4368_v17 = vsel %vm14240_vm8, %v14187_v30, %v4363_v43  ;;  %v2678_v43 = vpop.f32.mrf.mxu3 }
 0x4bb   : > { %v4408_v55 = vsel %vm14302_vm14, %v14130_v16, %v4404_v38  ;;  %v7619_v13 = vmul.f32 -1.442695, %v16460_v9  ;;  %v7835_v32 = vor.u32 %v8119_v29, %v7832_v2  ;;  %v4464_v57 = vadd.f32 %v14182_v63, %v4463_v10  ;;  %v2589_v38 = vpop.f32.mrf.mxu2  ;;  %v16468_v2 = vld [vmem:[#allocation85_spill] sm:$0xff] }
 0x4bc   : > { %vm4466_vm0 = vweird.f32 %v14182_v63  ;;  %8661 = vpow2.f32 %v7618_v51  ;;  %v7899_v39 = vor.u32 %v8135_v54, %v7896_v18  ;;  %vm14342_vm2 = vcmp.eq.f32.partialorder %v4469_v25, 8.507059e+37  ;;  %v16465_v25 = vld [vmem:[#allocation53_spill] sm:$0xff]  ;;  %v16469_v54 = vld [vmem:[#allocation86_spill] sm:$0xff] }
 0x4bd   : > { %v4471_v46 = vand.u32 2147483648, %v14096_v1  ;;  %v4476_v42 = vmul.f32 %v14312_v14, %v14226_v62  ;;  %8663 = vrcp.f32 %v14308_v60  ;;  %6453 = vmatpush.bf16.msrb.mxu2 %v7835_v32  ;;  %v4423_v41 = vsel %vm14338_vm1, %v14177_v58, %v4419_v50  ;;  %vm14367_vm3 = vmor %vm4465_vm12, %vm4466_vm0  ;;  %v2413_v50 = vpop.f32.mrf.mxu0  ;;  %v2502_v29 = vpop.f32.mrf.mxu1  ;;  %5931 = vmatmul.bf16.gmra.mxu0 %v16468_v2 }
 0x4be   : > { %8665 = vrcp.f32 %v14310_v5  ;;  %v7622_v37 = vmul.f32 -1.442695, %v16465_v25  ;;  %v2679_v10 = vadd.f32 %v2678_v43, %v2589_v38  ;;  %6542 = vmatpush.bf16.msrb.mxu3 %v7899_v39  ;;  %v14358_v11 = vmul.f32 %v4368_v17, %v16399_v3  ;;  %6020 = vmatmul.bf16.gmra.mxu1 %v16469_v54  ;;  %v8087_v17 = vld [vmem:[%s9057_s7 + $0x64] sm:$0xf]  ;;  %v7768_v38 = vld [vmem:[%s9057_s7 + $0xe8] sm:$0xf0] }
 0x4bf   : > { %v14355_v51 = vpop.eup %8657  ;;  %v4413_v53 = vsel %vm14277_vm11, %v14252_v49, %v4408_v55  ;;  %v4486_v56 = vand.u32 2147483648, %v14226_v62  ;;  %8667 = vpow2.f32 %v7619_v13  ;;  %v4468_v49 = vsel %vm14367_vm3, %v14182_v63, %v4464_v57  ;;  %v7704_v55 = vld [vmem:[%s9057_s7 + $0x68] sm:$0xf0]  ;;  %v8103_v13 = vld [vmem:[%s9057_s7 + $0xe4] sm:$0xf] }
 0x4c0   : > { %v14372_v3 = vpop.eup %8659  ;;  %v14378_v52 = vmul.f32 %v14232_v4, %v2679_v10  ;;  %v2503_v1 = vadd.f32 %v2502_v29, %v2413_v50  ;;  %v4428_v32 = vsel %vm14291_vm13, %v14287_v33, %v4423_v41  ;;  %v4472_v18 = vor.u32 1.1754944e-38, %v4471_v46  ;;  %v16470_v43 = vld [vmem:[#allocation105_spill] sm:$0xff]  ;;  %v16471_v10 = vld [vmem:[#allocation96_spill] sm:$0xff]  ;;  %v16472_v46 = vld [vmem:[#allocation163_spill] sm:$0xff] }
 0x4c1   : > { %v4477_v39 = vsub.f32 1.0, %v4476_v42  ;;  %v7707_v30 = vor.u32 %v8087_v17, %v7704_v55  ;;  %v14390_v4 = vmul.f32 %v4413_v53, %v16406_v0  ;;  %8669 = vpow2.f32 %v7622_v37  ;;  %6109 = vmatmul.bf16.gmra.mxu2 %v16470_v43  ;;  %6198 = vmatmul.bf16.gmra.mxu3 %v16471_v10 }
 0x4c2   : > { %v8662_v63 = vpop.eup %8661  ;;  %v5348_v57 = vmul.f32 %v14249_v8, %v2503_v1  ;;  %v7771_v58 = vor.u32 %v8103_v13, %v7768_v38  ;;  %v4473_v33 = vsel %vm14342_vm2, %v4472_v18, %v4468_v49  ;;  %v4521_v22 = vmul.f32 %v14355_v51, %v14266_v23  ;;  %v2680_v13 = vpop.f32.mrf.mxu3 }
 0x4c3   : > { %v14395_v50 = vpop.eup %8663  ;;  %v4536_v0 = vmul.f32 %v14372_v3, %v14282_v26  ;;  %v7623_v42 = vmul.f32 -1.442695, %v16472_v46  ;;  %6275 = vmatpush.bf16.msrb.mxu0 %v7707_v30  ;;  %v14407_v41 = vmul.f32 %v4428_v32, %v16415_v45  ;;  %vm4480_vm4 = vweird.f32 %v14226_v62  ;;  %v2591_v55 = vpop.f32.mrf.mxu2 }
 0x4c4   : > { %v14404_v8 = vpop.eup %8665  ;;  %v4484_v37 = vand.u32 2147483647, %v14226_v62  ;;  %v14411_v16 = vor.u32 1.1754944e-38, %v4486_v56  ;;  %6364 = vmatpush.bf16.msrb.mxu1 %v7771_v58  ;;  %v14414_v53 = vpack.c.bf16 %v5348_v57, %v14317_v34  ;;  %v4478_v49 = vmul.f32 %v14312_v14, %v4477_v39 }
 0x4c5   : > { %v8668_v29 = vpop.eup %8667  ;;  %v4529_v1 = vand.u32 2147483647, %v14266_v23  ;;  %v4531_v17 = vand.u32 2147483648, %v14266_v23  ;;  %v4546_v45 = vand.u32 2147483648, %v14282_v26  ;;  %v14421_v32 = vmul.f32 %v4473_v33, %v16417_v21  ;;  %v2416_v57 = vpop.f32.mrf.mxu0 }
 0x4c6   : > { %v4581_v56 = vmul.f32 %v14395_v50, %v14308_v60  ;;  %v14425_v18 = vadd.f32 1.0, %v8662_v63  ;;  %v2681_v34 = vadd.f32 %v2680_v13, %v2591_v55  ;;  %v4522_v30 = vsub.f32 1.0, %v4521_v22  ;;  %v2505_v58 = vpop.f32.mrf.mxu1 }
 0x4c7   : > { %v4537_v38 = vsub.f32 1.0, %v4536_v0  ;;  %v4596_v39 = vmul.f32 %v14404_v8, %v14310_v5  ;;  %8671 = vpow2.f32 %v7623_v42  ;;  %v8670_v10 = vpop.eup %8669  ;;  %v4544_v43 = vand.u32 2147483647, %v14282_v26 }
 0x4c8   : > { %v14430_v54 = vadd.f32 1.0, %v8668_v29  ;;  %v5349_v21 = vmul.f32 %v14260_v12, %v2681_v34  ;;  %v2506_v33 = vadd.f32 %v2505_v58, %v2416_v57  ;;  %v4479_v63 = vadd.f32 %v14312_v14, %v4478_v49 }
 0x4c9   : > { %vm4481_vm5 = vweird.f32 %v14312_v14  ;;  %vm14435_vm6 = vcmp.eq.f32.partialorder %v4484_v37, 8.507059e+37  ;;  %vm4525_vm7 = vweird.f32 %v14266_v23  ;;  %v14440_v0 = vor.u32 1.1754944e-38, %v4531_v17 }
 0x4ca   : > { %v14442_v42 = vor.u32 1.1754944e-38, %v4546_v45  ;;  %vm4540_vm8 = vweird.f32 %v14282_v26  ;;  %v4582_v29 = vsub.f32 1.0, %v4581_v56  ;;  %8673 = vrcp.f32 %v14425_v18  ;;  %v16475_v45 = vld [vmem:[#allocation61_spill] sm:$0xff]  ;;  %vm14462_vm10 = vmor %vm4480_vm4, %vm4481_vm5 }
 0x4cb   : > { %v5352_v12 = vmul.f32 %v14263_v24, %v2506_v33  ;;  %v14448_v49 = vpack.c.bf16 %v5349_v21, %v14378_v52  ;;  %v4523_v37 = vmul.f32 %v14355_v51, %v4522_v30  ;;  %v4538_v55 = vmul.f32 %v14372_v3, %v4537_v38  ;;  %v2594_v38 = vpop.f32.mrf.mxu2 }
 0x4cc   : > { %v4597_v13 = vsub.f32 1.0, %v4596_v39  ;;  %v14452_v34 = vadd.f32 1.0, %v8670_v10  ;;  %vm4585_vm9 = vweird.f32 %v14308_v60  ;;  %v4589_v17 = vand.u32 2147483647, %v14308_v60  ;;  %v2683_v39 = vpop.f32.mrf.mxu3 }
 0x4cd   : > { %8675 = vrcp.f32 %v14430_v54  ;;  %v7626_v56 = vmul.f32 -1.442695, %v16475_v45  ;;  %v8672_v57 = vpop.eup %8671  ;;  %vm4526_vm11 = vweird.f32 %v14355_v51  ;;  %vm14467_vm12 = vcmp.eq.f32.partialorder %v4529_v1, 8.507059e+37  ;;  %v2418_v36 = vpop.f32.mrf.mxu0 }
 0x4ce   : > { %v4591_v10 = vand.u32 2147483648, %v14308_v60  ;;  %vm4600_vm13 = vweird.f32 %v14310_v5  ;;  %v4604_v30 = vand.u32 2147483647, %v14310_v5  ;;  %v4483_v62 = vsel %vm14462_vm10, %v14312_v14, %v4479_v63  ;;  %v2507_v24 = vpop.f32.mrf.mxu1  ;;  %vm14513_vm3 = vmor %vm4525_vm7, %vm4526_vm11 }
 0x4cf   : > { %vm4541_vm14 = vweird.f32 %v14372_v3  ;;  %vm14478_vm15 = vcmp.eq.f32.partialorder %v4544_v43, 8.507059e+37  ;;  %v4583_v1 = vmul.f32 %v14395_v50, %v4582_v29  ;;  %v2684_v21 = vadd.f32 %v2683_v39, %v2594_v38  ;;  %v16484_v38 = vld [vmem:[#allocation87_spill] sm:$0xff] }
 0x4d0   : > { %v4524_v33 = vadd.f32 %v14355_v51, %v4523_v37  ;;  %v4539_v2 = vadd.f32 %v14372_v3, %v4538_v55  ;;  %v4598_v61 = vmul.f32 %v14404_v8, %v4597_v13  ;;  %8677 = vrcp.f32 %v14452_v34  ;;  %v14487_v14 = vpop.eup %8673  ;;  %5936 = vmatmul.bf16.gmra.mxu0 %v16484_v38  ;;  %v16485_v55 = vld [vmem:[#allocation43_spill] sm:$0xff]  ;;  %vm14529_vm5 = vmor %vm4540_vm8, %vm4541_vm14 }
 0x4d1   : > { %vm14489_vm0 = vcmp.eq.f32.partialorder %v4589_v17, 8.507059e+37  ;;  %v14493_v63 = vadd.f32 1.0, %v8672_v57  ;;  %8679 = vpow2.f32 %v7626_v56  ;;  %v5353_v29 = vmul.f32 %v14358_v11, %v2684_v21  ;;  %6025 = vmatmul.bf16.gmra.mxu1 %v16485_v55  ;;  %6114 = vmatmul.bf16.gmra.mxu2 %v13565_v15  ;;  %v7824_v43 = vld [vmem:[%s9057_s7 + $0x158] sm:$0xf0] }
 0x4d2   : > { %v2508_v37 = vadd.f32 %v2507_v24, %v2418_v36  ;;  %vm4586_vm1 = vweird.f32 %v14395_v50  ;;  %v4592_v13 = vor.u32 1.1754944e-38, %v4591_v10  ;;  %vm14499_vm2 = vcmp.eq.f32.partialorder %v4604_v30, 8.507059e+37  ;;  %v16490_v10 = vld [vmem:[#allocation106_spill] sm:$0xff]  ;;  %v16496_v24 = vld [vmem:[#allocation63_spill] sm:$0xff] }
 0x4d3   : > { %v4606_v17 = vand.u32 2147483648, %v14310_v5  ;;  %v14504_v44 = vpop.eup %8675  ;;  %v4488_v11 = vsel %vm14435_vm6, %v14411_v16, %v4483_v62  ;;  %v4584_v56 = vadd.f32 %v14395_v50, %v4583_v1  ;;  %vm4601_vm4 = vweird.f32 %v14404_v8  ;;  %6203 = vmatmul.bf16.gmra.mxu3 %v16490_v10  ;;  %vm14553_vm6 = vmor %vm4585_vm9, %vm4586_vm1  ;;  %v7888_v39 = vld [vmem:[%s9057_s7 + $0x1d8] sm:$0xf0] }
 0x4d4   : > { %v5356_v57 = vmul.f32 %v14390_v4, %v2508_v37  ;;  %v4528_v16 = vsel %vm14513_vm3, %v14355_v51, %v4524_v33  ;;  %v4599_v22 = vadd.f32 %v14404_v8, %v4598_v61  ;;  %v4641_v4 = vmul.f32 %v14487_v14, %v14425_v18  ;;  %v16493_v51 = vld [vmem:[#allocation69_spill] sm:$0xff]  ;;  %v2596_v37 = vpop.f32.mrf.mxu2  ;;  %v2685_v36 = vpop.f32.mrf.mxu3  ;;  %vm14570_vm7 = vmor %vm4600_vm13, %vm4601_vm4  ;;  %v7760_v38 = vld [vmem:[%s9057_s7 + $0xd8] sm:$0xf0] }
 0x4d5   : > { %v4651_v30 = vand.u32 2147483648, %v14425_v18  ;;  %v4543_v62 = vsel %vm14529_vm5, %v14372_v3, %v4539_v2  ;;  %8681 = vrcp.f32 %v14493_v63  ;;  %v7627_v1 = vmul.f32 -1.442695, %v16493_v51  ;;  %v2421_v5 = vpop.f32.mrf.mxu0 }
 0x4d6   : > { %v14542_v26 = vpack.c.bf16 %v5356_v57, %v5352_v12  ;;  %v14544_v21 = vpop.eup %8677  ;;  %v14547_v33 = vmul.f32 %v4488_v11, %v16423_v59  ;;  %v4607_v3 = vor.u32 1.1754944e-38, %v4606_v17  ;;  %v4656_v2 = vmul.f32 %v14504_v44, %v14430_v54 }
 0x4d7   : > { %v7630_v12 = vmul.f32 -1.442695, %v16496_v24  ;;  %v8680_v57 = vpop.eup %8679  ;;  %v4533_v59 = vsel %vm14467_vm12, %v14440_v0, %v4528_v16  ;;  %v4588_v60 = vsel %vm14553_vm6, %v14395_v50, %v4584_v56  ;;  %v4649_v11 = vand.u32 2147483647, %v14425_v18  ;;  %v2510_v16 = vpop.f32.mrf.mxu1 }
 0x4d8   : > { %v2686_v23 = vadd.f32 %v2685_v36, %v2596_v37  ;;  %v4548_v52 = vsel %vm14478_vm15, %v14442_v42, %v4543_v62  ;;  %v4603_v0 = vsel %vm14570_vm7, %v14404_v8, %v4599_v22  ;;  %v4642_v50 = vsub.f32 1.0, %v4641_v4 }
 0x4d9   : > { %v14581_v56 = vor.u32 1.1754944e-38, %v4651_v30  ;;  %v4701_v61 = vmul.f32 %v14544_v21, %v14452_v34  ;;  %8683 = vpow2.f32 %v7627_v1  ;;  %v2511_v58 = vadd.f32 %v2510_v16, %v2421_v5  ;;  %v8117_v1 = vld [vmem:[%s9057_s7 + $0x154] sm:$0xf] }
 0x4da   : > { %v5357_v37 = vmul.f32 %v14407_v41, %v2686_v23  ;;  %v4593_v42 = vsel %vm14489_vm0, %v4592_v13, %v4588_v60  ;;  %v4657_v62 = vsub.f32 1.0, %v4656_v2  ;;  %v14588_v8 = vadd.f32 1.0, %v8680_v57  ;;  %v8133_v13 = vld [vmem:[%s9057_s7 + $0x1d4] sm:$0xf]  ;;  %v16500_v60 = vld [vmem:[#allocation64_spill] sm:$0xff] }
 0x4db   : > { %8685 = vpow2.f32 %v7630_v12  ;;  %v14590_v22 = vpop.eup %8681  ;;  %v5236_v4 = vmul.f32 %v4533_v59, %v16424_v19  ;;  %v4608_v30 = vsel %vm14499_vm2, %v4607_v3, %v4603_v0  ;;  %vm4645_vm8 = vweird.f32 %v14425_v18 }
 0x4dc   : > { %v14597_v41 = vmul.f32 %v14421_v32, %v2511_v58  ;;  %v14602_v2 = vpack.c.bf16 %v5357_v37, %v5353_v29  ;;  %v14605_v36 = vmul.f32 %v4548_v52, %v16425_v47  ;;  %v4643_v12 = vmul.f32 %v14487_v14, %v4642_v50  ;;  %v2599_v23 = vpop.f32.mrf.mxu2  ;;  %v2688_v52 = vpop.f32.mrf.mxu3 }
 0x4dd   : > { %vm4646_vm9 = vweird.f32 %v14487_v14  ;;  %v7827_v19 = vor.u32 %v8117_v1, %v7824_v43  ;;  %v14611_v3 = vmul.f32 %v4593_v42, %v16441_v20  ;;  %vm4660_vm10 = vweird.f32 %v14430_v54  ;;  %v16504_v42 = vld [vmem:[#allocation66_spill] sm:$0xff] }
 0x4de   : > { %16499 = vst [vmem:[#allocation67_spill] sm:$0xff] %v14602_v2  ;;  %v4702_v32 = vsub.f32 1.0, %v4701_v61  ;;  %v7891_v57 = vor.u32 %v8133_v13, %v7888_v39  ;;  %v14615_v59 = vmul.f32 %v4608_v30, %v16442_v31  ;;  %v4664_v29 = vand.u32 2147483647, %v14430_v54  ;;  %v16505_v39 = vld [vmem:[#allocation44_spill] sm:$0xff]  ;;  %vm14652_vm13 = vmor %vm4645_vm8, %vm4646_vm9 }
 0x4df   : > { %v4716_v47 = vmul.f32 %v14590_v22, %v14493_v63  ;;  %v7631_v17 = vmul.f32 -1.442695, %v16500_v60  ;;  %6454 = vmatpush.bf16.msrb.mxu2 %v7827_v19  ;;  %v8684_v0 = vpop.eup %8683  ;;  %vm14621_vm11 = vcmp.eq.f32.partialorder %v4649_v11, 8.507059e+37  ;;  %v4658_v50 = vmul.f32 %v14504_v44, %v4657_v62  ;;  %v16503_v11 = vld [vmem:[#allocation65_spill] sm:$0xff]  ;;  %v2423_v62 = vpop.f32.mrf.mxu0 }
 0x4e0   : > { %v4666_v31 = vand.u32 2147483648, %v14430_v54  ;;  %8687 = vrcp.f32 %v14588_v8  ;;  %v2689_v5 = vadd.f32 %v2688_v52, %v2599_v23  ;;  %6543 = vmatpush.bf16.msrb.mxu3 %v7891_v57  ;;  %v4644_v61 = vadd.f32 %v14487_v14, %v4643_v12  ;;  %v2512_v1 = vpop.f32.mrf.mxu1  ;;  %5941 = vmatmul.bf16.gmra.mxu0 %v16505_v39  ;;  %v16506_v57 = vld [vmem:[#allocation46_spill] sm:$0xff]  ;;  %v7696_v23 = vld [vmem:[%s9057_s7 + $0x58] sm:$0xf0]  ;;  %v8099_v39 = vld [vmem:[%s9057_s7 + $0xc4] sm:$0xf] }
 0x4e1   : > { %v8686_v16 = vpop.eup %8685  ;;  %v4709_v37 = vand.u32 2147483647, %v14452_v34  ;;  %v7634_v58 = vmul.f32 -1.442695, %v16503_v11  ;;  %v7635_v30 = vmul.f32 -1.442695, %v16504_v42  ;;  %vm4661_vm12 = vweird.f32 %v14504_v44  ;;  %6030 = vmatmul.bf16.gmra.mxu1 %v16506_v57 }
 0x4e2   : > { %v4703_v43 = vmul.f32 %v14544_v21, %v4702_v32  ;;  %v5361_v13 = vmul.f32 %v14547_v33, %v2689_v5  ;;  %v2513_v19 = vadd.f32 %v2512_v1, %v2423_v62  ;;  %v8085_v12 = vld [vmem:[%s9057_s7 + $0x54] sm:$0xf]  ;;  %v4717_v10 = vsub.f32 1.0, %v4716_v47  ;;  %v16507_v33 = vld [vmem:[#allocation159_spill] sm:$0xff]  ;;  %vm14674_vm0 = vmor %vm4660_vm10, %vm4661_vm12 }
 0x4e3   : > { %v8101_v52 = vld [vmem:[%s9057_s7 + $0xd4] sm:$0xf]  ;;  %v14640_v15 = vadd.f32 1.0, %v8684_v0  ;;  %8689 = vpow2.f32 %v7631_v17  ;;  %v7699_v55 = vor.u32 %v8085_v12, %v7696_v23  ;;  %v4659_v28 = vadd.f32 %v14504_v44, %v4658_v50  ;;  %6119 = vmatmul.bf16.gmra.mxu2 %v16507_v33  ;;  %v16508_v5 = vld [vmem:[#allocation107_spill] sm:$0xff] }
 0x4e4   : > { %v14644_v2 = vadd.f32 1.0, %v8686_v16  ;;  %v5364_v32 = vmul.f32 %v5236_v4, %v2513_v19  ;;  %6208 = vmatmul.bf16.gmra.mxu3 %v16508_v5  ;;  %v7763_v62 = vor.u32 %v8101_v52, %v7760_v38  ;;  %vm14656_vm14 = vcmp.eq.f32.partialorder %v4664_v29, 8.507059e+37  ;;  %v2690_v16 = vpop.f32.mrf.mxu3 }
 0x4e5   : > { %vm4705_vm15 = vweird.f32 %v14452_v34  ;;  %v4711_v4 = vand.u32 2147483648, %v14452_v34  ;;  %8691 = vpow2.f32 %v7634_v58  ;;  %6276 = vmatpush.bf16.msrb.mxu0 %v7699_v55  ;;  %v4648_v18 = vsel %vm14652_vm13, %v14487_v14, %v4644_v61 }
 0x4e6   : > { %v14662_v0 = vpop.eup %8687  ;;  %v4667_v38 = vor.u32 1.1754944e-38, %v4666_v31  ;;  %8693 = vpow2.f32 %v7635_v30  ;;  %6365 = vmatpush.bf16.msrb.mxu1 %v7763_v62  ;;  %v14668_v29 = vpack.c.bf16 %v5364_v32, %v14597_v41  ;;  %v4704_v55 = vadd.f32 %v14544_v21, %v4703_v43  ;;  %v2601_v31 = vpop.f32.mrf.mxu2  ;;  %v16517_v43 = vld [vmem:[#allocation72_spill] sm:$0xff] }
 0x4e7   : > { %vm4706_vm1 = vweird.f32 %v14544_v21  ;;  %v4718_v14 = vmul.f32 %v14590_v22, %v4717_v10  ;;  %8695 = vrcp.f32 %v14640_v15  ;;  %v4663_v41 = vsel %vm14674_vm0, %v14504_v44, %v4659_v28  ;;  %v2426_v28 = vpop.f32.mrf.mxu0 }
 0x4e8   : > { %vm14685_vm2 = vcmp.eq.f32.partialorder %v4709_v37, 8.507059e+37  ;;  %8697 = vrcp.f32 %v14644_v2  ;;  %v2691_v61 = vadd.f32 %v2690_v16, %v2601_v31  ;;  %v4653_v10 = vsel %vm14621_vm11, %v14581_v56, %v4648_v18  ;;  %v2515_v44 = vpop.f32.mrf.mxu1  ;;  %vm14701_vm3 = vmor %vm4705_vm15, %vm4706_vm1 }
 0x4e9   : > { %v8690_v58 = vpop.eup %8689  ;;  %v4724_v30 = vand.u32 2147483647, %v14493_v63  ;;  %v4761_v1 = vmul.f32 %v14662_v0, %v14588_v8  ;;  %v7638_v19 = vmul.f32 -1.442695, %v16517_v43  ;;  %v4712_v12 = vor.u32 1.1754944e-38, %v4711_v4 }
 0x4ea   : > { %v4726_v56 = vand.u32 2147483648, %v14493_v63  ;;  %v5365_v20 = vmul.f32 %v14605_v36, %v2691_v61  ;;  %v2516_v23 = vadd.f32 %v2515_v44, %v2426_v28  ;;  %v4668_v32 = vsel %vm14656_vm14, %v4667_v38, %v4663_v41  ;;  %v16525_v44 = vld [vmem:[#allocation166_spill] sm:$0xff] }
 0x4eb   : > { %v8692_v52 = vpop.eup %8691  ;;  %v4708_v62 = vsel %vm14701_vm3, %v14544_v21, %v4704_v55  ;;  %v4719_v34 = vadd.f32 %v14590_v22, %v4718_v14  ;;  %vm4721_vm4 = vweird.f32 %v14590_v22  ;;  %v5244_v4 = vmul.f32 %v4653_v10, %v16457_v35  ;;  %v16524_v10 = vld [vmem:[#allocation165_spill] sm:$0xff] }
 0x4ec   : > { %v8694_v47 = vpop.eup %8693  ;;  %v14715_v18 = vadd.f32 1.0, %v8690_v58  ;;  %v5368_v36 = vmul.f32 %v14611_v3, %v2516_v23  ;;  %v14718_v50 = vpack.c.bf16 %v5365_v20, %v5361_v13  ;;  %vm4720_vm5 = vweird.f32 %v14493_v63  ;;  %v2693_v61 = vpop.f32.mrf.mxu3 }
 0x4ed   : > { %v14720_v31 = vpop.eup %8695  ;;  %vm14723_vm6 = vcmp.eq.f32.partialorder %v4724_v30, 8.507059e+37  ;;  %v4762_v21 = vsub.f32 1.0, %v4761_v1  ;;  %8699 = vpow2.f32 %v7638_v19  ;;  %v14730_v35 = vmul.f32 %v4668_v32, %v16460_v9  ;;  %vm14734_vm7 = vmor %vm4720_vm5, %vm4721_vm4  ;;  %v16526_v32 = vld [vmem:[#allocation90_spill] sm:$0xff] }
 0x4ee   : > { %v14727_v38 = vpop.eup %8697  ;;  %v4713_v3 = vsel %vm14685_vm2, %v4712_v12, %v4708_v62  ;;  %v4727_v55 = vor.u32 1.1754944e-38, %v4726_v56  ;;  %v14738_v63 = vadd.f32 1.0, %v8692_v52  ;;  %v4723_v14 = vsel %vm14734_vm7, %v14590_v22, %v4719_v34  ;;  %v2604_v54 = vpop.f32.mrf.mxu2 }
 0x4ef   : > { %vm4765_vm8 = vweird.f32 %v14588_v8  ;;  %v4769_v16 = vand.u32 2147483647, %v14588_v8  ;;  %v4771_v9 = vand.u32 2147483648, %v14588_v8  ;;  %v14746_v41 = vadd.f32 1.0, %v8694_v47  ;;  %v2428_v12 = vpop.f32.mrf.mxu0 }
 0x4f0   : > { %v4776_v58 = vmul.f32 %v14720_v31, %v14640_v15  ;;  %8701 = vrcp.f32 %v14715_v18  ;;  %v7639_v30 = vmul.f32 -1.442695, %v16524_v10  ;;  %v2694_v1 = vadd.f32 %v2693_v61, %v2604_v54  ;;  %v2517_v56 = vpop.f32.mrf.mxu1  ;;  %5946 = vmatmul.bf16.gmra.mxu0 %v16526_v32  ;;  %v16530_v54 = vld [vmem:[#allocation108_spill] sm:$0xff] }
 0x4f1   : > { %v14753_v22 = vmul.f32 %v4713_v3, %v16465_v25  ;;  %v4763_v19 = vmul.f32 %v14662_v0, %v4762_v21  ;;  %v4821_v28 = vmul.f32 %v14727_v38, %v14644_v2  ;;  %v7642_v37 = vmul.f32 -1.442695, %v16525_v44  ;;  %v16527_v25 = vld [vmem:[#allocation92_spill] sm:$0xff] }
 0x4f2   : > { %v4786_v20 = vand.u32 2147483648, %v14640_v15  ;;  %8703 = vrcp.f32 %v14738_v63  ;;  %v5369_v23 = vmul.f32 %v14615_v59, %v2694_v1  ;;  %v2518_v52 = vadd.f32 %v2517_v56, %v2428_v12  ;;  %6035 = vmatmul.bf16.gmra.mxu1 %v16527_v25 }
 0x4f3   : > { %v8700_v62 = vpop.eup %8699  ;;  %v4728_v34 = vsel %vm14723_vm6, %v4727_v55, %v4723_v14  ;;  %vm14766_vm9 = vcmp.eq.f32.partialorder %v4769_v16, 8.507059e+37  ;;  %v4784_v21 = vand.u32 2147483647, %v14640_v15  ;;  %8705 = vrcp.f32 %v14746_v41  ;;  %6124 = vmatmul.bf16.gmra.mxu2 %v16530_v54 }
 0x4f4   : > { %v4777_v3 = vsub.f32 1.0, %v4776_v58  ;;  %v4831_v59 = vand.u32 2147483648, %v14644_v2  ;;  %8707 = vpow2.f32 %v7639_v30  ;;  %v5372_v13 = vmul.f32 %v5244_v4, %v2518_v52  ;;  %6213 = vmatmul.bf16.gmra.mxu3 %v13892_v48  ;;  %v2695_v56 = vpop.f32.mrf.mxu3 }
 0x4f5   : > { %v4764_v17 = vadd.f32 %v14662_v0, %v4763_v19  ;;  %vm4766_vm10 = vweird.f32 %v14662_v0  ;;  %v4822_v55 = vsub.f32 1.0, %v4821_v28  ;;  %8709 = vpow2.f32 %v7642_v37  ;;  %v16532_v28 = vld [vmem:[#allocation77_spill] sm:$0xff] }
 0x4f6   : > { %v14777_v14 = vpop.eup %8701  ;;  %v4772_v16 = vor.u32 1.1754944e-38, %v4771_v9  ;;  %vm4780_vm11 = vweird.f32 %v14640_v15  ;;  %v14780_v61 = vor.u32 1.1754944e-38, %v4786_v20  ;;  %v14782_v58 = vadd.f32 1.0, %v8700_v62  ;;  %v2606_v12 = vpop.f32.mrf.mxu2  ;;  %vm14798_vm12 = vmor %vm4765_vm8, %vm4766_vm10 }
 0x4f7   : > { %v14784_v4 = vpack.c.bf16 %v5372_v13, %v5368_v36  ;;  %v14787_v30 = vmul.f32 %v4728_v34, %v16472_v46  ;;  %v4829_v1 = vand.u32 2147483647, %v14644_v2  ;;  %v7643_v37 = vmul.f32 -1.442695, %v16532_v28  ;;  %v2431_v19 = vpop.f32.mrf.mxu0 }
 0x4f8   : > { %v14792_v9 = vpop.eup %8703  ;;  %v4778_v46 = vmul.f32 %v14720_v31, %v4777_v3  ;;  %vm4781_vm13 = vweird.f32 %v14720_v31  ;;  %vm4825_vm14 = vweird.f32 %v14644_v2  ;;  %v14805_v20 = vor.u32 1.1754944e-38, %v4831_v59  ;;  %v2520_v48 = vpop.f32.mrf.mxu1 }
 0x4f9   : > { %16531 = vst [vmem:[#allocation12_spill] sm:$0xff] %v14784_v4  ;;  %v2696_v52 = vadd.f32 %v2695_v56, %v2606_v12  ;;  %v14807_v62 = vpop.eup %8705  ;;  %v4768_v34 = vsel %vm14798_vm12, %v14662_v0, %v4764_v17  ;;  %v4823_v8 = vmul.f32 %v14727_v38, %v4822_v55  ;;  %v4836_v13 = vmul.f32 %v14777_v14, %v14715_v18  ;;  %v16535_v12 = vld [vmem:[#allocation82_spill] sm:$0xff]  ;;  %vm14856_vm2 = vmor %vm4780_vm11, %vm4781_vm13 }
 0x4fa   : > { %v4846_v3 = vand.u32 2147483648, %v14715_v18  ;;  %v8708_v59 = vpop.eup %8707  ;;  %8711 = vrcp.f32 %v14782_v58  ;;  %v7646_v56 = vmul.f32 -1.442695, %v16535_v12  ;;  %v2521_v0 = vadd.f32 %v2520_v48, %v2431_v19  ;;  %v7816_v19 = vld [vmem:[%s9057_s7 + $0x148] sm:$0xf0] }
 0x4fb   : > { %v5373_v36 = vmul.f32 %v14730_v35, %v2696_v52  ;;  %v8710_v17 = vpop.eup %8709  ;;  %vm4826_vm15 = vweird.f32 %v14727_v38  ;;  %v4881_v55 = vmul.f32 %v14792_v9, %v14738_v63  ;;  %v4891_v54 = vand.u32 2147483648, %v14738_v63  ;;  %v8115_v35 = vld [vmem:[%s9057_s7 + $0x144] sm:$0xf] }
 0x4fc   : > { %8713 = vpow2.f32 %v7643_v37  ;;  %v4773_v25 = vsel %vm14766_vm9, %v4772_v16, %v4768_v34  ;;  %v14826_v32 = vadd.f32 %v14720_v31, %v4778_v46  ;;  %vm14828_vm0 = vcmp.eq.f32.partialorder %v4784_v21, 8.507059e+37  ;;  %v8131_v52 = vld [vmem:[%s9057_s7 + $0x1c4] sm:$0xf]  ;;  %v7880_v34 = vld [vmem:[%s9057_s7 + $0x1c8] sm:$0xf0]  ;;  %vm14878_vm4 = vmor %vm4825_vm14, %vm4826_vm15 }
 0x4fd   : > { %v14833_v48 = vmul.f32 %v14753_v22, %v2521_v0  ;;  %v14838_v33 = vpack.c.bf16 %v5373_v36, %v5369_v23  ;;  %vm14840_vm1 = vcmp.eq.f32.partialorder %v4829_v1, 8.507059e+37  ;;  %v4837_v47 = vsub.f32 1.0, %v4836_v13  ;;  %v16547_v23 = vld [vmem:[#allocation162_spill] sm:$0xff] }
 0x4fe   : > { %v4896_v16 = vmul.f32 %v14807_v62, %v14746_v41  ;;  %v14846_v21 = vadd.f32 1.0, %v8708_v59  ;;  %v7819_v46 = vor.u32 %v8115_v35, %v7816_v19  ;;  %v4824_v22 = vadd.f32 %v14727_v38, %v4823_v8  ;;  %v16543_v8 = vld [vmem:[#allocation83_spill] sm:$0xff] }
 0x4ff   : > { %16538 = vst [vmem:[#allocation13_spill] sm:$0xff] %v14838_v33  ;;  %v14850_v0 = vadd.f32 1.0, %v8710_v17  ;;  %8715 = vpow2.f32 %v7646_v56  ;;  %v7883_v57 = vor.u32 %v8131_v52, %v7880_v34  ;;  %vm4840_vm3 = vweird.f32 %v14715_v18  ;;  %v2609_v17 = vpop.f32.mrf.mxu2  ;;  %v2698_v56 = vpop.f32.mrf.mxu3 }
 0x500   : > { %v14861_v1 = vor.u32 1.1754944e-38, %v4846_v3  ;;  %v4882_v13 = vsub.f32 1.0, %v4881_v55  ;;  %v4889_v59 = vand.u32 2147483647, %v14738_v63  ;;  %v7647_v36 = vmul.f32 -1.442695, %v16543_v8  ;;  %6455 = vmatpush.bf16.msrb.mxu2 %v7819_v46  ;;  %v14865_v35 = vpop.eup %8711  ;;  %5951 = vmatmul.bf16.gmra.mxu0 %v16547_v23 }
 0x501   : > { %v5252_v15 = vmul.f32 %v4773_v25, %v16475_v45  ;;  %v4783_v19 = vsel %vm14856_vm2, %v14720_v31, %v14826_v32  ;;  %v14872_v52 = vor.u32 1.1754944e-38, %v4891_v54  ;;  %v2699_v3 = vadd.f32 %v2698_v56, %v2609_v17  ;;  %6544 = vmatpush.bf16.msrb.mxu3 %v7883_v57  ;;  %v16546_v57 = vld [vmem:[#allocation78_spill] sm:$0xff]  ;;  %v2433_v25 = vpop.f32.mrf.mxu0  ;;  %v2522_v54 = vpop.f32.mrf.mxu1  ;;  %v8083_v17 = vld [vmem:[%s9057_s7 + $0x44] sm:$0xf]  ;;  %v7688_v56 = vld [vmem:[%s9057_s7 + $0x48] sm:$0xf0] }
 0x502   : > { %v8714_v55 = vpop.eup %8713  ;;  %v4838_v45 = vmul.f32 %v14777_v14, %v4837_v47  ;;  %vm4885_vm5 = vweird.f32 %v14738_v63  ;;  %v4897_v31 = vsub.f32 1.0, %v4896_v16  ;;  %8717 = vrcp.f32 %v14846_v21  ;;  %v16548_v16 = vld [vmem:[#allocation164_spill] sm:$0xff] }
 0x503   : > { %v7650_v32 = vmul.f32 -1.442695, %v16546_v57  ;;  %v4828_v2 = vsel %vm14878_vm4, %v14727_v38, %v4824_v22  ;;  %8719 = vrcp.f32 %v14850_v0  ;;  %v14891_v34 = vmul.f32 %v14787_v30, %v2699_v3  ;;  %6040 = vmatmul.bf16.gmra.mxu1 %v16548_v16  ;;  %v7752_v22 = vld [vmem:[%s9057_s7 + $0xc8] sm:$0xf0] }
 0x504   : > { %v2523_v47 = vadd.f32 %v2522_v54, %v2433_v25  ;;  %v4883_v33 = vmul.f32 %v14792_v9, %v4882_v13  ;;  %v4941_v4 = vmul.f32 %v14865_v35, %v14782_v58  ;;  %8721 = vpow2.f32 %v7647_v36  ;;  %v16552_v16 = vld [vmem:[#allocation109_spill] sm:$0xff]  ;;  %v16553_v13 = vld [vmem:[#allocation42_spill] sm:$0xff] }
 0x505   : > { %v7691_v38 = vor.u32 %v8083_v17, %v7688_v56  ;;  %v8716_v46 = vpop.eup %8715  ;;  %vm4841_vm6 = vweird.f32 %v14777_v14  ;;  %v16549_v30 = vand.u32 2147483647, %v14715_v18  ;;  %v14909_v25 = vadd.f32 1.0, %v8714_v55  ;;  %6129 = vmatmul.bf16.gmra.mxu2 %v16552_v16  ;;  %6218 = vmatmul.bf16.gmra.mxu3 %v16553_v13  ;;  %v16556_v55 = vld [vmem:[#allocation79_spill] sm:$0xff] }
 0x506   : > { %v5380_v54 = vmul.f32 %v5252_v15, %v2523_v47  ;;  %v7755_v23 = vor.u32 %v8099_v39, %v7752_v22  ;;  %v4788_v36 = vsel %vm14828_vm0, %v14780_v61, %v4783_v19  ;;  %v4839_v17 = vadd.f32 %v14777_v14, %v4838_v45  ;;  %vm14943_vm10 = vmor %vm4840_vm3, %vm4841_vm6 }
 0x507   : > { %vm14905_vm7 = vcmp.eq.f32.partialorder %v16549_v30, 8.507059e+37  ;;  %vm14917_vm8 = vcmp.eq.f32.partialorder %v4889_v59, 8.507059e+37  ;;  %v4898_v30 = vmul.f32 %v14807_v62, %v4897_v31  ;;  %8723 = vpow2.f32 %v7650_v32  ;;  %6277 = vmatpush.bf16.msrb.mxu0 %v7691_v38  ;;  %v2611_v31 = vpop.f32.mrf.mxu2  ;;  %v2700_v37 = vpop.f32.mrf.mxu3 }
 0x508   : > { %v4833_v15 = vsel %vm14840_vm1, %v14805_v20, %v4828_v2  ;;  %v4904_v39 = vand.u32 2147483647, %v14746_v41  ;;  %v7651_v47 = vmul.f32 -1.442695, %v16556_v55  ;;  %6366 = vmatpush.bf16.msrb.mxu1 %v7755_v23  ;;  %v14928_v5 = vpack.c.bf16 %v5380_v54, %v14833_v48  ;;  %v14930_v61 = vpop.eup %8717 }
 0x509   : > { %v4884_v59 = vadd.f32 %v14792_v9, %v4883_v33  ;;  %vm4886_vm9 = vweird.f32 %v14792_v9  ;;  %v4942_v19 = vsub.f32 1.0, %v4941_v4  ;;  %v14934_v45 = vadd.f32 1.0, %v8716_v46  ;;  %v14936_v20 = vpop.eup %8719  ;;  %v2436_v18 = vpop.f32.mrf.mxu0 }
 0x50a   : > { %v5253_v32 = vmul.f32 %v4788_v36, %v16493_v51  ;;  %v4906_v33 = vand.u32 2147483648, %v14746_v41  ;;  %8725 = vrcp.f32 %v14909_v25  ;;  %v2701_v4 = vadd.f32 %v2700_v37, %v2611_v31  ;;  %v8722_v2 = vpop.eup %8721  ;;  %v2525_v22 = vpop.f32.mrf.mxu1  ;;  %vm14959_vm12 = vmor %vm4885_vm5, %vm4886_vm9 }
 0x50b   : > { %v5256_v23 = vmul.f32 %v4833_v15, %v16496_v24  ;;  %v4843_v51 = vsel %vm14943_vm10, %v14777_v14, %v4839_v17  ;;  %v4899_v38 = vadd.f32 %v14807_v62, %v4898_v30  ;;  %vm4901_vm11 = vweird.f32 %v14807_v62 }
 0x50c   : > { %v4956_v24 = vmul.f32 %v14930_v61, %v14846_v21  ;;  %8727 = vpow2.f32 %v7651_v47  ;;  %v5381_v54 = vmul.f32 %v5253_v32, %v2701_v4  ;;  %v2526_v14 = vadd.f32 %v2525_v22, %v2436_v18 }
 0x50d   : > { %v8724_v36 = vpop.eup %8723  ;;  %v4888_v17 = vsel %vm14959_vm12, %v14792_v9, %v4884_v59  ;;  %v4943_v30 = vmul.f32 %v14865_v35, %v4942_v19  ;;  %v5001_v63 = vmul.f32 %v14936_v20, %v14850_v0  ;;  %8729 = vrcp.f32 %v14934_v45 }
 0x50e   : > { %vm4900_vm13 = vweird.f32 %v14746_v41  ;;  %v14973_v15 = vadd.f32 1.0, %v8722_v2  ;;  %v5384_v31 = vmul.f32 %v5256_v23, %v2526_v14  ;;  %v14976_v47 = vpack.c.bf16 %v5381_v54, %v14891_v34 }
 0x50f   : > { %v4848_v37 = vsel %vm14905_vm7, %v14861_v1, %v4843_v51  ;;  %vm14983_vm14 = vmor %vm4900_vm13, %vm4901_vm11  ;;  %vm14987_vm15 = vcmp.eq.f32.partialorder %v4904_v39, 8.507059e+37  ;;  %v4907_v41 = vor.u32 1.1754944e-38, %v4906_v33  ;;  %v4949_v19 = vand.u32 2147483647, %v14782_v58  ;;  %v2614_v4 = vpop.f32.mrf.mxu2  ;;  %v2703_v2 = vpop.f32.mrf.mxu3 }
 0x510   : > { %v14992_v32 = vpop.eup %8725  ;;  %v4893_v34 = vsel %vm14917_vm8, %v14872_v52, %v4888_v17  ;;  %v4903_v1 = vsel %vm14983_vm14, %v14807_v62, %v4899_v38  ;;  %v4957_v3 = vsub.f32 1.0, %v4956_v24  ;;  %v15000_v48 = vadd.f32 1.0, %v8724_v36  ;;  %v16569_v17 = vld [vmem:[#allocation50_spill] sm:$0xff] }
 0x511   : > { %v4944_v39 = vadd.f32 %v14865_v35, %v4943_v30  ;;  %vm4945_vm0 = vweird.f32 %v14782_v58  ;;  %vm4946_vm1 = vweird.f32 %v14865_v35  ;;  %v5002_v33 = vsub.f32 1.0, %v5001_v63  ;;  %5956 = vmatmul.bf16.gmra.mxu0 %v16569_v17  ;;  %v16570_v30 = vld [vmem:[#allocation54_spill] sm:$0xff] }
 0x512   : > { %v8728_v23 = vpop.eup %8727  ;;  %v5257_v56 = vmul.f32 %v4848_v37, %v16500_v60  ;;  %v4951_v52 = vand.u32 2147483648, %v14782_v58  ;;  %8731 = vrcp.f32 %v14973_v15  ;;  %v2704_v62 = vadd.f32 %v2703_v2, %v2614_v4  ;;  %v2438_v60 = vpop.f32.mrf.mxu0  ;;  %vm15023_vm3 = vmor %vm4945_vm0, %vm4946_vm1 }
 0x513   : > { %v15008_v51 = vpop.eup %8729  ;;  %v5260_v38 = vmul.f32 %v4893_v34, %v16503_v11  ;;  %v4908_v18 = vsel %vm14987_vm15, %v4907_v41, %v4903_v1  ;;  %vm15013_vm2 = vcmp.eq.f32.partialorder %v4949_v19, 8.507059e+37  ;;  %v5016_v46 = vmul.f32 %v14992_v32, %v14909_v25  ;;  %v2527_v24 = vpop.f32.mrf.mxu1  ;;  %6045 = vmatmul.bf16.gmra.mxu1 %v16570_v30 }
 0x514   : > { %v4958_v11 = vmul.f32 %v14930_v61, %v4957_v3  ;;  %8733 = vrcp.f32 %v15000_v48  ;;  %v5385_v14 = vmul.f32 %v5257_v56, %v2704_v62  ;;  %v2528_v36 = vadd.f32 %v2527_v24, %v2438_v60 }
 0x515   : > { %v4948_v63 = vsel %vm15023_vm3, %v14865_v35, %v4944_v39  ;;  %v4964_v58 = vand.u32 2147483647, %v14846_v21  ;;  %v4966_v37 = vand.u32 2147483648, %v14846_v21  ;;  %v5003_v9 = vmul.f32 %v14936_v20, %v5002_v33  ;;  %6134 = vmatmul.bf16.gmra.mxu2 %v14121_v7  ;;  %6223 = vmatmul.bf16.gmra.mxu3 %v14175_v40  ;;  %v7872_v40 = vld [vmem:[%s9057_s7 + $0x1b8] sm:$0xf0] }
 0x516   : > { %v4952_v59 = vor.u32 1.1754944e-38, %v4951_v52  ;;  %v5061_v41 = vmul.f32 %v15008_v51, %v14934_v45  ;;  %v15039_v19 = vadd.f32 1.0, %v8728_v23  ;;  %v5388_v34 = vmul.f32 %v5260_v38, %v2528_v36 }
 0x517   : > { %v5261_v1 = vmul.f32 %v4908_v18, %v16504_v42  ;;  %vm4960_vm4 = vweird.f32 %v14846_v21  ;;  %vm4961_vm5 = vweird.f32 %v14930_v61  ;;  %v5017_v35 = vsub.f32 1.0, %v5016_v46  ;;  %v2616_v52 = vpop.f32.mrf.mxu2  ;;  %v2705_v62 = vpop.f32.mrf.mxu3 }
 0x518   : > { %v15046_v3 = vpop.eup %8731  ;;  %v4953_v39 = vsel %vm15013_vm2, %v4952_v59, %v4948_v63  ;;  %v4959_v33 = vadd.f32 %v14930_v61, %v4958_v11  ;;  %vm5006_vm6 = vweird.f32 %v14936_v20  ;;  %v15052_v4 = vpack.c.bf16 %v5388_v34, %v5384_v31  ;;  %vm15064_vm8 = vmor %vm4960_vm4, %vm4961_vm5  ;;  %v8113_v59 = vld [vmem:[%s9057_s7 + $0x134] sm:$0xf] }
 0x519   : > { %vm15054_vm7 = vcmp.eq.f32.partialorder %v4964_v58, 8.507059e+37  ;;  %v4967_v42 = vor.u32 1.1754944e-38, %v4966_v37  ;;  %v5004_v23 = vadd.f32 %v14936_v20, %v5003_v9  ;;  %v5011_v56 = vand.u32 2147483648, %v14850_v0 }
 0x51a   : > { %v15060_v38 = vpop.eup %8733  ;;  %vm5005_vm9 = vweird.f32 %v14850_v0  ;;  %v5062_v31 = vsub.f32 1.0, %v5061_v41  ;;  %8735 = vrcp.f32 %v15039_v19  ;;  %v2706_v22 = vadd.f32 %v2705_v62, %v2616_v52  ;;  %v2441_v11 = vpop.f32.mrf.mxu0  ;;  %v8129_v41 = vld [vmem:[%s9057_s7 + $0x1b4] sm:$0xf] }
 0x51b   : > { %vm15070_vm10 = vmor %vm5005_vm9, %vm5006_vm6  ;;  %v5009_v60 = vand.u32 2147483647, %v14850_v0  ;;  %v5018_v21 = vmul.f32 %v14992_v32, %v5017_v35  ;;  %v5024_v24 = vand.u32 2147483647, %v14909_v25  ;;  %v5076_v54 = vmul.f32 %v15046_v3, %v14973_v15  ;;  %v2530_v36 = vpop.f32.mrf.mxu1  ;;  %v7808_v0 = vld [vmem:[%s9057_s7 + $0x138] sm:$0xf0] }
 0x51c   : > { %v5264_v63 = vmul.f32 %v4953_v39, %v16517_v43  ;;  %v4963_v58 = vsel %vm15064_vm8, %v14930_v61, %v4959_v33  ;;  %v5389_v37 = vmul.f32 %v5261_v1, %v2706_v22  ;;  %v2531_v9 = vadd.f32 %v2530_v36, %v2441_v11 }
 0x51d   : > { %v5008_v34 = vsel %vm15070_vm10, %v14936_v20, %v5004_v23  ;;  %v5012_v35 = vor.u32 1.1754944e-38, %v5011_v56  ;;  %v5121_v52 = vmul.f32 %v15060_v38, %v15000_v48  ;;  %v7811_v62 = vor.u32 %v8113_v59, %v7808_v0  ;;  %v16581_v0 = vld [vmem:[#allocation35_spill] sm:$0xff] }
 0x51e   : > { %v5063_v43 = vmul.f32 %v15008_v51, %v5062_v31  ;;  %v5392_v39 = vmul.f32 %v5264_v63, %v2531_v9  ;;  %v7875_v18 = vor.u32 %v8129_v41, %v7872_v40  ;;  %v15093_v61 = vpack.c.bf16 %v5389_v37, %v5385_v14 }
 0x51f   : > { %v4968_v1 = vsel %vm15054_vm7, %v4967_v42, %v4963_v58  ;;  %v5019_v33 = vadd.f32 %v14992_v32, %v5018_v21  ;;  %vm5021_vm11 = vweird.f32 %v14992_v32  ;;  %v5077_v20 = vsub.f32 1.0, %v5076_v54  ;;  %6456 = vmatpush.bf16.msrb.mxu2 %v7811_v62  ;;  %v2619_v31 = vpop.f32.mrf.mxu2  ;;  %v2708_v22 = vpop.f32.mrf.mxu3 }
 0x520   : > { %v15099_v23 = vpop.eup %8735  ;;  %vm5010_vm12 = vcmp.eq.f32.partialorder %v5009_v60, 8.507059e+37  ;;  %vm5020_vm13 = vweird.f32 %v14909_v25  ;;  %v5026_v56 = vand.u32 2147483648, %v14909_v25  ;;  %6545 = vmatpush.bf16.msrb.mxu3 %v7875_v18  ;;  %v5069_v14 = vand.u32 2147483647, %v14934_v45 }
 0x521   : > { %v5013_v40 = vsel %vm5010_vm12, %v5012_v35, %v5008_v34  ;;  %v5071_v2 = vand.u32 2147483648, %v14934_v45  ;;  %v5122_v42 = vsub.f32 1.0, %v5121_v52  ;;  %v5265_v46 = vmul.f32 %v4968_v1, %v16524_v10  ;;  %vm15108_vm14 = vmor %vm5020_vm13, %vm5021_vm11  ;;  %5961 = vmatmul.bf16.gmra.mxu0 %v16581_v0 }
 0x522   : > { %v5064_v60 = vadd.f32 %v15008_v51, %v5063_v43  ;;  %vm5066_vm15 = vweird.f32 %v15008_v51  ;;  %v2709_v25 = vadd.f32 %v2708_v22, %v2619_v31  ;;  %v5023_v54 = vsel %vm15108_vm14, %v14992_v32, %v5019_v33  ;;  %v2443_v63 = vpop.f32.mrf.mxu0  ;;  %v16582_v32 = vld [vmem:[#allocation94_spill] sm:$0xff]  ;;  %v7744_v22 = vld [vmem:[%s9057_s7 + $0xb8] sm:$0xf0] }
 0x523   : > { %vm15117_vm0 = vcmp.eq.f32.partialorder %v5024_v24, 8.507059e+37  ;;  %v5078_v10 = vmul.f32 %v15046_v3, %v5077_v20  ;;  %v5136_v36 = vmul.f32 %v15099_v23, %v15039_v19  ;;  %v2532_v58 = vpop.f32.mrf.mxu1  ;;  %v5268_v37 = vmul.f32 %v5013_v40, %v16525_v44  ;;  %6050 = vmatmul.bf16.gmra.mxu1 %v16582_v32  ;;  %v8081_v33 = vld [vmem:[%s9057_s7 + $0x34] sm:$0xf] }
 0x524   : > { %vm5065_vm1 = vweird.f32 %v14934_v45  ;;  %v5393_v9 = vmul.f32 %v5265_v46, %v2709_v25  ;;  %v2533_v59 = vadd.f32 %v2532_v58, %v2443_v63  ;;  %v5027_v24 = vor.u32 1.1754944e-38, %v5026_v56  ;;  %v8097_v20 = vld [vmem:[%s9057_s7 + $0xb4] sm:$0xf] }
 0x525   : > { %vm15130_vm2 = vmor %vm5065_vm1, %vm5066_vm15  ;;  %v5084_v34 = vand.u32 2147483647, %v14973_v15  ;;  %v5086_v44 = vand.u32 2147483648, %v14973_v15  ;;  %v5123_v45 = vmul.f32 %v15060_v38, %v5122_v42  ;;  %vm5070_vm3 = vcmp.eq.f32.partialorder %v5069_v14, 8.507059e+37  ;;  %6139 = vmatmul.bf16.gmra.mxu2 %v14257_v27  ;;  %6228 = vmatmul.bf16.gmra.mxu3 %v14322_v6 }
 0x526   : > { %v5068_v35 = vsel %vm15130_vm2, %v15008_v51, %v5064_v60  ;;  %v5072_v52 = vor.u32 1.1754944e-38, %v5071_v2  ;;  %v5396_v62 = vmul.f32 %v5268_v37, %v2533_v59  ;;  %v5028_v43 = vsel %vm15117_vm0, %v5027_v24, %v5023_v54  ;;  %v7680_v51 = vld [vmem:[%s9057_s7 + $0x38] sm:$0xf0] }
 0x527   : > { %v5079_v18 = vadd.f32 %v15046_v3, %v5078_v10  ;;  %vm5081_vm4 = vweird.f32 %v15046_v3  ;;  %v5137_v1 = vsub.f32 1.0, %v5136_v36  ;;  %vm5080_vm5 = vweird.f32 %v14973_v15  ;;  %v2621_v2 = vpop.f32.mrf.mxu2  ;;  %v2710_v42 = vpop.f32.mrf.mxu3 }
 0x528   : > { %v15150_v56 = vpack.c.bf16 %v5396_v62, %v5392_v39  ;;  %v5073_v40 = vsel %vm5070_vm3, %v5072_v52, %v5068_v35  ;;  %v5124_v14 = vadd.f32 %v15060_v38, %v5123_v45  ;;  %vm5126_vm6 = vweird.f32 %v15060_v38  ;;  %vm15158_vm7 = vmor %vm5080_vm5, %vm5081_vm4 }
 0x529   : > { %v7683_v31 = vor.u32 %v8081_v33, %v7680_v51  ;;  %v5269_v46 = vmul.f32 %v5028_v43, %v16532_v28  ;;  %v5131_v39 = vand.u32 2147483648, %v15000_v48  ;;  %v2711_v21 = vadd.f32 %v2710_v42, %v2621_v2 }
 0x52a   : > { %v7747_v60 = vor.u32 %v8097_v20, %v7744_v22  ;;  %v5083_v25 = vsel %vm15158_vm7, %v15046_v3, %v5079_v18  ;;  %vm5125_vm8 = vweird.f32 %v15000_v48  ;;  %v5129_v54 = vand.u32 2147483647, %v15000_v48  ;;  %v2446_v11 = vpop.f32.mrf.mxu0  ;;  %v16587_v20 = vld [vmem:[#allocation60_spill] sm:$0xff] }
 0x52b   : > { %v2535_v28 = vpop.f32.mrf.mxu1  ;;  %6278 = vmatpush.bf16.msrb.mxu0 %v7683_v31  ;;  %v5272_v10 = vmul.f32 %v5073_v40, %v16535_v12  ;;  %vm5127_vm9 = vmor %vm5125_vm8, %vm5126_vm6  ;;  %v5138_v36 = vmul.f32 %v15099_v23, %v5137_v1  ;;  %v5397_v63 = vmul.f32 %v5269_v46, %v2711_v21  ;;  %v5087_v37 = vor.u32 1.1754944e-38, %v5086_v44  ;;  %v16588_v40 = vld [vmem:[#allocation98_spill] sm:$0xff] }
 0x52c   : > { %v2536_v58 = vadd.f32 %v2535_v28, %v2446_v11  ;;  %6367 = vmatpush.bf16.msrb.mxu1 %v7747_v60  ;;  %v5128_v3 = vsel %vm5127_vm9, %v15060_v38, %v5124_v14  ;;  %vm5085_vm10 = vcmp.eq.f32.partialorder %v5084_v34, 8.507059e+37  ;;  %v5132_v59 = vor.u32 1.1754944e-38, %v5131_v39  ;;  %v8111_v60 = vld [vmem:[%s9057_s7 + $0x124] sm:$0xf] }
 0x52d   : > { %v15173_v48 = vpack.c.bf16 %v5397_v63, %v5393_v9  ;;  %v5088_v41 = vsel %vm5085_vm10, %v5087_v37, %v5083_v25  ;;  %vm5130_vm11 = vcmp.eq.f32.partialorder %v5129_v54, 8.507059e+37  ;;  %v5139_v12 = vadd.f32 %v15099_v23, %v5138_v36  ;;  %v7800_v25 = vld [vmem:[%s9057_s7 + $0x128] sm:$0xf0]  ;;  %v8127_v54 = vld [vmem:[%s9057_s7 + $0x1a4] sm:$0xf] }
 0x52e   : > { %v5400_v24 = vmul.f32 %v5272_v10, %v2536_v58  ;;  %v5133_v45 = vsel %vm5130_vm11, %v5132_v59, %v5128_v3  ;;  %vm5141_vm12 = vweird.f32 %v15099_v23  ;;  %v5146_v35 = vand.u32 2147483648, %v15039_v19  ;;  %v7864_v36 = vld [vmem:[%s9057_s7 + $0x1a8] sm:$0xf0]  ;;  %v5406_v37 = vld [vmem:[#allocation8] sm:$0xff] }
 0x52f   : > { %v2624_v52 = vpop.f32.mrf.mxu2  ;;  %v2713_v62 = vpop.f32.mrf.mxu3  ;;  %v5273_v44 = vmul.f32 %v5088_v41, %v16543_v8  ;;  %vm5140_vm13 = vweird.f32 %v15039_v19  ;;  %v5144_v38 = vand.u32 2147483647, %v15039_v19  ;;  %v5276_v9 = vmul.f32 %v5133_v45, %v16546_v57  ;;  %v16590_v41 = vld [vmem:[#allocation95_spill] sm:$0xff] }
 0x530   : > { %v2714_v34 = vadd.f32 %v2713_v62, %v2624_v52  ;;  %vm5142_vm14 = vmor %vm5140_vm13, %vm5141_vm12  ;;  %v5147_v14 = vor.u32 1.1754944e-38, %v5146_v35  ;;  %v7803_v10 = vor.u32 %v8111_v60, %v7800_v25  ;;  %v7867_v58 = vor.u32 %v8127_v54, %v7864_v36  ;;  %v8079_v52 = vld [vmem:[%s9057_s7 + $0x24] sm:$0xf]  ;;  %v7672_v62 = vld [vmem:[%s9057_s7 + $0x28] sm:$0xf0] }
 0x531   : > { %v5143_v1 = vsel %vm5142_vm14, %v15099_v23, %v5139_v12  ;;  %5966 = vmatmul.bf16.gmra.mxu0 %v16587_v20  ;;  %vm5145_vm15 = vcmp.eq.f32.partialorder %v5144_v38, 8.507059e+37  ;;  %v16591_v12 = vld [vmem:[#allocation67_spill] sm:$0xff]  ;;  %v16592_v60 = vld [vmem:[#allocation97_spill] sm:$0xff] }
 0x532   : > { %v2448_v43 = vpop.f32.mrf.mxu0  ;;  %v5401_v33 = vmul.f32 %v5273_v44, %v2714_v34  ;;  %v5148_v57 = vsel %vm5145_vm15, %v5147_v14, %v5143_v1  ;;  %6457 = vmatpush.bf16.msrb.mxu2 %v7803_v10  ;;  %6546 = vmatpush.bf16.msrb.mxu3 %v7867_v58  ;;  %v7675_v34 = vor.u32 %v8079_v52, %v7672_v62  ;;  %v16593_v25 = vld [vmem:[#allocation167_spill] sm:$0xff] }
 0x533   : > { %v2537_v18 = vpop.f32.mrf.mxu1  ;;  %6055 = vmatmul.bf16.gmra.mxu1 %v16588_v40  ;;  %v5277_v42 = vmul.f32 %v5148_v57, %v16556_v55 }
 0x534   : > { %v2538_v51 = vadd.f32 %v2537_v18, %v2448_v43  ;;  %v7736_v43 = vld [vmem:[%s9057_s7 + $0xa8] sm:$0xf0]  ;;  %6279 = vmatpush.bf16.msrb.mxu0 %v7675_v34  ;;  %v7856_v34 = vld [vmem:[%s9057_s7 + $0x198] sm:$0xf0] }
 0x535   : > { %6144 = vmatmul.bf16.gmra.mxu2 %v14414_v53  ;;  %6233 = vmatmul.bf16.gmra.mxu3 %v14448_v49 }
 0x536   : > { %v5404_v8 = vmul.f32 %v5276_v9, %v2538_v51  ;;  %v8095_v9 = vld [vmem:[%s9057_s7 + $0xa4] sm:$0xf] }
 0x537   : > { %v2626_v23 = vpop.f32.mrf.mxu2  ;;  %v2715_v2 = vpop.f32.mrf.mxu3  ;;  %v7739_v1 = vor.u32 %v8095_v9, %v7736_v43 }
 0x538   : > { %v15187_v19 = vpack.c.bf16 %v5404_v8, %v5400_v24  ;;  %v2716_v31 = vadd.f32 %v2715_v2, %v2626_v23  ;;  %v16589_v24 = vld [vmem:[#allocation100_spill] sm:$0xff] }
 0x539   : > { %6368 = vmatpush.bf16.msrb.mxu1 %v7739_v1 }
 0x53a   : > { %v5927_v22 = vpop.f32.mrf.mxu0  ;;  %v5405_v15 = vmul.f32 %v5277_v42, %v2716_v31 }
 0x53b   : > { %v6016_v46 = vpop.f32.mrf.mxu1 }
 0x53c   : > { %v15190_v39 = vpack.c.bf16 %v5405_v15, %v5401_v33  ;;  %v6017_v21 = vadd.f32 %v6016_v46, %v5927_v22  ;;  %v5408_v33 = vld [vmem:[#allocation8 + $0x10] sm:$0xff]  ;;  %v5410_v22 = vld [vmem:[#allocation8 + $0x20] sm:$0xff] }
 0x53f   : > { %v6105_v11 = vpop.f32.mrf.mxu2  ;;  %v6194_v28 = vpop.f32.mrf.mxu3 }
 0x540   : > { %v6106_v63 = vadd.f32 %v6105_v11, %v6017_v21 }
 0x541   : > { %5971 = vmatmul.bf16.gmra.mxu0 %v16589_v24 }
 0x542   : > { %v5929_v55 = vpop.f32.mrf.mxu0  ;;  %v6195_v59 = vadd.f32 %v6194_v28, %v6106_v63  ;;  %v5412_v63 = vld [vmem:[#allocation8 + $0x30] sm:$0xff] }
 0x543   : > { %v6018_v3 = vpop.f32.mrf.mxu1  ;;  %6060 = vmatmul.bf16.gmra.mxu1 %v16590_v41 }
 0x544   : > { %v6630_v45 = vadd.f32 %v6195_v59, %v5406_v37  ;;  %v6019_v35 = vadd.f32 %v6018_v3, %v5929_v55 }
 0x545   : > { %6149 = vmatmul.bf16.gmra.mxu2 %v14542_v26  ;;  %6238 = vmatmul.bf16.gmra.mxu3 %v16591_v12 }
 0x546   : > { %6694 = vst [vmem:[#allocation8] sm:$0xff] %v6630_v45  ;;  %v8109_v45 = vld [vmem:[%s9057_s7 + $0x114] sm:$0xf] }
 0x547   : > { %v6107_v44 = vpop.f32.mrf.mxu2  ;;  %v6196_v38 = vpop.f32.mrf.mxu3 }
 0x548   : > { %v6108_v18 = vadd.f32 %v6107_v44, %v6019_v35  ;;  %v7792_v35 = vld [vmem:[%s9057_s7 + $0x118] sm:$0xf0] }
 0x549   : > { %v7795_v44 = vor.u32 %v8109_v45, %v7792_v35 }
 0x54a   : > { %v5932_v51 = vpop.f32.mrf.mxu0  ;;  %v6197_v8 = vadd.f32 %v6196_v38, %v6108_v18  ;;  %v8125_v38 = vld [vmem:[%s9057_s7 + $0x194] sm:$0xf]  ;;  %v5414_v18 = vld [vmem:[#allocation8 + $0x40] sm:$0xff] }
 0x54b   : > { %v6021_v14 = vpop.f32.mrf.mxu1  ;;  %v7859_v43 = vor.u32 %v8125_v38, %v7856_v34  ;;  %6458 = vmatpush.bf16.msrb.mxu2 %v7795_v44  ;;  %v16598_v34 = vld [vmem:[#allocation169_spill] sm:$0xff] }
 0x54c   : > { %v6632_v57 = vadd.f32 %v6197_v8, %v5408_v33  ;;  %v6022_v23 = vadd.f32 %v6021_v14, %v5932_v51  ;;  %v16594_v14 = vld [vmem:[#allocation168_spill] sm:$0xff]  ;;  %v16595_v8 = vld [vmem:[#allocation101_spill] sm:$0xff] }
 0x54d   : > { %6547 = vmatpush.bf16.msrb.mxu3 %v7859_v43 }
 0x54e   : > { %6696 = vst [vmem:[#allocation8 + $0x10] sm:$0xff] %v6632_v57 }
 0x54f   : > { %v6110_v2 = vpop.f32.mrf.mxu2  ;;  %v6199_v42 = vpop.f32.mrf.mxu3 }
 0x550   : > { %v6111_v31 = vadd.f32 %v6110_v2, %v6022_v23  ;;  %v16596_v23 = vld [vmem:[#allocation12_spill] sm:$0xff]  ;;  %v16597_v2 = vld [vmem:[#allocation13_spill] sm:$0xff] }
 0x551   : > { %5976 = vmatmul.bf16.gmra.mxu0 %v16592_v60 }
 0x552   : > { %v5934_v46 = vpop.f32.mrf.mxu0  ;;  %v6200_v21 = vadd.f32 %v6199_v42, %v6111_v31  ;;  %v8077_v31 = vld [vmem:[%s9057_s7 + $0x14] sm:$0xf] }
 0x553   : > { %v6023_v15 = vpop.f32.mrf.mxu1  ;;  %6065 = vmatmul.bf16.gmra.mxu1 %v16593_v25 }
 0x554   : > { %v6634_v54 = vadd.f32 %v6200_v21, %v5410_v22  ;;  %v6024_v11 = vadd.f32 %v6023_v15, %v5934_v46  ;;  %v7664_v22 = vld [vmem:[%s9057_s7 + $0x18] sm:$0xf0] }
 0x555   : > { %6154 = vmatmul.bf16.gmra.mxu2 %v14668_v29  ;;  %6243 = vmatmul.bf16.gmra.mxu3 %v14718_v50  ;;  %v7667_v21 = vor.u32 %v8077_v31, %v7664_v22 }
 0x556   : > { %6698 = vst [vmem:[#allocation8 + $0x20] sm:$0xff] %v6634_v54  ;;  %v8093_v54 = vld [vmem:[%s9057_s7 + $0x94] sm:$0xf] }
 0x557   : > { %v6112_v28 = vpop.f32.mrf.mxu2  ;;  %v6201_v10 = vpop.f32.mrf.mxu3  ;;  %6280 = vmatpush.bf16.msrb.mxu0 %v7667_v21  ;;  %v8107_v21 = vld [vmem:[%s9057_s7 + $0x104] sm:$0xf] }
 0x558   : > { %v6113_v36 = vadd.f32 %v6112_v28, %v6024_v11  ;;  %v7728_v11 = vld [vmem:[%s9057_s7 + $0x98] sm:$0xf0] }
 0x55a   : > { %v5937_v58 = vpop.f32.mrf.mxu0  ;;  %v6202_v55 = vadd.f32 %v6201_v10, %v6113_v36  ;;  %v7731_v10 = vor.u32 %v8093_v54, %v7728_v11  ;;  %v5416_v36 = vld [vmem:[#allocation8 + $0x50] sm:$0xff]  ;;  %v7784_v54 = vld [vmem:[%s9057_s7 + $0x108] sm:$0xf0] }
 0x55b   : > { %v6026_v37 = vpop.f32.mrf.mxu1 }
 0x55c   : > { %v6636_v3 = vadd.f32 %v6202_v55, %v5412_v63  ;;  %v6027_v59 = vadd.f32 %v6026_v37, %v5937_v58  ;;  %6369 = vmatpush.bf16.msrb.mxu1 %v7731_v10  ;;  %v7787_v10 = vor.u32 %v8107_v21, %v7784_v54 }
 0x55e   : > { %6700 = vst [vmem:[#allocation8 + $0x30] sm:$0xff] %v6636_v3  ;;  %6459 = vmatpush.bf16.msrb.mxu2 %v7787_v10 }
 0x55f   : > { %v6115_v52 = vpop.f32.mrf.mxu2  ;;  %v6204_v62 = vpop.f32.mrf.mxu3 }
 0x560   : > { %v6116_v9 = vadd.f32 %v6115_v52, %v6027_v59  ;;  %v5418_v52 = vld [vmem:[#allocation8 + $0x60] sm:$0xff] }
 0x561   : > { %5981 = vmatmul.bf16.gmra.mxu0 %v16594_v14 }
 0x562   : > { %v5939_v1 = vpop.f32.mrf.mxu0  ;;  %v6205_v51 = vadd.f32 %v6204_v62, %v6116_v9  ;;  %v16599_v9 = vld [vmem:[#allocation102_spill] sm:$0xff] }
 0x563   : > { %v6028_v33 = vpop.f32.mrf.mxu1  ;;  %6070 = vmatmul.bf16.gmra.mxu1 %v16595_v8 }
 0x564   : > { %v6638_v57 = vadd.f32 %v6205_v51, %v5414_v18  ;;  %v6029_v42 = vadd.f32 %v6028_v33, %v5939_v1 }
 0x565   : > { %6159 = vmatmul.bf16.gmra.mxu2 %v16596_v23  ;;  %6248 = vmatmul.bf16.gmra.mxu3 %v16597_v2 }
 0x566   : > { %6702 = vst [vmem:[#allocation8 + $0x40] sm:$0xff] %v6638_v57  ;;  %v5420_v57 = vld [vmem:[#allocation8 + $0x70] sm:$0xff] }
 0x567   : > { %v6117_v46 = vpop.f32.mrf.mxu2  ;;  %v6206_v15 = vpop.f32.mrf.mxu3 }
 0x568   : > { %v6118_v28 = vadd.f32 %v6117_v46, %v6029_v42 }
 0x56a   : > { %v5942_v63 = vpop.f32.mrf.mxu0  ;;  %v6207_v37 = vadd.f32 %v6206_v15, %v6118_v28 }
 0x56b   : > { %v6031_v58 = vpop.f32.mrf.mxu1 }
 0x56c   : > { %v6640_v55 = vadd.f32 %v6207_v37, %v5416_v36  ;;  %v6032_v3 = vadd.f32 %v6031_v58, %v5942_v63  ;;  %v8123_v36 = vld [vmem:[%s9057_s7 + $0x184] sm:$0xf]  ;;  %v7848_v63 = vld [vmem:[%s9057_s7 + $0x188] sm:$0xf0] }
 0x56d   : > { %v7851_v37 = vor.u32 %v8123_v36, %v7848_v63  ;;  %v5426_v63 = vld [vmem:[#allocation8 + $0xa0] sm:$0xff] }
 0x56e   : > { %6704 = vst [vmem:[#allocation8 + $0x50] sm:$0xff] %v6640_v55  ;;  %v5422_v55 = vld [vmem:[#allocation8 + $0x80] sm:$0xff] }
 0x56f   : > { %v6120_v59 = vpop.f32.mrf.mxu2  ;;  %v6209_v45 = vpop.f32.mrf.mxu3  ;;  %6548 = vmatpush.bf16.msrb.mxu3 %v7851_v37 }
 0x570   : > { %v6121_v35 = vadd.f32 %v6120_v59, %v6032_v3 }
 0x571   : > { %5986 = vmatmul.bf16.gmra.mxu0 %v16598_v34 }
 0x572   : > { %v5944_v62 = vpop.f32.mrf.mxu0  ;;  %v6210_v38 = vadd.f32 %v6209_v45, %v6121_v35  ;;  %v16600_v35 = vld [vmem:[#allocation70_spill] sm:$0xff] }
 0x573   : > { %v6033_v44 = vpop.f32.mrf.mxu1  ;;  %6075 = vmatmul.bf16.gmra.mxu1 %v16599_v9 }
 0x574   : > { %v6642_v43 = vadd.f32 %v6210_v38, %v5418_v52  ;;  %v6034_v18 = vadd.f32 %v6033_v44, %v5944_v62  ;;  %v16601_v52 = vld [vmem:[#allocation104_spill] sm:$0xff] }
 0x575   : > { %6164 = vmatmul.bf16.gmra.mxu2 %v14928_v5  ;;  %6253 = vmatmul.bf16.gmra.mxu3 %v14976_v47  ;;  %v8075_v38 = vld [vmem:[%s9057_s7 + $0x4] sm:$0xf] }
 0x576   : > { %6706 = vst [vmem:[#allocation8 + $0x60] sm:$0xff] %v6642_v43  ;;  %v7656_v43 = vld [vmem:[%s9057_s7 + $0x8] sm:$0xf0] }
 0x577   : > { %v6122_v1 = vpop.f32.mrf.mxu2  ;;  %v6211_v33 = vpop.f32.mrf.mxu3 }
 0x578   : > { %v6123_v51 = vadd.f32 %v6122_v1, %v6034_v18 }
 0x57a   : > { %v5947_v42 = vpop.f32.mrf.mxu0  ;;  %v6212_v22 = vadd.f32 %v6211_v33, %v6123_v51  ;;  %v7659_v33 = vor.u32 %v8075_v38, %v7656_v43  ;;  %v8091_v51 = vld [vmem:[%s9057_s7 + $0x84] sm:$0xf] }
 0x57b   : > { %v6036_v31 = vpop.f32.mrf.mxu1 }
 0x57c   : > { %v6644_v46 = vadd.f32 %v6212_v22, %v5420_v57  ;;  %v6037_v15 = vadd.f32 %v6036_v31, %v5947_v42  ;;  %v7720_v57 = vld [vmem:[%s9057_s7 + $0x88] sm:$0xf0]  ;;  %v5424_v22 = vld [vmem:[#allocation8 + $0x90] sm:$0xff]  ;;  %6281 = vmatpush.bf16.msrb.mxu0 %v7659_v33 }
 0x57d   : > { %v7723_v31 = vor.u32 %v8091_v51, %v7720_v57 }
 0x57e   : > { %6708 = vst [vmem:[#allocation8 + $0x70] sm:$0xff] %v6644_v46 }
 0x57f   : > { %v6125_v11 = vpop.f32.mrf.mxu2  ;;  %v6214_v28 = vpop.f32.mrf.mxu3  ;;  %6370 = vmatpush.bf16.msrb.mxu1 %v7723_v31 }
 0x580   : > { %v6126_v58 = vadd.f32 %v6125_v11, %v6037_v15 }
 0x581   : > { %5991 = vmatmul.bf16.gmra.mxu0 %v16600_v35 }
 0x582   : > { %v5949_v3 = vpop.f32.mrf.mxu0  ;;  %v6215_v45 = vadd.f32 %v6214_v28, %v6126_v58 }
 0x583   : > { %v6038_v59 = vpop.f32.mrf.mxu1  ;;  %6080 = vmatmul.bf16.gmra.mxu1 %v16601_v52 }
 0x584   : > { %v6646_v62 = vadd.f32 %v6215_v45, %v5422_v55  ;;  %v6039_v44 = vadd.f32 %v6038_v59, %v5949_v3  ;;  %v16602_v3 = vld [vmem:[#allocation71_spill] sm:$0xff]  ;;  %v16603_v59 = vld [vmem:[#allocation73_spill] sm:$0xff] }
 0x585   : > { %6169 = vmatmul.bf16.gmra.mxu2 %v15052_v4  ;;  %6258 = vmatmul.bf16.gmra.mxu3 %v15093_v61 }
 0x586   : > { %6710 = vst [vmem:[#allocation8 + $0x80] sm:$0xff] %v6646_v62 }
 0x587   : > { %v6127_v18 = vpop.f32.mrf.mxu2  ;;  %v6216_v1 = vpop.f32.mrf.mxu3 }
 0x588   : > { %v6128_v42 = vadd.f32 %v6127_v18, %v6039_v44  ;;  %v5428_v18 = vld [vmem:[#allocation8 + $0xb0] sm:$0xff] }
 0x58a   : > { %v5952_v46 = vpop.f32.mrf.mxu0  ;;  %v6217_v21 = vadd.f32 %v6216_v1, %v6128_v42 }
 0x58b   : > { %v6041_v15 = vpop.f32.mrf.mxu1 }
 0x58c   : > { %v6648_v54 = vadd.f32 %v6217_v21, %v5424_v22  ;;  %v6042_v11 = vadd.f32 %v6041_v15, %v5952_v46  ;;  %v5430_v15 = vld [vmem:[#allocation8 + $0xc0] sm:$0xff] }
 0x58e   : > { %6712 = vst [vmem:[#allocation8 + $0x90] sm:$0xff] %v6648_v54 }
 0x58f   : > { %v6130_v28 = vpop.f32.mrf.mxu2  ;;  %v6219_v10 = vpop.f32.mrf.mxu3 }
 0x590   : > { %v6131_v36 = vadd.f32 %v6130_v28, %v6042_v11  ;;  %v16604_v28 = vld [vmem:[#allocation99_spill] sm:$0xff] }
 0x591   : > { %5996 = vmatmul.bf16.gmra.mxu0 %v16602_v3 }
 0x592   : > { %v5954_v58 = vpop.f32.mrf.mxu0  ;;  %v6220_v55 = vadd.f32 %v6219_v10, %v6131_v36  ;;  %v16605_v10 = vld [vmem:[#allocation103_spill] sm:$0xff] }
 0x593   : > { %v6043_v37 = vpop.f32.mrf.mxu1  ;;  %6085 = vmatmul.bf16.gmra.mxu1 %v16603_v59 }
 0x594   : > { %v6650_v45 = vadd.f32 %v6220_v55, %v5426_v63  ;;  %v6044_v62 = vadd.f32 %v6043_v37, %v5954_v58 }
 0x595   : > { %6174 = vmatmul.bf16.gmra.mxu2 %v15150_v56  ;;  %6263 = vmatmul.bf16.gmra.mxu3 %v15173_v48 }
 0x596   : > { %6714 = vst [vmem:[#allocation8 + $0xa0] sm:$0xff] %v6650_v45  ;;  %v5432_v45 = vld [vmem:[#allocation8 + $0xd0] sm:$0xff] }
 0x597   : > { %v6132_v44 = vpop.f32.mrf.mxu2  ;;  %v6221_v38 = vpop.f32.mrf.mxu3 }
 0x598   : > { %v6133_v43 = vadd.f32 %v6132_v44, %v6044_v62 }
 0x59a   : > { %v5957_v1 = vpop.f32.mrf.mxu0  ;;  %v6222_v51 = vadd.f32 %v6221_v38, %v6133_v43 }
 0x59b   : > { %v6046_v33 = vpop.f32.mrf.mxu1 }
 0x59c   : > { %v6652_v57 = vadd.f32 %v6222_v51, %v5428_v18  ;;  %v6047_v42 = vadd.f32 %v6046_v33, %v5957_v1 }
 0x59e   : > { %6716 = vst [vmem:[#allocation8 + $0xb0] sm:$0xff] %v6652_v57  ;;  %v5434_v57 = vld [vmem:[#allocation8 + $0xe0] sm:$0xff] }
 0x59f   : > { %v6135_v31 = vpop.f32.mrf.mxu2  ;;  %v6224_v22 = vpop.f32.mrf.mxu3 }
 0x5a0   : > { %v6136_v46 = vadd.f32 %v6135_v31, %v6047_v42 }
 0x5a1   : > { %6001 = vmatmul.bf16.gmra.mxu0 %v16604_v28 }
 0x5a2   : > { %v5959_v21 = vpop.f32.mrf.mxu0  ;;  %v6225_v11 = vadd.f32 %v6224_v22, %v6136_v46  ;;  %v16606_v46 = vld [vmem:[#allocation81_spill] sm:$0xff] }
 0x5a3   : > { %v6048_v54 = vpop.f32.mrf.mxu1  ;;  %6090 = vmatmul.bf16.gmra.mxu1 %v16605_v10 }
 0x5a4   : > { %v6654_v36 = vadd.f32 %v6225_v11, %v5430_v15  ;;  %v6049_v63 = vadd.f32 %v6048_v54, %v5959_v21  ;;  %v16607_v15 = vld [vmem:[#allocation84_spill] sm:$0xff]  ;;  %v16608_v54 = vld [vmem:[#allocation74_spill] sm:$0xff]  ;;  %v16609_v11 = vld [vmem:[#allocation93_spill] sm:$0xff] }
 0x5a5   : > { %6179 = vmatmul.bf16.gmra.mxu2 %v15187_v19  ;;  %6268 = vmatmul.bf16.gmra.mxu3 %v15190_v39 }
 0x5a6   : > { %6718 = vst [vmem:[#allocation8 + $0xc0] sm:$0xff] %v6654_v36 }
 0x5a7   : > { %v6137_v58 = vpop.f32.mrf.mxu2  ;;  %v6226_v37 = vpop.f32.mrf.mxu3 }
 0x5a8   : > { %v6138_v55 = vadd.f32 %v6137_v58, %v6049_v63 }
 0x5aa   : > { %v5962_v62 = vpop.f32.mrf.mxu0  ;;  %v6227_v38 = vadd.f32 %v6226_v37, %v6138_v55  ;;  %v5436_v55 = vld [vmem:[#allocation8 + $0xf0] sm:$0xff] }
 0x5ab   : > { %v6051_v44 = vpop.f32.mrf.mxu1 }
 0x5ac   : > { %v6656_v43 = vadd.f32 %v6227_v38, %v5432_v45  ;;  %v6052_v18 = vadd.f32 %v6051_v44, %v5962_v62 }
 0x5ae   : > { %6720 = vst [vmem:[#allocation8 + $0xd0] sm:$0xff] %v6656_v43 }
 0x5af   : > { %v6140_v1 = vpop.f32.mrf.mxu2  ;;  %v6229_v33 = vpop.f32.mrf.mxu3 }
 0x5b0   : > { %v6141_v51 = vadd.f32 %v6140_v1, %v6052_v18 }
 0x5b1   : > { %6282 = vmatmul.bf16.vlgmr.msrb.gmra.mxu0 %v16606_v46 }
 0x5b2   : > { %v5964_v42 = vpop.f32.mrf.mxu0  ;;  %v6230_v22 = vadd.f32 %v6229_v33, %v6141_v51  ;;  %v5438_v51 = vld [vmem:[#allocation8 + $0x100] sm:$0xff] }
 0x5b3   : > { %v6053_v31 = vpop.f32.mrf.mxu1  ;;  %6371 = vmatmul.bf16.vlgmr.msrb.gmra.mxu1 %v16607_v15  ;;  %v16610_v15 = vld [vmem:[#allocation85_spill] sm:$0xff] }
 0x5b4   : > { %v6658_v21 = vadd.f32 %v6230_v22, %v5434_v57  ;;  %v6054_v36 = vadd.f32 %v6053_v31, %v5964_v42  ;;  %v16611_v42 = vld [vmem:[#allocation86_spill] sm:$0xff] }
 0x5b5   : > { %6460 = vmatmul.bf16.vlgmr.msrb.gmra.mxu2 %v16608_v54  ;;  %6549 = vmatmul.bf16.vlgmr.msrb.gmra.mxu3 %v16609_v11  ;;  %v16613_v54 = vld [vmem:[#allocation96_spill] sm:$0xff] }
 0x5b6   : > { %6722 = vst [vmem:[#allocation8 + $0xe0] sm:$0xff] %v6658_v21  ;;  %v16612_v21 = vld [vmem:[#allocation105_spill] sm:$0xff] }
 0x5b7   : > { %v6142_v63 = vpop.f32.mrf.mxu2  ;;  %v6231_v58 = vpop.f32.mrf.mxu3 }
 0x5b8   : > { %v6143_v37 = vadd.f32 %v6142_v63, %v6054_v36 }
 0x5ba   : > { %v5967_v45 = vpop.f32.mrf.mxu0  ;;  %v6232_v44 = vadd.f32 %v6231_v58, %v6143_v37  ;;  %v5440_v37 = vld [vmem:[#allocation8 + $0x110] sm:$0xff] }
 0x5bb   : > { %v6056_v62 = vpop.f32.mrf.mxu1 }
 0x5bc   : > { %v6660_v38 = vadd.f32 %v6232_v44, %v5436_v55  ;;  %v6057_v43 = vadd.f32 %v6056_v62, %v5967_v45 }
 0x5be   : > { %6724 = vst [vmem:[#allocation8 + $0xf0] sm:$0xff] %v6660_v38 }
 0x5bf   : > { %v6145_v18 = vpop.f32.mrf.mxu2  ;;  %v6234_v1 = vpop.f32.mrf.mxu3 }
 0x5c0   : > { %v6146_v33 = vadd.f32 %v6145_v18, %v6057_v43 }
 0x5c1   : > { %6287 = vmatmul.bf16.gmra.mxu0 %v16610_v15 }
 0x5c2   : > { %v5969_v57 = vpop.f32.mrf.mxu0  ;;  %v6235_v46 = vadd.f32 %v6234_v1, %v6146_v33  ;;  %v5442_v33 = vld [vmem:[#allocation8 + $0x120] sm:$0xff] }
 0x5c3   : > { %v6058_v22 = vpop.f32.mrf.mxu1  ;;  %6376 = vmatmul.bf16.gmra.mxu1 %v16611_v42  ;;  %v16614_v42 = vld [vmem:[#allocation87_spill] sm:$0xff] }
 0x5c4   : > { %v6662_v31 = vadd.f32 %v6235_v46, %v5438_v51  ;;  %v6059_v11 = vadd.f32 %v6058_v22, %v5969_v57  ;;  %v16615_v57 = vld [vmem:[#allocation43_spill] sm:$0xff] }
 0x5c5   : > { %6465 = vmatmul.bf16.gmra.mxu2 %v16612_v21  ;;  %6554 = vmatmul.bf16.gmra.mxu3 %v16613_v54  ;;  %v16617_v21 = vld [vmem:[#allocation106_spill] sm:$0xff] }
 0x5c6   : > { %6726 = vst [vmem:[#allocation8 + $0x100] sm:$0xff] %v6662_v31  ;;  %v16616_v31 = vld [vmem:[#allocation80_spill] sm:$0xff] }
 0x5c7   : > { %v6147_v36 = vpop.f32.mrf.mxu2  ;;  %v6236_v63 = vpop.f32.mrf.mxu3 }
 0x5c8   : > { %v6148_v58 = vadd.f32 %v6147_v36, %v6059_v11 }
 0x5ca   : > { %v5972_v55 = vpop.f32.mrf.mxu0  ;;  %v6237_v62 = vadd.f32 %v6236_v63, %v6148_v58  ;;  %v5444_v58 = vld [vmem:[#allocation8 + $0x130] sm:$0xff] }
 0x5cb   : > { %v6061_v45 = vpop.f32.mrf.mxu1 }
 0x5cc   : > { %v6664_v44 = vadd.f32 %v6237_v62, %v5440_v37  ;;  %v6062_v38 = vadd.f32 %v6061_v45, %v5972_v55 }
 0x5ce   : > { %6728 = vst [vmem:[#allocation8 + $0x110] sm:$0xff] %v6664_v44 }
 0x5cf   : > { %v6150_v43 = vpop.f32.mrf.mxu2  ;;  %v6239_v18 = vpop.f32.mrf.mxu3 }
 0x5d0   : > { %v6151_v1 = vadd.f32 %v6150_v43, %v6062_v38 }
 0x5d1   : > { %6292 = vmatmul.bf16.gmra.mxu0 %v16614_v42 }
 0x5d2   : > { %v5974_v51 = vpop.f32.mrf.mxu0  ;;  %v6240_v15 = vadd.f32 %v6239_v18, %v6151_v1  ;;  %v5446_v1 = vld [vmem:[#allocation8 + $0x140] sm:$0xff] }
 0x5d3   : > { %v6063_v46 = vpop.f32.mrf.mxu1  ;;  %6381 = vmatmul.bf16.gmra.mxu1 %v16615_v57  ;;  %v16618_v57 = vld [vmem:[#allocation44_spill] sm:$0xff] }
 0x5d4   : > { %v6666_v22 = vadd.f32 %v6240_v15, %v5442_v33  ;;  %v6064_v54 = vadd.f32 %v6063_v46, %v5974_v51  ;;  %v16619_v51 = vld [vmem:[#allocation46_spill] sm:$0xff] }
 0x5d5   : > { %6470 = vmatmul.bf16.gmra.mxu2 %v16616_v31  ;;  %6559 = vmatmul.bf16.gmra.mxu3 %v16617_v21  ;;  %v16621_v31 = vld [vmem:[#allocation107_spill] sm:$0xff] }
 0x5d6   : > { %6730 = vst [vmem:[#allocation8 + $0x120] sm:$0xff] %v6666_v22  ;;  %v16620_v22 = vld [vmem:[#allocation159_spill] sm:$0xff] }
 0x5d7   : > { %v6152_v11 = vpop.f32.mrf.mxu2  ;;  %v6241_v36 = vpop.f32.mrf.mxu3 }
 0x5d8   : > { %v6153_v63 = vadd.f32 %v6152_v11, %v6064_v54 }
 0x5da   : > { %v5977_v37 = vpop.f32.mrf.mxu0  ;;  %v6242_v45 = vadd.f32 %v6241_v36, %v6153_v63  ;;  %v5448_v63 = vld [vmem:[#allocation8 + $0x150] sm:$0xff] }
 0x5db   : > { %v6066_v55 = vpop.f32.mrf.mxu1 }
 0x5dc   : > { %v6668_v62 = vadd.f32 %v6242_v45, %v5444_v58  ;;  %v6067_v44 = vadd.f32 %v6066_v55, %v5977_v37 }
 0x5de   : > { %6732 = vst [vmem:[#allocation8 + $0x130] sm:$0xff] %v6668_v62 }
 0x5df   : > { %v6155_v38 = vpop.f32.mrf.mxu2  ;;  %v6244_v43 = vpop.f32.mrf.mxu3 }
 0x5e0   : > { %v6156_v18 = vadd.f32 %v6155_v38, %v6067_v44 }
 0x5e1   : > { %6297 = vmatmul.bf16.gmra.mxu0 %v16618_v57 }
 0x5e2   : > { %v5979_v33 = vpop.f32.mrf.mxu0  ;;  %v6245_v42 = vadd.f32 %v6244_v43, %v6156_v18  ;;  %v5450_v18 = vld [vmem:[#allocation8 + $0x160] sm:$0xff] }
 0x5e3   : > { %v6068_v15 = vpop.f32.mrf.mxu1  ;;  %6386 = vmatmul.bf16.gmra.mxu1 %v16619_v51  ;;  %v16622_v51 = vld [vmem:[#allocation90_spill] sm:$0xff] }
 0x5e4   : > { %v6670_v46 = vadd.f32 %v6245_v42, %v5446_v1  ;;  %v6069_v21 = vadd.f32 %v6068_v15, %v5979_v33  ;;  %v16623_v33 = vld [vmem:[#allocation92_spill] sm:$0xff] }
 0x5e5   : > { %6475 = vmatmul.bf16.gmra.mxu2 %v16620_v22  ;;  %6564 = vmatmul.bf16.gmra.mxu3 %v16621_v31  ;;  %v16625_v22 = vld [vmem:[#allocation41_spill] sm:$0xff] }
 0x5e6   : > { %6734 = vst [vmem:[#allocation8 + $0x140] sm:$0xff] %v6670_v46  ;;  %v16624_v46 = vld [vmem:[#allocation108_spill] sm:$0xff] }
 0x5e7   : > { %v6157_v54 = vpop.f32.mrf.mxu2  ;;  %v6246_v11 = vpop.f32.mrf.mxu3 }
 0x5e8   : > { %v6158_v36 = vadd.f32 %v6157_v54, %v6069_v21 }
 0x5ea   : > { %v5982_v58 = vpop.f32.mrf.mxu0  ;;  %v6247_v55 = vadd.f32 %v6246_v11, %v6158_v36  ;;  %v5452_v36 = vld [vmem:[#allocation8 + $0x170] sm:$0xff] }
 0x5eb   : > { %v6071_v37 = vpop.f32.mrf.mxu1 }
 0x5ec   : > { %v6672_v45 = vadd.f32 %v6247_v55, %v5448_v63  ;;  %v6072_v62 = vadd.f32 %v6071_v37, %v5982_v58 }
 0x5ee   : > { %6736 = vst [vmem:[#allocation8 + $0x150] sm:$0xff] %v6672_v45 }
 0x5ef   : > { %v6160_v44 = vpop.f32.mrf.mxu2  ;;  %v6249_v38 = vpop.f32.mrf.mxu3 }
 0x5f0   : > { %v6161_v43 = vadd.f32 %v6160_v44, %v6072_v62 }
 0x5f1   : > { %6302 = vmatmul.bf16.gmra.mxu0 %v16622_v51 }
 0x5f2   : > { %v5984_v1 = vpop.f32.mrf.mxu0  ;;  %v6250_v57 = vadd.f32 %v6249_v38, %v6161_v43  ;;  %v5454_v43 = vld [vmem:[#allocation8 + $0x180] sm:$0xff] }
 0x5f3   : > { %v6073_v42 = vpop.f32.mrf.mxu1  ;;  %6391 = vmatmul.bf16.gmra.mxu1 %v16623_v33  ;;  %v16626_v33 = vld [vmem:[#allocation162_spill] sm:$0xff] }
 0x5f4   : > { %v6674_v15 = vadd.f32 %v6250_v57, %v5450_v18  ;;  %v6074_v31 = vadd.f32 %v6073_v42, %v5984_v1  ;;  %v16627_v1 = vld [vmem:[#allocation164_spill] sm:$0xff] }
 0x5f5   : > { %6480 = vmatmul.bf16.gmra.mxu2 %v16624_v46  ;;  %6569 = vmatmul.bf16.gmra.mxu3 %v16625_v22 }
 0x5f6   : > { %6738 = vst [vmem:[#allocation8 + $0x160] sm:$0xff] %v6674_v15 }
 0x5f7   : > { %v6162_v21 = vpop.f32.mrf.mxu2  ;;  %v6251_v54 = vpop.f32.mrf.mxu3 }
 0x5f8   : > { %v6163_v11 = vadd.f32 %v6162_v21, %v6074_v31  ;;  %v5456_v21 = vld [vmem:[#allocation8 + $0x190] sm:$0xff] }
 0x5fa   : > { %v5987_v63 = vpop.f32.mrf.mxu0  ;;  %v6252_v37 = vadd.f32 %v6251_v54, %v6163_v11 }
 0x5fb   : > { %v6076_v58 = vpop.f32.mrf.mxu1 }
 0x5fc   : > { %v6676_v55 = vadd.f32 %v6252_v37, %v5452_v36  ;;  %v6077_v45 = vadd.f32 %v6076_v58, %v5987_v63 }
 0x5fe   : > { %6740 = vst [vmem:[#allocation8 + $0x170] sm:$0xff] %v6676_v55 }
 0x5ff   : > { %v6165_v62 = vpop.f32.mrf.mxu2  ;;  %v6254_v44 = vpop.f32.mrf.mxu3 }
 0x600   : > { %v6166_v38 = vadd.f32 %v6165_v62, %v6077_v45  ;;  %v5458_v62 = vld [vmem:[#allocation8 + $0x1a0] sm:$0xff] }
 0x601   : > { %6307 = vmatmul.bf16.gmra.mxu0 %v16626_v33 }
 0x602   : > { %v5989_v18 = vpop.f32.mrf.mxu0  ;;  %v6255_v51 = vadd.f32 %v6254_v44, %v6166_v38 }
 0x603   : > { %v6078_v57 = vpop.f32.mrf.mxu1  ;;  %6396 = vmatmul.bf16.gmra.mxu1 %v16627_v1  ;;  %v5460_v1 = vld [vmem:[#allocation8 + $0x1b0] sm:$0xff] }
 0x604   : > { %v6678_v42 = vadd.f32 %v6255_v51, %v5454_v43  ;;  %v6079_v15 = vadd.f32 %v6078_v57, %v5989_v18  ;;  %v16628_v43 = vld [vmem:[#allocation110_spill] sm:$0xff] }
 0x605   : > { %6485 = vmatmul.bf16.gmra.mxu2 %v16552_v16  ;;  %6574 = vmatmul.bf16.gmra.mxu3 %v16553_v13 }
 0x606   : > { %6742 = vst [vmem:[#allocation8 + $0x180] sm:$0xff] %v6678_v42 }
 0x607   : > { %v6167_v46 = vpop.f32.mrf.mxu2  ;;  %v6256_v22 = vpop.f32.mrf.mxu3 }
 0x608   : > { %v6168_v31 = vadd.f32 %v6167_v46, %v6079_v15 }
 0x60a   : > { %v5992_v54 = vpop.f32.mrf.mxu0  ;;  %v6257_v36 = vadd.f32 %v6256_v22, %v6168_v31 }
 0x60b   : > { %v6081_v11 = vpop.f32.mrf.mxu1 }
 0x60c   : > { %v6680_v63 = vadd.f32 %v6257_v36, %v5456_v21  ;;  %v6082_v58 = vadd.f32 %v6081_v11, %v5992_v54  ;;  %v5462_v54 = vld [vmem:[#allocation8 + $0x1c0] sm:$0xff] }
 0x60e   : > { %6744 = vst [vmem:[#allocation8 + $0x190] sm:$0xff] %v6680_v63 }
 0x60f   : > { %v6170_v37 = vpop.f32.mrf.mxu2  ;;  %v6259_v55 = vpop.f32.mrf.mxu3 }
 0x610   : > { %v6171_v45 = vadd.f32 %v6170_v37, %v6082_v58 }
 0x611   : > { %6312 = vmatmul.bf16.gmra.mxu0 %v16569_v17 }
 0x612   : > { %v5994_v44 = vpop.f32.mrf.mxu0  ;;  %v6260_v38 = vadd.f32 %v6259_v55, %v6171_v45 }
 0x613   : > { %v6083_v16 = vpop.f32.mrf.mxu1  ;;  %6401 = vmatmul.bf16.gmra.mxu1 %v16570_v30 }
 0x614   : > { %v6682_v13 = vadd.f32 %v6260_v38, %v5458_v62  ;;  %v6084_v18 = vadd.f32 %v6083_v16, %v5994_v44  ;;  %v5464_v62 = vld [vmem:[#allocation8 + $0x1d0] sm:$0xff] }
 0x615   : > { %6490 = vmatmul.bf16.gmra.mxu2 %v14121_v7  ;;  %6579 = vmatmul.bf16.gmra.mxu3 %v16628_v43 }
 0x616   : > { %6746 = vst [vmem:[#allocation8 + $0x1a0] sm:$0xff] %v6682_v13 }
 0x617   : > { %v6172_v57 = vpop.f32.mrf.mxu2  ;;  %v6261_v51 = vpop.f32.mrf.mxu3 }
 0x618   : > { %v6173_v33 = vadd.f32 %v6172_v57, %v6084_v18  ;;  %v5466_v57 = vld [vmem:[#allocation8 + $0x1e0] sm:$0xff] }
 0x61a   : > { %v5997_v42 = vpop.f32.mrf.mxu0  ;;  %v6262_v46 = vadd.f32 %v6261_v51, %v6173_v33 }
 0x61b   : > { %v6086_v15 = vpop.f32.mrf.mxu1 }
 0x61c   : > { %v6684_v22 = vadd.f32 %v6262_v46, %v5460_v1  ;;  %v6087_v31 = vadd.f32 %v6086_v15, %v5997_v42 }
 0x61e   : > { %6748 = vst [vmem:[#allocation8 + $0x1b0] sm:$0xff] %v6684_v22  ;;  %v5468_v22 = vld [vmem:[#allocation8 + $0x1f0] sm:$0xff] }
 0x61f   : > { %v6175_v17 = vpop.f32.mrf.mxu2  ;;  %v6264_v21 = vpop.f32.mrf.mxu3 }
 0x620   : > { %v6176_v30 = vadd.f32 %v6175_v17, %v6087_v31 }
 0x621   : > { %6317 = vmatmul.bf16.gmra.mxu0 %v16581_v0 }
 0x622   : > { %v5999_v11 = vpop.f32.mrf.mxu0  ;;  %v6265_v36 = vadd.f32 %v6264_v21, %v6176_v30 }
 0x623   : > { %v6088_v7 = vpop.f32.mrf.mxu1  ;;  %6406 = vmatmul.bf16.gmra.mxu1 %v16582_v32 }
 0x624   : > { %v6686_v63 = vadd.f32 %v6265_v36, %v5462_v54  ;;  %v6089_v58 = vadd.f32 %v6088_v7, %v5999_v11  ;;  %v5407_v7 = vld [vmem:[#allocation8 + $0x8] sm:$0xff] }
 0x625   : > { %6495 = vmatmul.bf16.gmra.mxu2 %v14257_v27  ;;  %6584 = vmatmul.bf16.gmra.mxu3 %v14322_v6 }
 0x626   : > { %6750 = vst [vmem:[#allocation8 + $0x1c0] sm:$0xff] %v6686_v63 }
 0x627   : > { %v6177_v37 = vpop.f32.mrf.mxu2  ;;  %v6266_v55 = vpop.f32.mrf.mxu3 }
 0x628   : > { %v6178_v45 = vadd.f32 %v6177_v37, %v6089_v58 }
 0x62a   : > { %v6002_v44 = vpop.f32.mrf.mxu0  ;;  %v6267_v38 = vadd.f32 %v6266_v55, %v6178_v45 }
 0x62b   : > { %v6091_v16 = vpop.f32.mrf.mxu1 }
 0x62c   : > { %v6688_v13 = vadd.f32 %v6267_v38, %v5464_v62  ;;  %v6092_v43 = vadd.f32 %v6091_v16, %v6002_v44  ;;  %v5409_v62 = vld [vmem:[#allocation8 + $0x18] sm:$0xff] }
 0x62e   : > { %6752 = vst [vmem:[#allocation8 + $0x1d0] sm:$0xff] %v6688_v13 }
 0x62f   : > { %v6180_v0 = vpop.f32.mrf.mxu2  ;;  %v6269_v18 = vpop.f32.mrf.mxu3 }
 0x630   : > { %v6181_v32 = vadd.f32 %v6180_v0, %v6092_v43 }
 0x631   : > { %6322 = vmatmul.bf16.gmra.mxu0 %v16587_v20 }
 0x632   : > { %v6004_v51 = vpop.f32.mrf.mxu0  ;;  %v6270_v33 = vadd.f32 %v6269_v18, %v6181_v32  ;;  %v5411_v18 = vld [vmem:[#allocation8 + $0x28] sm:$0xff] }
 0x633   : > { %v6093_v27 = vpop.f32.mrf.mxu1  ;;  %6411 = vmatmul.bf16.gmra.mxu1 %v16588_v40 }
 0x634   : > { %v6690_v6 = vadd.f32 %v6270_v33, %v5466_v57  ;;  %v6094_v1 = vadd.f32 %v6093_v27, %v6004_v51 }
 0x635   : > { %6500 = vmatmul.bf16.gmra.mxu2 %v14414_v53  ;;  %6589 = vmatmul.bf16.gmra.mxu3 %v14448_v49 }
 0x636   : > { %6754 = vst [vmem:[#allocation8 + $0x1e0] sm:$0xff] %v6690_v6 }
 0x637   : > { %v6182_v42 = vpop.f32.mrf.mxu2  ;;  %v6271_v15 = vpop.f32.mrf.mxu3 }
 0x638   : > { %v6183_v46 = vadd.f32 %v6182_v42, %v6094_v1  ;;  %v5413_v1 = vld [vmem:[#allocation8 + $0x38] sm:$0xff] }
 0x63a   : > { %v6283_v31 = vpop.f32.mrf.mxu0  ;;  %v6272_v21 = vadd.f32 %v6271_v15, %v6183_v46 }
 0x63b   : > { %v6372_v17 = vpop.f32.mrf.mxu1 }
 0x63c   : > { %v6692_v30 = vadd.f32 %v6272_v21, %v5468_v22  ;;  %v6373_v54 = vadd.f32 %v6372_v17, %v6283_v31  ;;  %v5415_v21 = vld [vmem:[#allocation8 + $0x48] sm:$0xff] }
 0x63e   : > { %6756 = vst [vmem:[#allocation8 + $0x1f0] sm:$0xff] %v6692_v30 }
 0x63f   : > { %v6461_v20 = vpop.f32.mrf.mxu2  ;;  %v6550_v11 = vpop.f32.mrf.mxu3 }
 0x640   : > { %v6462_v40 = vadd.f32 %v6461_v20, %v6373_v54 }
 0x641   : > { %6327 = vmatmul.bf16.gmra.mxu0 %v16589_v24 }
 0x642   : > { %v6285_v36 = vpop.f32.mrf.mxu0  ;;  %v6551_v63 = vadd.f32 %v6550_v11, %v6462_v40 }
 0x643   : > { %v6374_v53 = vpop.f32.mrf.mxu1  ;;  %6416 = vmatmul.bf16.gmra.mxu1 %v16590_v41 }
 0x644   : > { %v6631_v49 = vadd.f32 %v6551_v63, %v5407_v7  ;;  %v6375_v58 = vadd.f32 %v6374_v53, %v6285_v36  ;;  %v5417_v36 = vld [vmem:[#allocation8 + $0x58] sm:$0xff] }
 0x645   : > { %6505 = vmatmul.bf16.gmra.mxu2 %v14542_v26  ;;  %6594 = vmatmul.bf16.gmra.mxu3 %v16591_v12 }
 0x646   : > { %6695 = vst [vmem:[#allocation8 + $0x8] sm:$0xff] %v6631_v49 }
 0x647   : > { %v6463_v37 = vpop.f32.mrf.mxu2  ;;  %v6552_v55 = vpop.f32.mrf.mxu3 }
 0x648   : > { %v6464_v45 = vadd.f32 %v6463_v37, %v6375_v58 }
 0x64a   : > { %v6288_v44 = vpop.f32.mrf.mxu0  ;;  %v6553_v38 = vadd.f32 %v6552_v55, %v6464_v45  ;;  %v5419_v45 = vld [vmem:[#allocation8 + $0x68] sm:$0xff] }
 0x64b   : > { %v6377_v16 = vpop.f32.mrf.mxu1 }
 0x64c   : > { %v6633_v13 = vadd.f32 %v6553_v38, %v5409_v62  ;;  %v6378_v43 = vadd.f32 %v6377_v16, %v6288_v44 }
 0x64e   : > { %6697 = vst [vmem:[#allocation8 + $0x18] sm:$0xff] %v6633_v13 }
 0x64f   : > { %v6466_v24 = vpop.f32.mrf.mxu2  ;;  %v6555_v0 = vpop.f32.mrf.mxu3 }
 0x650   : > { %v6467_v41 = vadd.f32 %v6466_v24, %v6378_v43  ;;  %v5421_v24 = vld [vmem:[#allocation8 + $0x78] sm:$0xff] }
 0x651   : > { %6332 = vmatmul.bf16.gmra.mxu0 %v16592_v60 }
 0x652   : > { %v6290_v32 = vpop.f32.mrf.mxu0  ;;  %v6556_v57 = vadd.f32 %v6555_v0, %v6467_v41 }
 0x653   : > { %v6379_v26 = vpop.f32.mrf.mxu1  ;;  %6421 = vmatmul.bf16.gmra.mxu1 %v16593_v25 }
 0x654   : > { %v6635_v12 = vadd.f32 %v6556_v57, %v5411_v18  ;;  %v6380_v51 = vadd.f32 %v6379_v26, %v6290_v32 }
 0x655   : > { %6510 = vmatmul.bf16.gmra.mxu2 %v14668_v29  ;;  %6599 = vmatmul.bf16.gmra.mxu3 %v14718_v50 }
 0x656   : > { %6699 = vst [vmem:[#allocation8 + $0x28] sm:$0xff] %v6635_v12  ;;  %v5423_v12 = vld [vmem:[#allocation8 + $0x88] sm:$0xff] }
 0x657   : > { %v6468_v27 = vpop.f32.mrf.mxu2  ;;  %v6557_v33 = vpop.f32.mrf.mxu3 }
 0x658   : > { %v6469_v6 = vadd.f32 %v6468_v27, %v6380_v51 }
 0x65a   : > { %v6293_v42 = vpop.f32.mrf.mxu0  ;;  %v6558_v46 = vadd.f32 %v6557_v33, %v6469_v6 }
 0x65b   : > { %v6382_v15 = vpop.f32.mrf.mxu1 }
 0x65c   : > { %v6637_v22 = vadd.f32 %v6558_v46, %v5413_v1  ;;  %v6383_v31 = vadd.f32 %v6382_v15, %v6293_v42  ;;  %v5425_v15 = vld [vmem:[#allocation8 + $0x98] sm:$0xff] }
 0x65e   : > { %6701 = vst [vmem:[#allocation8 + $0x38] sm:$0xff] %v6637_v22 }
 0x65f   : > { %v6471_v60 = vpop.f32.mrf.mxu2  ;;  %v6560_v17 = vpop.f32.mrf.mxu3 }
 0x660   : > { %v6472_v25 = vadd.f32 %v6471_v60, %v6383_v31 }
 0x661   : > { %6337 = vmatmul.bf16.gmra.mxu0 %v16594_v14 }
 0x662   : > { %v6295_v30 = vpop.f32.mrf.mxu0  ;;  %v6561_v54 = vadd.f32 %v6560_v17, %v6472_v25 }
 0x663   : > { %v6384_v29 = vpop.f32.mrf.mxu1  ;;  %6426 = vmatmul.bf16.gmra.mxu1 %v16595_v8 }
 0x664   : > { %v6639_v50 = vadd.f32 %v6561_v54, %v5415_v21  ;;  %v6385_v20 = vadd.f32 %v6384_v29, %v6295_v30  ;;  %v5427_v21 = vld [vmem:[#allocation8 + $0xa8] sm:$0xff] }
 0x665   : > { %6515 = vmatmul.bf16.gmra.mxu2 %v16596_v23  ;;  %6604 = vmatmul.bf16.gmra.mxu3 %v16597_v2 }
 0x666   : > { %6703 = vst [vmem:[#allocation8 + $0x48] sm:$0xff] %v6639_v50 }
 0x667   : > { %v6473_v11 = vpop.f32.mrf.mxu2  ;;  %v6562_v40 = vpop.f32.mrf.mxu3 }
 0x668   : > { %v6474_v7 = vadd.f32 %v6473_v11, %v6385_v20 }
 0x66a   : > { %v6298_v53 = vpop.f32.mrf.mxu0  ;;  %v6563_v49 = vadd.f32 %v6562_v40, %v6474_v7  ;;  %v5429_v40 = vld [vmem:[#allocation8 + $0xb8] sm:$0xff] }
 0x66b   : > { %v6387_v63 = vpop.f32.mrf.mxu1 }
 0x66c   : > { %v6641_v58 = vadd.f32 %v6563_v49, %v5417_v36  ;;  %v6388_v37 = vadd.f32 %v6387_v63, %v6298_v53 }
 0x66e   : > { %6705 = vst [vmem:[#allocation8 + $0x58] sm:$0xff] %v6641_v58 }
 0x66f   : > { %v6476_v14 = vpop.f32.mrf.mxu2  ;;  %v6565_v55 = vpop.f32.mrf.mxu3 }
 0x670   : > { %v6477_v8 = vadd.f32 %v6476_v14, %v6388_v37  ;;  %v5431_v37 = vld [vmem:[#allocation8 + $0xc8] sm:$0xff] }
 0x671   : > { %6342 = vmatmul.bf16.gmra.mxu0 %v16598_v34 }
 0x672   : > { %v6300_v62 = vpop.f32.mrf.mxu0  ;;  %v6566_v44 = vadd.f32 %v6565_v55, %v6477_v8 }
 0x673   : > { %v6389_v23 = vpop.f32.mrf.mxu1  ;;  %6431 = vmatmul.bf16.gmra.mxu1 %v16599_v9 }
 0x674   : > { %v6643_v2 = vadd.f32 %v6566_v44, %v5419_v45  ;;  %v6390_v16 = vadd.f32 %v6389_v23, %v6300_v62  ;;  %v5433_v44 = vld [vmem:[#allocation8 + $0xd8] sm:$0xff] }
 0x675   : > { %6520 = vmatmul.bf16.gmra.mxu2 %v14928_v5  ;;  %6609 = vmatmul.bf16.gmra.mxu3 %v14976_v47 }
 0x676   : > { %6707 = vst [vmem:[#allocation8 + $0x68] sm:$0xff] %v6643_v2 }
 0x677   : > { %v6478_v38 = vpop.f32.mrf.mxu2  ;;  %v6567_v13 = vpop.f32.mrf.mxu3 }
 0x678   : > { %v6479_v43 = vadd.f32 %v6478_v38, %v6390_v16 }
 0x67a   : > { %v6303_v0 = vpop.f32.mrf.mxu0  ;;  %v6568_v18 = vadd.f32 %v6567_v13, %v6479_v43 }
 0x67b   : > { %v6392_v41 = vpop.f32.mrf.mxu1 }
 0x67c   : > { %v6645_v32 = vadd.f32 %v6568_v18, %v5421_v24  ;;  %v6393_v26 = vadd.f32 %v6392_v41, %v6303_v0  ;;  %v5435_v0 = vld [vmem:[#allocation8 + $0xe8] sm:$0xff] }
 0x67e   : > { %6709 = vst [vmem:[#allocation8 + $0x78] sm:$0xff] %v6645_v32 }
 0x67f   : > { %v6481_v34 = vpop.f32.mrf.mxu2  ;;  %v6570_v57 = vpop.f32.mrf.mxu3 }
 0x680   : > { %v6482_v9 = vadd.f32 %v6481_v34, %v6393_v26 }
 0x681   : > { %6347 = vmatmul.bf16.gmra.mxu0 %v16600_v35 }
 0x682   : > { %v6305_v51 = vpop.f32.mrf.mxu0  ;;  %v6571_v27 = vadd.f32 %v6570_v57, %v6482_v9  ;;  %v5437_v9 = vld [vmem:[#allocation8 + $0xf8] sm:$0xff] }
 0x683   : > { %v6394_v5 = vpop.f32.mrf.mxu1  ;;  %6436 = vmatmul.bf16.gmra.mxu1 %v16601_v52 }
 0x684   : > { %v6647_v47 = vadd.f32 %v6571_v27, %v5423_v12  ;;  %v6395_v33 = vadd.f32 %v6394_v5, %v6305_v51 }
 0x685   : > { %6525 = vmatmul.bf16.gmra.mxu2 %v15052_v4  ;;  %6614 = vmatmul.bf16.gmra.mxu3 %v15093_v61 }
 0x686   : > { %6711 = vst [vmem:[#allocation8 + $0x88] sm:$0xff] %v6647_v47 }
 0x687   : > { %v6483_v6 = vpop.f32.mrf.mxu2  ;;  %v6572_v1 = vpop.f32.mrf.mxu3 }
 0x688   : > { %v6484_v42 = vadd.f32 %v6483_v6, %v6395_v33 }
 0x68a   : > { %v6308_v46 = vpop.f32.mrf.mxu0  ;;  %v6573_v31 = vadd.f32 %v6572_v1, %v6484_v42  ;;  %v5439_v42 = vld [vmem:[#allocation8 + $0x108] sm:$0xff] }
 0x68b   : > { %v6397_v22 = vpop.f32.mrf.mxu1 }
 0x68c   : > { %v6649_v60 = vadd.f32 %v6573_v31, %v5425_v15  ;;  %v6398_v17 = vadd.f32 %v6397_v22, %v6308_v46 }
 0x68e   : > { %6713 = vst [vmem:[#allocation8 + $0x98] sm:$0xff] %v6649_v60 }
 0x68f   : > { %v6486_v35 = vpop.f32.mrf.mxu2  ;;  %v6575_v25 = vpop.f32.mrf.mxu3 }
 0x690   : > { %v6487_v52 = vadd.f32 %v6486_v35, %v6398_v17 }
 0x691   : > { %6352 = vmatmul.bf16.gmra.mxu0 %v16602_v3 }
 0x692   : > { %v6310_v30 = vpop.f32.mrf.mxu0  ;;  %v6576_v29 = vadd.f32 %v6575_v25, %v6487_v52  ;;  %v5441_v52 = vld [vmem:[#allocation8 + $0x118] sm:$0xff] }
 0x693   : > { %v6399_v4 = vpop.f32.mrf.mxu1  ;;  %6441 = vmatmul.bf16.gmra.mxu1 %v16603_v59 }
 0x694   : > { %v6651_v61 = vadd.f32 %v6576_v29, %v5427_v21  ;;  %v6400_v54 = vadd.f32 %v6399_v4, %v6310_v30 }
 0x695   : > { %6530 = vmatmul.bf16.gmra.mxu2 %v15150_v56  ;;  %6619 = vmatmul.bf16.gmra.mxu3 %v15173_v48 }
 0x696   : > { %6715 = vst [vmem:[#allocation8 + $0xa8] sm:$0xff] %v6651_v61 }
 0x697   : > { %v6488_v50 = vpop.f32.mrf.mxu2  ;;  %v6577_v20 = vpop.f32.mrf.mxu3 }
 0x698   : > { %v6489_v11 = vadd.f32 %v6488_v50, %v6400_v54 }
 0x69a   : > { %v6313_v7 = vpop.f32.mrf.mxu0  ;;  %v6578_v53 = vadd.f32 %v6577_v20, %v6489_v11  ;;  %v5443_v11 = vld [vmem:[#allocation8 + $0x128] sm:$0xff] }
 0x69b   : > { %v6402_v36 = vpop.f32.mrf.mxu1 }
 0x69c   : > { %v6653_v63 = vadd.f32 %v6578_v53, %v5429_v40  ;;  %v6403_v49 = vadd.f32 %v6402_v36, %v6313_v7 }
 0x69e   : > { %6717 = vst [vmem:[#allocation8 + $0xb8] sm:$0xff] %v6653_v63 }
 0x69f   : > { %v6491_v3 = vpop.f32.mrf.mxu2  ;;  %v6580_v58 = vpop.f32.mrf.mxu3 }
 0x6a0   : > { %v6492_v59 = vadd.f32 %v6491_v3, %v6403_v49 }
 0x6a1   : > { %6357 = vmatmul.bf16.gmra.mxu0 %v16604_v28 }
 0x6a2   : > { %v6315_v14 = vpop.f32.mrf.mxu0  ;;  %v6581_v55 = vadd.f32 %v6580_v58, %v6492_v59  ;;  %v5445_v59 = vld [vmem:[#allocation8 + $0x138] sm:$0xff] }
 0x6a3   : > { %v6404_v56 = vpop.f32.mrf.mxu1  ;;  %6446 = vmatmul.bf16.gmra.mxu1 %v16605_v10 }
 0x6a4   : > { %v6655_v48 = vadd.f32 %v6581_v55, %v5431_v37  ;;  %v6405_v8 = vadd.f32 %v6404_v56, %v6315_v14 }
 0x6a5   : > { %6535 = vmatmul.bf16.gmra.mxu2 %v15187_v19  ;;  %6624 = vmatmul.bf16.gmra.mxu3 %v15190_v39 }
 0x6a6   : > { %6719 = vst [vmem:[#allocation8 + $0xc8] sm:$0xff] %v6655_v48 }
 0x6a7   : > { %v6493_v45 = vpop.f32.mrf.mxu2  ;;  %v6582_v62 = vpop.f32.mrf.mxu3 }
 0x6a8   : > { %v6494_v23 = vadd.f32 %v6493_v45, %v6405_v8 }
 0x6aa   : > { %v6318_v2 = vpop.f32.mrf.mxu0  ;;  %v6583_v38 = vadd.f32 %v6582_v62, %v6494_v23  ;;  %v5447_v23 = vld [vmem:[#allocation8 + $0x148] sm:$0xff] }
 0x6ab   : > { %v6407_v16 = vpop.f32.mrf.mxu1 }
 0x6ac   : > { %v6657_v13 = vadd.f32 %v6583_v38, %v5433_v44  ;;  %v6408_v43 = vadd.f32 %v6407_v16, %v6318_v2 }
 0x6ae   : > { %6721 = vst [vmem:[#allocation8 + $0xd8] sm:$0xff] %v6657_v13 }
 0x6af   : > { %v6496_v28 = vpop.f32.mrf.mxu2  ;;  %v6585_v24 = vpop.f32.mrf.mxu3 }
 0x6b0   : > { %v6497_v10 = vadd.f32 %v6496_v28, %v6408_v43 }
 0x6b2   : > { %v6320_v41 = vpop.f32.mrf.mxu0  ;;  %v6586_v18 = vadd.f32 %v6585_v24, %v6497_v10  ;;  %v5449_v10 = vld [vmem:[#allocation8 + $0x158] sm:$0xff] }
 0x6b3   : > { %v6409_v19 = vpop.f32.mrf.mxu1 }
 0x6b4   : > { %v6659_v39 = vadd.f32 %v6586_v18, %v5435_v0  ;;  %v6410_v32 = vadd.f32 %v6409_v19, %v6320_v41 }
 0x6b6   : > { %6723 = vst [vmem:[#allocation8 + $0xe8] sm:$0xff] %v6659_v39 }
 0x6b7   : > { %v6498_v26 = vpop.f32.mrf.mxu2  ;;  %v6587_v34 = vpop.f32.mrf.mxu3 }
 0x6b8   : > { %v6499_v57 = vadd.f32 %v6498_v26, %v6410_v32 }
 0x6ba   : > { %v6323_v12 = vpop.f32.mrf.mxu0  ;;  %v6588_v5 = vadd.f32 %v6587_v34, %v6499_v57  ;;  %v5451_v57 = vld [vmem:[#allocation8 + $0x168] sm:$0xff] }
 0x6bb   : > { %v6412_v51 = vpop.f32.mrf.mxu1 }
 0x6bc   : > { %v6661_v27 = vadd.f32 %v6588_v5, %v5437_v9  ;;  %v6413_v47 = vadd.f32 %v6412_v51, %v6323_v12 }
 0x6be   : > { %6725 = vst [vmem:[#allocation8 + $0xf8] sm:$0xff] %v6661_v27 }
 0x6bf   : > { %v6501_v33 = vpop.f32.mrf.mxu2  ;;  %v6590_v6 = vpop.f32.mrf.mxu3 }
 0x6c0   : > { %v6502_v1 = vadd.f32 %v6501_v33, %v6413_v47 }
 0x6c2   : > { %v6325_v15 = vpop.f32.mrf.mxu0  ;;  %v6591_v22 = vadd.f32 %v6590_v6, %v6502_v1  ;;  %v5453_v1 = vld [vmem:[#allocation8 + $0x178] sm:$0xff] }
 0x6c3   : > { %v6414_v46 = vpop.f32.mrf.mxu1 }
 0x6c4   : > { %v6663_v31 = vadd.f32 %v6591_v22, %v5439_v42  ;;  %v6415_v60 = vadd.f32 %v6414_v46, %v6325_v15 }
 0x6c6   : > { %6727 = vst [vmem:[#allocation8 + $0x108] sm:$0xff] %v6663_v31 }
 0x6c7   : > { %v6503_v17 = vpop.f32.mrf.mxu2  ;;  %v6592_v35 = vpop.f32.mrf.mxu3 }
 0x6c8   : > { %v6504_v25 = vadd.f32 %v6503_v17, %v6415_v60 }
 0x6ca   : > { %v6328_v21 = vpop.f32.mrf.mxu0  ;;  %v6593_v4 = vadd.f32 %v6592_v35, %v6504_v25  ;;  %v5455_v25 = vld [vmem:[#allocation8 + $0x188] sm:$0xff] }
 0x6cb   : > { %v6417_v30 = vpop.f32.mrf.mxu1 }
 0x6cc   : > { %v6665_v29 = vadd.f32 %v6593_v4, %v5441_v52  ;;  %v6418_v61 = vadd.f32 %v6417_v30, %v6328_v21 }
 0x6ce   : > { %6729 = vst [vmem:[#allocation8 + $0x118] sm:$0xff] %v6665_v29 }
 0x6cf   : > { %v6506_v54 = vpop.f32.mrf.mxu2  ;;  %v6595_v50 = vpop.f32.mrf.mxu3 }
 0x6d0   : > { %v6507_v20 = vadd.f32 %v6506_v54, %v6418_v61 }
 0x6d2   : > { %v6330_v40 = vpop.f32.mrf.mxu0  ;;  %v6596_v36 = vadd.f32 %v6595_v50, %v6507_v20  ;;  %v5457_v20 = vld [vmem:[#allocation8 + $0x198] sm:$0xff] }
 0x6d3   : > { %v6419_v7 = vpop.f32.mrf.mxu1 }
 0x6d4   : > { %v6667_v53 = vadd.f32 %v6596_v36, %v5443_v11  ;;  %v6420_v63 = vadd.f32 %v6419_v7, %v6330_v40 }
 0x6d6   : > { %6731 = vst [vmem:[#allocation8 + $0x128] sm:$0xff] %v6667_v53 }
 0x6d7   : > { %v6508_v49 = vpop.f32.mrf.mxu2  ;;  %v6597_v3 = vpop.f32.mrf.mxu3 }
 0x6d8   : > { %v6509_v58 = vadd.f32 %v6508_v49, %v6420_v63 }
 0x6da   : > { %v6333_v37 = vpop.f32.mrf.mxu0  ;;  %v6598_v56 = vadd.f32 %v6597_v3, %v6509_v58  ;;  %v5459_v58 = vld [vmem:[#allocation8 + $0x1a8] sm:$0xff] }
 0x6db   : > { %v6422_v14 = vpop.f32.mrf.mxu1 }
 0x6dc   : > { %v6669_v55 = vadd.f32 %v6598_v56, %v5445_v59  ;;  %v6423_v48 = vadd.f32 %v6422_v14, %v6333_v37 }
 0x6de   : > { %6733 = vst [vmem:[#allocation8 + $0x138] sm:$0xff] %v6669_v55 }
 0x6df   : > { %v6511_v8 = vpop.f32.mrf.mxu2  ;;  %v6600_v45 = vpop.f32.mrf.mxu3 }
 0x6e0   : > { %v6512_v62 = vadd.f32 %v6511_v8, %v6423_v48 }
 0x6e2   : > { %v6335_v44 = vpop.f32.mrf.mxu0  ;;  %v6601_v16 = vadd.f32 %v6600_v45, %v6512_v62  ;;  %v5461_v62 = vld [vmem:[#allocation8 + $0x1b8] sm:$0xff] }
 0x6e3   : > { %v6424_v2 = vpop.f32.mrf.mxu1 }
 0x6e4   : > { %v6671_v38 = vadd.f32 %v6601_v16, %v5447_v23  ;;  %v6425_v13 = vadd.f32 %v6424_v2, %v6335_v44 }
 0x6e6   : > { %6735 = vst [vmem:[#allocation8 + $0x148] sm:$0xff] %v6671_v38 }
 0x6e7   : > { %v6513_v43 = vpop.f32.mrf.mxu2  ;;  %v6602_v28 = vpop.f32.mrf.mxu3 }
 0x6e8   : > { %v6514_v24 = vadd.f32 %v6513_v43, %v6425_v13 }
 0x6ea   : > { %v6338_v0 = vpop.f32.mrf.mxu0  ;;  %v6603_v19 = vadd.f32 %v6602_v28, %v6514_v24  ;;  %v5463_v24 = vld [vmem:[#allocation8 + $0x1c8] sm:$0xff] }
 0x6eb   : > { %v6427_v41 = vpop.f32.mrf.mxu1 }
 0x6ec   : > { %v6673_v18 = vadd.f32 %v6603_v19, %v5449_v10  ;;  %v6428_v39 = vadd.f32 %v6427_v41, %v6338_v0 }
 0x6ee   : > { %6737 = vst [vmem:[#allocation8 + $0x158] sm:$0xff] %v6673_v18 }
 0x6ef   : > { %v6516_v32 = vpop.f32.mrf.mxu2  ;;  %v6605_v26 = vpop.f32.mrf.mxu3 }
 0x6f0   : > { %v6517_v34 = vadd.f32 %v6516_v32, %v6428_v39 }
 0x6f2   : > { %v6340_v9 = vpop.f32.mrf.mxu0  ;;  %v6606_v51 = vadd.f32 %v6605_v26, %v6517_v34  ;;  %v5465_v34 = vld [vmem:[#allocation8 + $0x1d8] sm:$0xff] }
 0x6f3   : > { %v6429_v12 = vpop.f32.mrf.mxu1 }
 0x6f4   : > { %v6675_v5 = vadd.f32 %v6606_v51, %v5451_v57  ;;  %v6430_v27 = vadd.f32 %v6429_v12, %v6340_v9 }
 0x6f6   : > { %6739 = vst [vmem:[#allocation8 + $0x168] sm:$0xff] %v6675_v5 }
 0x6f7   : > { %v6518_v47 = vpop.f32.mrf.mxu2  ;;  %v6607_v33 = vpop.f32.mrf.mxu3 }
 0x6f8   : > { %v6519_v6 = vadd.f32 %v6518_v47, %v6430_v27 }
 0x6fa   : > { %v6343_v42 = vpop.f32.mrf.mxu0  ;;  %v6608_v46 = vadd.f32 %v6607_v33, %v6519_v6  ;;  %v5467_v6 = vld [vmem:[#allocation8 + $0x1e8] sm:$0xff] }
 0x6fb   : > { %v6432_v15 = vpop.f32.mrf.mxu1 }
 0x6fc   : > { %v6677_v22 = vadd.f32 %v6608_v46, %v5453_v1  ;;  %v6433_v31 = vadd.f32 %v6432_v15, %v6343_v42 }
 0x6fe   : > { %6741 = vst [vmem:[#allocation8 + $0x178] sm:$0xff] %v6677_v22 }
 0x6ff   : > { %v6521_v60 = vpop.f32.mrf.mxu2  ;;  %v6610_v17 = vpop.f32.mrf.mxu3 }
 0x700   : > { %v6522_v35 = vadd.f32 %v6521_v60, %v6433_v31 }
 0x702   : > { %v6345_v52 = vpop.f32.mrf.mxu0  ;;  %v6611_v30 = vadd.f32 %v6610_v17, %v6522_v35  ;;  %v5469_v17 = vld [vmem:[#allocation8 + $0x1f8] sm:$0xff] }
 0x703   : > { %v6434_v21 = vpop.f32.mrf.mxu1 }
 0x704   : > { %v6679_v4 = vadd.f32 %v6611_v30, %v5455_v25  ;;  %v6435_v29 = vadd.f32 %v6434_v21, %v6345_v52 }
 0x706   : > { %6743 = vst [vmem:[#allocation8 + $0x188] sm:$0xff] %v6679_v4 }
 0x707   : > { %v6523_v61 = vpop.f32.mrf.mxu2  ;;  %v6612_v54 = vpop.f32.mrf.mxu3 }
 0x708   : > { %v6524_v50 = vadd.f32 %v6523_v61, %v6435_v29 }
 0x70a   : > { %v6348_v11 = vpop.f32.mrf.mxu0  ;;  %v6613_v7 = vadd.f32 %v6612_v54, %v6524_v50 }
 0x70b   : > { %v6437_v40 = vpop.f32.mrf.mxu1 }
 0x70c   : > { %v6681_v36 = vadd.f32 %v6613_v7, %v5457_v20  ;;  %v6438_v53 = vadd.f32 %v6437_v40, %v6348_v11 }
 0x70e   : > { %6745 = vst [vmem:[#allocation8 + $0x198] sm:$0xff] %v6681_v36 }
 0x70f   : > { %v6526_v63 = vpop.f32.mrf.mxu2  ;;  %v6615_v49 = vpop.f32.mrf.mxu3 }
 0x710   : > { %v6527_v3 = vadd.f32 %v6526_v63, %v6438_v53 }
 0x712   : > { %v6350_v59 = vpop.f32.mrf.mxu0  ;;  %v6616_v14 = vadd.f32 %v6615_v49, %v6527_v3 }
 0x713   : > { %v6439_v37 = vpop.f32.mrf.mxu1 }
 0x714   : > { %v6683_v56 = vadd.f32 %v6616_v14, %v5459_v58  ;;  %v6440_v55 = vadd.f32 %v6439_v37, %v6350_v59 }
 0x716   : > { %6747 = vst [vmem:[#allocation8 + $0x1a8] sm:$0xff] %v6683_v56 }
 0x717   : > { %v6528_v48 = vpop.f32.mrf.mxu2  ;;  %v6617_v8 = vpop.f32.mrf.mxu3 }
 0x718   : > { %v6529_v45 = vadd.f32 %v6528_v48, %v6440_v55 }
 0x71a   : > { %v6353_v23 = vpop.f32.mrf.mxu0  ;;  %v6618_v2 = vadd.f32 %v6617_v8, %v6529_v45 }
 0x71b   : > { %v6442_v44 = vpop.f32.mrf.mxu1 }
 0x71c   : > { %v6685_v16 = vadd.f32 %v6618_v2, %v5461_v62  ;;  %v6443_v38 = vadd.f32 %v6442_v44, %v6353_v23 }
 0x71e   : > { %6749 = vst [vmem:[#allocation8 + $0x1b8] sm:$0xff] %v6685_v16 }
 0x71f   : > { %v6531_v13 = vpop.f32.mrf.mxu2  ;;  %v6620_v43 = vpop.f32.mrf.mxu3 }
 0x720   : > { %v6532_v28 = vadd.f32 %v6531_v13, %v6443_v38 }
 0x722   : > { %v6355_v10 = vpop.f32.mrf.mxu0  ;;  %v6621_v41 = vadd.f32 %v6620_v43, %v6532_v28 }
 0x723   : > { %v6444_v0 = vpop.f32.mrf.mxu1 }
 0x724   : > { %v6687_v19 = vadd.f32 %v6621_v41, %v5463_v24  ;;  %v6445_v18 = vadd.f32 %v6444_v0, %v6355_v10 }
 0x726   : > { %6751 = vst [vmem:[#allocation8 + $0x1c8] sm:$0xff] %v6687_v19 }
 0x727   : > { %v6533_v39 = vpop.f32.mrf.mxu2  ;;  %v6622_v32 = vpop.f32.mrf.mxu3 }
 0x728   : > { %v6534_v26 = vadd.f32 %v6533_v39, %v6445_v18 }
 0x72a   : > { %v6358_v57 = vpop.f32.mrf.mxu0  ;;  %v6623_v12 = vadd.f32 %v6622_v32, %v6534_v26 }
 0x72b   : > { %v6447_v9 = vpop.f32.mrf.mxu1 }
 0x72c   : > { %v6689_v51 = vadd.f32 %v6623_v12, %v5465_v34  ;;  %v6448_v5 = vadd.f32 %v6447_v9, %v6358_v57 }
 0x72e   : > { %6753 = vst [vmem:[#allocation8 + $0x1d8] sm:$0xff] %v6689_v51 }
 0x72f   : > { %v6536_v27 = vpop.f32.mrf.mxu2  ;;  %v6625_v47 = vpop.f32.mrf.mxu3 }
 0x730   : > { %v6537_v33 = vadd.f32 %v6536_v27, %v6448_v5 }
 0x732   : > { %v6626_v1 = vadd.f32 %v6625_v47, %v6537_v33  ;;  %v6360_v42 = vpop.f32.mrf.mxu0 }
 0x733   : > { %v6449_v15 = vpop.f32.mrf.mxu1 }
 0x734   : > { %v6691_v46 = vadd.f32 %v6626_v1, %v5467_v6  ;;  %v6450_v22 = vadd.f32 %v6449_v15, %v6360_v42 }
 0x736   : > { %6755 = vst [vmem:[#allocation8 + $0x1e8] sm:$0xff] %v6691_v46 }
 0x737   : > { %v6538_v31 = vpop.f32.mrf.mxu2  ;;  %v6627_v35 = vpop.f32.mrf.mxu3 }
 0x738   : > { %v6539_v60 = vadd.f32 %v6538_v31, %v6450_v22 }
 0x73a   : > { %v6628_v25 = vadd.f32 %v6627_v35, %v6539_v60 }
 0x73c   : > { %v6693_v52 = vadd.f32 %v6628_v25, %v5469_v17 }
 0x73e   : > { %6757 = vst [vmem:[#allocation8 + $0x1f8] sm:$0xff] %v6693_v52 }
 0x73f   : > { %8148 = dma.vmem_to_hbm [thread:$0]  (%p8165_p2), %s6768_s19, 8192, %s6770_s28, [#allocation4], %s8923_s29, %s8923_s29, %s8924_s30  }
 0x740   : > { %8888 = dma.done.wait (%p8165_p2), [#allocation4], 8192  }
 0x741   : > { %8890 = vsyncadd (%p8165_p2), [#allocation4], 4294959104 }
 0x742 PF: > { %s18_s17 = sadd.s32 1, %s8913_s17   ;;  %s16629_s12 = smov %s8897_s13 }
 0x743   : > { %p15_p3 = scmp.ge.s32.totalorder %s18_s17, 4   ;;  %s16630_s13 = smov %s8901_s14 }
 0x744   : > { %s16631_s14 = smov %s8993_s25  ;;  %s16632_s15 = smov %s8909_s16 }
 0x745   : > { %s16633_s16 = smov %s16635_s18  ;;  %17 = sbr.rel (!%p15_p3) target bundleno = 6 (0x6), region = 91 }
 0x74a   :  { %6786 = vsyncpa [#allocation3], 1 }
 0x74b   :  { %6788 = vsyncpa [#allocation3 + $0x1], 1 }
 0x74c   :  { %6789 = vsyncpa [#allocation6], 1 }
 0x74d   :  { %6791 = vsyncpa [#allocation6 + $0x1], 1 }
 0x74e   :  { %6792 = vsyncpa [#allocation4], 1 }
 0x74f   :  { %6794 = vsyncpa [#allocation4 + $0x1], 1 }

</bundles_post_ra>
